<compile_context>
chip_gen: v6e
topology: v6e:2x2x1
jax: 0.10.0
libtpu: 0.0.40
codegen_flags: <defaults>
</compile_context>

<pallas_src>
import jax
import jax.numpy as jnp
import numpy as np
from jax.experimental import pallas as pl
from jax.experimental.pallas import tpu as pltpu

VIEWS_LIST = ("L-CC", "R-CC", "L-MLO", "R-MLO")
FEAT_C = 256                  # channels per view out of the backbone
IN_FEAT = 4 * FEAT_C          # 1024 (fc1 fan-in)
HID = 2 * FEAT_C              # 512  (fc1 fan-out)


def _joint_risk_head_kernel(f0_ref, f1_ref, f2_ref, f3_ref,
                            w1_ref, b1_ref, w2_ref, b2_ref,
                            o_ref, acc_ref):
    # f*_ref : (NT, 256, TS)       per-view feature tile (bf16/f32), lane axis = spatial
    # w1_ref : (1024, 512) f32     fc1 weight pre-scaled by 1/(H*W), resident (single-buffered)
    # b1_ref : (1, 512), w2_ref: (1, 512), b2_ref: (1, 1)
    # o_ref  : (NT, 128)           lane-dense output slab (result broadcast over lanes)
    # acc_ref: (NT, 1024, 128) f32 wide pooled-sum accumulator (channels on sublanes,
    #                              128-lane spatial fold), persists across spatial steps
    k = pl.program_id(1)
    ts = f0_ref.shape[-1]
    nfull = ts // 128
    rem = ts - nfull * 128

    @pl.when(k == 0)
    def _():
        acc_ref[...] = jnp.zeros_like(acc_ref)

    # Pure-VPU lane-aligned partial sums: fold TS down to 128 lanes with elementwise adds,
    # accumulate into the per-view sublane slice of the wide accumulator.  No XLU reduce
    # and no relayout inside the streaming loop.
    for v, f_ref in enumerate((f0_ref, f1_ref, f2_ref, f3_ref)):
        lo, hi = v * FEAT_C, (v + 1) * FEAT_C
        if nfull > 0:
            part = f_ref[:, :, 0:128].astype(jnp.float32)
            for t in range(1, nfull):
                part = part + f_ref[:, :, t * 128:(t + 1) * 128].astype(jnp.float32)
            acc_ref[:, lo:hi, :] += part
        if rem:
            acc_ref[:, lo:hi, 0:rem] += f_ref[:, :, nfull * 128:ts].astype(jnp.float32)

    @pl.when(k == pl.num_programs(1) - 1)
    def _():
        # Single 128->1 lane reduce + relayout per batch tile (once, not per spatial step).
        pooled = jnp.sum(acc_ref[...], axis=-1)                    # (NT, 1024) spatial sum
        h1 = jnp.dot(pooled, w1_ref[...],                          # fc1 (MXU); 1/S folded in w1
                     preferred_element_type=jnp.float32)
        h1 = jnp.maximum(h1 + b1_ref[...], 0.0)                    # bias + ReLU (VPU)
        z = jnp.sum(h1 * w2_ref[...], axis=-1, keepdims=True)      # fc2 as lane reduce (XLU)
        z = z + b2_ref[...]
        y = jax.nn.sigmoid(z)                                      # (NT, 1)  (EUP)
        o_ref[...] = jnp.broadcast_to(y, o_ref.shape)              # lane-dense store


def init_params(key):
    """Deterministic init matching nn.Linear shapes (uniform +-1/sqrt(fan_in))."""
    k1, k2, k3, k4 = jax.random.split(key, 4)
    fan1, fan2 = IN_FEAT, HID
    w1 = jax.random.uniform(k1, (fan1, HID), jnp.float32,
                            minval=-1.0 / np.sqrt(fan1), maxval=1.0 / np.sqrt(fan1))
    b1 = jax.random.uniform(k2, (1, HID), jnp.float32,
                            minval=-1.0 / np.sqrt(fan1), maxval=1.0 / np.sqrt(fan1))
    w2 = jax.random.uniform(k3, (1, HID), jnp.float32,
                            minval=-1.0 / np.sqrt(fan2), maxval=1.0 / np.sqrt(fan2))
    b2 = jax.random.uniform(k4, (1,), jnp.float32,
                            minval=-1.0 / np.sqrt(fan2), maxval=1.0 / np.sqrt(fan2))
    return w1, b1, w2, b2


def _vmem_limit_bytes():
    """~85% of the chip's VMEM (=> ~54 MiB v7x, ~105+ MiB v5e/v6e); 64 MiB-safe fallback."""
    try:
        cap = int(pltpu.get_tpu_info().vmem_capacity_bytes)
    except Exception:
        cap = 64 << 20
    return max(min(int(0.85 * cap), cap - (8 << 20)), 32 << 20)


def _select_tiles(N, S, itemsize, vmem_limit):
    """Jointly pick (NT, TS) so the pipeline fits the VMEM budget.

    Priority: largest spatial tile (TS = S preferred => one contiguous DMA slab per view),
    then largest batch tile from multiples of 8 preferring >= 2 batch tiles (v7x megacore).
    """
    weights_bytes = 2 * (IN_FEAT * HID + 2 * HID + 1) * 4     # upper bound (double-buffered)
    feat_budget = int(0.60 * vmem_limit)                      # double-buffered feature tiles
    total_budget = vmem_limit - (6 << 20)                     # headroom for internal scratch

    div8 = [d for d in range(8 * (N // 8), 0, -8) if N % d == 0]
    pref = [d for d in div8 if N // d >= 2]                   # >= 2 batch tiles (megacore)
    nt_cands = pref + [d for d in div8 if d not in pref]
    if N not in nt_cands:
        nt_cands = nt_cands + [N]

    ts_cands = [S] + [t for t in range(128 * (S // 128), 0, -128) if t != S and S % t == 0]

    for ts in ts_cands:
        for nt in nt_cands:
            feat_bytes = 4 * nt * FEAT_C * ts * itemsize * 2      # 4 views, double-buffered
            acc_bytes = nt * IN_FEAT * 128 * 4                    # wide f32 accumulator
            out_bytes = nt * 128 * 4 * 2
            total = feat_bytes + acc_bytes + out_bytes + weights_bytes
            if feat_bytes <= feat_budget and total <= total_budget:
                return nt, ts
    return min(nt_cands), min(ts_cands)


def joint_risk_head(feat_maps, params, *, spatial_tile=None, batch_tile=None):
    """feat_maps: dict view -> (N, 256, H, W) bf16/f32 (NCHW, output of four_view_resnet)."""
    w1, b1, w2, b2 = params
    shape0 = feat_maps[VIEWS_LIST[0]].shape
    N, C, H, W = shape0
    assert C == FEAT_C
    for v in VIEWS_LIST:   # all views must match (no runtime bounds check on VMEM refs)
        assert feat_maps[v].shape == shape0, f"view {v}: {feat_maps[v].shape} != {shape0}"
    S = H * W

    # Per-view flatten of spatial dims (contiguous reshape); NO concat of the feature tensor.
    views = [feat_maps[v].reshape(N, C, S) for v in VIEWS_LIST]
    feat_dtype = views[0].dtype
    itemsize = jnp.dtype(feat_dtype).itemsize

    vmem_limit = _vmem_limit_bytes()
    nt_auto, ts_auto = _select_tiles(N, S, itemsize, vmem_limit)
    TS = spatial_tile if spatial_tile is not None else ts_auto
    NT = batch_tile if batch_tile is not None else nt_auto
    assert N % NT == 0 and S % TS == 0
    assert TS == S or TS % 128 == 0
    nb, nk = N // NT, S // TS

    # Fold the 1/(H*W) mean into fc1's weight at trace time (bias left unscaled).
    w1v = (w1.astype(jnp.float32) / float(S))
    b1v = b1.reshape(1, HID).astype(jnp.float32)
    w2v = w2.reshape(1, HID).astype(jnp.float32)
    b2v = b2.reshape(1, 1).astype(jnp.float32)

    feat_spec = pl.BlockSpec((NT, FEAT_C, TS), lambda i, k: (i, 0, k))
    const2d = lambda i, k: (0, 0)    # weights resident across all grid steps

    cost = pl.CostEstimate(
        flops=int(2 * N * IN_FEAT * HID + 4 * N * FEAT_C * S + 2 * N * HID),
        transcendentals=int(N),
        bytes_accessed=int(4 * N * FEAT_C * S * itemsize
                           + (IN_FEAT * HID + 2 * HID + 1) * 4
                           + N * 128 * 4),
    )

    def build(single_buffer_weights):
        def wspec(shape):
            if single_buffer_weights:
                # invariant index_map -> no need to double-buffer; frees VMEM for feature tiles
                return pl.BlockSpec(shape, const2d, pipeline_mode=pl.Buffered(1))
            return pl.BlockSpec(shape, const2d)

        return pl.pallas_call(
            _joint_risk_head_kernel,
            out_shape=jax.ShapeDtypeStruct((N, 128), jnp.float32),
            grid_spec=pltpu.PrefetchScalarGridSpec(
                num_scalar_prefetch=0,
                grid=(nb, nk),                                   # (batch tiles, spatial tiles)
                in_specs=[feat_spec, feat_spec, feat_spec, feat_spec,
                          wspec((IN_FEAT, HID)),                 # w1 (pre-scaled by 1/S)
                          wspec((1, HID)),                       # b1
                          wspec((1, HID)),                       # w2
                          wspec((1, 1))],                        # b2
                out_specs=pl.BlockSpec((NT, 128), lambda i, k: (i, 0)),
                scratch_shapes=[pltpu.VMEM((NT, IN_FEAT, 128), jnp.float32)],
            ),
            compiler_params=pltpu.CompilerParams(
                dimension_semantics=("parallel", "arbitrary"),
                vmem_limit_bytes=int(vmem_limit),
            ),
            cost_estimate=cost,
        )

    args = (*views, w1v, b1v, w2v, b2v)
    try:
        out = build(hasattr(pl, "Buffered"))(*args)
    except Exception:
        # pipeline_mode / Buffered(1) unsupported in this JAX build: default buffering.
        out = build(False)(*args)

    return out[:, 0]   # torch.sigmoid(...).squeeze(dim=1)


def joint_risk_head_ref(feat_maps, params):
    """Pure-JAX reference (mirrors the PyTorch head)."""
    w1, b1, w2, b2 = params
    pooled = jnp.concatenate(
        [jnp.mean(feat_maps[v].astype(jnp.float32), axis=(2, 3)) for v in VIEWS_LIST],
        axis=1)                                              # (N, 1024)
    h1 = jax.nn.relu(pooled @ w1 + b1.reshape(-1))
    y = jax.nn.sigmoid(h1 @ w2.reshape(-1) + b2[0])
    return y


if __name__ == "__main__":
    key = jax.random.PRNGKey(0)
    kp, kf = jax.random.split(key)
    params = init_params(kp)

    def make_feats(fkey, n, h, w, dtype=jnp.bfloat16):
        fkeys = jax.random.split(fkey, len(VIEWS_LIST))
        return {v: jax.random.normal(k, (n, FEAT_C, h, w), jnp.float32).astype(dtype)
                for v, k in zip(VIEWS_LIST, fkeys)}

    # Case 1: tiny batch, auto tiles (TS = S -> single contiguous spatial slab per view).
    feats = make_feats(kf, 2, 16, 16)
    y_ref = jax.block_until_ready(joint_risk_head_ref(feats, params))
    y = jax.block_until_ready(joint_risk_head(feats, params))
    np.testing.assert_allclose(np.asarray(y), np.asarray(y_ref), rtol=5e-4, atol=1e-5)
    assert y.shape == (2,)

    # Case 2: force a 2-step spatial reduction grid (exercises the cross-step accumulator).
    y2 = jax.block_until_ready(joint_risk_head(feats, params, spatial_tile=128))
    np.testing.assert_allclose(np.asarray(y2), np.asarray(y_ref), rtol=5e-4, atol=1e-5)

    # Case 3: batch-tiled path (N=16 -> NT=8, >= 2 batch tiles on the "parallel" axis).
    feats16 = make_feats(jax.random.PRNGKey(1), 16, 16, 16)
    y3_ref = jax.block_until_ready(joint_risk_head_ref(feats16, params))
    y3 = jax.block_until_ready(joint_risk_head(feats16, params))
    np.testing.assert_allclose(np.asarray(y3), np.asarray(y3_ref), rtol=5e-4, atol=1e-5)

    print("KERNEL_OK")
</pallas_src>

<mosaic_0001>
module attributes {stable_mosaic.version = 11 : i64} {
  func.func @_joint_risk_head_kernel(%arg0: i32, %arg1: i32, %arg2: memref<2x256x256xbf16, #tpu.memory_space<vmem>>, %arg3: memref<2x256x256xbf16, #tpu.memory_space<vmem>>, %arg4: memref<2x256x256xbf16, #tpu.memory_space<vmem>>, %arg5: memref<2x256x256xbf16, #tpu.memory_space<vmem>>, %arg6: memref<1024x512xf32, #tpu.memory_space<vmem>>, %arg7: memref<1x512xf32, #tpu.memory_space<vmem>>, %arg8: memref<1x512xf32, #tpu.memory_space<vmem>>, %arg9: memref<1x1xf32, #tpu.memory_space<vmem>>, %arg10: memref<2x128xf32, #tpu.memory_space<vmem>>, %arg11: memref<2x1024x128xf32, #tpu.memory_space<vmem>>) attributes {dimension_semantics = [#tpu.dimension_semantics<parallel>, #tpu.dimension_semantics<arbitrary>], iteration_bounds = array<i64: 1, 1>, scalar_prefetch = 0 : i64, scratch_operands = 1 : i64, tpu.core_type = #tpu.core_type<tc>, window_params = [{transform_indices = @transform_0, window_bounds = array<i64: 2, 256, 256>}, {transform_indices = @transform_1, window_bounds = array<i64: 2, 256, 256>}, {transform_indices = @transform_2, window_bounds = array<i64: 2, 256, 256>}, {transform_indices = @transform_3, window_bounds = array<i64: 2, 256, 256>}, {pipeline_mode = #tpu.pipeline_mode<synchronous>, transform_indices = @transform_4, window_bounds = array<i64: 1024, 512>}, {pipeline_mode = #tpu.pipeline_mode<synchronous>, transform_indices = @transform_5, window_bounds = array<i64: 1, 512>}, {pipeline_mode = #tpu.pipeline_mode<synchronous>, transform_indices = @transform_6, window_bounds = array<i64: 1, 512>}, {pipeline_mode = #tpu.pipeline_mode<synchronous>, transform_indices = @transform_7, window_bounds = array<i64: 1, 1>}, {transform_indices = @transform_8, window_bounds = array<i64: 2, 128>}]} {
    %c0_i32 = arith.constant 0 : i32
    %0 = arith.cmpi eq, %arg1, %c0_i32 : i32
    %1 = arith.extui %0 : i1 to i32
    %c0_i32_0 = arith.constant 0 : i32
    %2 = arith.cmpi ne, %1, %c0_i32_0 : i32
    scf.if %2 {
      %cst = arith.constant 0.000000e+00 : f32
      %38 = vector.broadcast %cst : f32 to vector<2x1024x128xf32>
      %c0_46 = arith.constant 0 : index
      %c0_47 = arith.constant 0 : index
      %c0_48 = arith.constant 0 : index
      %39 = vector.load %arg11[%c0_46, %c0_47, %c0_48] : memref<2x1024x128xf32, #tpu.memory_space<vmem>>, vector<2x1024x128xf32>
      tpu.vector_store %arg11[%c0_46, %c0_47, %c0_48], %38 {strides = array<i32>} : memref<2x1024x128xf32, #tpu.memory_space<vmem>>, vector<2x1024x128xf32>,
    } else {
    }
    %c0 = arith.constant 0 : index
    %c0_1 = arith.constant 0 : index
    %c0_2 = arith.constant 0 : index
    %3 = vector.load %arg2[%c0, %c0_1, %c0_2] : memref<2x256x256xbf16, #tpu.memory_space<vmem>>, vector<2x256x128xbf16>
    %4 = arith.extf %3 : vector<2x256x128xbf16> to vector<2x256x128xf32>
    %c0_3 = arith.constant 0 : index
    %c0_4 = arith.constant 0 : index
    %c128 = arith.constant 128 : index
    %5 = vector.load %arg2[%c0_3, %c0_4, %c128] : memref<2x256x256xbf16, #tpu.memory_space<vmem>>, vector<2x256x128xbf16>
    %6 = arith.extf %5 : vector<2x256x128xbf16> to vector<2x256x128xf32>
    %7 = arith.addf %4, %6 : vector<2x256x128xf32>
    %c0_5 = arith.constant 0 : index
    %c0_6 = arith.constant 0 : index
    %c0_7 = arith.constant 0 : index
    %8 = vector.load %arg11[%c0_5, %c0_6, %c0_7] : memref<2x1024x128xf32, #tpu.memory_space<vmem>>, vector<2x256x128xf32>
    %9 = arith.addf %8, %7 : vector<2x256x128xf32>
    %c0_8 = arith.constant 0 : index
    %c0_9 = arith.constant 0 : index
    %c0_10 = arith.constant 0 : index
    %10 = vector.load %arg11[%c0_8, %c0_9, %c0_10] : memref<2x1024x128xf32, #tpu.memory_space<vmem>>, vector<2x256x128xf32>
    tpu.vector_store %arg11[%c0_8, %c0_9, %c0_10], %9 {strides = array<i32>} : memref<2x1024x128xf32, #tpu.memory_space<vmem>>, vector<2x256x128xf32>,
    %c0_11 = arith.constant 0 : index
    %c0_12 = arith.constant 0 : index
    %c0_13 = arith.constant 0 : index
    %11 = vector.load %arg3[%c0_11, %c0_12, %c0_13] : memref<2x256x256xbf16, #tpu.memory_space<vmem>>, vector<2x256x128xbf16>
    %12 = arith.extf %11 : vector<2x256x128xbf16> to vector<2x256x128xf32>
    %c0_14 = arith.constant 0 : index
    %c0_15 = arith.constant 0 : index
    %c128_16 = arith.constant 128 : index
    %13 = vector.load %arg3[%c0_14, %c0_15, %c128_16] : memref<2x256x256xbf16, #tpu.memory_space<vmem>>, vector<2x256x128xbf16>
    %14 = arith.extf %13 : vector<2x256x128xbf16> to vector<2x256x128xf32>
    %15 = arith.addf %12, %14 : vector<2x256x128xf32>
    %c0_17 = arith.constant 0 : index
    %c256 = arith.constant 256 : index
    %c0_18 = arith.constant 0 : index
    %16 = vector.load %arg11[%c0_17, %c256, %c0_18] : memref<2x1024x128xf32, #tpu.memory_space<vmem>>, vector<2x256x128xf32>
    %17 = arith.addf %16, %15 : vector<2x256x128xf32>
    %c0_19 = arith.constant 0 : index
    %c256_20 = arith.constant 256 : index
    %c0_21 = arith.constant 0 : index
    %18 = vector.load %arg11[%c0_19, %c256_20, %c0_21] : memref<2x1024x128xf32, #tpu.memory_space<vmem>>, vector<2x256x128xf32>
    tpu.vector_store %arg11[%c0_19, %c256_20, %c0_21], %17 {strides = array<i32>} : memref<2x1024x128xf32, #tpu.memory_space<vmem>>, vector<2x256x128xf32>,
    %c0_22 = arith.constant 0 : index
    %c0_23 = arith.constant 0 : index
    %c0_24 = arith.constant 0 : index
    %19 = vector.load %arg4[%c0_22, %c0_23, %c0_24] : memref<2x256x256xbf16, #tpu.memory_space<vmem>>, vector<2x256x128xbf16>
    %20 = arith.extf %19 : vector<2x256x128xbf16> to vector<2x256x128xf32>
    %c0_25 = arith.constant 0 : index
    %c0_26 = arith.constant 0 : index
    %c128_27 = arith.constant 128 : index
    %21 = vector.load %arg4[%c0_25, %c0_26, %c128_27] : memref<2x256x256xbf16, #tpu.memory_space<vmem>>, vector<2x256x128xbf16>
    %22 = arith.extf %21 : vector<2x256x128xbf16> to vector<2x256x128xf32>
    %23 = arith.addf %20, %22 : vector<2x256x128xf32>
    %c0_28 = arith.constant 0 : index
    %c512 = arith.constant 512 : index
    %c0_29 = arith.constant 0 : index
    %24 = vector.load %arg11[%c0_28, %c512, %c0_29] : memref<2x1024x128xf32, #tpu.memory_space<vmem>>, vector<2x256x128xf32>
    %25 = arith.addf %24, %23 : vector<2x256x128xf32>
    %c0_30 = arith.constant 0 : index
    %c512_31 = arith.constant 512 : index
    %c0_32 = arith.constant 0 : index
    %26 = vector.load %arg11[%c0_30, %c512_31, %c0_32] : memref<2x1024x128xf32, #tpu.memory_space<vmem>>, vector<2x256x128xf32>
    tpu.vector_store %arg11[%c0_30, %c512_31, %c0_32], %25 {strides = array<i32>} : memref<2x1024x128xf32, #tpu.memory_space<vmem>>, vector<2x256x128xf32>,
    %c0_33 = arith.constant 0 : index
    %c0_34 = arith.constant 0 : index
    %c0_35 = arith.constant 0 : index
    %27 = vector.load %arg5[%c0_33, %c0_34, %c0_35] : memref<2x256x256xbf16, #tpu.memory_space<vmem>>, vector<2x256x128xbf16>
    %28 = arith.extf %27 : vector<2x256x128xbf16> to vector<2x256x128xf32>
    %c0_36 = arith.constant 0 : index
    %c0_37 = arith.constant 0 : index
    %c128_38 = arith.constant 128 : index
    %29 = vector.load %arg5[%c0_36, %c0_37, %c128_38] : memref<2x256x256xbf16, #tpu.memory_space<vmem>>, vector<2x256x128xbf16>
    %30 = arith.extf %29 : vector<2x256x128xbf16> to vector<2x256x128xf32>
    %31 = arith.addf %28, %30 : vector<2x256x128xf32>
    %c0_39 = arith.constant 0 : index
    %c768 = arith.constant 768 : index
    %c0_40 = arith.constant 0 : index
    %32 = vector.load %arg11[%c0_39, %c768, %c0_40] : memref<2x1024x128xf32, #tpu.memory_space<vmem>>, vector<2x256x128xf32>
    %33 = arith.addf %32, %31 : vector<2x256x128xf32>
    %c0_41 = arith.constant 0 : index
    %c768_42 = arith.constant 768 : index
    %c0_43 = arith.constant 0 : index
    %34 = vector.load %arg11[%c0_41, %c768_42, %c0_43] : memref<2x1024x128xf32, #tpu.memory_space<vmem>>, vector<2x256x128xf32>
    tpu.vector_store %arg11[%c0_41, %c768_42, %c0_43], %33 {strides = array<i32>} : memref<2x1024x128xf32, #tpu.memory_space<vmem>>, vector<2x256x128xf32>,
    %c0_i32_44 = arith.constant 0 : i32
    %35 = arith.cmpi eq, %arg1, %c0_i32_44 : i32
    %36 = arith.extui %35 : i1 to i32
    %c0_i32_45 = arith.constant 0 : i32
    %37 = arith.cmpi ne, %36, %c0_i32_45 : i32
    scf.if %37 {
      %c0_46 = arith.constant 0 : index
      %c0_47 = arith.constant 0 : index
      %c0_48 = arith.constant 0 : index
      %38 = vector.load %arg11[%c0_46, %c0_47, %c0_48] : memref<2x1024x128xf32, #tpu.memory_space<vmem>>, vector<2x1024x128xf32>
      %cst = arith.constant dense<0.000000e+00> : vector<2x1024xf32>
      %39 = vector.multi_reduction <add>, %38, %cst [2] : vector<2x1024x128xf32> to vector<2x1024xf32>
      %c0_49 = arith.constant 0 : index
      %c0_50 = arith.constant 0 : index
      %40 = vector.load %arg6[%c0_49, %c0_50] : memref<1024x512xf32, #tpu.memory_space<vmem>>, vector<1024x512xf32>
      %cst_51 = arith.constant dense<0.000000e+00> : vector<2x512xf32>
      %41 = tpu.matmul %39, %40, %cst_51 {dimension_numbers = #tpu.dot_dimension_numbers<[1], [0], [0], [1], [0, 0, 1, 1], [], []>} : vector<2x1024xf32>, vector<1024x512xf32>, vector<2x512xf32> -> vector<2x512xf32>
      %c0_52 = arith.constant 0 : index
      %c0_53 = arith.constant 0 : index
      %42 = vector.load %arg7[%c0_52, %c0_53] : memref<1x512xf32, #tpu.memory_space<vmem>>, vector<1x512xf32>
      %43 = vector.broadcast %42 : vector<1x512xf32> to vector<2x512xf32>
      %44 = arith.addf %41, %43 : vector<2x512xf32>
      %cst_54 = arith.constant 0.000000e+00 : f32
      %45 = vector.broadcast %cst_54 : f32 to vector<2x512xf32>
      %46 = arith.maximumf %44, %45 : vector<2x512xf32>
      %c0_55 = arith.constant 0 : index
      %c0_56 = arith.constant 0 : index
      %47 = vector.load %arg8[%c0_55, %c0_56] : memref<1x512xf32, #tpu.memory_space<vmem>>, vector<1x512xf32>
      %48 = vector.broadcast %47 : vector<1x512xf32> to vector<2x512xf32>
      %49 = arith.mulf %46, %48 : vector<2x512xf32>
      %cst_57 = arith.constant dense<0.000000e+00> : vector<2xf32>
      %50 = vector.multi_reduction <add>, %49, %cst_57 [1] : vector<2x512xf32> to vector<2xf32>
      %51 = vector.shape_cast %50 : vector<2xf32> to vector<2x1xf32>
      %c0_58 = arith.constant 0 : index
      %c0_59 = arith.constant 0 : index
      %52 = vector.load %arg9[%c0_58, %c0_59] : memref<1x1xf32, #tpu.memory_space<vmem>>, vector<1x1xf32>
      %53 = vector.broadcast %52 : vector<1x1xf32> to vector<2x1xf32>
      %54 = arith.addf %51, %53 : vector<2x1xf32>
      %55 = arith.negf %54 : vector<2x1xf32>
      %56 = math.exp %55 : vector<2x1xf32>
      %cst_60 = arith.constant 1.000000e+00 : f32
      %57 = vector.broadcast %cst_60 : f32 to vector<2x1xf32>
      %58 = arith.addf %57, %56 : vector<2x1xf32>
      %59 = arith.divf %57, %58 : vector<2x1xf32>
      %60 = vector.shape_cast %59 : vector<2x1xf32> to vector<2x1xf32>
      %61 = vector.broadcast %60 : vector<2x1xf32> to vector<2x128xf32>
      %c0_61 = arith.constant 0 : index
      %c0_62 = arith.constant 0 : index
      %62 = vector.load %arg10[%c0_61, %c0_62] : memref<2x128xf32, #tpu.memory_space<vmem>>, vector<2x128xf32>
      tpu.vector_store %arg10[%c0_61, %c0_62], %61 {strides = array<i32>} : memref<2x128xf32, #tpu.memory_space<vmem>>, vector<2x128xf32>,
    } else {
    }
    return
  }
  func.func @transform_0(%arg0: i32, %arg1: i32) -> (i32, i32, i32) {
    %c0_i32 = arith.constant 0 : i32
    %c0_i32_0 = arith.constant 0 : i32
    return %arg0, %c0_i32, %arg1 : i32, i32, i32
  }
  func.func @transform_1(%arg0: i32, %arg1: i32) -> (i32, i32, i32) {
    %c0_i32 = arith.constant 0 : i32
    %c0_i32_0 = arith.constant 0 : i32
    return %arg0, %c0_i32, %arg1 : i32, i32, i32
  }
  func.func @transform_2(%arg0: i32, %arg1: i32) -> (i32, i32, i32) {
    %c0_i32 = arith.constant 0 : i32
    %c0_i32_0 = arith.constant 0 : i32
    return %arg0, %c0_i32, %arg1 : i32, i32, i32
  }
  func.func @transform_3(%arg0: i32, %arg1: i32) -> (i32, i32, i32) {
    %c0_i32 = arith.constant 0 : i32
    %c0_i32_0 = arith.constant 0 : i32
    return %arg0, %c0_i32, %arg1 : i32, i32, i32
  }
  func.func @transform_4(%arg0: i32, %arg1: i32) -> (i32, i32) {
    %c0_i32 = arith.constant 0 : i32
    %c0_i32_0 = arith.constant 0 : i32
    %c0_i32_1 = arith.constant 0 : i32
    return %c0_i32, %c0_i32_0 : i32, i32
  }
  func.func @transform_5(%arg0: i32, %arg1: i32) -> (i32, i32) {
    %c0_i32 = arith.constant 0 : i32
    %c0_i32_0 = arith.constant 0 : i32
    %c0_i32_1 = arith.constant 0 : i32
    return %c0_i32, %c0_i32_0 : i32, i32
  }
  func.func @transform_6(%arg0: i32, %arg1: i32) -> (i32, i32) {
    %c0_i32 = arith.constant 0 : i32
    %c0_i32_0 = arith.constant 0 : i32
    %c0_i32_1 = arith.constant 0 : i32
    return %c0_i32, %c0_i32_0 : i32, i32
  }
  func.func @transform_7(%arg0: i32, %arg1: i32) -> (i32, i32) {
    %c0_i32 = arith.constant 0 : i32
    %c0_i32_0 = arith.constant 0 : i32
    %c0_i32_1 = arith.constant 0 : i32
    return %c0_i32, %c0_i32_0 : i32, i32
  }
  func.func @transform_8(%arg0: i32, %arg1: i32) -> (i32, i32) {
    %c0_i32 = arith.constant 0 : i32
    %c0_i32_0 = arith.constant 0 : i32
    return %arg0, %c0_i32 : i32, i32
  }
}

module attributes {stable_mosaic.version = 11 : i64} {
  func.func @_joint_risk_head_kernel(%arg0: i32, %arg1: i32, %arg2: memref<2x256x256xbf16, #tpu.memory_space<vmem>>, %arg3: memref<2x256x256xbf16, #tpu.memory_space<vmem>>, %arg4: memref<2x256x256xbf16, #tpu.memory_space<vmem>>, %arg5: memref<2x256x256xbf16, #tpu.memory_space<vmem>>, %arg6: memref<1024x512xf32, #tpu.memory_space<vmem>>, %arg7: memref<1x512xf32, #tpu.memory_space<vmem>>, %arg8: memref<1x512xf32, #tpu.memory_space<vmem>>, %arg9: memref<1x1xf32, #tpu.memory_space<vmem>>, %arg10: memref<2x128xf32, #tpu.memory_space<vmem>>, %arg11: memref<2x1024x128xf32, #tpu.memory_space<vmem>>) attributes {dimension_semantics = [#tpu.dimension_semantics<parallel>, #tpu.dimension_semantics<arbitrary>], iteration_bounds = array<i64: 1, 1>, scalar_prefetch = 0 : i64, scratch_operands = 1 : i64, tpu.core_type = #tpu.core_type<tc>, window_params = [{transform_indices = @transform_0, window_bounds = array<i64: 2, 256, 256>}, {transform_indices = @transform_1, window_bounds = array<i64: 2, 256, 256>}, {transform_indices = @transform_2, window_bounds = array<i64: 2, 256, 256>}, {transform_indices = @transform_3, window_bounds = array<i64: 2, 256, 256>}, {pipeline_mode = #tpu.pipeline_mode<synchronous>, transform_indices = @transform_4, window_bounds = array<i64: 1024, 512>}, {pipeline_mode = #tpu.pipeline_mode<synchronous>, transform_indices = @transform_5, window_bounds = array<i64: 1, 512>}, {pipeline_mode = #tpu.pipeline_mode<synchronous>, transform_indices = @transform_6, window_bounds = array<i64: 1, 512>}, {pipeline_mode = #tpu.pipeline_mode<synchronous>, transform_indices = @transform_7, window_bounds = array<i64: 1, 1>}, {transform_indices = @transform_8, window_bounds = array<i64: 2, 128>}]} {
    %c0_i32 = arith.constant 0 : i32
    %0 = arith.cmpi eq, %arg1, %c0_i32 : i32
    %1 = arith.extui %0 : i1 to i32
    %c0_i32_0 = arith.constant 0 : i32
    %2 = arith.cmpi ne, %1, %c0_i32_0 : i32
    scf.if %2 {
      %cst = arith.constant 0.000000e+00 : f32
      %38 = vector.broadcast %cst : f32 to vector<2x1024x128xf32>
      %c0_46 = arith.constant 0 : index
      %c0_47 = arith.constant 0 : index
      %c0_48 = arith.constant 0 : index
      %39 = vector.load %arg11[%c0_46, %c0_47, %c0_48] : memref<2x1024x128xf32, #tpu.memory_space<vmem>>, vector<2x1024x128xf32>
      tpu.vector_store %arg11[%c0_46, %c0_47, %c0_48], %38 {strides = array<i32>} : memref<2x1024x128xf32, #tpu.memory_space<vmem>>, vector<2x1024x128xf32>,
    } else {
    }
    %c0 = arith.constant 0 : index
    %c0_1 = arith.constant 0 : index
    %c0_2 = arith.constant 0 : index
    %3 = vector.load %arg2[%c0, %c0_1, %c0_2] : memref<2x256x256xbf16, #tpu.memory_space<vmem>>, vector<2x256x128xbf16>
    %4 = arith.extf %3 : vector<2x256x128xbf16> to vector<2x256x128xf32>
    %c0_3 = arith.constant 0 : index
    %c0_4 = arith.constant 0 : index
    %c128 = arith.constant 128 : index
    %5 = vector.load %arg2[%c0_3, %c0_4, %c128] : memref<2x256x256xbf16, #tpu.memory_space<vmem>>, vector<2x256x128xbf16>
    %6 = arith.extf %5 : vector<2x256x128xbf16> to vector<2x256x128xf32>
    %7 = arith.addf %4, %6 : vector<2x256x128xf32>
    %c0_5 = arith.constant 0 : index
    %c0_6 = arith.constant 0 : index
    %c0_7 = arith.constant 0 : index
    %8 = vector.load %arg11[%c0_5, %c0_6, %c0_7] : memref<2x1024x128xf32, #tpu.memory_space<vmem>>, vector<2x256x128xf32>
    %9 = arith.addf %8, %7 : vector<2x256x128xf32>
    %c0_8 = arith.constant 0 : index
    %c0_9 = arith.constant 0 : index
    %c0_10 = arith.constant 0 : index
    %10 = vector.load %arg11[%c0_8, %c0_9, %c0_10] : memref<2x1024x128xf32, #tpu.memory_space<vmem>>, vector<2x256x128xf32>
    tpu.vector_store %arg11[%c0_8, %c0_9, %c0_10], %9 {strides = array<i32>} : memref<2x1024x128xf32, #tpu.memory_space<vmem>>, vector<2x256x128xf32>,
    %c0_11 = arith.constant 0 : index
    %c0_12 = arith.constant 0 : index
    %c0_13 = arith.constant 0 : index
    %11 = vector.load %arg3[%c0_11, %c0_12, %c0_13] : memref<2x256x256xbf16, #tpu.memory_space<vmem>>, vector<2x256x128xbf16>
    %12 = arith.extf %11 : vector<2x256x128xbf16> to vector<2x256x128xf32>
    %c0_14 = arith.constant 0 : index
    %c0_15 = arith.constant 0 : index
    %c128_16 = arith.constant 128 : index
    %13 = vector.load %arg3[%c0_14, %c0_15, %c128_16] : memref<2x256x256xbf16, #tpu.memory_space<vmem>>, vector<2x256x128xbf16>
    %14 = arith.extf %13 : vector<2x256x128xbf16> to vector<2x256x128xf32>
    %15 = arith.addf %12, %14 : vector<2x256x128xf32>
    %c0_17 = arith.constant 0 : index
    %c256 = arith.constant 256 : index
    %c0_18 = arith.constant 0 : index
    %16 = vector.load %arg11[%c0_17, %c256, %c0_18] : memref<2x1024x128xf32, #tpu.memory_space<vmem>>, vector<2x256x128xf32>
    %17 = arith.addf %16, %15 : vector<2x256x128xf32>
    %c0_19 = arith.constant 0 : index
    %c256_20 = arith.constant 256 : index
    %c0_21 = arith.constant 0 : index
    %18 = vector.load %arg11[%c0_19, %c256_20, %c0_21] : memref<2x1024x128xf32, #tpu.memory_space<vmem>>, vector<2x256x128xf32>
    tpu.vector_store %arg11[%c0_19, %c256_20, %c0_21], %17 {strides = array<i32>} : memref<2x1024x128xf32, #tpu.memory_space<vmem>>, vector<2x256x128xf32>,
    %c0_22 = arith.constant 0 : index
    %c0_23 = arith.constant 0 : index
    %c0_24 = arith.constant 0 : index
    %19 = vector.load %arg4[%c0_22, %c0_23, %c0_24] : memref<2x256x256xbf16, #tpu.memory_space<vmem>>, vector<2x256x128xbf16>
    %20 = arith.extf %19 : vector<2x256x128xbf16> to vector<2x256x128xf32>
    %c0_25 = arith.constant 0 : index
    %c0_26 = arith.constant 0 : index
    %c128_27 = arith.constant 128 : index
    %21 = vector.load %arg4[%c0_25, %c0_26, %c128_27] : memref<2x256x256xbf16, #tpu.memory_space<vmem>>, vector<2x256x128xbf16>
    %22 = arith.extf %21 : vector<2x256x128xbf16> to vector<2x256x128xf32>
    %23 = arith.addf %20, %22 : vector<2x256x128xf32>
    %c0_28 = arith.constant 0 : index
    %c512 = arith.constant 512 : index
    %c0_29 = arith.constant 0 : index
    %24 = vector.load %arg11[%c0_28, %c512, %c0_29] : memref<2x1024x128xf32, #tpu.memory_space<vmem>>, vector<2x256x128xf32>
    %25 = arith.addf %24, %23 : vector<2x256x128xf32>
    %c0_30 = arith.constant 0 : index
    %c512_31 = arith.constant 512 : index
    %c0_32 = arith.constant 0 : index
    %26 = vector.load %arg11[%c0_30, %c512_31, %c0_32] : memref<2x1024x128xf32, #tpu.memory_space<vmem>>, vector<2x256x128xf32>
    tpu.vector_store %arg11[%c0_30, %c512_31, %c0_32], %25 {strides = array<i32>} : memref<2x1024x128xf32, #tpu.memory_space<vmem>>, vector<2x256x128xf32>,
    %c0_33 = arith.constant 0 : index
    %c0_34 = arith.constant 0 : index
    %c0_35 = arith.constant 0 : index
    %27 = vector.load %arg5[%c0_33, %c0_34, %c0_35] : memref<2x256x256xbf16, #tpu.memory_space<vmem>>, vector<2x256x128xbf16>
    %28 = arith.extf %27 : vector<2x256x128xbf16> to vector<2x256x128xf32>
    %c0_36 = arith.constant 0 : index
    %c0_37 = arith.constant 0 : index
    %c128_38 = arith.constant 128 : index
    %29 = vector.load %arg5[%c0_36, %c0_37, %c128_38] : memref<2x256x256xbf16, #tpu.memory_space<vmem>>, vector<2x256x128xbf16>
    %30 = arith.extf %29 : vector<2x256x128xbf16> to vector<2x256x128xf32>
    %31 = arith.addf %28, %30 : vector<2x256x128xf32>
    %c0_39 = arith.constant 0 : index
    %c768 = arith.constant 768 : index
    %c0_40 = arith.constant 0 : index
    %32 = vector.load %arg11[%c0_39, %c768, %c0_40] : memref<2x1024x128xf32, #tpu.memory_space<vmem>>, vector<2x256x128xf32>
    %33 = arith.addf %32, %31 : vector<2x256x128xf32>
    %c0_41 = arith.constant 0 : index
    %c768_42 = arith.constant 768 : index
    %c0_43 = arith.constant 0 : index
    %34 = vector.load %arg11[%c0_41, %c768_42, %c0_43] : memref<2x1024x128xf32, #tpu.memory_space<vmem>>, vector<2x256x128xf32>
    tpu.vector_store %arg11[%c0_41, %c768_42, %c0_43], %33 {strides = array<i32>} : memref<2x1024x128xf32, #tpu.memory_space<vmem>>, vector<2x256x128xf32>,
    %c0_i32_44 = arith.constant 0 : i32
    %35 = arith.cmpi eq, %arg1, %c0_i32_44 : i32
    %36 = arith.extui %35 : i1 to i32
    %c0_i32_45 = arith.constant 0 : i32
    %37 = arith.cmpi ne, %36, %c0_i32_45 : i32
    scf.if %37 {
      %c0_46 = arith.constant 0 : index
      %c0_47 = arith.constant 0 : index
      %c0_48 = arith.constant 0 : index
      %38 = vector.load %arg11[%c0_46, %c0_47, %c0_48] : memref<2x1024x128xf32, #tpu.memory_space<vmem>>, vector<2x1024x128xf32>
      %cst = arith.constant dense<0.000000e+00> : vector<2x1024xf32>
      %39 = vector.multi_reduction <add>, %38, %cst [2] : vector<2x1024x128xf32> to vector<2x1024xf32>
      %c0_49 = arith.constant 0 : index
      %c0_50 = arith.constant 0 : index
      %40 = vector.load %arg6[%c0_49, %c0_50] : memref<1024x512xf32, #tpu.memory_space<vmem>>, vector<1024x512xf32>
      %cst_51 = arith.constant dense<0.000000e+00> : vector<2x512xf32>
      %41 = tpu.matmul %39, %40, %cst_51 {dimension_numbers = #tpu.dot_dimension_numbers<[1], [0], [0], [1], [0, 0, 1, 1], [], []>} : vector<2x1024xf32>, vector<1024x512xf32>, vector<2x512xf32> -> vector<2x512xf32>
      %c0_52 = arith.constant 0 : index
      %c0_53 = arith.constant 0 : index
      %42 = vector.load %arg7[%c0_52, %c0_53] : memref<1x512xf32, #tpu.memory_space<vmem>>, vector<1x512xf32>
      %43 = vector.broadcast %42 : vector<1x512xf32> to vector<2x512xf32>
      %44 = arith.addf %41, %43 : vector<2x512xf32>
      %cst_54 = arith.constant 0.000000e+00 : f32
      %45 = vector.broadcast %cst_54 : f32 to vector<2x512xf32>
      %46 = arith.maximumf %44, %45 : vector<2x512xf32>
      %c0_55 = arith.constant 0 : index
      %c0_56 = arith.constant 0 : index
      %47 = vector.load %arg8[%c0_55, %c0_56] : memref<1x512xf32, #tpu.memory_space<vmem>>, vector<1x512xf32>
      %48 = vector.broadcast %47 : vector<1x512xf32> to vector<2x512xf32>
      %49 = arith.mulf %46, %48 : vector<2x512xf32>
      %cst_57 = arith.constant dense<0.000000e+00> : vector<2xf32>
      %50 = vector.multi_reduction <add>, %49, %cst_57 [1] : vector<2x512xf32> to vector<2xf32>
      %51 = vector.shape_cast %50 : vector<2xf32> to vector<2x1xf32>
      %c0_58 = arith.constant 0 : index
      %c0_59 = arith.constant 0 : index
      %52 = vector.load %arg9[%c0_58, %c0_59] : memref<1x1xf32, #tpu.memory_space<vmem>>, vector<1x1xf32>
      %53 = vector.broadcast %52 : vector<1x1xf32> to vector<2x1xf32>
      %54 = arith.addf %51, %53 : vector<2x1xf32>
      %55 = arith.negf %54 : vector<2x1xf32>
      %56 = math.exp %55 : vector<2x1xf32>
      %cst_60 = arith.constant 1.000000e+00 : f32
      %57 = vector.broadcast %cst_60 : f32 to vector<2x1xf32>
      %58 = arith.addf %57, %56 : vector<2x1xf32>
      %59 = arith.divf %57, %58 : vector<2x1xf32>
      %60 = vector.shape_cast %59 : vector<2x1xf32> to vector<2x1xf32>
      %61 = vector.broadcast %60 : vector<2x1xf32> to vector<2x128xf32>
      %c0_61 = arith.constant 0 : index
      %c0_62 = arith.constant 0 : index
      %62 = vector.load %arg10[%c0_61, %c0_62] : memref<2x128xf32, #tpu.memory_space<vmem>>, vector<2x128xf32>
      tpu.vector_store %arg10[%c0_61, %c0_62], %61 {strides = array<i32>} : memref<2x128xf32, #tpu.memory_space<vmem>>, vector<2x128xf32>,
    } else {
    }
    return
  }
  func.func @transform_0(%arg0: i32, %arg1: i32) -> (i32, i32, i32) {
    %c0_i32 = arith.constant 0 : i32
    %c0_i32_0 = arith.constant 0 : i32
    return %arg0, %c0_i32, %arg1 : i32, i32, i32
  }
  func.func @transform_1(%arg0: i32, %arg1: i32) -> (i32, i32, i32) {
    %c0_i32 = arith.constant 0 : i32
    %c0_i32_0 = arith.constant 0 : i32
    return %arg0, %c0_i32, %arg1 : i32, i32, i32
  }
  func.func @transform_2(%arg0: i32, %arg1: i32) -> (i32, i32, i32) {
    %c0_i32 = arith.constant 0 : i32
    %c0_i32_0 = arith.constant 0 : i32
    return %arg0, %c0_i32, %arg1 : i32, i32, i32
  }
  func.func @transform_3(%arg0: i32, %arg1: i32) -> (i32, i32, i32) {
    %c0_i32 = arith.constant 0 : i32
    %c0_i32_0 = arith.constant 0 : i32
    return %arg0, %c0_i32, %arg1 : i32, i32, i32
  }
  func.func @transform_4(%arg0: i32, %arg1: i32) -> (i32, i32) {
    %c0_i32 = arith.constant 0 : i32
    %c0_i32_0 = arith.constant 0 : i32
    %c0_i32_1 = arith.constant 0 : i32
    return %c0_i32, %c0_i32_0 : i32, i32
  }
  func.func @transform_5(%arg0: i32, %arg1: i32) -> (i32, i32) {
    %c0_i32 = arith.constant 0 : i32
    %c0_i32_0 = arith.constant 0 : i32
    %c0_i32_1 = arith.constant 0 : i32
    return %c0_i32, %c0_i32_0 : i32, i32
  }
  func.func @transform_6(%arg0: i32, %arg1: i32) -> (i32, i32) {
    %c0_i32 = arith.constant 0 : i32
    %c0_i32_0 = arith.constant 0 : i32
    %c0_i32_1 = arith.constant 0 : i32
    return %c0_i32, %c0_i32_0 : i32, i32
  }
  func.func @transform_7(%arg0: i32, %arg1: i32) -> (i32, i32) {
    %c0_i32 = arith.constant 0 : i32
    %c0_i32_0 = arith.constant 0 : i32
    %c0_i32_1 = arith.constant 0 : i32
    return %c0_i32, %c0_i32_0 : i32, i32
  }
  func.func @transform_8(%arg0: i32, %arg1: i32) -> (i32, i32) {
    %c0_i32 = arith.constant 0 : i32
    %c0_i32_0 = arith.constant 0 : i32
    return %arg0, %c0_i32 : i32, i32
  }
}

</mosaic_0001>

<bundles_post_ra>
// kernel: tpu_custom_call.1
= control target key start
LH: loop header
LB: loop body
LE: loop exit
PB: predicated region body
PF: predicated region fallthrough
CT: control target
= control target key end

     0   :  { %s7366_s0 = inlined_call_operand.hbm [shape: bf16[2,256,256], index: 0, kind: input, shape index: {}]   ;;  %s7367_s1 = inlined_call_operand.hbm [shape: bf16[2,256,256], index: 1, kind: input, shape index: {}]   ;;  %s7368_s2 = inlined_call_operand.hbm [shape: bf16[2,256,256], index: 2, kind: input, shape index: {}]   ;;  %s7369_s3 = inlined_call_operand.hbm [shape: bf16[2,256,256], index: 3, kind: input, shape index: {}]   ;;  %s7370_s4 = inlined_call_operand.hbm [shape: f32[1024,512], index: 4, kind: input, shape index: {}]   ;;  %s7371_s5 = inlined_call_operand.hbm [shape: f32[1,512], index: 5, kind: input, shape index: {}]   ;;  %s7372_s6 = inlined_call_operand.hbm [shape: f32[1,512], index: 6, kind: input, shape index: {}]   ;;  %s7373_s7 = inlined_call_operand.<no memory space> [shape: f32[1,1], index: 7, kind: input, shape index: {}]   ;;  %s7374_s8 = inlined_call_operand.hbm [shape: f32[2,128], index: 8, kind: output, shape index: {}]  }
   0x1   :  { %v13_v0 = vstv %s7373_s7 }
   0x2   :  { %14 = vst [vmem:[#allocation3] sm:$0x1] %v13_v0 }
   0x3   :  { %15 = vsyncpa [#allocation5], 0 }
   0x4   :  { %16 = vsyncpa [#allocation8], 0 }
   0x5   :  { %17 = vsyncpa [#allocation11], 0 }
   0x6   :  { %18 = vsyncpa [#allocation14], 0 }
   0x7   :  { %19 = vsyncpa [#allocation6], 0  ;;  %s6142_s29 = smov [#allocation7]   ;;  %s6143_s9 = smov [#allocation10]  }
   0x8   :  { %s37_s30 = sshll.u32 %s6142_s29, 4  ;;  %s61_s10 = sshll.u32 %s6143_s9, 4  ;;  %s38_s30 = int_to_ptr.vmem [resolvable:$true] %s37_s30  ;;  %s62_s10 = int_to_ptr.vmem [resolvable:$true] %s61_s10 }
   0x9   :  { %s5980_s11 = scalar_lea.vmem %s38_s30, 8192  ;;  %p5985_p1 = scmp.lt.s32.totalorder %s38_s30, %s38_s30 }
   0xa   :  { %p5981_p0 = scmp.ne.s32.totalorder %s38_s30, %s5980_s11  ;;  %p5986_p2 = scmp.lt.s32.totalorder %s5980_s11, %s5980_s11 }
   0xc   :  { %p5987_p3 = por %p5986_p2, %p5985_p1 }
   0xe   :  { %p5988_p4 = pnand %p5987_p3, %p5981_p0 }
  0x10   :  { %5991 = shalt.err (!%p5988_p4)
}
  0x11   :  { %s6144_s7 = smov 128   ;;  %s6145_s12 = smov 8  }
  0x12   :  { %43 = dma.hbm_to_vmem [thread:$0]  %s7367_s1, 8192, %s38_s30, [#allocation8], %s6144_s7, %s6144_s7, %s6145_s12  }
  0x13   :  { %s6000_s15 = scalar_lea.vmem %s62_s10, 8192  ;;  %p6005_p6 = scmp.lt.s32.totalorder %s62_s10, %s62_s10 }
  0x14   :  { %p6001_p5 = scmp.ne.s32.totalorder %s62_s10, %s6000_s15  ;;  %p6006_p7 = scmp.lt.s32.totalorder %s6000_s15, %s6000_s15 }
  0x16   :  { %p6007_p8 = por %p6006_p7, %p6005_p6 }
  0x18   :  { %p6008_p9 = pnand %p6007_p8, %p6001_p5 }
  0x1a   :  { %6011 = shalt.err (!%p6008_p9)
}
  0x1b   :  { %67 = dma.hbm_to_vmem [thread:$0]  %s7369_s3, 8192, %s62_s10, [#allocation11], %s6144_s7, %s6144_s7, %s6145_s12  }
  0x1c   :  { %s6146_s18 = smov [#allocation13]   ;;  %s6147_s20 = smov [#allocation4]  }
  0x1d   :  { %s86_s19 = sshll.u32 %s6146_s18, 4  ;;  %s25_s21 = sshll.u32 %s6147_s20, 4  ;;  %s87_s19 = int_to_ptr.vmem [resolvable:$true] %s86_s19  ;;  %s26_s21 = int_to_ptr.vmem [resolvable:$true] %s25_s21 }
  0x1e   :  { %s6020_s1 = scalar_lea.vmem %s87_s19, 64  ;;  %p6025_p11 = scmp.lt.s32.totalorder %s87_s19, %s87_s19 }
  0x1f   :  { %p6021_p10 = scmp.ne.s32.totalorder %s87_s19, %s6020_s1  ;;  %p6026_p12 = scmp.lt.s32.totalorder %s6020_s1, %s6020_s1 }
  0x21   :  { %p6027_p13 = por %p6026_p12, %p6025_p11 }
  0x23   :  { %p6028_p0 = pnand %p6027_p13, %p6021_p10 }
  0x25   :  { %6031 = shalt.err (!%p6028_p0)
}
  0x26   :  { %89 = dma.hbm_to_vmem [thread:$0]  %s7371_s5, 64, %s87_s19, [#allocation14]  }
  0x27   :  { %s6040_s24 = scalar_lea.vmem %s26_s21, 8192  ;;  %p6045_p2 = scmp.lt.s32.totalorder %s26_s21, %s26_s21 }
  0x28   :  { %p6041_p1 = scmp.ne.s32.totalorder %s26_s21, %s6040_s24  ;;  %p6046_p3 = scmp.lt.s32.totalorder %s6040_s24, %s6040_s24 }
  0x2a   :  { %p6047_p4 = por %p6046_p3, %p6045_p2 }
  0x2c   :  { %p6048_p5 = pnand %p6047_p4, %p6041_p1 }
  0x2e   :  { %6051 = shalt.err (!%p6048_p5)
}
  0x2f   :  { %31 = dma.hbm_to_vmem [thread:$0]  %s7366_s0, 8192, %s26_s21, [#allocation5], %s6144_s7, %s6144_s7, %s6145_s12  }
  0x30   :  { %s6148_s26 = smov [#allocation9]   ;;  %s6149_s28 = smov [#allocation12]  }
  0x31   :  { %s49_s27 = sshll.u32 %s6148_s26, 4  ;;  %s73_s29 = sshll.u32 %s6149_s28, 4  ;;  %s50_s27 = int_to_ptr.vmem [resolvable:$true] %s49_s27  ;;  %s74_s29 = int_to_ptr.vmem [resolvable:$true] %s73_s29 }
  0x32   :  { %s6060_s5 = scalar_lea.vmem %s50_s27, 8192  ;;  %p6065_p7 = scmp.lt.s32.totalorder %s50_s27, %s50_s27 }
  0x33   :  { %p6061_p6 = scmp.ne.s32.totalorder %s50_s27, %s6060_s5  ;;  %p6066_p8 = scmp.lt.s32.totalorder %s6060_s5, %s6060_s5 }
  0x35   :  { %p6067_p9 = por %p6066_p8, %p6065_p7 }
  0x37   :  { %p6068_p10 = pnand %p6067_p9, %p6061_p6 }
  0x39   :  { %6071 = shalt.err (!%p6068_p10)
}
  0x3a   :  { %55 = dma.hbm_to_vmem [thread:$0]  %s7368_s2, 8192, %s50_s27, [#allocation8], %s6144_s7, %s6144_s7, %s6145_s12  }
  0x3b   :  { %s6080_s0 = scalar_lea.vmem %s74_s29, 65536  ;;  %p6085_p12 = scmp.lt.s32.totalorder %s74_s29, %s74_s29 }
  0x3c   :  { %p6081_p11 = scmp.ne.s32.totalorder %s74_s29, %s6080_s0  ;;  %p6086_p13 = scmp.lt.s32.totalorder %s6080_s0, %s6080_s0 }
  0x3e   :  { %p6087_p0 = por %p6086_p13, %p6085_p12 }
  0x40   :  { %p6088_p1 = pnand %p6087_p0, %p6081_p11 }
  0x42   :  { %6091 = shalt.err (!%p6088_p1)
}
  0x43   :  { %s6150_s10 = smov 512   ;;  %s6151_s11 = smov 32  }
  0x44   :  { %79 = dma.hbm_to_vmem [thread:$0]  %s7370_s4, 65536, %s74_s29, [#allocation11], %s6150_s10, %s6150_s10, %s6151_s11  }
  0x45   :  { %s6152_s15 = smov [#allocation15]  }
  0x46   :  { %s96_s16 = sshll.u32 %s6152_s15, 4  ;;  %s97_s16 = int_to_ptr.vmem [resolvable:$true] %s96_s16 }
  0x47   :  { %s6100_s17 = scalar_lea.vmem %s97_s16, 64  ;;  %p6105_p3 = scmp.lt.s32.totalorder %s97_s16, %s97_s16 }
  0x48   :  { %p6101_p2 = scmp.ne.s32.totalorder %s97_s16, %s6100_s17  ;;  %p6106_p4 = scmp.lt.s32.totalorder %s6100_s17, %s6100_s17 }
  0x4a   :  { %p6107_p5 = por %p6106_p4, %p6105_p3 }
  0x4c   :  { %p6108_p6 = pnand %p6107_p5, %p6101_p2 }
  0x4e   :  { %6111 = shalt.err (!%p6108_p6)
}
  0x4f   :  { %99 = dma.hbm_to_vmem [thread:$0]  %s7372_s6, 64, %s97_s16, [#allocation14]  }
  0x50   :  { %6132 = dma.done.wait [#allocation5], 8192  }
  0x51   :  { %6133 = vsyncadd [#allocation5], 4294959104 }
  0x52   :  { %6134 = dma.done.wait [#allocation8], 16384  }
  0x53   :  { %6135 = vsyncadd [#allocation8], 4294950912 }
  0x54   :  { %6136 = dma.done.wait [#allocation11], 73728  }
  0x55   :  { %6137 = vsyncadd [#allocation11], 4294893568 }
  0x56   :  { %6138 = dma.done.wait [#allocation14], 128  }
  0x57   :  { %6139 = vsyncadd [#allocation14], 4294967168  ;;  %v431_v1 = vld [vmem:[#allocation4 + $0x180] sm:$0xff]   ;;  %v432_v3 = vld [vmem:[#allocation4 + $0x188] sm:$0xff]   ;;  %vm4003_vm0 = vcmask 130112   ;;  %vm4010_vm1 = vcmask 195712  }
  0x58   :  { %v399_v2 = vld [vmem:[#allocation4 + $0x80] sm:$0xff]   ;;  %v495_v4 = vunpack.c.l.bf16 %v431_v1  ;;  %v623_v5 = vunpack.c.h.bf16 %v431_v1  ;;  %v400_v8 = vld [vmem:[#allocation4 + $0x88] sm:$0xff]   ;;  %v496_v10 = vunpack.c.l.bf16 %v432_v3  ;;  %v624_v11 = vunpack.c.h.bf16 %v432_v3  ;;  %v401_v24 = vld [vmem:[#allocation4 + $0x90] sm:$0xff]   ;;  %s6154_s4 = smov [#allocation16]  }
  0x59   :  { %v463_v6 = vunpack.c.l.bf16 %v399_v2  ;;  %v591_v7 = vunpack.c.h.bf16 %v399_v2  ;;  %v384_v9 = vld [vmem:[#allocation4 + $0x8] sm:$0xff]   ;;  %v464_v12 = vunpack.c.l.bf16 %v400_v8  ;;  %v592_v13 = vunpack.c.h.bf16 %v400_v8  ;;  %v383_v14 = vld [vmem:[#allocation4] sm:$0xff]   ;;  %v433_v31 = vld [vmem:[#allocation4 + $0x190] sm:$0xff]   ;;  %s5939_s6 = sshll.u32 %s6154_s4, 4  ;;  %s5940_s6 = int_to_ptr.vmem [resolvable:$true] %s5939_s6 }
  0x5a   :  { %v687_v15 = vadd.f32 %v623_v5, %v495_v4  ;;  %v448_v17 = vunpack.c.l.bf16 %v384_v9  ;;  %v576_v18 = vunpack.c.h.bf16 %v384_v9  ;;  %v688_v19 = vadd.f32 %v624_v11, %v496_v10  ;;  %v415_v23 = vld [vmem:[#allocation4 + $0x100] sm:$0xff]   ;;  %v416_v32 = vld [vmem:[#allocation4 + $0x108] sm:$0xff]   ;;  %v402_v39 = vld [vmem:[#allocation4 + $0x98] sm:$0xff]   ;;  %s6112_s12 = scalar_lea.vmem %s5940_s6, 32  ;;  %p6117_p8 = scmp.lt.s32.totalorder %s5940_s6, %s5940_s6 }
  0x5b   :  { %v655_v16 = vadd.f32 %v591_v7, %v463_v6  ;;  %v656_v20 = vadd.f32 %v592_v13, %v464_v12  ;;  %v447_v21 = vunpack.c.l.bf16 %v383_v14  ;;  %v575_v22 = vunpack.c.h.bf16 %v383_v14  ;;  %v385_v40 = vld [vmem:[#allocation4 + $0x10] sm:$0xff]   ;;  %v912_v47 = vld [vmem:[#allocation7 + $0x88] sm:$0xff]   ;;  %v911_v48 = vld [vmem:[#allocation7 + $0x80] sm:$0xff]   ;;  %p6113_p7 = scmp.ne.s32.totalorder %s5940_s6, %s6112_s12  ;;  %p6118_p9 = scmp.lt.s32.totalorder %s6112_s12, %s6112_s12 }
  0x5c   :  { %2978 = vadd.xlane.f32.xlu1 %v687_v15  ;;  %v640_v25 = vadd.f32 %v576_v18, %v448_v17  ;;  %v479_v26 = vunpack.c.l.bf16 %v415_v23  ;;  %v607_v28 = vunpack.c.h.bf16 %v415_v23  ;;  %v465_v29 = vunpack.c.l.bf16 %v401_v24  ;;  %v434_v55 = vld [vmem:[#allocation4 + $0x198] sm:$0xff]   ;;  %v417_v56 = vld [vmem:[#allocation4 + $0x110] sm:$0xff]   ;;  %v944_v63 = vld [vmem:[#allocation7 + $0x188] sm:$0xff]  }
  0x5d   :  { %2722 = vadd.xlane.f32.xlu0 %v655_v16  ;;  %v639_v27 = vadd.f32 %v575_v22, %v447_v21  ;;  %v593_v30 = vunpack.c.h.bf16 %v401_v24  ;;  %v497_v33 = vunpack.c.l.bf16 %v433_v31  ;;  %v625_v34 = vunpack.c.h.bf16 %v433_v31  ;;  %v943_v0 = vld [vmem:[#allocation7 + $0x180] sm:$0xff]   ;;  %v386_v8 = vld [vmem:[#allocation4 + $0x18] sm:$0xff]   ;;  %v896_v15 = vld [vmem:[#allocation7 + $0x8] sm:$0xff]   ;;  %p6119_p10 = por %p6118_p9, %p6117_p8 }
  0x5e   :  { %v671_v35 = vadd.f32 %v607_v28, %v479_v26  ;;  %v480_v37 = vunpack.c.l.bf16 %v416_v32  ;;  %v608_v38 = vunpack.c.h.bf16 %v416_v32  ;;  %v466_v42 = vunpack.c.l.bf16 %v402_v39  ;;  %v403_v7 = vld [vmem:[#allocation4 + $0xa0] sm:$0xff]   ;;  %v418_v23 = vld [vmem:[#allocation4 + $0x118] sm:$0xff]   ;;  %v913_v24 = vld [vmem:[#allocation7 + $0x90] sm:$0xff]  }
  0x5f   :  { %v657_v36 = vadd.f32 %v593_v30, %v465_v29  ;;  %v689_v41 = vadd.f32 %v625_v34, %v497_v33  ;;  %v594_v44 = vunpack.c.h.bf16 %v402_v39  ;;  %v449_v45 = vunpack.c.l.bf16 %v385_v40  ;;  %v895_v16 = vld [vmem:[#allocation7] sm:$0xff]   ;;  %v945_v39 = vld [vmem:[#allocation7 + $0x190] sm:$0xff]   ;;  %p6120_p11 = pnand %p6119_p10, %p6113_p7 }
  0x60   :  { %2980 = vadd.xlane.f32.xlu1 %v688_v19  ;;  %v672_v43 = vadd.f32 %v608_v38, %v480_v37  ;;  %v577_v46 = vunpack.c.h.bf16 %v385_v40  ;;  %v976_v49 = vunpack.c.l.bf16 %v912_v47  ;;  %v1104_v50 = vunpack.c.h.bf16 %v912_v47  ;;  %v927_v31 = vld [vmem:[#allocation7 + $0x100] sm:$0xff]   ;;  %v928_v40 = vld [vmem:[#allocation7 + $0x108] sm:$0xff]  }
  0x61   :  { %2724 = vadd.xlane.f32.xlu0 %v656_v20  ;;  %v658_v51 = vadd.f32 %v594_v44, %v466_v42  ;;  %v975_v53 = vunpack.c.l.bf16 %v911_v48  ;;  %v1103_v54 = vunpack.c.h.bf16 %v911_v48  ;;  %v498_v58 = vunpack.c.l.bf16 %v434_v55  ;;  %v435_v32 = vld [vmem:[#allocation4 + $0x1a0] sm:$0xff]   ;;  %v404_v47 = vld [vmem:[#allocation4 + $0xa8] sm:$0xff]  }
  0x62   :  { %v641_v52 = vadd.f32 %v577_v46, %v449_v45  ;;  %v1168_v57 = vadd.f32 %v1104_v50, %v976_v49  ;;  %v626_v60 = vunpack.c.h.bf16 %v434_v55  ;;  %v481_v61 = vunpack.c.l.bf16 %v417_v56  ;;  %v387_v48 = vld [vmem:[#allocation4 + $0x20] sm:$0xff]   ;;  %v914_v55 = vld [vmem:[#allocation7 + $0x98] sm:$0xff]  }
  0x63   :  { %v1167_v59 = vadd.f32 %v1103_v54, %v975_v53  ;;  %v609_v62 = vunpack.c.h.bf16 %v417_v56  ;;  %v1008_v1 = vunpack.c.l.bf16 %v944_v63  ;;  %v1136_v2 = vunpack.c.h.bf16 %v944_v63  ;;  %v897_v56 = vld [vmem:[#allocation7 + $0x10] sm:$0xff]   ;;  %v436_v63 = vld [vmem:[#allocation4 + $0x1a8] sm:$0xff]  }
  0x64   :  { %2692 = vadd.xlane.f32.xlu1 %v640_v25  ;;  %v690_v3 = vadd.f32 %v626_v60, %v498_v58  ;;  %v1007_v5 = vunpack.c.l.bf16 %v943_v0  ;;  %v1135_v6 = vunpack.c.h.bf16 %v943_v0  ;;  %v467_v10 = vunpack.c.l.bf16 %v403_v7  ;;  %v419_v0 = vld [vmem:[#allocation4 + $0x120] sm:$0xff]  }
  0x65   :  { %2690 = vadd.xlane.f32.xlu0 %v639_v27  ;;  %v673_v4 = vadd.f32 %v609_v62, %v481_v61  ;;  %v1200_v9 = vadd.f32 %v1136_v2, %v1008_v1  ;;  %v595_v12 = vunpack.c.h.bf16 %v403_v7  ;;  %v450_v13 = vunpack.c.l.bf16 %v386_v8  ;;  %v946_v7 = vld [vmem:[#allocation7 + $0x198] sm:$0xff]  }
  0x66   :  { %v1199_v11 = vadd.f32 %v1135_v6, %v1007_v5  ;;  %v578_v14 = vunpack.c.h.bf16 %v386_v8  ;;  %v960_v17 = vunpack.c.l.bf16 %v896_v15  ;;  %v1088_v18 = vunpack.c.h.bf16 %v896_v15  ;;  %v929_v8 = vld [vmem:[#allocation7 + $0x110] sm:$0xff]  }
  0x67   :  { %v659_v19 = vadd.f32 %v595_v12, %v467_v10  ;;  %v959_v21 = vunpack.c.l.bf16 %v895_v16  ;;  %v1087_v22 = vunpack.c.h.bf16 %v895_v16  ;;  %v482_v26 = vunpack.c.l.bf16 %v418_v23  ;;  %v405_v15 = vld [vmem:[#allocation4 + $0xb0] sm:$0xff]   ;;  %v388_v16 = vld [vmem:[#allocation4 + $0x28] sm:$0xff]  }
  0x68   :  { %2946 = vadd.xlane.f32.xlu1 %v671_v35  ;;  %v642_v20 = vadd.f32 %v578_v14, %v450_v13  ;;  %v1152_v25 = vadd.f32 %v1088_v18, %v960_v17  ;;  %v610_v28 = vunpack.c.h.bf16 %v418_v23  ;;  %v977_v29 = vunpack.c.l.bf16 %v913_v24  ;;  %v915_v23 = vld [vmem:[#allocation7 + $0xa0] sm:$0xff]  }
  0x69   :  { %2726 = vadd.xlane.f32.xlu0 %v657_v36  ;;  %v1151_v27 = vadd.f32 %v1087_v22, %v959_v21  ;;  %v1105_v30 = vunpack.c.h.bf16 %v913_v24  ;;  %v991_v33 = vunpack.c.l.bf16 %v927_v31  ;;  %v1119_v34 = vunpack.c.h.bf16 %v927_v31  ;;  %v898_v24 = vld [vmem:[#allocation7 + $0x18] sm:$0xff]   ;;  %v437_v31 = vld [vmem:[#allocation4 + $0x1b0] sm:$0xff]  }
  0x6a   :  { %v674_v35 = vadd.f32 %v610_v28, %v482_v26  ;;  %v499_v37 = vunpack.c.l.bf16 %v435_v32  ;;  %v627_v38 = vunpack.c.h.bf16 %v435_v32  ;;  %v1009_v42 = vunpack.c.l.bf16 %v945_v39  ;;  %v420_v32 = vld [vmem:[#allocation4 + $0x128] sm:$0xff]  }
  0x6b   :  { %v1169_v36 = vadd.f32 %v1105_v30, %v977_v29  ;;  %v1137_v44 = vunpack.c.h.bf16 %v945_v39  ;;  %v992_v45 = vunpack.c.l.bf16 %v928_v40  ;;  %v1120_v46 = vunpack.c.h.bf16 %v928_v40  ;;  %v947_v39 = vld [vmem:[#allocation7 + $0x1a0] sm:$0xff]   ;;  %v930_v40 = vld [vmem:[#allocation7 + $0x118] sm:$0xff]  }
  0x6c   :  { %2982 = vadd.xlane.f32.xlu1 %v689_v41  ;;  %v1183_v41 = vadd.f32 %v1119_v34, %v991_v33  ;;  %v468_v49 = vunpack.c.l.bf16 %v404_v47  ;;  %v596_v50 = vunpack.c.h.bf16 %v404_v47  ;;  %v451_v53 = vunpack.c.l.bf16 %v387_v48  ;;  %v406_v47 = vld [vmem:[#allocation4 + $0xb8] sm:$0xff]  }
  0x6d   :  { %2948 = vadd.xlane.f32.xlu0 %v672_v43  ;;  %v691_v43 = vadd.f32 %v627_v38, %v499_v37  ;;  %v579_v54 = vunpack.c.h.bf16 %v387_v48  ;;  %v978_v58 = vunpack.c.l.bf16 %v914_v55  ;;  %v1106_v60 = vunpack.c.h.bf16 %v914_v55  ;;  %v389_v48 = vld [vmem:[#allocation4 + $0x30] sm:$0xff]   ;;  %v916_v55 = vld [vmem:[#allocation7 + $0xa8] sm:$0xff]  }
  0x6e   :  { %v961_v61 = vunpack.c.l.bf16 %v897_v56  ;;  %v1089_v62 = vunpack.c.h.bf16 %v897_v56  ;;  %v500_v1 = vunpack.c.l.bf16 %v436_v63  ;;  %v628_v2 = vunpack.c.h.bf16 %v436_v63  ;;  %v899_v56 = vld [vmem:[#allocation7 + $0x20] sm:$0xff]   ;;  %v438_v63 = vld [vmem:[#allocation4 + $0x1b8] sm:$0xff]  }
  0x6f   :  { %v483_v5 = vunpack.c.l.bf16 %v419_v0  ;;  %v611_v6 = vunpack.c.h.bf16 %v419_v0  ;;  %v1010_v10 = vunpack.c.l.bf16 %v946_v7  ;;  %v1138_v12 = vunpack.c.h.bf16 %v946_v7  ;;  %v421_v0 = vld [vmem:[#allocation4 + $0x130] sm:$0xff]   ;;  %v948_v7 = vld [vmem:[#allocation7 + $0x1a8] sm:$0xff]  }
  0x70   :  { %2728 = vadd.xlane.f32.xlu1 %v658_v51  ;;  %v1201_v51 = vadd.f32 %v1137_v44, %v1009_v42  ;;  %v993_v13 = vunpack.c.l.bf16 %v929_v8  ;;  %v1121_v14 = vunpack.c.h.bf16 %v929_v8  ;;  %v469_v17 = vunpack.c.l.bf16 %v405_v15  ;;  %v931_v8 = vld [vmem:[#allocation7 + $0x120] sm:$0xff]  }
  0x71   :  { %2694 = vadd.xlane.f32.xlu0 %v641_v52  ;;  %v1184_v52 = vadd.f32 %v1120_v46, %v992_v45  ;;  %v597_v18 = vunpack.c.h.bf16 %v405_v15  ;;  %v452_v21 = vunpack.c.l.bf16 %v388_v16  ;;  %v580_v22 = vunpack.c.h.bf16 %v388_v16  ;;  %v407_v15 = vld [vmem:[#allocation4 + $0xc0] sm:$0xff]   ;;  %v390_v16 = vld [vmem:[#allocation4 + $0x38] sm:$0xff]  }
  0x72   :  { %v979_v26 = vunpack.c.l.bf16 %v915_v23  ;;  %v1107_v28 = vunpack.c.h.bf16 %v915_v23  ;;  %v962_v29 = vunpack.c.l.bf16 %v898_v24  ;;  %v1090_v30 = vunpack.c.h.bf16 %v898_v24  ;;  %v917_v23 = vld [vmem:[#allocation7 + $0xb0] sm:$0xff]   ;;  %v900_v24 = vld [vmem:[#allocation7 + $0x28] sm:$0xff]  }
  0x73   :  { %v501_v33 = vunpack.c.l.bf16 %v437_v31  ;;  %v629_v34 = vunpack.c.h.bf16 %v437_v31  ;;  %v484_v37 = vunpack.c.l.bf16 %v420_v32  ;;  %v612_v38 = vunpack.c.h.bf16 %v420_v32  ;;  %v439_v31 = vld [vmem:[#allocation4 + $0x1c0] sm:$0xff]   ;;  %v422_v32 = vld [vmem:[#allocation4 + $0x138] sm:$0xff]  }
  0x74   :  { %2788 = vadd.xlane.f32.xlu1 %v1168_v57  ;;  %v660_v57 = vadd.f32 %v596_v50, %v468_v49  ;;  %v1011_v42 = vunpack.c.l.bf16 %v947_v39  ;;  %v1139_v44 = vunpack.c.h.bf16 %v947_v39  ;;  %v994_v45 = vunpack.c.l.bf16 %v930_v40  ;;  %v949_v39 = vld [vmem:[#allocation7 + $0x1b0] sm:$0xff]  }
  0x75   :  { %2786 = vadd.xlane.f32.xlu0 %v1167_v59  ;;  %v643_v59 = vadd.f32 %v579_v54, %v451_v53  ;;  %v1122_v46 = vunpack.c.h.bf16 %v930_v40  ;;  %v470_v49 = vunpack.c.l.bf16 %v406_v47  ;;  %v598_v50 = vunpack.c.h.bf16 %v406_v47  ;;  %v932_v40 = vld [vmem:[#allocation7 + $0x128] sm:$0xff]  }
  0x76   :  { %v453_v53 = vunpack.c.l.bf16 %v389_v48  ;;  %v581_v54 = vunpack.c.h.bf16 %v389_v48  ;;  %v408_v47 = vld [vmem:[#allocation4 + $0xc8] sm:$0xff]   ;;  %v391_v48 = vld [vmem:[#allocation4 + $0x40] sm:$0xff]   ;;  %vm4017_vm2 = vcmask 261312   ;;  %vm4024_vm3 = vcmask 326912  }
  0x77   :  { %vm4031_vm4 = vcmask 392512   ;;  %vm4038_vm5 = vcmask 458112   ;;  %vm4045_vm6 = vcmask 523712   ;;  %vm4052_vm7 = vcmask 589312  }
  0x78   :  { %2984 = vadd.xlane.f32.xlu1 %v690_v3  ;;  %v1170_v3 = vadd.f32 %v1106_v60, %v978_v58  ;;  %v980_v58 = vunpack.c.l.bf16 %v916_v55  ;;  %v1108_v60 = vunpack.c.h.bf16 %v916_v55  ;;  %v918_v55 = vld [vmem:[#allocation7 + $0xb8] sm:$0xff]   ;;  %vm4059_vm8 = vcmask 654912  }
  0x79   :  { %2950 = vadd.xlane.f32.xlu0 %v673_v4  ;;  %v1153_v4 = vadd.f32 %v1089_v62, %v961_v61  ;;  %v963_v61 = vunpack.c.l.bf16 %v899_v56  ;;  %v1091_v62 = vunpack.c.h.bf16 %v899_v56  ;;  %v901_v56 = vld [vmem:[#allocation7 + $0x30] sm:$0xff]   ;;  %vm4066_vm9 = vcmask 720512  }
  0x7a   :  { %vm4073_vm10 = vcmask 786112   ;;  %vm4080_vm11 = vcmask 851712   ;;  %vm4087_vm12 = vcmask 917312   ;;  %vm4094_vm13 = vcmask 982912  }
  0x7b   :  { %vm4101_vm14 = vcmask 1048512   ;;  %vm5288_vm15 = vcmask 1041409  }
  0x7c   :  { %3044 = vadd.xlane.f32.xlu1 %v1200_v9  ;;  %v692_v9 = vadd.f32 %v628_v2, %v500_v1  ;;  %v502_v1 = vunpack.c.l.bf16 %v438_v63  ;;  %v630_v2 = vunpack.c.h.bf16 %v438_v63  ;;  %v440_v63 = vld [vmem:[#allocation4 + $0x1c8] sm:$0xff]  }
  0x7d   :  { %3042 = vadd.xlane.f32.xlu0 %v1199_v11  ;;  %v675_v11 = vadd.f32 %v611_v6, %v483_v5  ;;  %v485_v5 = vunpack.c.l.bf16 %v421_v0  ;;  %v613_v6 = vunpack.c.h.bf16 %v421_v0  ;;  %v423_v0 = vld [vmem:[#allocation4 + $0x140] sm:$0xff]  }
  0x80   :  { %2730 = vadd.xlane.f32.xlu1 %v659_v19  ;;  %v1202_v19 = vadd.f32 %v1138_v12, %v1010_v10  ;;  %v1012_v10 = vunpack.c.l.bf16 %v948_v7  ;;  %v1140_v12 = vunpack.c.h.bf16 %v948_v7  ;;  %v950_v7 = vld [vmem:[#allocation7 + $0x1b8] sm:$0xff]  }
  0x81   :  { %2696 = vadd.xlane.f32.xlu0 %v642_v20  ;;  %v1185_v20 = vadd.f32 %v1121_v14, %v993_v13  ;;  %v995_v13 = vunpack.c.l.bf16 %v931_v8  ;;  %v1123_v14 = vunpack.c.h.bf16 %v931_v8  ;;  %v933_v8 = vld [vmem:[#allocation7 + $0x130] sm:$0xff]  }
  0x84   :  { %2756 = vadd.xlane.f32.xlu1 %v1152_v25  ;;  %v661_v25 = vadd.f32 %v597_v18, %v469_v17  ;;  %v471_v17 = vunpack.c.l.bf16 %v407_v15  ;;  %v599_v18 = vunpack.c.h.bf16 %v407_v15  ;;  %v409_v15 = vld [vmem:[#allocation4 + $0xd0] sm:$0xff]  }
  0x85   :  { %2754 = vadd.xlane.f32.xlu0 %v1151_v27  ;;  %v644_v27 = vadd.f32 %v580_v22, %v452_v21  ;;  %v454_v21 = vunpack.c.l.bf16 %v390_v16  ;;  %v582_v22 = vunpack.c.h.bf16 %v390_v16  ;;  %v392_v16 = vld [vmem:[#allocation4 + $0x48] sm:$0xff]  }
  0x88   :  { %2952 = vadd.xlane.f32.xlu1 %v674_v35  ;;  %v1171_v35 = vadd.f32 %v1107_v28, %v979_v26  ;;  %v981_v26 = vunpack.c.l.bf16 %v917_v23  ;;  %v1109_v28 = vunpack.c.h.bf16 %v917_v23  ;;  %v3716_v23 = vlaneseq }
  0x89   :  { %2790 = vadd.xlane.f32.xlu0 %v1169_v36  ;;  %v1154_v36 = vadd.f32 %v1090_v30, %v962_v29  ;;  %v964_v29 = vunpack.c.l.bf16 %v900_v24  ;;  %v1092_v30 = vunpack.c.h.bf16 %v900_v24  ;;  %v919_v24 = vld [vmem:[#allocation7 + $0xc0] sm:$0xff]  }
  0x8c   :  { %3010 = vadd.xlane.f32.xlu1 %v1183_v41  ;;  %v693_v41 = vadd.f32 %v629_v34, %v501_v33  ;;  %v503_v33 = vunpack.c.l.bf16 %v439_v31  ;;  %v631_v34 = vunpack.c.h.bf16 %v439_v31 }
  0x8d   :  { %2986 = vadd.xlane.f32.xlu0 %v691_v43  ;;  %v676_v43 = vadd.f32 %v612_v38, %v484_v37  ;;  %v486_v37 = vunpack.c.l.bf16 %v422_v32  ;;  %v614_v38 = vunpack.c.h.bf16 %v422_v32 }
  0x90   :  { %3046 = vadd.xlane.f32.xlu1 %v1201_v51  ;;  %v1203_v51 = vadd.f32 %v1139_v44, %v1011_v42  ;;  %v1013_v42 = vunpack.c.l.bf16 %v949_v39  ;;  %v1141_v44 = vunpack.c.h.bf16 %v949_v39 }
  0x91   :  { %3012 = vadd.xlane.f32.xlu0 %v1184_v52  ;;  %v1186_v52 = vadd.f32 %v1122_v46, %v994_v45  ;;  %v996_v45 = vunpack.c.l.bf16 %v932_v40  ;;  %v1124_v46 = vunpack.c.h.bf16 %v932_v40 }
  0x94   :  { %2732 = vadd.xlane.f32.xlu1 %v660_v57  ;;  %v662_v57 = vadd.f32 %v598_v50, %v470_v49  ;;  %v472_v49 = vunpack.c.l.bf16 %v408_v47  ;;  %v600_v50 = vunpack.c.h.bf16 %v408_v47 }
  0x95   :  { %2698 = vadd.xlane.f32.xlu0 %v643_v59  ;;  %v645_v59 = vadd.f32 %v581_v54, %v453_v53  ;;  %v455_v53 = vunpack.c.l.bf16 %v391_v48  ;;  %v583_v54 = vunpack.c.h.bf16 %v391_v48 }
  0x98   :  { %2792 = vadd.xlane.f32.xlu1 %v1170_v3  ;;  %v1172_v3 = vadd.f32 %v1108_v60, %v980_v58  ;;  %v982_v58 = vunpack.c.l.bf16 %v918_v55  ;;  %v1110_v60 = vunpack.c.h.bf16 %v918_v55  ;;  %v410_v55 = vld [vmem:[#allocation4 + $0xd8] sm:$0xff]  }
  0x99   :  { %2758 = vadd.xlane.f32.xlu0 %v1153_v4  ;;  %v1155_v4 = vadd.f32 %v1091_v62, %v963_v61  ;;  %v965_v61 = vunpack.c.l.bf16 %v901_v56  ;;  %v1093_v62 = vunpack.c.h.bf16 %v901_v56 }
  0x9c   :  { %2988 = vadd.xlane.f32.xlu1 %v692_v9  ;;  %v694_v9 = vadd.f32 %v630_v2, %v502_v1  ;;  %v504_v1 = vunpack.c.l.bf16 %v440_v63  ;;  %v632_v2 = vunpack.c.h.bf16 %v440_v63 }
  0x9d   :  { %2954 = vadd.xlane.f32.xlu0 %v675_v11  ;;  %v677_v11 = vadd.f32 %v613_v6, %v485_v5  ;;  %v487_v5 = vunpack.c.l.bf16 %v423_v0  ;;  %v615_v6 = vunpack.c.h.bf16 %v423_v0 }
  0xa0   :  { %3048 = vadd.xlane.f32.xlu1 %v1202_v19  ;;  %v1204_v19 = vadd.f32 %v1140_v12, %v1012_v10  ;;  %v1142_v10 = vunpack.c.h.bf16 %v950_v7  ;;  %v679_v12 = vadd.f32 %v615_v6, %v487_v5 }
  0xa1   :  { %3014 = vadd.xlane.f32.xlu0 %v1185_v20  ;;  %v1187_v20 = vadd.f32 %v1123_v14, %v995_v13  ;;  %v997_v13 = vunpack.c.l.bf16 %v933_v8  ;;  %v1125_v14 = vunpack.c.h.bf16 %v933_v8  ;;  %v920_v8 = vld [vmem:[#allocation7 + $0xc8] sm:$0xff]  }
  0xa4   :  { %2734 = vadd.xlane.f32.xlu1 %v661_v25  ;;  %v663_v25 = vadd.f32 %v599_v18, %v471_v17  ;;  %v473_v18 = vunpack.c.l.bf16 %v409_v15 }
  0xa5   :  { %2700 = vadd.xlane.f32.xlu0 %v644_v27  ;;  %v646_v27 = vadd.f32 %v582_v22, %v454_v21  ;;  %v456_v21 = vunpack.c.l.bf16 %v392_v16  ;;  %v584_v22 = vunpack.c.h.bf16 %v392_v16  ;;  %v984_v16 = vunpack.c.l.bf16 %v920_v8 }
  0xa8   :  { %2794 = vadd.xlane.f32.xlu1 %v1171_v35  ;;  %v1173_v35 = vadd.f32 %v1109_v28, %v981_v26  ;;  %v1111_v28 = vunpack.c.h.bf16 %v919_v24 }
  0xa9   :  { %2760 = vadd.xlane.f32.xlu0 %v1154_v36  ;;  %v1156_v36 = vadd.f32 %v1092_v30, %v964_v29  ;;  %v648_v29 = vadd.f32 %v584_v22, %v456_v21  ;;  %v6236_v30 = vand.u32 127, %v3716_v23  ;;  %v442_v22 = vld [vmem:[#allocation4 + $0x1d8] sm:$0xff]  }
  0xac   :  { %2990 = vadd.xlane.f32.xlu1 %v693_v41  ;;  %v695_v41 = vadd.f32 %v631_v34, %v503_v33  ;;  %v441_v33 = vld [vmem:[#allocation4 + $0x1d0] sm:$0xff]   ;;  %v424_v34 = vld [vmem:[#allocation4 + $0x148] sm:$0xff]  }
  0xad   :  { %2956 = vadd.xlane.f32.xlu0 %v676_v43  ;;  %v678_v43 = vadd.f32 %v614_v38, %v486_v37  ;;  %v505_v38 = vunpack.c.l.bf16 %v441_v33  ;;  %v633_v40 = vunpack.c.h.bf16 %v441_v33 }
  0xb0   :  { %3050 = vadd.xlane.f32.xlu1 %v1203_v51  ;;  %v1205_v51 = vadd.f32 %v1141_v44, %v1013_v42  ;;  %v616_v42 = vunpack.c.h.bf16 %v424_v34  ;;  %v934_v44 = vld [vmem:[#allocation7 + $0x138] sm:$0xff]  }
  0xb1   :  { %3016 = vadd.xlane.f32.xlu0 %v1186_v52  ;;  %v1188_v52 = vadd.f32 %v1124_v46, %v996_v45 }
  0xb4   :  { %2736 = vadd.xlane.f32.xlu1 %v662_v57  ;;  %v664_v57 = vadd.f32 %v600_v50, %v472_v49 }
  0xb5   :  { %2702 = vadd.xlane.f32.xlu0 %v645_v59  ;;  %v647_v59 = vadd.f32 %v583_v54, %v455_v53  ;;  %v697_v53 = vadd.f32 %v633_v40, %v505_v38  ;;  %v935_v38 = vld [vmem:[#allocation7 + $0x140] sm:$0xff]  }
  0xb8   :  { %2796 = vadd.xlane.f32.xlu1 %v1172_v3  ;;  %v1174_v3 = vadd.f32 %v1110_v60, %v982_v58  ;;  %v4005_v58 = vadd.s32 4294967280, %v6236_v30 }
  0xb9   :  { %2762 = vadd.xlane.f32.xlu0 %v1155_v4  ;;  %v1157_v4 = vadd.f32 %v1093_v62, %v965_v61 }
  0xbc   :  { %2992 = vadd.xlane.f32.xlu1 %v694_v9  ;;  %v1014_v9 = vunpack.c.l.bf16 %v950_v7 }
  0xbd   :  { %2958 = vadd.xlane.f32.xlu0 %v677_v11  ;;  %v696_v11 = vadd.f32 %v632_v2, %v504_v1  ;;  %v474_v2 = vunpack.c.l.bf16 %v410_v55 }
  0xbe   :  { %v1206_v17 = vadd.f32 %v1142_v10, %v1014_v9 }
  0xc0   :  { %3052 = vadd.xlane.f32.xlu1 %v1204_v19  ;;  %v601_v19 = vunpack.c.h.bf16 %v409_v15 }
  0xc1   :  { %3018 = vadd.xlane.f32.xlu0 %v1187_v20  ;;  %v1189_v20 = vadd.f32 %v1125_v14, %v997_v13 }
  0xc2   :  { %v665_v26 = vadd.f32 %v601_v19, %v473_v18 }
  0xc4   :  { %2738 = vadd.xlane.f32.xlu1 %v663_v25  ;;  %v902_v25 = vld [vmem:[#allocation7 + $0x38] sm:$0xff]  }
  0xc5   :  { %2704 = vadd.xlane.f32.xlu0 %v646_v27  ;;  %v983_v27 = vunpack.c.l.bf16 %v919_v24  ;;  %v966_v31 = vunpack.c.l.bf16 %v902_v25  ;;  %v1094_v32 = vunpack.c.h.bf16 %v902_v25  ;;  %v425_v25 = vld [vmem:[#allocation4 + $0x150] sm:$0xff]  }
  0xc7   :  { %v1175_v37 = vadd.f32 %v1111_v28, %v983_v27  ;;  %v1158_v39 = vadd.f32 %v1094_v32, %v966_v31  ;;  %v4012_v27 = vadd.s32 4294967272, %v6236_v30  ;;  %v634_v31 = vunpack.c.h.bf16 %v442_v22 }
  0xc8   :  { %2798 = vadd.xlane.f32.xlu1 %v1173_v35  ;;  %v6238_v35 = vshrl.u32 %v3716_v23, 7 }
  0xc9   :  { %2764 = vadd.xlane.f32.xlu0 %v1156_v36  ;;  %v3998_v36 = vadd.s32 4294967288, %v6236_v30 }
  0xca   :  { %7389 = vst [vmem:[#allocation22_spill] sm:$0xff] %v6238_v35  ;;  %v6243_v47 = vsub.s32 %v6236_v30, %v6238_v35  ;;  %v6258_v14 = vsub.s32 %v4005_v58, %v6238_v35 }
  0xcb   :  { %v6246_v48 = vsub.s32 %v3998_v36, %v6238_v35  ;;  %v617_v36 = vunpack.c.h.bf16 %v425_v25 }
  0xcc   :  { %2994 = vadd.xlane.f32.xlu1 %v695_v41  ;;  %v488_v41 = vunpack.c.l.bf16 %v424_v34  ;;  %v489_v34 = vunpack.c.l.bf16 %v425_v25  ;;  %v4019_v25 = vadd.s32 4294967264, %v6236_v30 }
  0xcd   :  { %2960 = vadd.xlane.f32.xlu0 %v678_v43  ;;  %v951_v43 = vld [vmem:[#allocation7 + $0x1c0] sm:$0xff]  }
  0xce   :  { %v1015_v49 = vunpack.c.l.bf16 %v951_v43  ;;  %v1143_v50 = vunpack.c.h.bf16 %v951_v43  ;;  %v680_v54 = vadd.f32 %v616_v42, %v488_v41 }
  0xd0   :  { %3054 = vadd.xlane.f32.xlu1 %v1205_v51  ;;  %v998_v51 = vunpack.c.l.bf16 %v934_v44  ;;  %v1207_v0 = vadd.f32 %v1143_v50, %v1015_v49  ;;  %v999_v50 = vunpack.c.l.bf16 %v935_v38 }
  0xd1   :  { %3020 = vadd.xlane.f32.xlu0 %v1188_v52  ;;  %v1126_v52 = vunpack.c.h.bf16 %v934_v44  ;;  %v6268_v44 = vsub.s32 %v4012_v27, %v6238_v35 }
  0xd3   :  { %v1190_v1 = vadd.f32 %v1126_v52, %v998_v51 }
  0xd4   :  { %2740 = vadd.xlane.f32.xlu1 %v664_v57 }
  0xd5   :  { %2706 = vadd.xlane.f32.xlu0 %v647_v59  ;;  %v393_v59 = vld [vmem:[#allocation4 + $0x50] sm:$0xff]  }
  0xd6   :  { %v457_v6 = vunpack.c.l.bf16 %v393_v59  ;;  %v585_v7 = vunpack.c.h.bf16 %v393_v59 }
  0xd8   :  { %2800 = vadd.xlane.f32.xlu1 %v1174_v3  ;;  %v602_v3 = vunpack.c.h.bf16 %v410_v55  ;;  %v649_v19 = vadd.f32 %v585_v7, %v457_v6  ;;  %v411_v55 = vld [vmem:[#allocation4 + $0xe0] sm:$0xff]   ;;  %v904_v6 = vld [vmem:[#allocation7 + $0x48] sm:$0xff]  }
  0xd9   :  { %2766 = vadd.xlane.f32.xlu0 %v1157_v4 }
  0xda   :  { %v666_v15 = vadd.f32 %v602_v3, %v474_v2 }
  0xdc   :  { %2996 = vadd.xlane.f32.xlu1 %v696_v11  ;;  %v903_v11 = vld [vmem:[#allocation7 + $0x40] sm:$0xff]  }
  0xdd   :  { %2962 = vadd.xlane.f32.xlu0 %v679_v12  ;;  %v1095_v21 = vunpack.c.h.bf16 %v903_v11 }
  0xe0   :  { %3056 = vadd.xlane.f32.xlu1 %v1206_v17  ;;  %v1112_v17 = vunpack.c.h.bf16 %v920_v8 }
  0xe1   :  { %3022 = vadd.xlane.f32.xlu0 %v1189_v20  ;;  %v967_v20 = vunpack.c.l.bf16 %v903_v11 }
  0xe2   :  { %v1176_v28 = vadd.f32 %v1112_v17, %v984_v16 }
  0xe3   :  { %v1159_v33 = vadd.f32 %v1095_v21, %v967_v20 }
  0xe4   :  { %2742 = vadd.xlane.f32.xlu1 %v665_v26 }
  0xe5   :  { %2708 = vadd.xlane.f32.xlu0 %v648_v29  ;;  %v2979_v45 = vpop.xlane.xlu1 %2978  ;;  %v506_v29 = vunpack.c.l.bf16 %v442_v22  ;;  %v426_v22 = vld [vmem:[#allocation4 + $0x158] sm:$0xff]  }
  0xe6   :  { %v2723_v46 = vpop.xlane.xlu0 %2722  ;;  %v4738_v60 = vrot.slane %v2979_v45, %v6243_v47 }
  0xe7   :  { %v4106_v61 = vrot.slane %v2723_v46, %v6243_v47  ;;  %v698_v45 = vadd.f32 %v634_v31, %v506_v29 }
  0xe8   :  { %2802 = vadd.xlane.f32.xlu1 %v1175_v37  ;;  %v952_v37 = vld [vmem:[#allocation7 + $0x1c8] sm:$0xff]  }
  0xe9   :  { %2768 = vadd.xlane.f32.xlu0 %v1158_v39  ;;  %v2981_v56 = vpop.xlane.xlu1 %2980  ;;  %v1016_v46 = vunpack.c.l.bf16 %v952_v37  ;;  %v1144_v49 = vunpack.c.h.bf16 %v952_v37 }
  0xea   :  { %v2725_v57 = vpop.xlane.xlu0 %2724  ;;  %v4742_v62 = vrot.slane %v2981_v56, %v6246_v48  ;;  %v394_v56 = vld [vmem:[#allocation4 + $0x58] sm:$0xff]  }
  0xeb   :  { %v4110_v63 = vrot.slane %v2725_v57, %v6246_v48 }
  0xec   :  { %v4743_v4 = vsel %vm4003_vm0, %v4742_v62, %v4738_v60  ;;  %2998 = vadd.xlane.f32.xlu1 %v697_v53  ;;  %v681_v53 = vadd.f32 %v617_v36, %v489_v34  ;;  %v475_v62 = vunpack.c.l.bf16 %v411_v55  ;;  %v618_v34 = vunpack.c.h.bf16 %v426_v22  ;;  %v953_v36 = vld [vmem:[#allocation7 + $0x1d0] sm:$0xff]  }
  0xed   :  { %v4111_v5 = vsel %vm4003_vm0, %v4110_v63, %v4106_v61  ;;  %2964 = vadd.xlane.f32.xlu0 %v680_v54  ;;  %v2693_v9 = vpop.xlane.xlu1 %2692  ;;  %v1127_v54 = vunpack.c.h.bf16 %v935_v38  ;;  %v1208_v61 = vadd.f32 %v1144_v49, %v1016_v46  ;;  %v603_v63 = vunpack.c.h.bf16 %v411_v55 }
  0xee   :  { %v2691_v10 = vpop.xlane.xlu0 %2690  ;;  %v4002_v12 = vrot.slane %v2693_v9, %v6246_v48  ;;  %v1145_v46 = vunpack.c.h.bf16 %v953_v36 }
  0xef   :  { %v3997_v13 = vrot.slane %v2691_v10, %v6243_v47  ;;  %v1191_v3 = vadd.f32 %v1127_v54, %v999_v50  ;;  %v667_v17 = vadd.f32 %v603_v63, %v475_v62  ;;  %v395_v54 = vld [vmem:[#allocation4 + $0x60] sm:$0xff]  }
  0xf0   :  { %3058 = vadd.xlane.f32.xlu1 %v1207_v0  ;;  %v458_v0 = vunpack.c.l.bf16 %v394_v56  ;;  %v459_v62 = vunpack.c.l.bf16 %v395_v54 }
  0xf1   :  { %v4004_v18 = vsel %vm4003_vm0, %v4002_v12, %v3997_v13  ;;  %3024 = vadd.xlane.f32.xlu0 %v1190_v1  ;;  %v2947_v23 = vpop.xlane.xlu1 %2946  ;;  %v968_v13 = vunpack.c.l.bf16 %v904_v6 }
  0xf2   :  { %v2727_v24 = vpop.xlane.xlu0 %2726  ;;  %v4659_v41 = vrot.slane %v2947_v23, %v6243_v47 }
  0xf3   :  { %v4115_v26 = vrot.slane %v2727_v24, %v6258_v14 }
  0xf4   :  { %2744 = vadd.xlane.f32.xlu1 %v666_v15  ;;  %v1096_v15 = vunpack.c.h.bf16 %v904_v6 }
  0xf5   :  { %v4116_v32 = vsel %vm4010_vm1, %v4115_v26, %v4111_v5  ;;  %2710 = vadd.xlane.f32.xlu0 %v649_v19  ;;  %v2983_v39 = vpop.xlane.xlu1 %2982  ;;  %v921_v5 = vld [vmem:[#allocation7 + $0xd0] sm:$0xff]   ;;  %v443_v19 = vld [vmem:[#allocation4 + $0x1e0] sm:$0xff]  }
  0xf6   :  { %v2949_v40 = vpop.xlane.xlu0 %2948  ;;  %v4747_v42 = vrot.slane %v2983_v39, %v6258_v14  ;;  %v985_v11 = vunpack.c.l.bf16 %v921_v5  ;;  %v1113_v12 = vunpack.c.h.bf16 %v921_v5  ;;  %v1160_v27 = vadd.f32 %v1096_v15, %v968_v13  ;;  %v936_v39 = vld [vmem:[#allocation7 + $0x148] sm:$0xff]   ;;  %v922_v5 = vld [vmem:[#allocation7 + $0xd8] sm:$0xff]  }
  0xf7   :  { %v4663_v43 = vrot.slane %v2949_v40, %v6246_v48  ;;  %v635_v29 = vunpack.c.h.bf16 %v443_v19 }
  0xf8   :  { %v4748_v51 = vsel %vm4010_vm1, %v4747_v42, %v4743_v4  ;;  %2804 = vadd.xlane.f32.xlu1 %v1176_v28  ;;  %v586_v4 = vunpack.c.h.bf16 %v394_v56  ;;  %v1177_v26 = vadd.f32 %v1113_v12, %v985_v11  ;;  %v507_v28 = vunpack.c.l.bf16 %v443_v19  ;;  %v427_v19 = vld [vmem:[#allocation4 + $0x160] sm:$0xff]  }
  0xf9   :  { %v4664_v52 = vsel %vm4003_vm0, %v4663_v43, %v4659_v41  ;;  %2770 = vadd.xlane.f32.xlu0 %v1159_v33  ;;  %v2729_v57 = vpop.xlane.xlu1 %2728  ;;  %v490_v33 = vunpack.c.l.bf16 %v426_v22  ;;  %v6297_v42 = vsub.s32 %v4019_v25, %v6238_v35  ;;  %v986_v12 = vunpack.c.l.bf16 %v922_v5 }
  0xfa   :  { %v2695_v58 = vpop.xlane.xlu0 %2694  ;;  %v4120_v59 = vrot.slane %v2729_v57, %v6268_v44  ;;  %v699_v43 = vadd.f32 %v635_v29, %v507_v28 }
  0xfb   :  { %v4009_v60 = vrot.slane %v2695_v58, %v6258_v14  ;;  %7390 = vst [vmem:[#allocation23_spill] sm:$0xff] %v6297_v42  ;;  %v682_v50 = vadd.f32 %v618_v34, %v490_v33  ;;  %v619_v34 = vunpack.c.h.bf16 %v427_v19 }
  0xfc   :  { %v6275_v1 = vsel %vm4017_vm2, %v4120_v59, %v4116_v32  ;;  %3000 = vadd.xlane.f32.xlu1 %v698_v45  ;;  %v1017_v45 = vunpack.c.l.bf16 %v953_v36  ;;  %v954_v36 = vld [vmem:[#allocation7 + $0x1d8] sm:$0xff]  }
  0xfd   :  { %v6278_v2 = vsel %vm4010_vm1, %v4009_v60, %v4004_v18  ;;  %2966 = vadd.xlane.f32.xlu0 %v681_v53  ;;  %v2789_v7 = vpop.xlane.xlu1 %2788  ;;  %v650_v18 = vadd.f32 %v586_v4, %v458_v0  ;;  %v412_v53 = vld [vmem:[#allocation4 + $0xe8] sm:$0xff]   ;;  %v587_v4 = vunpack.c.h.bf16 %v395_v54 }
  0xfe   :  { %v2787_v8 = vpop.xlane.xlu0 %2786  ;;  %v4268_v9 = vrot.slane %v2789_v7, %v6246_v48  ;;  %v1209_v59 = vadd.f32 %v1145_v46, %v1017_v45  ;;  %v476_v60 = vunpack.c.l.bf16 %v412_v53  ;;  %v1018_v46 = vunpack.c.l.bf16 %v954_v36 }
  0xff   :  { %v4264_v10 = vrot.slane %v2787_v8, %v6243_v47  ;;  %v905_v8 = vld [vmem:[#allocation7 + $0x50] sm:$0xff]  }
 0x100   :  { %3060 = vadd.xlane.f32.xlu1 %v1208_v61  ;;  %v604_v61 = vunpack.c.h.bf16 %v412_v53  ;;  %v969_v15 = vunpack.c.l.bf16 %v905_v8 }
 0x101   :  { %v6283_v16 = vsel %vm4003_vm0, %v4268_v9, %v4264_v10  ;;  %3026 = vadd.xlane.f32.xlu0 %v1191_v3  ;;  %v2985_v20 = vpop.xlane.xlu1 %2984 }
 0x102   :  { %v2951_v21 = vpop.xlane.xlu0 %2950  ;;  %v4752_v23 = vrot.slane %v2985_v20, %v6268_v44  ;;  %v668_v11 = vadd.f32 %v604_v61, %v476_v60  ;;  %v3255_v60 = vld [vmem:[#allocation12 + $0x1a8] sm:$0xff] }
 0x103   :  { %v4668_v24 = vrot.slane %v2951_v21, %v6258_v14 }
 0x104   :  { %v6289_v31 = vsel %vm4017_vm2, %v4752_v23, %v4748_v51  ;;  %2746 = vadd.xlane.f32.xlu1 %v667_v17  ;;  %v1000_v51 = vunpack.c.l.bf16 %v936_v39  ;;  %v1097_v17 = vunpack.c.h.bf16 %v905_v8 }
 0x105   :  { %v6292_v32 = vsel %vm4010_vm1, %v4668_v24, %v4664_v52  ;;  %2712 = vadd.xlane.f32.xlu0 %v650_v18  ;;  %v3045_v37 = vpop.xlane.xlu1 %3044  ;;  %v1128_v52 = vunpack.c.h.bf16 %v936_v39  ;;  %v444_v18 = vld [vmem:[#allocation4 + $0x1e8] sm:$0xff]   ;;  %v937_v39 = vld [vmem:[#allocation7 + $0x150] sm:$0xff]  }
 0x106   :  { %v3043_v38 = vpop.xlane.xlu0 %3042  ;;  %v4900_v40 = vrot.slane %v3045_v37, %v6246_v48  ;;  %v508_v25 = vunpack.c.l.bf16 %v444_v18  ;;  %v1161_v33 = vadd.f32 %v1097_v17, %v969_v15  ;;  %v1001_v53 = vunpack.c.l.bf16 %v937_v39  ;;  %v906_v15 = vld [vmem:[#allocation7 + $0x58] sm:$0xff]   ;;  %v3250_v17 = vld [vmem:[#allocation12 + $0x180] sm:$0xff] }
 0x107   :  { %v4896_v41 = vrot.slane %v3043_v38, %v6243_v47  ;;  %v1192_v3 = vadd.f32 %v1128_v52, %v1000_v51  ;;  %v1129_v54 = vunpack.c.h.bf16 %v937_v39 }
 0x108   :  { %2806 = vadd.xlane.f32.xlu1 %v1177_v26  ;;  %v636_v26 = vunpack.c.h.bf16 %v444_v18 }
 0x109   :  { %v6300_v49 = vsel %vm4003_vm0, %v4900_v40, %v4896_v41  ;;  %2772 = vadd.xlane.f32.xlu0 %v1160_v27  ;;  %v2731_v55 = vpop.xlane.xlu1 %2730  ;;  %v491_v27 = vunpack.c.l.bf16 %v427_v19  ;;  %v3263_v40 = vld [vmem:[#allocation12 + $0x1e8] sm:$0xff] }
 0x10a   :  { %v2697_v56 = vpop.xlane.xlu0 %2696  ;;  %v4125_v57 = vrot.slane %v2731_v55, %v6297_v42  ;;  %5305 = vmatprep.subr.mxu0 %v3263_v40  ;;  %v700_v45 = vadd.f32 %v636_v26, %v508_v25  ;;  %v413_v55 = vld [vmem:[#allocation4 + $0xf0] sm:$0xff]   ;;  %v970_v25 = vunpack.c.l.bf16 %v906_v15  ;;  %v1098_v26 = vunpack.c.h.bf16 %v906_v15 }
 0x10b   :  { %v4016_v58 = vrot.slane %v2697_v56, %v6268_v44  ;;  %v683_v52 = vadd.f32 %v619_v34, %v491_v27  ;;  %v396_v56 = vld [vmem:[#allocation4 + $0x68] sm:$0xff]   ;;  %v445_v27 = vld [vmem:[#allocation4 + $0x1f0] sm:$0xff]  }
 0x10c   :  { %v6306_v63 = vsel %vm4024_vm3, %v4125_v57, %v6275_v1  ;;  %3002 = vadd.xlane.f32.xlu1 %v699_v43  ;;  %v1114_v1 = vunpack.c.h.bf16 %v922_v5  ;;  %v4026_v43 = vadd.s32 4294967256, %v6236_v30  ;;  %v3258_v57 = vld [vmem:[#allocation12 + $0x1c0] sm:$0xff]  ;;  %v460_v8 = vunpack.c.l.bf16 %v396_v56 }
 0x10d   :  { %v6310_v0 = vsel %vm4017_vm2, %v4016_v58, %v6278_v2  ;;  %2968 = vadd.xlane.f32.xlu0 %v682_v50  ;;  %v2757_v6 = vpop.xlane.xlu1 %2756  ;;  %v651_v2 = vadd.f32 %v587_v4, %v459_v62  ;;  %v1146_v50 = vunpack.c.h.bf16 %v954_v36  ;;  %v3254_v4 = vld [vmem:[#allocation12 + $0x1a0] sm:$0xff] }
 0x10e   :  { %v2755_v7 = vpop.xlane.xlu0 %2754  ;;  %v4189_v9 = vrot.slane %v2757_v6, %v6246_v48  ;;  %v1178_v24 = vadd.f32 %v1114_v1, %v986_v12  ;;  %v477_v6 = vunpack.c.l.bf16 %v413_v55  ;;  %v1193_v1 = vadd.f32 %v1129_v54, %v1001_v53 }
 0x10f   :  { %v4185_v10 = vrot.slane %v2755_v7, %v6243_v47  ;;  %v1210_v5 = vadd.f32 %v1146_v50, %v1018_v46  ;;  %v605_v7 = vunpack.c.h.bf16 %v413_v55  ;;  %v637_v46 = vunpack.c.h.bf16 %v445_v27 }
 0x110   :  { %3062 = vadd.xlane.f32.xlu1 %v1209_v59 }
 0x111   :  { %v6315_v13 = vsel %vm4003_vm0, %v4189_v9, %v4185_v10  ;;  %3028 = vadd.xlane.f32.xlu0 %v1192_v3  ;;  %v2953_v20 = vpop.xlane.xlu1 %2952  ;;  %v923_v9 = vld [vmem:[#allocation7 + $0xe0] sm:$0xff]   ;;  %v3251_v10 = vld [vmem:[#allocation12 + $0x188] sm:$0xff] }
 0x112   :  { %v2791_v21 = vpop.xlane.xlu0 %2790  ;;  %v4673_v22 = vrot.slane %v2953_v20, %v6268_v44 }
 0x113   :  { %v4273_v23 = vrot.slane %v2791_v21, %v6258_v14 }
 0x114   :  { %v6321_v28 = vsel %vm4017_vm2, %v4673_v22, %v6292_v32  ;;  %2748 = vadd.xlane.f32.xlu1 %v668_v11  ;;  %v3262_v32 = vld [vmem:[#allocation12 + $0x1e0] sm:$0xff]  ;;  %v987_v22 = vunpack.c.l.bf16 %v923_v9 }
 0x115   :  { %v6325_v29 = vsel %vm4010_vm1, %v4273_v23, %v6283_v16  ;;  %2714 = vadd.xlane.f32.xlu0 %v651_v2  ;;  %v3011_v37 = vpop.xlane.xlu1 %3010  ;;  %5306 = vmatpush1.msra.mxu0 %v3262_v32  ;;  %v3259_v16 = vld [vmem:[#allocation12 + $0x1c8] sm:$0xff]  ;;  %v588_v2 = vunpack.c.h.bf16 %v396_v56  ;;  %v669_v23 = vadd.f32 %v605_v7, %v477_v6  ;;  %v955_v56 = vld [vmem:[#allocation7 + $0x1e0] sm:$0xff]  }
 0x116   :  { %v2987_v38 = vpop.xlane.xlu0 %2986  ;;  %5307 = vmatprep.subr.mxu0 %v3259_v16  ;;  %v4817_v61 = vrot.slane %v3011_v37, %v6243_v47  ;;  %v1162_v16 = vadd.f32 %v1098_v26, %v970_v25  ;;  %v1019_v6 = vunpack.c.l.bf16 %v955_v56  ;;  %v1147_v7 = vunpack.c.h.bf16 %v955_v56 }
 0x117   :  { %v4757_v41 = vrot.slane %v2987_v38, %v6297_v42  ;;  %5308 = vmatpush1.msra.mxu0 %v3258_v57  ;;  %v652_v37 = vadd.f32 %v588_v2, %v460_v8  ;;  %v3243_v38 = vld [vmem:[#allocation12 + $0x148] sm:$0xff]  ;;  %v938_v57 = vld [vmem:[#allocation7 + $0x158] sm:$0xff]  }
 0x118   :  { %2808 = vadd.xlane.f32.xlu1 %v1178_v24  ;;  %5309 = vmatprep.subr.mxu0 %v3255_v60  ;;  %v1115_v24 = vunpack.c.h.bf16 %v923_v9  ;;  %v1002_v8 = vunpack.c.l.bf16 %v938_v57  ;;  %v1130_v9 = vunpack.c.h.bf16 %v938_v57  ;;  %v3387_v2 = vld [vmem:[#allocation12 + $0x5c8] sm:$0xff] }
 0x119   :  { %v6331_v51 = vsel %vm4024_vm3, %v4757_v41, %v6289_v31  ;;  %2774 = vadd.xlane.f32.xlu0 %v1161_v33  ;;  %v3047_v58 = vpop.xlane.xlu1 %3046  ;;  %v6337_v31 = vsub.s32 %v4026_v43, %v6238_v35  ;;  %5310 = vmatpush1.msra.mxu0 %v3254_v4  ;;  %v3246_v33 = vld [vmem:[#allocation12 + $0x160] sm:$0xff]  ;;  %v428_v41 = vld [vmem:[#allocation4 + $0x168] sm:$0xff]  }
 0x11a   :  { %v3013_v59 = vpop.xlane.xlu0 %3012  ;;  %v4905_v62 = vrot.slane %v3047_v58, %v6258_v14  ;;  %5311 = vmatprep.subr.mxu0 %v3251_v10  ;;  %v1179_v50 = vadd.f32 %v1115_v24, %v987_v22  ;;  %v492_v54 = vunpack.c.l.bf16 %v428_v41  ;;  %v620_v55 = vunpack.c.h.bf16 %v428_v41  ;;  %v3238_v58 = vld [vmem:[#allocation12 + $0x120] sm:$0xff]  ;;  %v414_v10 = vld [vmem:[#allocation4 + $0xf8] sm:$0xff]   ;;  %v3383_v24 = vld [vmem:[#allocation12 + $0x5a8] sm:$0xff] }
 0x11b   :  { %v4821_v3 = vrot.slane %v3013_v59, %v6246_v48  ;;  %7391 = vst [vmem:[#allocation24_spill] sm:$0xff] %v6337_v31  ;;  %5312 = vmatpush1.msra.mxu0 %v3250_v17  ;;  %v606_v26 = vunpack.c.h.bf16 %v414_v10  ;;  %v3379_v41 = vld [vmem:[#allocation12 + $0x588] sm:$0xff] }
 0x11c   :  { %v6341_v11 = vsel %vm4010_vm1, %v4905_v62, %v6300_v49  ;;  %3004 = vadd.xlane.f32.xlu1 %v700_v45  ;;  %v3247_v49 = vld [vmem:[#allocation12 + $0x168] sm:$0xff]  ;;  %v509_v45 = vunpack.c.l.bf16 %v445_v27  ;;  %v3230_v27 = vld [vmem:[#allocation12 + $0xe0] sm:$0xff] }
 0x11d   :  { %v6344_v12 = vsel %vm4003_vm0, %v4821_v3, %v4817_v61  ;;  %2970 = vadd.xlane.f32.xlu0 %v683_v52  ;;  %v2733_v18 = vpop.xlane.xlu1 %2732  ;;  %5313 = vmatprep.subr.mxu0 %v3247_v49  ;;  %v4033_v61 = vadd.s32 4294967248, %v6236_v30  ;;  %v3391_v62 = vld [vmem:[#allocation12 + $0x5e8] sm:$0xff] }
 0x11e   :  { %v2699_v19 = vpop.xlane.xlu0 %2698  ;;  %v4130_v20 = vrot.slane %v2733_v18, %v6337_v31  ;;  %5314 = vmatpush1.msra.mxu0 %v3246_v33  ;;  %v701_v4 = vadd.f32 %v637_v46, %v509_v45  ;;  %5376 = vmatprep.subr.mxu1 %v3391_v62  ;;  %v684_v18 = vadd.f32 %v620_v55, %v492_v54  ;;  %v3382_v33 = vld [vmem:[#allocation12 + $0x5a0] sm:$0xff]  ;;  %v3375_v57 = vld [vmem:[#allocation12 + $0x568] sm:$0xff]  ;;  %v446_v62 = vld [vmem:[#allocation4 + $0x1f8] sm:$0xff]  }
 0x11f   :  { %v4023_v21 = vrot.slane %v2699_v19, %v6297_v42  ;;  %5315 = vmatprep.subr.mxu0 %v3243_v38  ;;  %v3231_v19 = vld [vmem:[#allocation12 + $0xe8] sm:$0xff]  ;;  %v6378_v49 = vsub.s32 %v4033_v61, %v6238_v35  ;;  %v1194_v38 = vadd.f32 %v1130_v9, %v1002_v8 }
 0x120   :  { %v6350_v34 = vsel %vm4031_vm4, %v4130_v20, %v6306_v63  ;;  %3064 = vadd.xlane.f32.xlu1 %v1210_v5  ;;  %v3242_v63 = vld [vmem:[#allocation12 + $0x140] sm:$0xff] }
 0x121   :  { %v6354_v36 = vsel %vm4024_vm3, %v4023_v21, %v6310_v0  ;;  %3030 = vadd.xlane.f32.xlu0 %v1193_v1  ;;  %v2793_v39 = vpop.xlane.xlu1 %2792  ;;  %v3239_v0 = vld [vmem:[#allocation12 + $0x128] sm:$0xff]  ;;  %5316 = vmatpush1.msra.mxu0 %v3242_v63  ;;  %v3390_v5 = vld [vmem:[#allocation12 + $0x5e0] sm:$0xff]  ;;  %7392 = vst [vmem:[#allocation25_spill] sm:$0xff] %v6378_v49 }
 0x122   :  { %v2759_v40 = vpop.xlane.xlu0 %2758  ;;  %v4278_v43 = vrot.slane %v2793_v39, %v6268_v44  ;;  %5317 = vmatprep.subr.mxu0 %v3239_v0  ;;  %v3234_v1 = vld [vmem:[#allocation12 + $0x100] sm:$0xff]  ;;  %5377 = vmatpush1.msra.mxu1 %v3390_v5  ;;  %v924_v39 = vld [vmem:[#allocation7 + $0xe8] sm:$0xff]  }
 0x123   :  { %v4194_v32 = vrot.slane %v2759_v40, %v6258_v14  ;;  %5318 = vmatpush1.msra.mxu0 %v3238_v58  ;;  %v3386_v20 = vld [vmem:[#allocation12 + $0x5c0] sm:$0xff]  ;;  %5378 = vmatprep.subr.mxu1 %v3387_v2  ;;  %v3227_v40 = vld [vmem:[#allocation12 + $0xc8] sm:$0xff]  ;;  %v988_v58 = vunpack.c.l.bf16 %v924_v39 }
 0x124   :  { %v6360_v52 = vsel %vm4017_vm2, %v4278_v43, %v6325_v29  ;;  %2750 = vadd.xlane.f32.xlu1 %v669_v23  ;;  %v397_v23 = vld [vmem:[#allocation4 + $0x70] sm:$0xff]   ;;  %5379 = vmatpush1.msra.mxu1 %v3386_v20  ;;  %v907_v63 = vld [vmem:[#allocation7 + $0x60] sm:$0xff]  }
 0x125   :  { %v6364_v53 = vsel %vm4010_vm1, %v4194_v32, %v6315_v13  ;;  %2716 = vadd.xlane.f32.xlu0 %v652_v37  ;;  %v2989_v59 = vpop.xlane.xlu1 %2988  ;;  %v3235_v13 = vld [vmem:[#allocation12 + $0x108] sm:$0xff]  ;;  %v1211_v37 = vadd.f32 %v1147_v7, %v1019_v6  ;;  %5380 = vmatprep.subr.mxu1 %v3383_v24  ;;  %v461_v45 = vunpack.c.l.bf16 %v397_v23  ;;  %v589_v46 = vunpack.c.h.bf16 %v397_v23 }
 0x126   :  { %v2955_v60 = vpop.xlane.xlu0 %2954  ;;  %v4762_v29 = vrot.slane %v2989_v59, %v6337_v31  ;;  %5319 = vmatprep.subr.mxu0 %v3235_v13  ;;  %5381 = vmatpush1.msra.mxu1 %v3382_v33  ;;  %v1116_v59 = vunpack.c.h.bf16 %v924_v39  ;;  %v1099_v61 = vunpack.c.h.bf16 %v907_v63  ;;  %v3219_v6 = vld [vmem:[#allocation12 + $0x88] sm:$0xff]  ;;  %v3214_v33 = vld [vmem:[#allocation12 + $0x60] sm:$0xff] }
 0x127   :  { %v4678_v3 = vrot.slane %v2955_v60, %v6297_v42  ;;  %5320 = vmatpush1.msra.mxu0 %v3234_v1  ;;  %5382 = vmatprep.subr.mxu1 %v3379_v41  ;;  %v971_v60 = vunpack.c.l.bf16 %v907_v63  ;;  %v653_v5 = vadd.f32 %v589_v46, %v461_v45  ;;  %v3371_v7 = vld [vmem:[#allocation12 + $0x548] sm:$0xff] }
 0x128   :  { %v6371_v15 = vsel %vm4031_vm4, %v4762_v29, %v6331_v51  ;;  %2810 = vadd.xlane.f32.xlu1 %v1179_v50  ;;  %5321 = vmatprep.subr.mxu0 %v3231_v19  ;;  %v3226_v50 = vld [vmem:[#allocation12 + $0xc0] sm:$0xff]  ;;  %v1180_v20 = vadd.f32 %v1116_v59, %v988_v58  ;;  %v3215_v23 = vld [vmem:[#allocation12 + $0x68] sm:$0xff] }
 0x129   :  { %v6375_v17 = vsel %vm4024_vm3, %v4678_v3, %v6321_v28  ;;  %2776 = vadd.xlane.f32.xlu0 %v1162_v16  ;;  %v3049_v21 = vpop.xlane.xlu1 %3048  ;;  %v478_v28 = vunpack.c.l.bf16 %v414_v10  ;;  %v3378_v16 = vld [vmem:[#allocation12 + $0x580] sm:$0xff]  ;;  %5322 = vmatpush1.msra.mxu0 %v3230_v27  ;;  %v429_v10 = vld [vmem:[#allocation4 + $0x170] sm:$0xff]   ;;  %v3367_v24 = vld [vmem:[#allocation12 + $0x528] sm:$0xff] }
 0x12a   :  { %v3015_v22 = vpop.xlane.xlu0 %3014  ;;  %v4910_v51 = vrot.slane %v3049_v21, %v6268_v44  ;;  %5323 = vmatprep.subr.mxu0 %v3227_v40  ;;  %v3222_v29 = vld [vmem:[#allocation12 + $0xa0] sm:$0xff]  ;;  %5383 = vmatpush1.msra.mxu1 %v3378_v16  ;;  %v1163_v21 = vadd.f32 %v1099_v61, %v971_v60  ;;  %v4040_v40 = vadd.s32 4294967240, %v6236_v30  ;;  %v3363_v46 = vld [vmem:[#allocation12 + $0x508] sm:$0xff] }
 0x12b   :  { %v4826_v25 = vrot.slane %v3015_v22, %v6258_v14  ;;  %v670_v56 = vadd.f32 %v606_v26, %v478_v28  ;;  %5324 = vmatpush1.msra.mxu0 %v3226_v50  ;;  %v3374_v3 = vld [vmem:[#allocation12 + $0x560] sm:$0xff]  ;;  %5384 = vmatprep.subr.mxu1 %v3375_v57  ;;  %v956_v22 = vld [vmem:[#allocation7 + $0x1e8] sm:$0xff]   ;;  %v493_v28 = vunpack.c.l.bf16 %v429_v10  ;;  %v621_v26 = vunpack.c.h.bf16 %v429_v10  ;;  %v430_v10 = vld [vmem:[#allocation4 + $0x178] sm:$0xff]  }
 0x12c   :  { %v6384_v43 = vsel %vm4017_vm2, %v4910_v51, %v6341_v11  ;;  %3006 = vadd.xlane.f32.xlu1 %v701_v4  ;;  %v3218_v19 = vld [vmem:[#allocation12 + $0x80] sm:$0xff]  ;;  %5385 = vmatpush1.msra.mxu1 %v3374_v3  ;;  %v1020_v63 = vunpack.c.l.bf16 %v956_v22  ;;  %v1148_v50 = vunpack.c.h.bf16 %v956_v22  ;;  %v3207_v58 = vld [vmem:[#allocation12 + $0x28] sm:$0xff] }
 0x12d   :  { %v6388_v32 = vsel %vm4010_vm1, %v4826_v25, %v6344_v12  ;;  %2972 = vadd.xlane.f32.xlu0 %v684_v18  ;;  %v2735_v0 = vpop.xlane.xlu1 %2734  ;;  %v3223_v12 = vld [vmem:[#allocation12 + $0xa8] sm:$0xff]  ;;  %v638_v18 = vunpack.c.h.bf16 %v446_v62  ;;  %5386 = vmatprep.subr.mxu1 %v3371_v7  ;;  %v939_v27 = vld [vmem:[#allocation7 + $0x160] sm:$0xff]   ;;  %v685_v57 = vadd.f32 %v621_v26, %v493_v28 }
 0x12e   :  { %v2701_v54 = vpop.xlane.xlu0 %2700  ;;  %v4135_v55 = vrot.slane %v2735_v0, %v6378_v49  ;;  %5325 = vmatprep.subr.mxu0 %v3223_v12  ;;  %v1003_v16 = vunpack.c.l.bf16 %v939_v27  ;;  %v1131_v0 = vunpack.c.h.bf16 %v939_v27  ;;  %v3359_v59 = vld [vmem:[#allocation12 + $0x4e8] sm:$0xff]  ;;  %v3358_v7 = vld [vmem:[#allocation12 + $0x4e0] sm:$0xff] }
 0x12f   :  { %v4030_v11 = vrot.slane %v2701_v54, %v6337_v31  ;;  %5326 = vmatpush1.msra.mxu0 %v3222_v29  ;;  %v908_v54 = vld [vmem:[#allocation7 + $0x68] sm:$0xff]   ;;  %v398_v29 = vld [vmem:[#allocation4 + $0x78] sm:$0xff]   ;;  %v3354_v22 = vld [vmem:[#allocation12 + $0x4c0] sm:$0xff] }
 0x130   :  { %v6394_v4 = vsel %vm4038_vm5, %v4135_v55, %v6350_v34  ;;  %3066 = vadd.xlane.f32.xlu1 %v1211_v37  ;;  %v510_v34 = vunpack.c.l.bf16 %v446_v62  ;;  %5327 = vmatprep.subr.mxu0 %v3219_v6  ;;  %v3366_v37 = vld [vmem:[#allocation12 + $0x520] sm:$0xff]  ;;  %v6422_v62 = vsub.s32 %v4040_v40, %v6238_v35  ;;  %v3351_v27 = vld [vmem:[#allocation12 + $0x4a8] sm:$0xff]  ;;  %v957_v40 = vld [vmem:[#allocation7 + $0x1f0] sm:$0xff]  }
 0x131   :  { %v6398_v13 = vsel %vm4031_vm4, %v4030_v11, %v6354_v36  ;;  %3032 = vadd.xlane.f32.xlu0 %v1194_v38  ;;  %v2795_v8 = vpop.xlane.xlu1 %2794  ;;  %v3370_v36 = vld [vmem:[#allocation12 + $0x540] sm:$0xff]  ;;  %5328 = vmatpush1.msra.mxu0 %v3218_v19  ;;  %v462_v19 = vunpack.c.l.bf16 %v398_v29 }
 0x132   :  { %v2761_v9 = vpop.xlane.xlu0 %2760  ;;  %v4283_v1 = vrot.slane %v2795_v8, %v6297_v42  ;;  %5387 = vmatpush1.msra.mxu1 %v3370_v36  ;;  %v702_v45 = vadd.f32 %v638_v18, %v510_v34  ;;  %5329 = vmatprep.subr.mxu0 %v3215_v23  ;;  %v3210_v55 = vld [vmem:[#allocation12 + $0x40] sm:$0xff]  ;;  %7393 = vst [vmem:[#allocation26_spill] sm:$0xff] %v6422_v62  ;;  %v590_v36 = vunpack.c.h.bf16 %v398_v29  ;;  %v3319_v29 = vld [vmem:[#allocation12 + $0x3a8] sm:$0xff] }
 0x133   :  { %v4199_v2 = vrot.slane %v2761_v9, %v6268_v44  ;;  %5388 = vmatprep.subr.mxu1 %v3367_v24  ;;  %5330 = vmatpush1.msra.mxu0 %v3214_v33  ;;  %v3362_v11 = vld [vmem:[#allocation12 + $0x500] sm:$0xff]  ;;  %v1212_v8 = vadd.f32 %v1148_v50, %v1020_v63  ;;  %v1195_v9 = vadd.f32 %v1131_v0, %v1003_v16  ;;  %v494_v33 = vunpack.c.l.bf16 %v430_v10  ;;  %v3323_v63 = vld [vmem:[#allocation12 + $0x3c8] sm:$0xff] }
 0x134   :  { %v6404_v51 = vsel %vm4024_vm3, %v4283_v1, %v6360_v52  ;;  %2752 = vadd.xlane.f32.xlu1 %v670_v56  ;;  %5389 = vmatpush1.msra.mxu1 %v3366_v37  ;;  %v3206_v6 = vld [vmem:[#allocation12 + $0x20] sm:$0xff]  ;;  %v3203_v1 = vld [vmem:[#allocation12 + $0x8] sm:$0xff]  ;;  %v622_v37 = vunpack.c.h.bf16 %v430_v10 }
 0x135   :  { %v6408_v25 = vsel %vm4017_vm2, %v4199_v2, %v6364_v53  ;;  %2718 = vadd.xlane.f32.xlu0 %v653_v5  ;;  %v2991_v38 = vpop.xlane.xlu1 %2990  ;;  %v3211_v53 = vld [vmem:[#allocation12 + $0x48] sm:$0xff]  ;;  %5390 = vmatprep.subr.mxu1 %v3363_v46  ;;  %v972_v5 = vunpack.c.l.bf16 %v908_v54  ;;  %v654_v46 = vadd.f32 %v590_v36, %v462_v19 }
 0x136   :  { %v2957_v39 = vpop.xlane.xlu0 %2956  ;;  %v4767_v52 = vrot.slane %v2991_v38, %v6378_v49  ;;  %5331 = vmatprep.subr.mxu0 %v3211_v53  ;;  %5391 = vmatpush1.msra.mxu1 %v3362_v11  ;;  %v3355_v2 = vld [vmem:[#allocation12 + $0x4c8] sm:$0xff] }
 0x137   :  { %v4683_v41 = vrot.slane %v2957_v39, %v6337_v31  ;;  %5332 = vmatpush1.msra.mxu0 %v3210_v55  ;;  %5392 = vmatprep.subr.mxu1 %v3359_v59  ;;  %v3347_v50 = vld [vmem:[#allocation12 + $0x488] sm:$0xff]  ;;  %v686_v59 = vadd.f32 %v622_v37, %v494_v33 }
 0x138   :  { %v6415_v56 = vsel %vm4038_vm5, %v4767_v52, %v6371_v15  ;;  %2812 = vadd.xlane.f32.xlu1 %v1180_v20  ;;  %5333 = vmatprep.subr.mxu0 %v3207_v58  ;;  %v925_v20 = vld [vmem:[#allocation7 + $0xf0] sm:$0xff]   ;;  %v3326_v52 = vld [vmem:[#allocation12 + $0x3e0] sm:$0xff]  ;;  %v3311_v37 = vld [vmem:[#allocation12 + $0x368] sm:$0xff] }
 0x139   :  { %v6419_v12 = vsel %vm4031_vm4, %v4683_v41, %v6375_v17  ;;  %2778 = vadd.xlane.f32.xlu0 %v1163_v21  ;;  %v3051_v60 = vpop.xlane.xlu1 %3050  ;;  %v1100_v17 = vunpack.c.h.bf16 %v908_v54  ;;  %v3202_v21 = vld [vmem:[#allocation12] sm:$0xff]  ;;  %5334 = vmatpush1.msra.mxu0 %v3206_v6  ;;  %v989_v38 = vunpack.c.l.bf16 %v925_v20  ;;  %v1117_v39 = vunpack.c.h.bf16 %v925_v20  ;;  %v940_v54 = vld [vmem:[#allocation7 + $0x168] sm:$0xff]  }
 0x13a   :  { %v3017_v61 = vpop.xlane.xlu0 %3016  ;;  %v4915_v15 = vrot.slane %v3051_v60, %v6297_v42  ;;  %5393 = vmatpush1.msra.mxu1 %v3358_v7  ;;  %5335 = vmatprep.subr.mxu0 %v3203_v1  ;;  %v3350_v41 = vld [vmem:[#allocation12 + $0x4a0] sm:$0xff]  ;;  %v1132_v6 = vunpack.c.h.bf16 %v940_v54  ;;  %v909_v7 = vld [vmem:[#allocation7 + $0x70] sm:$0xff]   ;;  %v3339_v20 = vld [vmem:[#allocation12 + $0x448] sm:$0xff] }
 0x13b   :  { %v4831_v3 = vrot.slane %v3017_v61, %v6268_v44  ;;  %v1164_v26 = vadd.f32 %v1100_v17, %v972_v5  ;;  %5394 = vmatprep.subr.mxu1 %v3355_v2  ;;  %5336 = vmatpush1.msra.mxu0 %v3202_v21  ;;  %v3322_v58 = vld [vmem:[#allocation12 + $0x3c0] sm:$0xff]  ;;  %v1181_v60 = vadd.f32 %v1117_v39, %v989_v38  ;;  %v926_v61 = vld [vmem:[#allocation7 + $0xf8] sm:$0xff]   ;;  %v1004_v17 = vunpack.c.l.bf16 %v940_v54  ;;  %v3335_v38 = vld [vmem:[#allocation12 + $0x428] sm:$0xff] }
 0x13c   :  { %v6428_v34 = vsel %vm4024_vm3, %v4915_v15, %v6384_v43  ;;  %3008 = vadd.xlane.f32.xlu1 %v702_v45  ;;  %5395 = vmatpush1.msra.mxu1 %v3354_v22  ;;  %v3343_v15 = vld [vmem:[#allocation12 + $0x468] sm:$0xff]  ;;  %v4047_v2 = vadd.s32 4294967232, %v6236_v30  ;;  %v990_v21 = vunpack.c.l.bf16 %v926_v61  ;;  %v1118_v22 = vunpack.c.h.bf16 %v926_v61  ;;  %v3306_v61 = vld [vmem:[#allocation12 + $0x340] sm:$0xff] }
 0x13d   :  { %v6432_v18 = vsel %vm4017_vm2, %v4831_v3, %v6388_v32  ;;  %2974 = vadd.xlane.f32.xlu0 %v685_v57  ;;  %v2737_v23 = vpop.xlane.xlu1 %2736  ;;  %v3327_v32 = vld [vmem:[#allocation12 + $0x3e8] sm:$0xff]  ;;  %5396 = vmatprep.subr.mxu1 %v3351_v27  ;;  %v1149_v57 = vunpack.c.h.bf16 %v957_v40  ;;  %v1196_v33 = vadd.f32 %v1132_v6, %v1004_v17 }
 0x13e   :  { %v2703_v24 = vpop.xlane.xlu0 %2702  ;;  %v4140_v28 = vrot.slane %v2737_v23, %v6422_v62  ;;  %5337 = vmatprep.subr.mxu0 %v3327_v32  ;;  %5397 = vmatpush1.msra.mxu1 %v3350_v41  ;;  %v973_v23 = vunpack.c.l.bf16 %v909_v7  ;;  %v941_v41 = vld [vmem:[#allocation7 + $0x170] sm:$0xff]  }
 0x13f   :  { %v4037_v43 = vrot.slane %v2703_v24, %v6378_v49  ;;  %5338 = vmatpush2.msra.mxu0 %v3326_v52  ;;  %5398 = vmatprep.subr.mxu1 %v3347_v50  ;;  %v1101_v24 = vunpack.c.h.bf16 %v909_v7  ;;  %v6466_v52 = vsub.s32 %v4047_v2, %v6238_v35  ;;  %v3310_v50 = vld [vmem:[#allocation12 + $0x360] sm:$0xff] }
 0x140   :  { %v6438_v45 = vsel %vm4045_vm6, %v4140_v28, %v6394_v4  ;;  %3068 = vadd.xlane.f32.xlu1 %v1212_v8  ;;  %v1021_v4 = vunpack.c.l.bf16 %v957_v40  ;;  %5339 = vmatprep.subr.mxu0 %v3323_v63  ;;  %v3318_v8 = vld [vmem:[#allocation12 + $0x3a0] sm:$0xff]  ;;  %v958_v28 = vld [vmem:[#allocation7 + $0x1f8] sm:$0xff]  }
 0x141   :  { %v6442_v53 = vsel %vm4038_vm5, %v4037_v43, %v6398_v13  ;;  %3034 = vadd.xlane.f32.xlu0 %v1195_v9  ;;  %v2797_v16 = vpop.xlane.xlu1 %2796  ;;  %v3346_v13 = vld [vmem:[#allocation12 + $0x480] sm:$0xff]  ;;  %5340 = vmatpush2.msra.mxu0 %v3322_v58  ;;  %7394 = vst [vmem:[#allocation27_spill] sm:$0xff] %v6466_v52  ;;  %v1022_v63 = vunpack.c.l.bf16 %v958_v28  ;;  %v1165_v54 = vadd.f32 %v1101_v24, %v973_v23  ;;  %v3451_v23 = vld [vmem:[#allocation12 + $0x7c8] sm:$0xff] }
 0x142   :  { %v2763_v0 = vpop.xlane.xlu0 %2762  ;;  %v4288_v55 = vrot.slane %v2797_v16, %v6337_v31  ;;  %v3342_v9 = vld [vmem:[#allocation12 + $0x460] sm:$0xff]  ;;  %5399 = vmatpush1.msra.mxu1 %v3346_v13  ;;  %v1213_v36 = vadd.f32 %v1149_v57, %v1021_v4  ;;  %5341 = vmatprep.subr.mxu0 %v3319_v29  ;;  %v3331_v4 = vld [vmem:[#allocation12 + $0x408] sm:$0xff]  ;;  %v1005_v13 = vunpack.c.l.bf16 %v941_v41 }
 0x143   :  { %v4204_v11 = vrot.slane %v2763_v0, %v6297_v42  ;;  %5400 = vmatprep.subr.mxu1 %v3343_v15  ;;  %5342 = vmatpush2.msra.mxu0 %v3318_v8  ;;  %v3314_v43 = vld [vmem:[#allocation12 + $0x380] sm:$0xff]  ;;  %v1182_v0 = vadd.f32 %v1118_v22, %v990_v21  ;;  %v3455_v8 = vld [vmem:[#allocation12 + $0x7e8] sm:$0xff] }
 0x144   :  { %v6448_v3 = vsel %vm4031_vm4, %v4288_v55, %v6404_v51  ;;  %2780 = vadd.xlane.f32.xlu1 %v1164_v26  ;;  %5401 = vmatpush1.msra.mxu1 %v3342_v9  ;;  %v3338_v26 = vld [vmem:[#allocation12 + $0x440] sm:$0xff]  ;;  %v942_v55 = vld [vmem:[#allocation7 + $0x178] sm:$0xff]   ;;  %v3299_v22 = vld [vmem:[#allocation12 + $0x308] sm:$0xff] }
 0x145   :  { %v6452_v5 = vsel %vm4024_vm3, %v4204_v11, %v6408_v25  ;;  %2720 = vadd.xlane.f32.xlu0 %v654_v46  ;;  %v2993_v10 = vpop.xlane.xlu1 %2992  ;;  %v3315_v25 = vld [vmem:[#allocation12 + $0x388] sm:$0xff]  ;;  %5402 = vmatprep.subr.mxu1 %v3339_v20  ;;  %v3334_v16 = vld [vmem:[#allocation12 + $0x420] sm:$0xff]  ;;  %v1006_v9 = vunpack.c.l.bf16 %v942_v55 }
 0x146   :  { %v2959_v1 = vpop.xlane.xlu0 %2958  ;;  %v4772_v51 = vrot.slane %v2993_v10, %v6422_v62  ;;  %5343 = vmatprep.subr.mxu0 %v3315_v25  ;;  %5403 = vmatpush1.msra.mxu1 %v3338_v26  ;;  %v3307_v11 = vld [vmem:[#allocation12 + $0x348] sm:$0xff]  ;;  %v3330_v29 = vld [vmem:[#allocation12 + $0x400] sm:$0xff]  ;;  %v1134_v10 = vunpack.c.h.bf16 %v942_v55 }
 0x147   :  { %v4688_v19 = vrot.slane %v2959_v1, %v6378_v49  ;;  %5344 = vmatpush2.msra.mxu0 %v3314_v43  ;;  %5404 = vmatprep.subr.mxu1 %v3335_v38  ;;  %v1423_v43 = vld [vmem:[#allocation9 + $0x80] sm:$0xff]  }
 0x148   :  { %v6459_v32 = vsel %vm4045_vm6, %v4772_v51, %v6415_v56  ;;  %2976 = vadd.xlane.f32.xlu1 %v686_v59  ;;  %5345 = vmatprep.subr.mxu0 %v3311_v37  ;;  %v1133_v59 = vunpack.c.h.bf16 %v941_v41  ;;  %v1424_v51 = vld [vmem:[#allocation9 + $0x88] sm:$0xff]   ;;  %v3298_v38 = vld [vmem:[#allocation12 + $0x300] sm:$0xff] }
 0x149   :  { %v6463_v27 = vsel %vm4038_vm5, %v4688_v19, %v6419_v12  ;;  %2814 = vadd.xlane.f32.xlu0 %v1181_v60  ;;  %v3053_v39 = vpop.xlane.xlu1 %3052  ;;  %v1150_v12 = vunpack.c.h.bf16 %v958_v28  ;;  %v910_v60 = vld [vmem:[#allocation7 + $0x78] sm:$0xff]   ;;  %5346 = vmatpush2.msra.mxu0 %v3310_v50  ;;  %v3302_v19 = vld [vmem:[#allocation12 + $0x320] sm:$0xff]  ;;  %v1616_v37 = vunpack.c.h.bf16 %v1424_v51  ;;  %v1456_v41 = vld [vmem:[#allocation9 + $0x188] sm:$0xff]   ;;  %v1487_v50 = vunpack.c.l.bf16 %v1423_v43 }
 0x14a   :  { %v3019_v40 = vpop.xlane.xlu0 %3018  ;;  %v4920_v56 = vrot.slane %v3053_v39, %v6337_v31  ;;  %5405 = vmatpush1.msra.mxu1 %v3334_v16  ;;  %5347 = vmatprep.subr.mxu0 %v3307_v11  ;;  %v974_v1 = vunpack.c.l.bf16 %v910_v60  ;;  %v1102_v2 = vunpack.c.h.bf16 %v910_v60  ;;  %v1197_v21 = vadd.f32 %v1133_v59, %v1005_v13  ;;  %v3446_v55 = vld [vmem:[#allocation12 + $0x7a0] sm:$0xff] }
 0x14b   :  { %v4836_v46 = vrot.slane %v3019_v40, %v6297_v42  ;;  %v1214_v7 = vadd.f32 %v1150_v12, %v1022_v63  ;;  %5406 = vmatprep.subr.mxu1 %v3331_v4  ;;  %5348 = vmatpush2.msra.mxu0 %v3306_v61  ;;  %v1198_v39 = vadd.f32 %v1134_v10, %v1006_v9  ;;  %v1615_v16 = vunpack.c.h.bf16 %v1423_v43  ;;  %v3443_v61 = vld [vmem:[#allocation12 + $0x788] sm:$0xff] }
 0x14c   :  { %v6472_v57 = vsel %vm4031_vm4, %v4920_v56, %v6428_v34  ;;  %3070 = vadd.xlane.f32.xlu1 %v1213_v36  ;;  %5407 = vmatpush1.msra.mxu1 %v3330_v29  ;;  %v3454_v36 = vld [vmem:[#allocation12 + $0x7e0] sm:$0xff]  ;;  %v1166_v40 = vadd.f32 %v1102_v2, %v974_v1  ;;  %v3295_v56 = vld [vmem:[#allocation12 + $0x2e8] sm:$0xff]  ;;  %v4054_v13 = vadd.s32 4294967224, %v6236_v30  ;;  %v1520_v29 = vunpack.c.l.bf16 %v1456_v41 }
 0x14d   :  { %v6476_v58 = vsel %vm4024_vm3, %v4836_v46, %v6432_v18  ;;  %3036 = vadd.xlane.f32.xlu0 %v1196_v33  ;;  %v2739_v15 = vpop.xlane.xlu1 %2738  ;;  %v3303_v18 = vld [vmem:[#allocation12 + $0x328] sm:$0xff]  ;;  %5408 = vmatprep.subr.mxu1 %v3455_v8  ;;  %v1679_v10 = vadd.f32 %v1615_v16, %v1487_v50 }
 0x14e   :  { %v2705_v17 = vpop.xlane.xlu0 %2704  ;;  %v4145_v6 = vrot.slane %v2739_v15, %v6466_v52  ;;  %5349 = vmatprep.subr.mxu0 %v3303_v18  ;;  %5409 = vmatpush2.msra.mxu1 %v3454_v36  ;;  %v3447_v46 = vld [vmem:[#allocation12 + $0x7a8] sm:$0xff]  ;;  %v1648_v15 = vunpack.c.h.bf16 %v1456_v41  ;;  %v3442_v18 = vld [vmem:[#allocation12 + $0x780] sm:$0xff]  ;;  %v6510_v36 = vsub.s32 %v4054_v13, %v6238_v35  ;;  %v1425_v41 = vld [vmem:[#allocation9 + $0x90] sm:$0xff]  }
 0x14f   :  { %v4044_v34 = vrot.slane %v2705_v17, %v6422_v62  ;;  %5350 = vmatpush2.msra.mxu0 %v3302_v19  ;;  %5410 = vmatprep.subr.mxu1 %v3451_v23  ;;  %v3287_v1 = vld [vmem:[#allocation12 + $0x2a8] sm:$0xff]  ;;  %v1489_v13 = vunpack.c.l.bf16 %v1425_v41 }
 0x150   :  { %v6482_v25 = vsel %vm4052_vm7, %v4145_v6, %v6438_v45  ;;  %2816 = vadd.xlane.f32.xlu1 %v1182_v0  ;;  %v1488_v45 = vunpack.c.l.bf16 %v1424_v51  ;;  %5351 = vmatprep.subr.mxu0 %v3299_v22  ;;  %v1455_v0 = vld [vmem:[#allocation9 + $0x180] sm:$0xff]   ;;  %v3439_v2 = vld [vmem:[#allocation12 + $0x768] sm:$0xff]  ;;  %7395 = vst [vmem:[#allocation28_spill] sm:$0xff] %v6510_v36  ;;  %v1712_v43 = vadd.f32 %v1648_v15, %v1520_v29 }
 0x151   :  { %v6486_v20 = vsel %vm4045_vm6, %v4044_v34, %v6442_v53  ;;  %2782 = vadd.xlane.f32.xlu0 %v1165_v54  ;;  %v2799_v24 = vpop.xlane.xlu1 %2798  ;;  %v3450_v53 = vld [vmem:[#allocation12 + $0x7c0] sm:$0xff]  ;;  %5352 = vmatpush2.msra.mxu0 %v3298_v38  ;;  %v1519_v17 = vunpack.c.l.bf16 %v1455_v0  ;;  %v1647_v6 = vunpack.c.h.bf16 %v1455_v0  ;;  %v1408_v34 = vld [vmem:[#allocation9 + $0x8] sm:$0xff]  }
 0x152   :  { %v2765_v28 = vpop.xlane.xlu0 %2764  ;;  %v4293_v26 = vrot.slane %v2799_v24, %v6378_v49  ;;  %v3294_v54 = vld [vmem:[#allocation12 + $0x2e0] sm:$0xff]  ;;  %5411 = vmatpush2.msra.mxu1 %v3450_v53  ;;  %v1680_v60 = vadd.f32 %v1616_v37, %v1488_v45  ;;  %5353 = vmatprep.subr.mxu0 %v3295_v56  ;;  %v1472_v23 = vunpack.c.l.bf16 %v1408_v34  ;;  %v3283_v45 = vld [vmem:[#allocation12 + $0x288] sm:$0xff] }
 0x153   :  { %v4209_v33 = vrot.slane %v2765_v28, %v6337_v31  ;;  %5412 = vmatprep.subr.mxu1 %v3447_v46  ;;  %5354 = vmatpush2.msra.mxu0 %v3294_v54  ;;  %v3286_v24 = vld [vmem:[#allocation12 + $0x2a0] sm:$0xff]  ;;  %v3435_v37 = vld [vmem:[#allocation12 + $0x748] sm:$0xff] }
 0x154   :  { %v6492_v63 = vsel %vm4038_vm5, %v4293_v26, %v6448_v3  ;;  %3072 = vadd.xlane.f32.xlu1 %v1214_v7  ;;  %v3290_v7 = vld [vmem:[#allocation12 + $0x2c0] sm:$0xff]  ;;  %5413 = vmatpush2.msra.mxu1 %v3446_v55  ;;  %v1711_v26 = vadd.f32 %v1647_v6, %v1519_v17  ;;  %v3431_v55 = vld [vmem:[#allocation12 + $0x728] sm:$0xff] }
 0x155   :  { %v6496_v12 = vsel %vm4031_vm4, %v4209_v33, %v6452_v5  ;;  %3038 = vadd.xlane.f32.xlu0 %v1197_v21  ;;  %v2995_v11 = vpop.xlane.xlu1 %2994  ;;  %v3291_v5 = vld [vmem:[#allocation12 + $0x2c8] sm:$0xff]  ;;  %v1407_v21 = vld [vmem:[#allocation9] sm:$0xff]   ;;  %5414 = vmatprep.subr.mxu1 %v3443_v61 }
 0x156   :  { %v2961_v4 = vpop.xlane.xlu0 %2960  ;;  %v4777_v3 = vrot.slane %v2995_v11, %v6466_v52  ;;  %5355 = vmatprep.subr.mxu0 %v3291_v5  ;;  %5415 = vmatpush2.msra.mxu1 %v3442_v18  ;;  %v3438_v28 = vld [vmem:[#allocation12 + $0x760] sm:$0xff]  ;;  %v3275_v17 = vld [vmem:[#allocation12 + $0x248] sm:$0xff] }
 0x157   :  { %v4693_v59 = vrot.slane %v2961_v4, %v6422_v62  ;;  %5356 = vmatpush2.msra.mxu0 %v3290_v7  ;;  %v1439_v33 = vld [vmem:[#allocation9 + $0x100] sm:$0xff]   ;;  %5416 = vmatprep.subr.mxu1 %v3439_v2  ;;  %v3427_v6 = vld [vmem:[#allocation12 + $0x708] sm:$0xff] }
 0x158   :  { %v6503_v8 = vsel %vm4052_vm7, %v4777_v3, %v6459_v32  ;;  %3040 = vadd.xlane.f32.xlu1 %v1198_v39  ;;  %5357 = vmatprep.subr.mxu0 %v3287_v1  ;;  %v1471_v39 = vunpack.c.l.bf16 %v1407_v21  ;;  %v3282_v56 = vld [vmem:[#allocation12 + $0x280] sm:$0xff]  ;;  %v1503_v11 = vunpack.c.l.bf16 %v1439_v33  ;;  %v1631_v4 = vunpack.c.h.bf16 %v1439_v33  ;;  %v1440_v18 = vld [vmem:[#allocation9 + $0x108] sm:$0xff]  }
 0x159   :  { %v6507_v9 = vsel %vm4045_vm6, %v4693_v59, %v6463_v27  ;;  %2784 = vadd.xlane.f32.xlu0 %v1166_v40  ;;  %v3055_v51 = vpop.xlane.xlu1 %3054  ;;  %v1600_v27 = vunpack.c.h.bf16 %v1408_v34  ;;  %v1599_v40 = vunpack.c.h.bf16 %v1407_v21  ;;  %v3434_v46 = vld [vmem:[#allocation12 + $0x740] sm:$0xff]  ;;  %5358 = vmatpush2.msra.mxu0 %v3286_v24  ;;  %v1617_v3 = vunpack.c.h.bf16 %v1425_v41  ;;  %v1457_v59 = vld [vmem:[#allocation9 + $0x190] sm:$0xff]   ;;  %v1432_v42 = vld [vmem:[#allocation9 + $0xc8] sm:$0xff]  }
 0x15a   :  { %v3021_v19 = vpop.xlane.xlu0 %3020  ;;  %v4925_v32 = vrot.slane %v3055_v51, %v6378_v49  ;;  %5417 = vmatpush2.msra.mxu1 %v3438_v28  ;;  %5359 = vmatprep.subr.mxu0 %v3283_v45  ;;  %v3430_v5 = vld [vmem:[#allocation12 + $0x720] sm:$0xff]  ;;  %v1649_v2 = vunpack.c.h.bf16 %v1457_v59  ;;  %v1504_v28 = vunpack.c.l.bf16 %v1440_v18 }
 0x15b   :  { %v4841_v22 = vrot.slane %v3021_v19, %v6337_v31  ;;  %v1664_v54 = vadd.f32 %v1600_v27, %v1472_v23  ;;  %5418 = vmatprep.subr.mxu1 %v3435_v37  ;;  %5360 = vmatpush2.msra.mxu0 %v3282_v56  ;;  %v1663_v15 = vadd.f32 %v1599_v40, %v1471_v39  ;;  %v3274_v51 = vld [vmem:[#allocation12 + $0x240] sm:$0xff]  ;;  %v3423_v23 = vld [vmem:[#allocation12 + $0x6e8] sm:$0xff]  ;;  %v4061_v40 = vadd.s32 4294967216, %v6236_v30 }
 0x15c   :  { %v6516_v38 = vsel %vm4038_vm5, %v4925_v32, %v6472_v57  ;;  %2852 = vadd.xlane.f32.xlu1 %v1680_v60  ;;  %v3278_v60 = vld [vmem:[#allocation12 + $0x260] sm:$0xff]  ;;  %5419 = vmatpush2.msra.mxu1 %v3434_v46  ;;  %v1695_v19 = vadd.f32 %v1631_v4, %v1503_v11  ;;  %v1681_v21 = vadd.f32 %v1617_v3, %v1489_v13  ;;  %v1426_v32 = vld [vmem:[#allocation9 + $0x98] sm:$0xff]   ;;  %v3419_v46 = vld [vmem:[#allocation12 + $0x6c8] sm:$0xff] }
 0x15d   :  { %v6520_v53 = vsel %vm4031_vm4, %v4841_v22, %v6476_v58  ;;  %2850 = vadd.xlane.f32.xlu0 %v1679_v10  ;;  %v2741_v50 = vpop.xlane.xlu1 %2740  ;;  %v3279_v58 = vld [vmem:[#allocation12 + $0x268] sm:$0xff]  ;;  %5420 = vmatprep.subr.mxu1 %v3431_v55  ;;  %v3270_v33 = vld [vmem:[#allocation12 + $0x220] sm:$0xff] }
 0x15e   :  { %v2707_v16 = vpop.xlane.xlu0 %2706  ;;  %v4150_v0 = vrot.slane %v2741_v50, %v6510_v36  ;;  %5361 = vmatprep.subr.mxu0 %v3279_v58  ;;  %5421 = vmatpush2.msra.mxu1 %v3430_v5  ;;  %v3271_v22 = vld [vmem:[#allocation12 + $0x228] sm:$0xff]  ;;  %v3422_v45 = vld [vmem:[#allocation12 + $0x6e0] sm:$0xff]  ;;  %v1490_v50 = vunpack.c.l.bf16 %v1426_v32  ;;  %v6554_v5 = vsub.s32 %v4061_v40, %v6238_v35 }
 0x15f   :  { %v4051_v57 = vrot.slane %v2707_v16, %v6466_v52  ;;  %5362 = vmatpush2.msra.mxu0 %v3278_v60  ;;  %5422 = vmatprep.subr.mxu1 %v3427_v6  ;;  %v1618_v16 = vunpack.c.h.bf16 %v1426_v32  ;;  %v3266_v58 = vld [vmem:[#allocation12 + $0x200] sm:$0xff]  ;;  %v3415_v3 = vld [vmem:[#allocation12 + $0x6a8] sm:$0xff] }
 0x160   :  { %v6526_v61 = vsel %vm4059_vm8, %v4150_v0, %v6482_v25  ;;  %3108 = vadd.xlane.f32.xlu1 %v1712_v43  ;;  %v1521_v25 = vunpack.c.l.bf16 %v1457_v59  ;;  %5363 = vmatprep.subr.mxu0 %v3275_v17  ;;  %v1632_v43 = vunpack.c.h.bf16 %v1440_v18  ;;  %v3418_v55 = vld [vmem:[#allocation12 + $0x6c0] sm:$0xff] }
 0x161   :  { %v6530_v29 = vsel %vm4052_vm7, %v4051_v57, %v6486_v20  ;;  %3106 = vadd.xlane.f32.xlu0 %v1711_v26  ;;  %v2801_v34 = vpop.xlane.xlu1 %2800  ;;  %v3426_v20 = vld [vmem:[#allocation12 + $0x700] sm:$0xff]  ;;  %v1409_v26 = vld [vmem:[#allocation9 + $0x10] sm:$0xff]   ;;  %5364 = vmatpush2.msra.mxu0 %v3274_v51 }
 0x162   :  { %v2767_v7 = vpop.xlane.xlu0 %2766  ;;  %v4298_v10 = vrot.slane %v2801_v34, %v6422_v62  ;;  %5423 = vmatpush2.msra.mxu1 %v3426_v20  ;;  %v1713_v56 = vadd.f32 %v1649_v2, %v1521_v25  ;;  %5365 = vmatprep.subr.mxu0 %v3271_v22  ;;  %v1473_v0 = vunpack.c.l.bf16 %v1409_v26  ;;  %v1601_v57 = vunpack.c.h.bf16 %v1409_v26  ;;  %v1458_v20 = vld [vmem:[#allocation9 + $0x198] sm:$0xff]  }
 0x163   :  { %v4214_v1 = vrot.slane %v2767_v7, %v6378_v49  ;;  %5424 = vmatprep.subr.mxu1 %v3423_v23  ;;  %5366 = vmatpush2.msra.mxu0 %v3270_v33  ;;  %v1696_v13 = vadd.f32 %v1632_v43, %v1504_v28  ;;  %v1682_v7 = vadd.f32 %v1618_v16, %v1490_v50  ;;  %v3407_v43 = vld [vmem:[#allocation12 + $0x668] sm:$0xff]  ;;  %v1650_v26 = vunpack.c.h.bf16 %v1458_v20  ;;  %v1967_v50 = vld [vmem:[#allocation10 + $0x180] sm:$0xff]  }
 0x164   :  { %v6536_v27 = vsel %vm4045_vm6, %v4298_v10, %v6492_v63  ;;  %2820 = vadd.xlane.f32.xlu1 %v1664_v54  ;;  %v1936_v54 = vld [vmem:[#allocation10 + $0x88] sm:$0xff]   ;;  %5425 = vmatpush2.msra.mxu1 %v3422_v45  ;;  %v1665_v18 = vadd.f32 %v1601_v57, %v1473_v0 }
 0x165   :  { %v6540_v24 = vsel %vm4038_vm5, %v4214_v1, %v6496_v12  ;;  %2818 = vadd.xlane.f32.xlu0 %v1663_v15  ;;  %v2997_v37 = vpop.xlane.xlu1 %2996  ;;  %v3267_v12 = vld [vmem:[#allocation12 + $0x208] sm:$0xff]  ;;  %v1935_v15 = vld [vmem:[#allocation10 + $0x80] sm:$0xff]   ;;  %5426 = vmatprep.subr.mxu1 %v3419_v46  ;;  %v2000_v6 = vunpack.c.l.bf16 %v1936_v54  ;;  %v2128_v34 = vunpack.c.h.bf16 %v1936_v54 }
 0x166   :  { %v2963_v39 = vpop.xlane.xlu0 %2962  ;;  %v4782_v63 = vrot.slane %v2997_v37, %v6510_v36  ;;  %5367 = vmatprep.subr.mxu0 %v3267_v12  ;;  %5427 = vmatpush2.msra.mxu1 %v3418_v55  ;;  %v3411_v10 = vld [vmem:[#allocation12 + $0x688] sm:$0xff]  ;;  %v1999_v2 = vunpack.c.l.bf16 %v1935_v15  ;;  %v2127_v51 = vunpack.c.h.bf16 %v1935_v15  ;;  %v1427_v15 = vld [vmem:[#allocation9 + $0xa0] sm:$0xff]  }
 0x167   :  { %v4698_v41 = vrot.slane %v2963_v39, %v6466_v52  ;;  %5368 = vmatpush2.msra.mxu0 %v3266_v58  ;;  %5428 = vmatprep.subr.mxu1 %v3415_v3  ;;  %v2192_v28 = vadd.f32 %v2128_v34, %v2000_v6  ;;  %v1968_v37 = vld [vmem:[#allocation10 + $0x188] sm:$0xff]   ;;  %v3406_v39 = vld [vmem:[#allocation12 + $0x660] sm:$0xff] }
 0x168   :  { %v6547_v11 = vsel %vm4059_vm8, %v4782_v63, %v6503_v8  ;;  %3074 = vadd.xlane.f32.xlu1 %v1695_v19  ;;  %v1441_v19 = vld [vmem:[#allocation9 + $0x110] sm:$0xff]   ;;  %v2032_v57 = vunpack.c.l.bf16 %v1968_v37  ;;  %v2160_v54 = vunpack.c.h.bf16 %v1968_v37 }
 0x169   :  { %v6551_v4 = vsel %vm4052_vm7, %v4698_v41, %v6507_v9  ;;  %2854 = vadd.xlane.f32.xlu0 %v1681_v21  ;;  %v3057_v59 = vpop.xlane.xlu1 %3056  ;;  %v3414_v9 = vld [vmem:[#allocation12 + $0x6a0] sm:$0xff]  ;;  %v1505_v33 = vunpack.c.l.bf16 %v1441_v19  ;;  %v1633_v45 = vunpack.c.h.bf16 %v1441_v19  ;;  %v2191_v41 = vadd.f32 %v2127_v51, %v1999_v2  ;;  %v1920_v19 = vld [vmem:[#allocation10 + $0x8] sm:$0xff]  }
 0x16a   :  { %v3023_v60 = vpop.xlane.xlu0 %3022  ;;  %v4930_v17 = vrot.slane %v3057_v59, %v6422_v62  ;;  %v3410_v21 = vld [vmem:[#allocation12 + $0x680] sm:$0xff]  ;;  %5429 = vmatpush2.msra.mxu1 %v3414_v9  ;;  %v2031_v59 = vunpack.c.l.bf16 %v1967_v50  ;;  %v4068_v9 = vadd.s32 4294967208, %v6236_v30  ;;  %v1619_v2 = vunpack.c.h.bf16 %v1427_v15 }
 0x16b   :  { %v4846_v8 = vrot.slane %v3023_v60, %v6378_v49  ;;  %5430 = vmatprep.subr.mxu1 %v3411_v10  ;;  %v1697_v55 = vadd.f32 %v1633_v45, %v1505_v33  ;;  %v2159_v60 = vunpack.c.h.bf16 %v1967_v50  ;;  %v1491_v10 = vunpack.c.l.bf16 %v1427_v15  ;;  %v1937_v50 = vld [vmem:[#allocation10 + $0x90] sm:$0xff]   ;;  %v1951_v15 = vld [vmem:[#allocation10 + $0x100] sm:$0xff]  }
 0x16c   :  { %v6560_v1 = vsel %vm4045_vm6, %v4930_v17, %v6516_v38  ;;  %3110 = vadd.xlane.f32.xlu1 %v1713_v56  ;;  %5431 = vmatpush2.msra.mxu1 %v3410_v21  ;;  %v3403_v56 = vld [vmem:[#allocation12 + $0x648] sm:$0xff]  ;;  %v1410_v17 = vld [vmem:[#allocation9 + $0x18] sm:$0xff]   ;;  %v3394_v21 = vld [vmem:[#allocation12 + $0x600] sm:$0xff]  ;;  %v2112_v45 = vunpack.c.h.bf16 %v1920_v19 }
 0x16d   :  { %v6564_v25 = vsel %vm4038_vm5, %v4846_v8, %v6520_v53  ;;  %3076 = vadd.xlane.f32.xlu0 %v1696_v13  ;;  %v2743_v32 = vpop.xlane.xlu1 %2742  ;;  %v1522_v53 = vunpack.c.l.bf16 %v1458_v20  ;;  %5432 = vmatprep.subr.mxu1 %v3407_v43  ;;  %v3398_v8 = vld [vmem:[#allocation12 + $0x620] sm:$0xff]  ;;  %v1474_v51 = vunpack.c.l.bf16 %v1410_v17  ;;  %v1602_v20 = vunpack.c.h.bf16 %v1410_v17 }
 0x16e   :  { %v2709_v22 = vpop.xlane.xlu0 %2708  ;;  %v4155_v23 = vrot.slane %v2743_v32, %v6554_v5  ;;  %5433 = vmatpush2.msra.mxu1 %v3406_v39  ;;  %v6598_v43 = vsub.s32 %v4068_v9, %v6238_v35  ;;  %v1683_v37 = vadd.f32 %v1619_v2, %v1491_v10 }
 0x16f   :  { %v4058_v38 = vrot.slane %v2709_v22, %v6510_v36  ;;  %v1714_v58 = vadd.f32 %v1650_v26, %v1522_v53  ;;  %5434 = vmatprep.subr.mxu1 %v3403_v56  ;;  %v1919_v53 = vld [vmem:[#allocation10] sm:$0xff]  }
 0x170   :  { %v6570_v40 = vsel %vm4066_vm9, %v4155_v23, %v6526_v61  ;;  %2856 = vadd.xlane.f32.xlu1 %v1682_v7  ;;  %v3402_v61 = vld [vmem:[#allocation12 + $0x640] sm:$0xff]  ;;  %v2223_v23 = vadd.f32 %v2159_v60, %v2031_v59  ;;  %v1983_v56 = vunpack.c.l.bf16 %v1919_v53 }
 0x171   :  { %v6574_v63 = vsel %vm4059_vm8, %v4058_v38, %v6530_v29  ;;  %2822 = vadd.xlane.f32.xlu0 %v1665_v18  ;;  %v2803_v12 = vpop.xlane.xlu1 %2802  ;;  %v3399_v29 = vld [vmem:[#allocation12 + $0x628] sm:$0xff]  ;;  %5435 = vmatpush2.msra.mxu1 %v3402_v61  ;;  %v2224_v18 = vadd.f32 %v2160_v54, %v2032_v57 }
 0x172   :  { %v2769_v46 = vpop.xlane.xlu0 %2768  ;;  %v4303_v16 = vrot.slane %v2803_v12, %v6466_v52  ;;  %5436 = vmatprep.subr.mxu1 %v3399_v29  ;;  %v2111_v12 = vunpack.c.h.bf16 %v1919_v53  ;;  %v2129_v29 = vunpack.c.h.bf16 %v1937_v50 }
 0x173   :  { %v4219_v0 = vrot.slane %v2769_v46, %v6422_v62  ;;  %5437 = vmatpush2.msra.mxu1 %v3398_v8  ;;  %v1442_v46 = vld [vmem:[#allocation9 + $0x118] sm:$0xff]  }
 0x174   :  { %v6580_v13 = vsel %vm4052_vm7, %v4303_v16, %v6536_v27  ;;  %2916 = vadd.xlane.f32.xlu1 %v2192_v28  ;;  %v2175_v60 = vadd.f32 %v2111_v12, %v1983_v56 }
 0x175   :  { %v6584_v3 = vsel %vm4045_vm6, %v4219_v0, %v6540_v24  ;;  %2914 = vadd.xlane.f32.xlu0 %v2191_v41  ;;  %v2999_v6 = vpop.xlane.xlu1 %2998  ;;  %v3395_v24 = vld [vmem:[#allocation12 + $0x608] sm:$0xff] }
 0x176   :  { %v2965_v34 = vpop.xlane.xlu0 %2964  ;;  %v4787_v7 = vrot.slane %v2999_v6, %v6554_v5  ;;  %5438 = vmatprep.subr.mxu1 %v3395_v24  ;;  %v1459_v6 = vld [vmem:[#allocation9 + $0x1a0] sm:$0xff]   ;;  %v2143_v24 = vunpack.c.h.bf16 %v1951_v15 }
 0x177   :  { %v4703_v27 = vrot.slane %v2965_v34, %v6510_v36  ;;  %5439 = vmatpush2.msra.mxu1 %v3394_v21  ;;  %v1523_v10 = vunpack.c.l.bf16 %v1459_v6  ;;  %v1651_v2 = vunpack.c.h.bf16 %v1459_v6 }
 0x178   :  { %v6591_v32 = vsel %vm4066_vm9, %v4787_v7, %v6547_v11  ;;  %3112 = vadd.xlane.f32.xlu1 %v1714_v58  ;;  %v1984_v11 = vunpack.c.l.bf16 %v1920_v19  ;;  %v1634_v58 = vunpack.c.h.bf16 %v1442_v46 }
 0x179   :  { %v6595_v22 = vsel %vm4059_vm8, %v4703_v27, %v6551_v4  ;;  %3078 = vadd.xlane.f32.xlu0 %v1697_v55  ;;  %v3059_v38 = vpop.xlane.xlu1 %3058  ;;  %v1666_v4 = vadd.f32 %v1602_v20, %v1474_v51  ;;  %v2001_v55 = vunpack.c.l.bf16 %v1937_v50  ;;  %v1969_v51 = vld [vmem:[#allocation10 + $0x190] sm:$0xff]   ;;  %v1952_v20 = vld [vmem:[#allocation10 + $0x108] sm:$0xff]  }
 0x17a   :  { %v3025_v28 = vpop.xlane.xlu0 %3024  ;;  %v4935_v26 = vrot.slane %v3059_v38, %v6466_v52  ;;  %v2176_v61 = vadd.f32 %v2112_v45, %v1984_v11  ;;  %v2033_v38 = vunpack.c.l.bf16 %v1969_v51  ;;  %v2016_v53 = vunpack.c.l.bf16 %v1952_v20  ;;  %v1428_v11 = vld [vmem:[#allocation9 + $0xa8] sm:$0xff]  }
 0x17b   :  { %v4851_v33 = vrot.slane %v3025_v28, %v6422_v62  ;;  %v2193_v27 = vadd.f32 %v2129_v29, %v2001_v55  ;;  %v2161_v28 = vunpack.c.h.bf16 %v1969_v51  ;;  %v1921_v29 = vld [vmem:[#allocation10 + $0x10] sm:$0xff]   ;;  %v1463_v62 = vld [vmem:[#allocation9 + $0x1c0] sm:$0xff]  }
 0x17c   :  { %v6604_v39 = vsel %vm4052_vm7, %v4935_v26, %v6560_v1  ;;  %3172 = vadd.xlane.f32.xlu1 %v2224_v18  ;;  %v1506_v1 = vunpack.c.l.bf16 %v1442_v46  ;;  %v2015_v18 = vunpack.c.l.bf16 %v1951_v15  ;;  %v2144_v26 = vunpack.c.h.bf16 %v1952_v20 }
 0x17d   :  { %v6608_v41 = vsel %vm4045_vm6, %v4851_v33, %v6564_v25  ;;  %3170 = vadd.xlane.f32.xlu0 %v2223_v23  ;;  %v2745_v16 = vpop.xlane.xlu1 %2744  ;;  %v1715_v33 = vadd.f32 %v1651_v2, %v1523_v10  ;;  %v2225_v46 = vadd.f32 %v2161_v28, %v2033_v38  ;;  %v1655_v31 = vunpack.c.h.bf16 %v1463_v62 }
 0x17e   :  { %v2711_v0 = vpop.xlane.xlu0 %2710  ;;  %v4160_v57 = vrot.slane %v2745_v16, %v6598_v43  ;;  %v1698_v7 = vadd.f32 %v1634_v58, %v1506_v1  ;;  %v2208_v50 = vadd.f32 %v2144_v26, %v2016_v53  ;;  %v1492_v16 = vunpack.c.l.bf16 %v1428_v11 }
 0x17f   :  { %v4065_v54 = vrot.slane %v2711_v0, %v6554_v5  ;;  %v1620_v0 = vunpack.c.h.bf16 %v1428_v11 }
 0x180   :  { %v6614_v25 = vsel %vm4073_vm10, %v4160_v57, %v6570_v40  ;;  %2858 = vadd.xlane.f32.xlu1 %v1683_v37  ;;  %v1938_v57 = vld [vmem:[#allocation10 + $0x98] sm:$0xff]  }
 0x181   :  { %v4067_v59 = vsel %vm4066_vm9, %v4065_v54, %v6574_v63  ;;  %2824 = vadd.xlane.f32.xlu0 %v1666_v4  ;;  %v2805_v17 = vpop.xlane.xlu1 %2804  ;;  %v1411_v4 = vld [vmem:[#allocation9 + $0x20] sm:$0xff]   ;;  %v2002_v15 = vunpack.c.l.bf16 %v1938_v57 }
 0x182   :  { %v2771_v8 = vpop.xlane.xlu0 %2770  ;;  %v4308_v34 = vrot.slane %v2805_v17, %v6510_v36  ;;  %v1603_v1 = vunpack.c.h.bf16 %v1411_v4  ;;  %v2130_v17 = vunpack.c.h.bf16 %v1938_v57 }
 0x183   :  { %v4224_v9 = vrot.slane %v2771_v8, %v6466_v52  ;;  %v1684_v8 = vadd.f32 %v1620_v0, %v1492_v16 }
 0x184   :  { %v4309_v40 = vsel %vm4059_vm8, %v4308_v34, %v6580_v13  ;;  %2884 = vadd.xlane.f32.xlu1 %v2176_v61  ;;  %v1475_v61 = vunpack.c.l.bf16 %v1411_v4  ;;  %v2113_v34 = vunpack.c.h.bf16 %v1921_v29  ;;  %v2194_v2 = vadd.f32 %v2130_v17, %v2002_v15 }
 0x185   :  { %v4225_v63 = vsel %vm4052_vm7, %v4224_v9, %v6584_v3  ;;  %2882 = vadd.xlane.f32.xlu0 %v2175_v60  ;;  %v6624_v19 = vpop.xlane.xlu1 %3000  ;;  %v2207_v3 = vadd.f32 %v2143_v24, %v2015_v18  ;;  %v1460_v9 = vld [vmem:[#allocation9 + $0x1a8] sm:$0xff]  }
 0x186   :  { %v2967_v21 = vpop.xlane.xlu0 %2966  ;;  %v1524_v51 = vunpack.c.l.bf16 %v1460_v9  ;;  %v1652_v20 = vunpack.c.h.bf16 %v1460_v9 }
 0x187   :  { %v4708_v23 = vrot.slane %v2967_v21, %v6554_v5 }
 0x188   :  { %3080 = vadd.xlane.f32.xlu1 %v1698_v7  ;;  %v1443_v7 = vld [vmem:[#allocation9 + $0x120] sm:$0xff]   ;;  %v1716_v11 = vadd.f32 %v1652_v20, %v1524_v51 }
 0x189   :  { %v6629_v13 = vsel %vm4066_vm9, %v4708_v23, %v6595_v22  ;;  %2918 = vadd.xlane.f32.xlu0 %v2193_v27  ;;  %v3061_v45 = vpop.xlane.xlu1 %3060  ;;  %v1507_v21 = vunpack.c.l.bf16 %v1443_v7  ;;  %v1635_v23 = vunpack.c.h.bf16 %v1443_v7 }
 0x18a   :  { %v3027_v37 = vpop.xlane.xlu0 %3026  ;;  %v4940_v56 = vrot.slane %v3061_v45, %v6510_v36 }
 0x18b   :  { %v4856_v12 = vrot.slane %v3027_v37, %v6466_v52  ;;  %v1699_v45 = vadd.f32 %v1635_v23, %v1507_v21 }
 0x18c   :  { %v6635_v22 = vsel %vm4059_vm8, %v4940_v56, %v6604_v39  ;;  %3138 = vadd.xlane.f32.xlu1 %v2207_v3  ;;  %v1667_v39 = vadd.f32 %v1603_v1, %v1475_v61  ;;  %v1970_v3 = vld [vmem:[#allocation10 + $0x198] sm:$0xff]  }
 0x18d   :  { %v4857_v54 = vsel %vm4052_vm7, %v4856_v12, %v6608_v41  ;;  %3114 = vadd.xlane.f32.xlu0 %v1715_v33  ;;  %v6639_v58 = vpop.xlane.xlu1 %2746  ;;  %v1985_v41 = vunpack.c.l.bf16 %v1921_v29  ;;  %v1953_v33 = vld [vmem:[#allocation10 + $0x110] sm:$0xff]   ;;  %v2034_v37 = vunpack.c.l.bf16 %v1970_v3  ;;  %v2162_v4 = vunpack.c.h.bf16 %v1970_v3 }
 0x18e   :  { %v2713_v55 = vpop.xlane.xlu0 %2712  ;;  %v2145_v56 = vunpack.c.h.bf16 %v1953_v33  ;;  %v1429_v12 = vld [vmem:[#allocation9 + $0xb0] sm:$0xff]  }
 0x18f   :  { %v4072_v60 = vrot.slane %v2713_v55, %v6598_v43  ;;  %v2177_v28 = vadd.f32 %v2113_v34, %v1985_v41  ;;  %v1493_v0 = vunpack.c.l.bf16 %v1429_v12  ;;  %v1621_v57 = vunpack.c.h.bf16 %v1429_v12 }
 0x190   :  { %3174 = vadd.xlane.f32.xlu1 %v2225_v46  ;;  %v2226_v29 = vadd.f32 %v2162_v4, %v2034_v37  ;;  %v1954_v37 = vld [vmem:[#allocation10 + $0x118] sm:$0xff]  }
 0x191   :  { %v6643_v6 = vsel %vm4073_vm10, %v4072_v60, %v4067_v59  ;;  %3140 = vadd.xlane.f32.xlu0 %v2208_v50  ;;  %v2807_v27 = vpop.xlane.xlu1 %2806  ;;  %v1685_v41 = vadd.f32 %v1621_v57, %v1493_v0  ;;  %v1413_v0 = vld [vmem:[#allocation9 + $0x30] sm:$0xff]  }
 0x192   :  { %v2773_v18 = vpop.xlane.xlu0 %2772  ;;  %v4313_v24 = vrot.slane %v2807_v27, %v6554_v5 }
 0x193   :  { %v4229_v10 = vrot.slane %v2773_v18, %v6510_v36 }
 0x194   :  { %v6648_v59 = vsel %vm4066_vm9, %v4313_v24, %v4309_v40  ;;  %2860 = vadd.xlane.f32.xlu1 %v1684_v8  ;;  %v2017_v40 = vunpack.c.l.bf16 %v1953_v33  ;;  %v1939_v8 = vld [vmem:[#allocation10 + $0xa0] sm:$0xff]   ;;  %v1444_v24 = vld [vmem:[#allocation9 + $0x128] sm:$0xff]  }
 0x195   :  { %v6651_v38 = vsel %vm4059_vm8, %v4229_v10, %v4225_v63  ;;  %2826 = vadd.xlane.f32.xlu0 %v1667_v39  ;;  %v6653_v53 = vpop.xlane.xlu1 %3002  ;;  %v1412_v63 = vld [vmem:[#allocation9 + $0x28] sm:$0xff]   ;;  %v1922_v39 = vld [vmem:[#allocation10 + $0x18] sm:$0xff]   ;;  %v2003_v9 = vunpack.c.l.bf16 %v1939_v8  ;;  %v2131_v7 = vunpack.c.h.bf16 %v1939_v8  ;;  %v1508_v21 = vunpack.c.l.bf16 %v1444_v24 }
 0x196   :  { %v6655_v26 = vpop.xlane.xlu0 %2968  ;;  %v1476_v61 = vunpack.c.l.bf16 %v1412_v63  ;;  %v1604_v1 = vunpack.c.h.bf16 %v1412_v63  ;;  %v2209_v60 = vadd.f32 %v2145_v56, %v2017_v40  ;;  %v1986_v27 = vunpack.c.l.bf16 %v1922_v39 }
 0x197   :  { %v2114_v18 = vunpack.c.h.bf16 %v1922_v39  ;;  %v1636_v23 = vunpack.c.h.bf16 %v1444_v24  ;;  %v2018_v63 = vunpack.c.l.bf16 %v1954_v37  ;;  %v1605_v8 = vunpack.c.h.bf16 %v1413_v0 }
 0x198   :  { %2920 = vadd.xlane.f32.xlu1 %v2194_v2  ;;  %v1668_v34 = vadd.f32 %v1604_v1, %v1476_v61 }
 0x199   :  { %2886 = vadd.xlane.f32.xlu0 %v2177_v28  ;;  %v6657_v46 = vpop.xlane.xlu1 %3062  ;;  %v2195_v28 = vadd.f32 %v2131_v7, %v2003_v9  ;;  %v2178_v3 = vadd.f32 %v2114_v18, %v1986_v27  ;;  %v1700_v40 = vadd.f32 %v1636_v23, %v1508_v21  ;;  %v1940_v7 = vld [vmem:[#allocation10 + $0xa8] sm:$0xff]   ;;  %v1923_v27 = vld [vmem:[#allocation10 + $0x20] sm:$0xff]   ;;  %v1462_v23 = vld [vmem:[#allocation9 + $0x1b8] sm:$0xff]  }
 0x19a   :  { %v3029_v50 = vpop.xlane.xlu0 %3028  ;;  %v2004_v24 = vunpack.c.l.bf16 %v1940_v7  ;;  %v2115_v21 = vunpack.c.h.bf16 %v1923_v27 }
 0x19b   :  { %v4861_v16 = vrot.slane %v3029_v50, %v6510_v36  ;;  %v2146_v50 = vunpack.c.h.bf16 %v1954_v37  ;;  %v1526_v37 = vunpack.c.l.bf16 %v1462_v23 }
 0x19c   :  { %3116 = vadd.xlane.f32.xlu1 %v1716_v11 }
 0x19d   :  { %v6661_v55 = vsel %vm4059_vm8, %v4861_v16, %v4857_v54  ;;  %3082 = vadd.xlane.f32.xlu0 %v1699_v45  ;;  %v6663_v15 = vpop.xlane.xlu1 %2748  ;;  %v1461_v54 = vld [vmem:[#allocation9 + $0x1b0] sm:$0xff]   ;;  %v1971_v45 = vld [vmem:[#allocation10 + $0x1a0] sm:$0xff]   ;;  %v1430_v16 = vld [vmem:[#allocation9 + $0xb8] sm:$0xff]  }
 0x19e   :  { %v6665_v17 = vpop.xlane.xlu0 %2714  ;;  %v1525_v51 = vunpack.c.l.bf16 %v1461_v54  ;;  %v1653_v20 = vunpack.c.h.bf16 %v1461_v54  ;;  %v2035_v56 = vunpack.c.l.bf16 %v1971_v45  ;;  %v2163_v12 = vunpack.c.h.bf16 %v1971_v45 }
 0x19f   :  { %v1494_v1 = vunpack.c.l.bf16 %v1430_v16 }
 0x1a0   :  { %3176 = vadd.xlane.f32.xlu1 %v2226_v29  ;;  %v1717_v4 = vadd.f32 %v1653_v20, %v1525_v51  ;;  %v1622_v29 = vunpack.c.h.bf16 %v1430_v16  ;;  %v2227_v39 = vadd.f32 %v2163_v12, %v2035_v56  ;;  %v2132_v51 = vunpack.c.h.bf16 %v1940_v7 }
 0x1a1   :  { %3142 = vadd.xlane.f32.xlu0 %v2209_v60  ;;  %v6667_v10 = vpop.xlane.xlu1 %2808  ;;  %v1477_v60 = vunpack.c.l.bf16 %v1413_v0  ;;  %v1987_v20 = vunpack.c.l.bf16 %v1923_v27  ;;  %v1972_v0 = vld [vmem:[#allocation10 + $0x1a8] sm:$0xff]  }
 0x1a2   :  { %v6669_v2 = vpop.xlane.xlu0 %2774  ;;  %v1686_v18 = vadd.f32 %v1622_v29, %v1494_v1  ;;  %v2196_v12 = vadd.f32 %v2132_v51, %v2004_v24  ;;  %v1955_v1 = vld [vmem:[#allocation10 + $0x120] sm:$0xff]  }
 0x1a3   :  { %v1669_v54 = vadd.f32 %v1605_v8, %v1477_v60  ;;  %v1431_v8 = vld [vmem:[#allocation9 + $0xc0] sm:$0xff]   ;;  %v2019_v7 = vunpack.c.l.bf16 %v1955_v1  ;;  %v2147_v27 = vunpack.c.h.bf16 %v1955_v1 }
 0x1a4   :  { %2862 = vadd.xlane.f32.xlu1 %v1685_v41  ;;  %v2210_v41 = vadd.f32 %v2146_v50, %v2018_v63  ;;  %v2179_v63 = vadd.f32 %v2115_v21, %v1987_v20  ;;  %v4089_v20 = vadd.s32 4294967184, %v6236_v30  ;;  %v4096_v21 = vadd.s32 4294967176, %v6236_v30 }
 0x1a5   :  { %2828 = vadd.xlane.f32.xlu0 %v1668_v34  ;;  %v6671_v33 = vpop.xlane.xlu1 %3004 }
 0x1a6   :  { %v6673_v11 = vpop.xlane.xlu0 %2970 }
 0x1a8   :  { %2922 = vadd.xlane.f32.xlu1 %v2195_v28  ;;  %v1445_v28 = vld [vmem:[#allocation9 + $0x130] sm:$0xff]  }
 0x1a9   :  { %2888 = vadd.xlane.f32.xlu0 %v2178_v3  ;;  %v6675_v57 = vpop.xlane.xlu1 %3064  ;;  %v1637_v56 = vunpack.c.h.bf16 %v1445_v28 }
 0x1aa   :  { %v6677_v61 = vpop.xlane.xlu0 %3030 }
 0x1ac   :  { %3118 = vadd.xlane.f32.xlu1 %v1717_v4  ;;  %v1654_v4 = vunpack.c.h.bf16 %v1462_v23  ;;  %v1414_v23 = vld [vmem:[#allocation9 + $0x38] sm:$0xff]  }
 0x1ad   :  { %3084 = vadd.xlane.f32.xlu0 %v1700_v40  ;;  %v6679_v34 = vpop.xlane.xlu1 %2750  ;;  %v1509_v40 = vunpack.c.l.bf16 %v1445_v28  ;;  %v1495_v28 = vunpack.c.l.bf16 %v1431_v8 }
 0x1ae   :  { %v6681_v9 = vpop.xlane.xlu0 %2716  ;;  %v1718_v29 = vadd.f32 %v1654_v4, %v1526_v37  ;;  %v1623_v37 = vunpack.c.h.bf16 %v1431_v8  ;;  %v1478_v4 = vunpack.c.l.bf16 %v1414_v23  ;;  %v6708_v8 = vsub.s32 %v4089_v20, %v6238_v35 }
 0x1af   :  { %v1701_v60 = vadd.f32 %v1637_v56, %v1509_v40  ;;  %v1606_v40 = vunpack.c.h.bf16 %v1414_v23 }
 0x1b0   :  { %3178 = vadd.xlane.f32.xlu1 %v2227_v39  ;;  %v2036_v39 = vunpack.c.l.bf16 %v1972_v0 }
 0x1b1   :  { %3144 = vadd.xlane.f32.xlu0 %v2210_v41  ;;  %v6683_v3 = vpop.xlane.xlu1 %2810  ;;  %v2164_v41 = vunpack.c.h.bf16 %v1972_v0  ;;  %v1924_v0 = vld [vmem:[#allocation10 + $0x28] sm:$0xff]  }
 0x1b2   :  { %v6685_v45 = vpop.xlane.xlu0 %2776  ;;  %v1988_v23 = vunpack.c.l.bf16 %v1924_v0  ;;  %v2116_v49 = vunpack.c.h.bf16 %v1924_v0 }
 0x1b3   :  { %v2228_v56 = vadd.f32 %v2164_v41, %v2036_v39  ;;  %v1446_v39 = vld [vmem:[#allocation9 + $0x138] sm:$0xff]   ;;  %v1670_v41 = vadd.f32 %v1606_v40, %v1478_v4 }
 0x1b4   :  { %2864 = vadd.xlane.f32.xlu1 %v1686_v18  ;;  %v4075_v18 = vadd.s32 4294967200, %v6236_v30  ;;  %v1510_v4 = vunpack.c.l.bf16 %v1446_v39  ;;  %v1638_v40 = vunpack.c.h.bf16 %v1446_v39 }
 0x1b5   :  { %2830 = vadd.xlane.f32.xlu0 %v1669_v54  ;;  %v6687_v50 = vpop.xlane.xlu1 %3006  ;;  %v4082_v54 = vadd.s32 4294967192, %v6236_v30 }
 0x1b6   :  { %v6689_v16 = vpop.xlane.xlu0 %2972  ;;  %v6700_v1 = vsub.s32 %v4075_v18, %v6238_v35  ;;  %v4792_v18 = vrot.slane %v6624_v19, %v6598_v43 }
 0x1b7   :  { %v6705_v30 = vsub.s32 %v4082_v54, %v6238_v35  ;;  %v1527_v54 = vunpack.c.l.bf16 %v1463_v62  ;;  %v4175_v62 = vrot.slane %v6679_v34, %v6708_v8 }
 0x1b8   :  { %2924 = vadd.xlane.f32.xlu1 %v2196_v12  ;;  %v2211_v12 = vadd.f32 %v2147_v27, %v2019_v7  ;;  %v4165_v20 = vrot.slane %v6639_v58, %v6700_v1  ;;  %v4807_v58 = vrot.slane %v6687_v50, %v6708_v8 }
 0x1b9   :  { %2890 = vadd.xlane.f32.xlu0 %v2179_v63  ;;  %v6693_v24 = vpop.xlane.xlu1 %3066  ;;  %v1941_v63 = vld [vmem:[#allocation10 + $0xb0] sm:$0xff]   ;;  %v4170_v19 = vrot.slane %v6663_v15, %v6705_v30  ;;  %v2180_v15 = vadd.f32 %v2116_v49, %v1988_v23 }
 0x1ba   :  { %v6695_v51 = vpop.xlane.xlu0 %3032  ;;  %v2005_v7 = vunpack.c.l.bf16 %v1941_v63  ;;  %v2133_v27 = vunpack.c.h.bf16 %v1941_v63  ;;  %v4793_v63 = vsel %vm4073_vm10, %v4792_v18, %v6591_v32  ;;  %v4166_v39 = vsel %vm4080_vm11, %v4165_v20, %v6614_v25 }
 0x1bb   :  { %v4171_v32 = vsel %vm4087_vm12, %v4170_v19, %v4166_v39  ;;  %v1464_v39 = vld [vmem:[#allocation9 + $0x1c8] sm:$0xff]  }
 0x1bc   :  { %3120 = vadd.xlane.f32.xlu1 %v1718_v29  ;;  %v6711_v29 = vsub.s32 %v4096_v21, %v6238_v35  ;;  %v4797_v21 = vrot.slane %v6653_v53, %v6700_v1  ;;  %v2197_v53 = vadd.f32 %v2133_v27, %v2005_v7  ;;  %v1719_v7 = vadd.f32 %v1655_v31, %v1527_v54 }
 0x1bd   :  { %3086 = vadd.xlane.f32.xlu0 %v1701_v60  ;;  %v2753_v36 = vpop.xlane.xlu1 %2752  ;;  %v1687_v60 = vadd.f32 %v1623_v37, %v1495_v28  ;;  %v1702_v27 = vadd.f32 %v1638_v40, %v1510_v4  ;;  %v4176_v23 = vsel %vm4094_vm13, %v4175_v62, %v4171_v32  ;;  %v1496_v40 = vunpack.c.l.bf16 %v1432_v42 }
 0x1be   :  { %v6702_v52 = vpop.xlane.xlu0 %2718  ;;  %v4180_v0 = vrot.slane %v2753_v36, %v6711_v29  ;;  %v4798_v34 = vsel %vm4080_vm11, %v4797_v21, %v4793_v63  ;;  %v1942_v21 = vld [vmem:[#allocation10 + $0xb8] sm:$0xff]   ;;  %v1925_v63 = vld [vmem:[#allocation10 + $0x30] sm:$0xff]   ;;  %v1624_v62 = vunpack.c.h.bf16 %v1432_v42  ;;  %v4079_v42 = vrot.slane %v6665_v17, %v6700_v1 }
 0x1bf   :  { %v4093_v17 = vrot.slane %v6702_v52, %v6708_v8 }
 0x1c0   :  { %3180 = vadd.xlane.f32.xlu1 %v2228_v56  ;;  %v4802_v56 = vrot.slane %v6671_v33, %v6705_v30  ;;  %v1956_v33 = vld [vmem:[#allocation10 + $0x128] sm:$0xff]   ;;  %v4181_v31 = vsel %vm4101_vm14, %v4180_v0, %v4176_v23  ;;  %v1989_v0 = vunpack.c.l.bf16 %v1925_v63  ;;  %v1656_v23 = vunpack.c.h.bf16 %v1464_v39 }
 0x1c1   :  { %3146 = vadd.xlane.f32.xlu0 %v2211_v12  ;;  %v6719_v28 = vpop.xlane.xlu1 %2812  ;;  %v1973_v12 = vld [vmem:[#allocation10 + $0x1b0] sm:$0xff]   ;;  %v2020_v20 = vunpack.c.l.bf16 %v1956_v33  ;;  %v2148_v4 = vunpack.c.h.bf16 %v1956_v33  ;;  %v4713_v33 = vrot.slane %v6655_v26, %v6598_v43  ;;  %v4086_v26 = vrot.slane %v6681_v9, %v6705_v30 }
 0x1c2   :  { %v6721_v37 = vpop.xlane.xlu0 %2778  ;;  %v4803_v36 = vsel %vm4087_vm12, %v4802_v56, %v4798_v34  ;;  %v2037_v49 = vunpack.c.l.bf16 %v1973_v12  ;;  %v2165_v18 = vunpack.c.h.bf16 %v1973_v12  ;;  %v2117_v34 = vunpack.c.h.bf16 %v1925_v63 }
 0x1c3   :  { %v4808_v25 = vsel %vm4094_vm13, %v4807_v58, %v4803_v36  ;;  %v2212_v36 = vadd.f32 %v2148_v4, %v2020_v20  ;;  %v1688_v63 = vadd.f32 %v1624_v62, %v1496_v40  ;;  %v4714_v40 = vsel %vm4073_vm10, %v4713_v33, %v6629_v13 }
 0x1c4   :  { %2866 = vadd.xlane.f32.xlu1 %v1687_v60  ;;  %v2229_v32 = vadd.f32 %v2165_v18, %v2037_v49  ;;  %v1974_v18 = vld [vmem:[#allocation10 + $0x1b8] sm:$0xff]   ;;  %v2181_v20 = vadd.f32 %v2117_v34, %v1989_v0  ;;  %v1416_v34 = vld [vmem:[#allocation9 + $0x48] sm:$0xff]  }
 0x1c5   :  { %2832 = vadd.xlane.f32.xlu0 %v1670_v41  ;;  %v3009_v35 = vpop.xlane.xlu1 %3008  ;;  %v1415_v41 = vld [vmem:[#allocation9 + $0x40] sm:$0xff]  }
 0x1c6   :  { %v6737_v50 = vpop.xlane.xlu0 %2974  ;;  %v4812_v60 = vrot.slane %v3009_v35, %v6711_v29  ;;  %v1479_v58 = vunpack.c.l.bf16 %v1415_v41  ;;  %v1607_v12 = vunpack.c.h.bf16 %v1415_v41  ;;  %v4718_v41 = vrot.slane %v6673_v11, %v6700_v1 }
 0x1c7   :  { %v4728_v11 = vrot.slane %v6737_v50, %v6708_v8 }
 0x1c8   :  { %2926 = vadd.xlane.f32.xlu1 %v2197_v53  ;;  %v4813_v54 = vsel %vm4101_vm14, %v4812_v60, %v4808_v25  ;;  %v2006_v53 = vunpack.c.l.bf16 %v1942_v21  ;;  %v1528_v60 = vunpack.c.l.bf16 %v1464_v39  ;;  %v1447_v25 = vld [vmem:[#allocation9 + $0x140] sm:$0xff]   ;;  %v1671_v49 = vadd.f32 %v1607_v12, %v1479_v58  ;;  %v1433_v58 = vld [vmem:[#allocation9 + $0xd0] sm:$0xff]  }
 0x1c9   :  { %2892 = vadd.xlane.f32.xlu0 %v2180_v15  ;;  %v6746_v19 = vpop.xlane.xlu1 %3068  ;;  %v6751_v56 = vsel %vm5288_vm15, %v4813_v54, %v4181_v31  ;;  %v2134_v15 = vunpack.c.h.bf16 %v1942_v21  ;;  %v1957_v54 = vld [vmem:[#allocation10 + $0x130] sm:$0xff]   ;;  %v1511_v4 = vunpack.c.l.bf16 %v1447_v25  ;;  %v1639_v39 = vunpack.c.h.bf16 %v1447_v25 }
 0x1ca   :  { %v6748_v35 = vpop.xlane.xlu0 %3034  ;;  %5369 = vmatprep.mubr.f32.mxu0 %v6751_v56  ;;  %v6773_v9 = vadd.f32 %v1656_v23, %v1528_v60  ;;  %v4081_v12 = vsel %vm4080_vm11, %v4079_v42, %v6643_v6  ;;  %v4719_v52 = vsel %vm4080_vm11, %v4718_v41, %v4714_v40  ;;  %v2021_v0 = vunpack.c.l.bf16 %v1957_v54  ;;  %v1943_v60 = vld [vmem:[#allocation10 + $0xc0] sm:$0xff]  }
 0x1cb   :  { %v4088_v13 = vsel %vm4087_vm12, %v4086_v26, %v4081_v12  ;;  %v1497_v25 = vunpack.c.l.bf16 %v1433_v58  ;;  %v1625_v42 = vunpack.c.h.bf16 %v1433_v58  ;;  %v1608_v26 = vunpack.c.h.bf16 %v1416_v34  ;;  %v1926_v58 = vld [vmem:[#allocation10 + $0x38] sm:$0xff]  }
 0x1cc   :  { %3122 = vadd.xlane.f32.xlu1 %v1719_v7  ;;  %v4723_v7 = vrot.slane %v6689_v16, %v6705_v30  ;;  %v2038_v16 = vunpack.c.l.bf16 %v1974_v18  ;;  %v4095_v23 = vsel %vm4094_vm13, %v4093_v17, %v4088_v13  ;;  %v2135_v12 = vunpack.c.h.bf16 %v1943_v60 }
 0x1cd   :  { %3088 = vadd.xlane.f32.xlu0 %v1702_v27  ;;  %v6760_v31 = vpop.xlane.xlu1 %2780  ;;  %v2198_v27 = vadd.f32 %v2134_v15, %v2006_v53  ;;  %v2166_v15 = vunpack.c.h.bf16 %v1974_v18  ;;  %v1480_v18 = vunpack.c.l.bf16 %v1416_v34 }
 0x1ce   :  { %v2721_v21 = vpop.xlane.xlu0 %2720 }
 0x1cf   :  { %v4100_v62 = vrot.slane %v2721_v21, %v6711_v29  ;;  %v2230_v34 = vadd.f32 %v2166_v15, %v2038_v16 }
 0x1d0   :  { %3182 = vadd.xlane.f32.xlu1 %v2229_v32  ;;  %v4724_v32 = vsel %vm4087_vm12, %v4723_v7, %v4719_v52  ;;  %v4945_v7 = vrot.slane %v6657_v46, %v6554_v5  ;;  %v1703_v46 = vadd.f32 %v1639_v39, %v1511_v4  ;;  %v4866_v52 = vrot.slane %v6677_v61, %v6554_v5 }
 0x1d1   :  { %3148 = vadd.xlane.f32.xlu0 %v2212_v36  ;;  %v2977_v53 = vpop.xlane.xlu1 %2976  ;;  %v2149_v36 = vunpack.c.h.bf16 %v1957_v54  ;;  %v4729_v6 = vsel %vm4094_vm13, %v4728_v11, %v4724_v32  ;;  %v4102_v41 = vsel %vm4101_vm14, %v4100_v62, %v4095_v23  ;;  %v2007_v11 = vunpack.c.l.bf16 %v1943_v60 }
 0x1d2   :  { %v6778_v50 = vpop.xlane.xlu0 %2814  ;;  %v4733_v33 = vrot.slane %v2977_v53, %v6711_v29  ;;  %v4950_v62 = vrot.slane %v6675_v57, %v6598_v43  ;;  %v4323_v53 = vrot.slane %v6683_v3, %v6700_v1  ;;  %v1672_v32 = vadd.f32 %v1608_v26, %v1480_v18 }
 0x1d3   :  { %v2213_v13 = vadd.f32 %v2149_v36, %v2021_v0  ;;  %v4946_v57 = vsel %vm4066_vm9, %v4945_v7, %v6635_v22  ;;  %v4955_v4 = vrot.slane %v6693_v24, %v6700_v1  ;;  %v4328_v61 = vrot.slane %v6719_v28, %v6705_v30 }
 0x1d4   :  { %2868 = vadd.xlane.f32.xlu1 %v1688_v63  ;;  %v4734_v21 = vsel %vm4101_vm14, %v4733_v33, %v4729_v6  ;;  %v4318_v63 = vrot.slane %v6667_v10, %v6598_v43  ;;  %v4239_v10 = vrot.slane %v6685_v45, %v6598_v43  ;;  %v1990_v33 = vunpack.c.l.bf16 %v1926_v58 }
 0x1d5   :  { %2834 = vadd.xlane.f32.xlu0 %v1671_v49  ;;  %v3071_v40 = vpop.xlane.xlu1 %3070  ;;  %v6792_v17 = vsel %vm5288_vm15, %v4734_v21, %v4102_v41  ;;  %v4234_v49 = vrot.slane %v6669_v2, %v6554_v5  ;;  %v1689_v2 = vadd.f32 %v1625_v42, %v1497_v25  ;;  %v6813_v16 = vadd.f32 %v2135_v12, %v2007_v11 }
 0x1d6   :  { %v6789_v54 = vpop.xlane.xlu0 %3036  ;;  %5370 = vmatmul.mubr.f32.vlgmr.msra.gmra.mxu0 %v6792_v17  ;;  %v4319_v45 = vsel %vm4073_vm10, %v4318_v63, %v6648_v59  ;;  %v4960_v22 = vrot.slane %v6746_v19, %v6705_v30  ;;  %v4867_v24 = vsel %vm4066_vm9, %v4866_v52, %v6661_v55  ;;  %v4333_v15 = vrot.slane %v6778_v50, %v6708_v8 }
 0x1d7   :  { %v4324_v28 = vsel %vm4080_vm11, %v4323_v53, %v4319_v45  ;;  %v4965_v0 = vrot.slane %v3071_v40, %v6708_v8  ;;  %v2118_v19 = vunpack.c.h.bf16 %v1926_v58  ;;  %v4244_v50 = vrot.slane %v6721_v37, %v6700_v1  ;;  %v1465_v40 = vld [vmem:[#allocation9 + $0x1d0] sm:$0xff]   ;;  %v1975_v45 = vld [vmem:[#allocation10 + $0x1c0] sm:$0xff]  }
 0x1d8   :  { %2928 = vadd.xlane.f32.xlu1 %v2198_v27  ;;  %v4235_v27 = vsel %vm4066_vm9, %v4234_v49, %v6651_v38  ;;  %v4871_v38 = vrot.slane %v6695_v51, %v6598_v43  ;;  %v4329_v60 = vsel %vm4087_vm12, %v4328_v61, %v4324_v28  ;;  %v4876_v23 = vrot.slane %v6748_v35, %v6700_v1 }
 0x1d9   :  { %2894 = vadd.xlane.f32.xlu0 %v2181_v20  ;;  %v2817_v3 = vpop.xlane.xlu1 %2816  ;;  %v4951_v20 = vsel %vm4073_vm10, %v4950_v62, %v4946_v57  ;;  %v4240_v59 = vsel %vm4073_vm10, %v4239_v10, %v4235_v27  ;;  %v4249_v42 = vrot.slane %v6760_v31, %v6705_v30  ;;  %v4334_v37 = vsel %vm4094_vm13, %v4333_v15, %v4329_v60  ;;  %v1448_v62 = vld [vmem:[#allocation9 + $0x148] sm:$0xff]  }
 0x1da   :  { %v2783_v39 = vpop.xlane.xlu0 %2782  ;;  %v4338_v36 = vrot.slane %v2817_v3, %v6711_v29  ;;  %v4956_v55 = vsel %vm4080_vm11, %v4955_v4, %v4951_v20  ;;  %v4872_v26 = vsel %vm4073_vm10, %v4871_v38, %v4867_v24  ;;  %v2182_v49 = vadd.f32 %v2118_v19, %v1990_v33  ;;  %v1958_v24 = vld [vmem:[#allocation10 + $0x138] sm:$0xff]  }
 0x1db   :  { %v4961_v51 = vsel %vm4087_vm12, %v4960_v22, %v4956_v55  ;;  %v4254_v21 = vrot.slane %v2783_v39, %v6708_v8  ;;  %v4877_v11 = vsel %vm4080_vm11, %v4876_v23, %v4872_v26  ;;  %v1529_v57 = vunpack.c.l.bf16 %v1465_v40  ;;  %v1434_v55 = vld [vmem:[#allocation9 + $0xd8] sm:$0xff]   ;;  %v1417_v23 = vld [vmem:[#allocation9 + $0x50] sm:$0xff]  }
 0x1dc   :  { %3124 = vadd.xlane.f32.xlu1 %v6773_v9  ;;  %v4881_v9 = vrot.slane %v6789_v54, %v6705_v30  ;;  %v4966_v35 = vsel %vm4094_vm13, %v4965_v0, %v4961_v51  ;;  %v4339_v7 = vsel %vm4101_vm14, %v4338_v36, %v4334_v37  ;;  %v4245_v54 = vsel %vm4080_vm11, %v4244_v50, %v4240_v59  ;;  %v1944_v37 = vld [vmem:[#allocation10 + $0xc8] sm:$0xff]  }
 0x1dd   :  { %3090 = vadd.xlane.f32.xlu0 %v1703_v46  ;;  %v3073_v6 = vpop.xlane.xlu1 %3072  ;;  %v4250_v46 = vsel %vm4087_vm12, %v4249_v42, %v4245_v54  ;;  %v1657_v4 = vunpack.c.h.bf16 %v1465_v40  ;;  %v1512_v3 = vunpack.c.l.bf16 %v1448_v62  ;;  %v1640_v39 = vunpack.c.h.bf16 %v1448_v62 }
 0x1de   :  { %v3039_v25 = vpop.xlane.xlu0 %3038  ;;  %v4970_v41 = vrot.slane %v3073_v6, %v6711_v29  ;;  %v4882_v52 = vsel %vm4087_vm12, %v4881_v9, %v4877_v11  ;;  %v2167_v0 = vunpack.c.h.bf16 %v1975_v45  ;;  %v2022_v36 = vunpack.c.l.bf16 %v1958_v24 }
 0x1df   :  { %v4886_v18 = vrot.slane %v3039_v25, %v6708_v8  ;;  %v1704_v38 = vadd.f32 %v1640_v39, %v1512_v3  ;;  %v2150_v19 = vunpack.c.h.bf16 %v1958_v24  ;;  %v1498_v42 = vunpack.c.l.bf16 %v1434_v55 }
 0x1e0   :  { %3184 = vadd.xlane.f32.xlu1 %v2230_v34  ;;  %v4971_v31 = vsel %vm4101_vm14, %v4970_v41, %v4966_v35  ;;  %v1626_v9 = vunpack.c.h.bf16 %v1434_v55  ;;  %v2008_v11 = vunpack.c.l.bf16 %v1944_v37 }
 0x1e1   :  { %3150 = vadd.xlane.f32.xlu0 %v2213_v13  ;;  %v3041_v12 = vpop.xlane.xlu1 %3040  ;;  %v6855_v63 = vsel %vm5288_vm15, %v4971_v31, %v4339_v7  ;;  %v4255_v13 = vsel %vm4094_vm13, %v4254_v21, %v4250_v46  ;;  %v4887_v10 = vsel %vm4094_vm13, %v4886_v18, %v4882_v52  ;;  %v1481_v21 = vunpack.c.l.bf16 %v1417_v23  ;;  %v1927_v7 = vld [vmem:[#allocation10 + $0x40] sm:$0xff]  }
 0x1e2   :  { %v2785_v58 = vpop.xlane.xlu0 %2784  ;;  %v4891_v53 = vrot.slane %v3041_v12, %v6711_v29  ;;  %5440 = vmatprep.mubr.f32.mxu1 %v6855_v63  ;;  %v1609_v18 = vunpack.c.h.bf16 %v1417_v23  ;;  %v1690_v54 = vadd.f32 %v1626_v9, %v1498_v42  ;;  %v2136_v12 = vunpack.c.h.bf16 %v1944_v37  ;;  %v1435_v23 = vld [vmem:[#allocation9 + $0xe0] sm:$0xff]  }
 0x1e3   :  { %v4259_v34 = vrot.slane %v2785_v58, %v6711_v29  ;;  %v1466_v58 = vld [vmem:[#allocation9 + $0x1d8] sm:$0xff]   ;;  %v1991_v46 = vunpack.c.l.bf16 %v1927_v7  ;;  %v2119_v52 = vunpack.c.h.bf16 %v1927_v7  ;;  %v1627_v37 = vunpack.c.h.bf16 %v1435_v23 }
 0x1e4   :  { %2870 = vadd.xlane.f32.xlu1 %v1689_v2  ;;  %v4892_v61 = vsel %vm4101_vm14, %v4891_v53, %v4887_v10  ;;  %v1721_v2 = vadd.f32 %v1657_v4, %v1529_v57  ;;  %v1673_v62 = vadd.f32 %v1609_v18, %v1481_v21  ;;  %v1530_v57 = vunpack.c.l.bf16 %v1466_v58 }
 0x1e5   :  { %2836 = vadd.xlane.f32.xlu0 %v1672_v32  ;;  %v4260_v33 = vsel %vm4101_vm14, %v4259_v34, %v4255_v13  ;;  %v2853_v27 = vpop.xlane.xlu1 %2852  ;;  %v2039_v32 = vunpack.c.l.bf16 %v1975_v45  ;;  %v1449_v13 = vld [vmem:[#allocation9 + $0x150] sm:$0xff]   ;;  %v1658_v4 = vunpack.c.h.bf16 %v1466_v58  ;;  %v2183_v3 = vadd.f32 %v2119_v52, %v1991_v46 }
 0x1e6   :  { %v2851_v20 = vpop.xlane.xlu0 %2850  ;;  %v6867_v22 = vsel %vm5288_vm15, %v4892_v61, %v4260_v33  ;;  %v4426_v28 = vrot.slane %v2853_v27, %v6246_v48  ;;  %v2200_v33 = vadd.f32 %v2136_v12, %v2008_v11  ;;  %v1513_v39 = vunpack.c.l.bf16 %v1449_v13  ;;  %v1976_v27 = vld [vmem:[#allocation10 + $0x1c8] sm:$0xff]  }
 0x1e7   :  { %v4422_v15 = vrot.slane %v2851_v20, %v6243_v47  ;;  %5441 = vmatmul.mubr.f32.vlgmr.msra.gmra.mxu1 %v6867_v22  ;;  %v2231_v51 = vadd.f32 %v2167_v0, %v2039_v32  ;;  %v1641_v45 = vunpack.c.h.bf16 %v1449_v13  ;;  %v1959_v20 = vld [vmem:[#allocation10 + $0x140] sm:$0xff]   ;;  %v1722_v0 = vadd.f32 %v1658_v4, %v1530_v57 }
 0x1e8   :  { %2930 = vadd.xlane.f32.xlu1 %v6813_v16  ;;  %v2214_v16 = vadd.f32 %v2150_v19, %v2022_v36  ;;  %v2168_v36 = vunpack.c.h.bf16 %v1976_v27  ;;  %v2023_v19 = vunpack.c.l.bf16 %v1959_v20  ;;  %v1499_v18 = vunpack.c.l.bf16 %v1435_v23 }
 0x1e9   :  { %v4427_v59 = vsel %vm4003_vm0, %v4426_v28, %v4422_v15  ;;  %2896 = vadd.xlane.f32.xlu0 %v2182_v49  ;;  %v3109_v60 = vpop.xlane.xlu1 %3108 }
 0x1ea   :  { %v3107_v50 = vpop.xlane.xlu0 %3106  ;;  %v5058_v6 = vrot.slane %v3109_v60, %v6246_v48 }
 0x1eb   :  { %v5054_v25 = vrot.slane %v3107_v50, %v6243_v47  ;;  %v1705_v50 = vadd.f32 %v1641_v45, %v1513_v39 }
 0x1ec   :  { %3126 = vadd.xlane.f32.xlu1 %v1721_v2 }
 0x1ed   :  { %v5059_v41 = vsel %vm4003_vm0, %v5058_v6, %v5054_v25  ;;  %3092 = vadd.xlane.f32.xlu0 %v1704_v38  ;;  %v2821_v35 = vpop.xlane.xlu1 %2820  ;;  %v2040_v38 = vunpack.c.l.bf16 %v1976_v27 }
 0x1ee   :  { %v2819_v26 = vpop.xlane.xlu0 %2818  ;;  %v4347_v31 = vrot.slane %v2821_v35, %v6246_v48 }
 0x1ef   :  { %v4343_v40 = vrot.slane %v2819_v26, %v6243_v47 }
 0x1f0   :  { %3186 = vadd.xlane.f32.xlu1 %v2231_v51  ;;  %v1418_v51 = vld [vmem:[#allocation9 + $0x58] sm:$0xff]  }
 0x1f1   :  { %v4348_v49 = vsel %vm4003_vm0, %v4347_v31, %v4343_v40  ;;  %3152 = vadd.xlane.f32.xlu0 %v2214_v16  ;;  %v3075_v53 = vpop.xlane.xlu1 %3074  ;;  %v2232_v16 = vadd.f32 %v2168_v36, %v2040_v38  ;;  %v1482_v26 = vunpack.c.l.bf16 %v1418_v51  ;;  %v1610_v7 = vunpack.c.h.bf16 %v1418_v51  ;;  %v1945_v31 = vld [vmem:[#allocation10 + $0xd0] sm:$0xff]   ;;  %v1928_v40 = vld [vmem:[#allocation10 + $0x48] sm:$0xff]  }
 0x1f2   :  { %v2855_v34 = vpop.xlane.xlu0 %2854  ;;  %v4975_v15 = vrot.slane %v3075_v53, %v6243_v47  ;;  %v2137_v46 = vunpack.c.h.bf16 %v1945_v31  ;;  %v1992_v52 = vunpack.c.l.bf16 %v1928_v40  ;;  %v2120_v53 = vunpack.c.h.bf16 %v1928_v40 }
 0x1f3   :  { %v4431_v10 = vrot.slane %v2855_v34, %v6258_v14  ;;  %v1674_v13 = vadd.f32 %v1610_v7, %v1482_v26 }
 0x1f4   :  { %2872 = vadd.xlane.f32.xlu1 %v1690_v54  ;;  %v2184_v45 = vadd.f32 %v2120_v53, %v1992_v52  ;;  %v1929_v52 = vld [vmem:[#allocation10 + $0x50] sm:$0xff]  }
 0x1f5   :  { %v4432_v61 = vsel %vm4010_vm1, %v4431_v10, %v4427_v59  ;;  %2838 = vadd.xlane.f32.xlu0 %v1673_v62  ;;  %v3111_v24 = vpop.xlane.xlu1 %3110  ;;  %v2151_v59 = vunpack.c.h.bf16 %v1959_v20  ;;  %v2009_v62 = vunpack.c.l.bf16 %v1945_v31  ;;  %v1467_v10 = vld [vmem:[#allocation9 + $0x1e0] sm:$0xff]  }
 0x1f6   :  { %v3077_v28 = vpop.xlane.xlu0 %3076  ;;  %v5063_v2 = vrot.slane %v3111_v24, %v6258_v14  ;;  %v1531_v27 = vunpack.c.l.bf16 %v1467_v10  ;;  %v1659_v20 = vunpack.c.h.bf16 %v1467_v10 }
 0x1f7   :  { %v4979_v32 = vrot.slane %v3077_v28, %v6246_v48  ;;  %v2215_v21 = vadd.f32 %v2151_v59, %v2023_v19  ;;  %v2201_v39 = vadd.f32 %v2137_v46, %v2009_v62  ;;  %v1946_v46 = vld [vmem:[#allocation10 + $0xd8] sm:$0xff]  }
 0x1f8   :  { %v5064_v55 = vsel %vm4010_vm1, %v5063_v2, %v5059_v41  ;;  %2932 = vadd.xlane.f32.xlu1 %v2200_v33  ;;  %v1450_v33 = vld [vmem:[#allocation9 + $0x158] sm:$0xff]  }
 0x1f9   :  { %v4980_v60 = vsel %vm4003_vm0, %v4979_v32, %v4975_v15  ;;  %2898 = vadd.xlane.f32.xlu0 %v2183_v3  ;;  %v2857_v6 = vpop.xlane.xlu1 %2856  ;;  %v1514_v15 = vunpack.c.l.bf16 %v1450_v33  ;;  %v1642_v2 = vunpack.c.h.bf16 %v1450_v33  ;;  %v1977_v32 = vld [vmem:[#allocation10 + $0x1d0] sm:$0xff]   ;;  %v2121_v33 = vunpack.c.h.bf16 %v1929_v52 }
 0x1fa   :  { %v2823_v25 = vpop.xlane.xlu0 %2822  ;;  %v4436_v42 = vrot.slane %v2857_v6, %v6268_v44  ;;  %v2169_v23 = vunpack.c.h.bf16 %v1977_v32 }
 0x1fb   :  { %v4352_v9 = vrot.slane %v2823_v25, %v6258_v14  ;;  %v1706_v51 = vadd.f32 %v1642_v2, %v1514_v15 }
 0x1fc   :  { %v6890_v35 = vsel %vm4017_vm2, %v4436_v42, %v4432_v61  ;;  %3128 = vadd.xlane.f32.xlu1 %v1722_v0  ;;  %v1960_v0 = vld [vmem:[#allocation10 + $0x148] sm:$0xff]  }
 0x1fd   :  { %v6893_v41 = vsel %vm4010_vm1, %v4352_v9, %v4348_v49  ;;  %3094 = vadd.xlane.f32.xlu0 %v1705_v50  ;;  %v2917_v54 = vpop.xlane.xlu1 %2916  ;;  %v1691_v49 = vadd.f32 %v1627_v37, %v1499_v18  ;;  %v2041_v50 = vunpack.c.l.bf16 %v1977_v32  ;;  %v2024_v6 = vunpack.c.l.bf16 %v1960_v0  ;;  %v1436_v42 = vld [vmem:[#allocation9 + $0xe8] sm:$0xff]   ;;  %v7396_v18 = vld [vmem:[#allocation23_spill] sm:$0xff] }
 0x1fe   :  { %v2915_v11 = vpop.xlane.xlu0 %2914  ;;  %v4584_v12 = vrot.slane %v2917_v54, %v6246_v48  ;;  %v1500_v40 = vunpack.c.l.bf16 %v1436_v42  ;;  %v1628_v54 = vunpack.c.h.bf16 %v1436_v42  ;;  %v1961_v42 = vld [vmem:[#allocation10 + $0x150] sm:$0xff]  }
 0x1ff   :  { %v4580_v58 = vrot.slane %v2915_v11, %v6243_v47  ;;  %v2233_v7 = vadd.f32 %v2169_v23, %v2041_v50 }
 0x200   :  { %3188 = vadd.xlane.f32.xlu1 %v2232_v16 }
 0x201   :  { %v6898_v34 = vsel %vm4003_vm0, %v4584_v12, %v4580_v58  ;;  %3154 = vadd.xlane.f32.xlu0 %v2215_v21  ;;  %v3113_v57 = vpop.xlane.xlu1 %3112  ;;  %v1419_v21 = vld [vmem:[#allocation9 + $0x60] sm:$0xff]  }
 0x202   :  { %v3079_v4 = vpop.xlane.xlu0 %3078  ;;  %v5068_v61 = vrot.slane %v3113_v57, %v6268_v44  ;;  %v1483_v58 = vunpack.c.l.bf16 %v1419_v21  ;;  %v1611_v62 = vunpack.c.h.bf16 %v1419_v21  ;;  %v2010_v57 = vunpack.c.l.bf16 %v1946_v46 }
 0x203   :  { %v4984_v3 = vrot.slane %v3079_v4, %v6258_v14  ;;  %v2138_v4 = vunpack.c.h.bf16 %v1946_v46  ;;  %v3511_v46 = vld [vmem:[#allocation12 + $0x9a8] sm:$0xff] }
 0x204   :  { %v6903_v24 = vsel %vm4017_vm2, %v5068_v61, %v5064_v55  ;;  %2874 = vadd.xlane.f32.xlu1 %v1691_v49  ;;  %v2152_v55 = vunpack.c.h.bf16 %v1960_v0 }
 0x205   :  { %v6906_v28 = vsel %vm4010_vm1, %v4984_v3, %v4980_v60  ;;  %2840 = vadd.xlane.f32.xlu0 %v1674_v13  ;;  %v3173_v38 = vpop.xlane.xlu1 %3172  ;;  %v1723_v60 = vadd.f32 %v1659_v20, %v1531_v27  ;;  %v1675_v3 = vadd.f32 %v1611_v62, %v1483_v58  ;;  %v1451_v20 = vld [vmem:[#allocation9 + $0x160] sm:$0xff]   ;;  %v2202_v32 = vadd.f32 %v2138_v4, %v2010_v57  ;;  %v1437_v58 = vld [vmem:[#allocation9 + $0xf0] sm:$0xff]   ;;  %v1420_v62 = vld [vmem:[#allocation9 + $0x68] sm:$0xff]  }
 0x206   :  { %v3171_v36 = vpop.xlane.xlu0 %3170  ;;  %v5216_v19 = vrot.slane %v3173_v38, %v6246_v48  ;;  %v2216_v31 = vadd.f32 %v2152_v55, %v2024_v6  ;;  %v1515_v23 = vunpack.c.l.bf16 %v1451_v20  ;;  %v1643_v6 = vunpack.c.h.bf16 %v1451_v20  ;;  %v3519_v55 = vld [vmem:[#allocation12 + $0x9e8] sm:$0xff] }
 0x207   :  { %v5212_v59 = vrot.slane %v3171_v36, %v6243_v47  ;;  %5447 = vmatprep.subr.mxu0 %v3519_v55  ;;  %v3507_v4 = vld [vmem:[#allocation12 + $0x988] sm:$0xff] }
 0x208   :  { %2934 = vadd.xlane.f32.xlu1 %v2201_v39  ;;  %v1468_v39 = vld [vmem:[#allocation9 + $0x1e8] sm:$0xff]  }
 0x209   :  { %v6911_v25 = vsel %vm4003_vm0, %v5216_v19, %v5212_v59  ;;  %2900 = vadd.xlane.f32.xlu0 %v2184_v45  ;;  %v2859_v9 = vpop.xlane.xlu1 %2858  ;;  %v1532_v38 = vunpack.c.l.bf16 %v1468_v39  ;;  %v1660_v36 = vunpack.c.h.bf16 %v1468_v39  ;;  %v1978_v19 = vld [vmem:[#allocation10 + $0x1d8] sm:$0xff]   ;;  %v3506_v39 = vld [vmem:[#allocation12 + $0x980] sm:$0xff]  ;;  %v3503_v20 = vld [vmem:[#allocation12 + $0x968] sm:$0xff] }
 0x20a   :  { %v2825_v16 = vpop.xlane.xlu0 %2824  ;;  %v4441_v37 = vrot.slane %v2859_v9, %v7396_v18  ;;  %v3518_v9 = vld [vmem:[#allocation12 + $0x9e0] sm:$0xff]  ;;  %v2042_v21 = vunpack.c.l.bf16 %v1978_v19 }
 0x20b   :  { %v4357_v26 = vrot.slane %v2825_v16, %v6268_v44  ;;  %5448 = vmatpush1.msra.mxu0 %v3518_v9 }
 0x20c   :  { %v6917_v11 = vsel %vm4024_vm3, %v4441_v37, %v6890_v35  ;;  %3130 = vadd.xlane.f32.xlu1 %v1723_v60  ;;  %v1993_v35 = vunpack.c.l.bf16 %v1929_v52  ;;  %v2170_v37 = vunpack.c.h.bf16 %v1978_v19  ;;  %v3502_v19 = vld [vmem:[#allocation12 + $0x960] sm:$0xff] }
 0x20d   :  { %v6921_v12 = vsel %vm4017_vm2, %v4357_v26, %v6893_v41  ;;  %3096 = vadd.xlane.f32.xlu0 %v1706_v51  ;;  %v2885_v53 = vpop.xlane.xlu1 %2884  ;;  %v1692_v41 = vadd.f32 %v1628_v54, %v1500_v40  ;;  %v1724_v26 = vadd.f32 %v1660_v36, %v1532_v38  ;;  %v2025_v40 = vunpack.c.l.bf16 %v1961_v42 }
 0x20e   :  { %v2883_v49 = vpop.xlane.xlu0 %2882  ;;  %v4505_v13 = vrot.slane %v2885_v53, %v6246_v48  ;;  %v2185_v0 = vadd.f32 %v2121_v33, %v1993_v35  ;;  %v2153_v54 = vunpack.c.h.bf16 %v1961_v42  ;;  %v1501_v35 = vunpack.c.l.bf16 %v1437_v58 }
 0x20f   :  { %v4501_v10 = vrot.slane %v2883_v49, %v6243_v47  ;;  %v3510_v49 = vld [vmem:[#allocation12 + $0x9a0] sm:$0xff]  ;;  %v1629_v33 = vunpack.c.h.bf16 %v1437_v58 }
 0x210   :  { %3190 = vadd.xlane.f32.xlu1 %v2233_v7 }
 0x211   :  { %v6926_v61 = vsel %vm4003_vm0, %v4505_v13, %v4501_v10  ;;  %3156 = vadd.xlane.f32.xlu0 %v2216_v31  ;;  %v3081_v45 = vpop.xlane.xlu1 %3080  ;;  %v1707_v31 = vadd.f32 %v1643_v6, %v1515_v23 }
 0x212   :  { %v2919_v27 = vpop.xlane.xlu0 %2918  ;;  %v4989_v15 = vrot.slane %v3081_v45, %v6268_v44 }
 0x213   :  { %v4589_v2 = vrot.slane %v2919_v27, %v6258_v14 }
 0x214   :  { %v6932_v59 = vsel %vm4017_vm2, %v4989_v15, %v6906_v28  ;;  %2876 = vadd.xlane.f32.xlu1 %v1692_v41  ;;  %v3515_v28 = vld [vmem:[#allocation12 + $0x9c8] sm:$0xff]  ;;  %v1484_v41 = vunpack.c.l.bf16 %v1420_v62 }
 0x215   :  { %v6936_v50 = vsel %vm4010_vm1, %v4589_v2, %v6898_v34  ;;  %2842 = vadd.xlane.f32.xlu0 %v1675_v3  ;;  %v3139_v60 = vpop.xlane.xlu1 %3138  ;;  %5449 = vmatprep.subr.mxu0 %v3515_v28  ;;  %v3514_v34 = vld [vmem:[#allocation12 + $0x9c0] sm:$0xff]  ;;  %v1612_v3 = vunpack.c.h.bf16 %v1420_v62 }
 0x216   :  { %v3115_v51 = vpop.xlane.xlu0 %3114  ;;  %5450 = vmatpush1.msra.mxu0 %v3514_v34  ;;  %v5133_v13 = vrot.slane %v3139_v60, %v6243_v47  ;;  %v2217_v47 = vadd.f32 %v2153_v54, %v2025_v40  ;;  %v3499_v60 = vld [vmem:[#allocation12 + $0x948] sm:$0xff]  ;;  %v3498_v28 = vld [vmem:[#allocation12 + $0x940] sm:$0xff] }
 0x217   :  { %v5073_v16 = vrot.slane %v3115_v51, %v7396_v18  ;;  %5451 = vmatprep.subr.mxu0 %v3511_v46  ;;  %v1676_v23 = vadd.f32 %v1612_v3, %v1484_v41  ;;  %v3643_v41 = vld [vmem:[#allocation12 + $0xdc8] sm:$0xff] }
 0x218   :  { %2936 = vadd.xlane.f32.xlu1 %v2202_v32  ;;  %5452 = vmatpush1.msra.mxu0 %v3510_v49  ;;  %v1930_v32 = vld [vmem:[#allocation10 + $0x58] sm:$0xff]   ;;  %v3647_v49 = vld [vmem:[#allocation12 + $0xde8] sm:$0xff] }
 0x219   :  { %v6941_v7 = vsel %vm4024_vm3, %v5073_v16, %v6903_v24  ;;  %2902 = vadd.xlane.f32.xlu0 %v2185_v0  ;;  %v3175_v52 = vpop.xlane.xlu1 %3174  ;;  %v2234_v24 = vadd.f32 %v2170_v37, %v2042_v21  ;;  %5453 = vmatprep.subr.mxu0 %v3507_v4  ;;  %v7397_v0 = vld [vmem:[#allocation24_spill] sm:$0xff]  ;;  %v1994_v9 = vunpack.c.l.bf16 %v1930_v32  ;;  %v2122_v16 = vunpack.c.h.bf16 %v1930_v32  ;;  %v1469_v21 = vld [vmem:[#allocation9 + $0x1f0] sm:$0xff]   ;;  %v1452_v37 = vld [vmem:[#allocation9 + $0x168] sm:$0xff]  }
 0x21a   :  { %v3141_v53 = vpop.xlane.xlu0 %3140  ;;  %v5221_v10 = vrot.slane %v3175_v52, %v6258_v14  ;;  %5454 = vmatpush1.msra.mxu0 %v3506_v39  ;;  %v1661_v40 = vunpack.c.h.bf16 %v1469_v21  ;;  %v1516_v54 = vunpack.c.l.bf16 %v1452_v37  ;;  %v1644_v58 = vunpack.c.h.bf16 %v1452_v37  ;;  %v1979_v52 = vld [vmem:[#allocation10 + $0x1e0] sm:$0xff]   ;;  %5518 = vmatprep.subr.mxu1 %v3647_v49  ;;  %v3631_v49 = vld [vmem:[#allocation12 + $0xd68] sm:$0xff] }
 0x21b   :  { %v5137_v57 = vrot.slane %v3141_v53, %v6246_v48  ;;  %v1947_v48 = vld [vmem:[#allocation10 + $0xe0] sm:$0xff]   ;;  %5455 = vmatprep.subr.mxu0 %v3503_v20  ;;  %v2186_v46 = vadd.f32 %v2122_v16, %v1994_v9  ;;  %v3491_v53 = vld [vmem:[#allocation12 + $0x908] sm:$0xff]  ;;  %v1438_v20 = vld [vmem:[#allocation9 + $0xf8] sm:$0xff]  }
 0x21c   :  { %v6948_v45 = vsel %vm4010_vm1, %v5221_v10, %v6911_v25  ;;  %3132 = vadd.xlane.f32.xlu1 %v1724_v26  ;;  %v1693_v25 = vadd.f32 %v1629_v33, %v1501_v35  ;;  %v2011_v6 = vunpack.c.l.bf16 %v1947_v48  ;;  %v2139_v55 = vunpack.c.h.bf16 %v1947_v48  ;;  %5456 = vmatpush1.msra.mxu0 %v3502_v19  ;;  %v3490_v33 = vld [vmem:[#allocation12 + $0x900] sm:$0xff] }
 0x21d   :  { %v6951_v27 = vsel %vm4003_vm0, %v5137_v57, %v5133_v13  ;;  %3098 = vadd.xlane.f32.xlu0 %v1707_v31  ;;  %v2861_v15 = vpop.xlane.xlu1 %2860  ;;  %5457 = vmatprep.subr.mxu0 %v3499_v60  ;;  %v3495_v31 = vld [vmem:[#allocation12 + $0x928] sm:$0xff]  ;;  %v1962_v57 = vld [vmem:[#allocation10 + $0x158] sm:$0xff]   ;;  %v1708_v39 = vadd.f32 %v1644_v58, %v1516_v54  ;;  %v2171_v48 = vunpack.c.h.bf16 %v1979_v52  ;;  %v3638_v9 = vld [vmem:[#allocation12 + $0xda0] sm:$0xff]  ;;  %v1630_v37 = vunpack.c.h.bf16 %v1438_v20 }
 0x21e   :  { %v2827_v2 = vpop.xlane.xlu0 %2826  ;;  %v4446_v38 = vrot.slane %v2861_v15, %v7397_v0  ;;  %5458 = vmatpush1.msra.mxu0 %v3498_v28  ;;  %v2203_v62 = vadd.f32 %v2139_v55, %v2011_v6  ;;  %v3487_v15 = vld [vmem:[#allocation12 + $0x8e8] sm:$0xff]  ;;  %v2154_v19 = vunpack.c.h.bf16 %v1962_v57  ;;  %v3482_v58 = vld [vmem:[#allocation12 + $0x8c0] sm:$0xff]  ;;  %vm5903_vm0 = vcmask 1041408  }
 0x21f   :  { %v4362_v36 = vrot.slane %v2827_v2, %v7396_v18  ;;  %5459 = vmatprep.subr.mxu0 %v3495_v31  ;;  %v3642_v2 = vld [vmem:[#allocation12 + $0xdc0] sm:$0xff]  ;;  %v3639_v6 = vld [vmem:[#allocation12 + $0xda8] sm:$0xff] }
 0x220   :  { %v6957_v51 = vsel %vm4031_vm4, %v4446_v38, %v6917_v11  ;;  %3192 = vadd.xlane.f32.xlu1 %v2234_v24  ;;  %v1533_v11 = vunpack.c.l.bf16 %v1469_v21  ;;  %v3646_v24 = vld [vmem:[#allocation12 + $0xde0] sm:$0xff]  ;;  %v1502_v21 = vunpack.c.l.bf16 %v1438_v20  ;;  %v3483_v28 = vld [vmem:[#allocation12 + $0x8c8] sm:$0xff]  ;;  %v1470_v20 = vld [vmem:[#allocation9 + $0x1f8] sm:$0xff]  }
 0x221   :  { %v6961_v42 = vsel %vm4024_vm3, %v4362_v36, %v6921_v12  ;;  %3158 = vadd.xlane.f32.xlu0 %v2217_v47  ;;  %v6963_v26 = vpop.xlane.xlu1 %2920  ;;  %v3494_v12 = vld [vmem:[#allocation12 + $0x920] sm:$0xff]  ;;  %5519 = vmatpush1.msra.mxu1 %v3646_v24  ;;  %v2043_v47 = vunpack.c.l.bf16 %v1979_v52  ;;  %v2026_v36 = vunpack.c.l.bf16 %v1962_v57  ;;  %v3635_v31 = vld [vmem:[#allocation12 + $0xd88] sm:$0xff] }
 0x222   :  { %v6965_v34 = vpop.xlane.xlu0 %2886  ;;  %5460 = vmatpush1.msra.mxu0 %v3494_v12  ;;  %v1725_v3 = vadd.f32 %v1661_v40, %v1533_v11  ;;  %5520 = vmatprep.subr.mxu1 %v3643_v41  ;;  %v3634_v12 = vld [vmem:[#allocation12 + $0xd80] sm:$0xff]  ;;  %v1694_v41 = vadd.f32 %v1630_v37, %v1502_v21  ;;  %v3623_v21 = vld [vmem:[#allocation12 + $0xd28] sm:$0xff] }
 0x223   :  { %5461 = vmatprep.subr.mxu0 %v3491_v53  ;;  %5521 = vmatpush1.msra.mxu1 %v3642_v2  ;;  %v2235_v11 = vadd.f32 %v2171_v48, %v2043_v47  ;;  %v2218_v52 = vadd.f32 %v2154_v19, %v2026_v36  ;;  %v3479_v53 = vld [vmem:[#allocation12 + $0x8a8] sm:$0xff]  ;;  %v4510_v47 = vrot.slane %v6965_v34, %v6258_v14  ;;  %v3626_v34 = vld [vmem:[#allocation12 + $0xd40] sm:$0xff] }
 0x224   :  { %2878 = vadd.xlane.f32.xlu1 %v1693_v25  ;;  %v1421_v25 = vld [vmem:[#allocation9 + $0x70] sm:$0xff]   ;;  %5462 = vmatpush1.msra.mxu0 %v3490_v33  ;;  %v3627_v2 = vld [vmem:[#allocation12 + $0xd48] sm:$0xff] }
 0x225   :  { %2844 = vadd.xlane.f32.xlu0 %v1676_v23  ;;  %v3117_v13 = vpop.xlane.xlu1 %3116  ;;  %v3486_v23 = vld [vmem:[#allocation12 + $0x8e0] sm:$0xff]  ;;  %5463 = vmatprep.subr.mxu0 %v3487_v15  ;;  %v1485_v40 = vunpack.c.l.bf16 %v1421_v25  ;;  %v1613_v54 = vunpack.c.h.bf16 %v1421_v25  ;;  %v3475_v15 = vld [vmem:[#allocation12 + $0x888] sm:$0xff] }
 0x226   :  { %v3083_v10 = vpop.xlane.xlu0 %3082  ;;  %v5078_v4 = vrot.slane %v3117_v13, %v7397_v0  ;;  %5522 = vmatprep.subr.mxu1 %v3639_v6  ;;  %5464 = vmatpush1.msra.mxu0 %v3486_v23  ;;  %v1453_v23 = vld [vmem:[#allocation9 + $0x170] sm:$0xff]  }
 0x227   :  { %v4994_v35 = vrot.slane %v3083_v10, %v7396_v18  ;;  %5523 = vmatpush1.msra.mxu1 %v3638_v9  ;;  %5465 = vmatprep.subr.mxu0 %v3483_v28  ;;  %v1677_v48 = vadd.f32 %v1613_v54, %v1485_v40  ;;  %v1517_v28 = vunpack.c.l.bf16 %v1453_v23  ;;  %v3470_v40 = vld [vmem:[#allocation12 + $0x860] sm:$0xff] }
 0x228   :  { %v6971_v32 = vsel %vm4031_vm4, %v5078_v4, %v6941_v7  ;;  %2938 = vadd.xlane.f32.xlu1 %v2203_v62  ;;  %v1931_v4 = vld [vmem:[#allocation10 + $0x60] sm:$0xff]   ;;  %5524 = vmatprep.subr.mxu1 %v3635_v31  ;;  %v1645_v31 = vunpack.c.h.bf16 %v1453_v23 }
 0x229   :  { %v6975_v38 = vsel %vm4024_vm3, %v4994_v35, %v6932_v59  ;;  %2904 = vadd.xlane.f32.xlu0 %v2186_v46  ;;  %v3177_v55 = vpop.xlane.xlu1 %3176  ;;  %v1948_v59 = vld [vmem:[#allocation10 + $0xe8] sm:$0xff]   ;;  %5466 = vmatpush1.msra.mxu0 %v3482_v58  ;;  %v2123_v25 = vunpack.c.h.bf16 %v1931_v4  ;;  %v3622_v54 = vld [vmem:[#allocation12 + $0xd20] sm:$0xff] }
 0x22a   :  { %v3143_v60 = vpop.xlane.xlu0 %3142  ;;  %v5226_v16 = vrot.slane %v3177_v55, %v6268_v44  ;;  %v2012_v57 = vunpack.c.l.bf16 %v1948_v59  ;;  %v2140_v24 = vunpack.c.h.bf16 %v1948_v59  ;;  %v7398_v35 = vld [vmem:[#allocation25_spill] sm:$0xff]  ;;  %5525 = vmatpush1.msra.mxu1 %v3634_v12  ;;  %5467 = vmatprep.subr.mxu0 %v3479_v53  ;;  %v4511_v59 = vsel %vm4010_vm1, %v4510_v47, %v6926_v61 }
 0x22b   :  { %v5142_v7 = vrot.slane %v3143_v60, %v6258_v14  ;;  %5526 = vmatprep.subr.mxu1 %v3631_v49  ;;  %v3474_v14 = vld [vmem:[#allocation12 + $0x880] sm:$0xff]  ;;  %v3619_v53 = vld [vmem:[#allocation12 + $0xd08] sm:$0xff] }
 0x22c   :  { %v6981_v62 = vsel %vm4017_vm2, %v5226_v16, %v6948_v45  ;;  %3134 = vadd.xlane.f32.xlu1 %v1725_v3  ;;  %v3630_v3 = vld [vmem:[#allocation12 + $0xd60] sm:$0xff]  ;;  %v2204_v60 = vadd.f32 %v2140_v24, %v2012_v57  ;;  %v1534_v16 = vunpack.c.l.bf16 %v1470_v20  ;;  %v3615_v47 = vld [vmem:[#allocation12 + $0xce8] sm:$0xff] }
 0x22d   :  { %v6985_v46 = vsel %vm4010_vm1, %v5142_v7, %v6951_v27  ;;  %3100 = vadd.xlane.f32.xlu0 %v1708_v39  ;;  %v2863_v13 = vpop.xlane.xlu1 %2862  ;;  %v3478_v27 = vld [vmem:[#allocation12 + $0x8a0] sm:$0xff]  ;;  %v4594_v39 = vrot.slane %v6963_v26, %v6268_v44  ;;  %v1995_v26 = vunpack.c.l.bf16 %v1931_v4  ;;  %5527 = vmatpush1.msra.mxu1 %v3630_v3  ;;  %v1662_v7 = vunpack.c.h.bf16 %v1470_v20  ;;  %v1932_v3 = vld [vmem:[#allocation10 + $0x68] sm:$0xff]  }
 0x22e   :  { %v2829_v10 = vpop.xlane.xlu0 %2828  ;;  %v4451_v33 = vrot.slane %v2863_v13, %v7398_v35  ;;  %5468 = vmatpush1.msra.mxu0 %v3478_v27  ;;  %5528 = vmatprep.subr.mxu1 %v3627_v2  ;;  %v1963_v13 = vld [vmem:[#allocation10 + $0x160] sm:$0xff]   ;;  %v1709_v27 = vadd.f32 %v1645_v31, %v1517_v28  ;;  %v3583_v31 = vld [vmem:[#allocation12 + $0xbe8] sm:$0xff] }
 0x22f   :  { %v4367_v45 = vrot.slane %v2829_v10, %v7397_v0  ;;  %5469 = vmatprep.subr.mxu0 %v3475_v15  ;;  %v4595_v37 = vsel %vm4017_vm2, %v4594_v39, %v6936_v50  ;;  %5529 = vmatpush1.msra.mxu1 %v3626_v34  ;;  %v3467_v50 = vld [vmem:[#allocation12 + $0x848] sm:$0xff]  ;;  %v2027_v15 = vunpack.c.l.bf16 %v1963_v13  ;;  %v2155_v2 = vunpack.c.h.bf16 %v1963_v13  ;;  %v3614_v23 = vld [vmem:[#allocation12 + $0xce0] sm:$0xff] }
 0x230   :  { %v6995_v36 = vsel %vm4038_vm5, %v4451_v33, %v6957_v51  ;;  %3194 = vadd.xlane.f32.xlu1 %v2235_v11  ;;  %v1980_v11 = vld [vmem:[#allocation10 + $0x1e8] sm:$0xff]   ;;  %5470 = vmatpush1.msra.mxu0 %v3474_v14  ;;  %v3466_v33 = vld [vmem:[#allocation12 + $0x840] sm:$0xff] }
 0x231   :  { %v6999_v19 = vsel %vm4031_vm4, %v4367_v45, %v6961_v42  ;;  %3160 = vadd.xlane.f32.xlu0 %v2218_v52  ;;  %v2923_v6 = vpop.xlane.xlu1 %2922  ;;  %v3471_v42 = vld [vmem:[#allocation12 + $0x868] sm:$0xff]  ;;  %v2187_v52 = vadd.f32 %v2123_v25, %v1995_v26  ;;  %5530 = vmatprep.subr.mxu1 %v3623_v21  ;;  %v2044_v24 = vunpack.c.l.bf16 %v1980_v11  ;;  %v2172_v4 = vunpack.c.h.bf16 %v1980_v11  ;;  %v3618_v45 = vld [vmem:[#allocation12 + $0xd00] sm:$0xff]  ;;  %v1422_v26 = vld [vmem:[#allocation9 + $0x78] sm:$0xff]  }
 0x232   :  { %v2889_v55 = vpop.xlane.xlu0 %2888  ;;  %v4599_v9 = vrot.slane %v2923_v6, %v7396_v18  ;;  %5471 = vmatprep.subr.mxu0 %v3471_v42  ;;  %5531 = vmatpush1.msra.mxu1 %v3622_v54  ;;  %v3463_v39 = vld [vmem:[#allocation12 + $0x828] sm:$0xff]  ;;  %v3462_v25 = vld [vmem:[#allocation12 + $0x820] sm:$0xff]  ;;  %v1454_v42 = vld [vmem:[#allocation9 + $0x178] sm:$0xff]   ;;  %v2219_v28 = vadd.f32 %v2155_v2, %v2027_v15 }
 0x233   :  { %v4515_v51 = vrot.slane %v2889_v55, %v6268_v44  ;;  %5472 = vmatpush1.msra.mxu0 %v3470_v40  ;;  %5532 = vmatprep.subr.mxu1 %v3619_v53  ;;  %v2236_v55 = vadd.f32 %v2172_v4, %v2044_v24  ;;  %v3458_v21 = vld [vmem:[#allocation12 + $0x800] sm:$0xff]  ;;  %v3607_v11 = vld [vmem:[#allocation12 + $0xca8] sm:$0xff]  ;;  %v1981_v24 = vld [vmem:[#allocation10 + $0x1f0] sm:$0xff]  }
 0x234   :  { %v7008_v58 = vsel %vm4024_vm3, %v4599_v9, %v4595_v37  ;;  %2880 = vadd.xlane.f32.xlu1 %v1694_v41  ;;  %v1726_v41 = vadd.f32 %v1662_v7, %v1534_v16  ;;  %5473 = vmatprep.subr.mxu0 %v3467_v50  ;;  %v3459_v9 = vld [vmem:[#allocation12 + $0x808] sm:$0xff]  ;;  %v1486_v16 = vunpack.c.l.bf16 %v1422_v26  ;;  %v1614_v7 = vunpack.c.h.bf16 %v1422_v26  ;;  %v3610_v37 = vld [vmem:[#allocation12 + $0xcc0] sm:$0xff] }
 0x235   :  { %v7011_v12 = vsel %vm4017_vm2, %v4515_v51, %v4511_v59  ;;  %2846 = vadd.xlane.f32.xlu0 %v1677_v48  ;;  %v3119_v49 = vpop.xlane.xlu1 %3118  ;;  %5474 = vmatpush1.msra.mxu0 %v3466_v33  ;;  %v2124_v51 = vunpack.c.h.bf16 %v1932_v3  ;;  %v7399_v50 = vld [vmem:[#allocation26_spill] sm:$0xff]  ;;  %v3582_v13 = vld [vmem:[#allocation12 + $0xbe0] sm:$0xff] }
 0x236   :  { %v3085_v61 = vpop.xlane.xlu0 %3084  ;;  %v5083_v10 = vrot.slane %v3119_v49, %v7398_v35  ;;  %5533 = vmatpush1.msra.mxu1 %v3618_v45  ;;  %5475 = vmatprep.subr.mxu0 %v3463_v39  ;;  %v3579_v4 = vld [vmem:[#allocation12 + $0xbc8] sm:$0xff]  ;;  %v3602_v15 = vld [vmem:[#allocation12 + $0xc80] sm:$0xff] }
 0x237   :  { %v4999_v57 = vrot.slane %v3085_v61, %v7397_v0  ;;  %5534 = vmatprep.subr.mxu1 %v3615_v47  ;;  %5476 = vmatpush1.msra.mxu0 %v3462_v25  ;;  %v1646_v61 = vunpack.c.h.bf16 %v1454_v42  ;;  %v3603_v33 = vld [vmem:[#allocation12 + $0xc88] sm:$0xff]  ;;  %v3578_v47 = vld [vmem:[#allocation12 + $0xbc0] sm:$0xff] }
 0x238   :  { %v7017_v48 = vsel %vm4038_vm5, %v5083_v10, %v6971_v32  ;;  %2940 = vadd.xlane.f32.xlu1 %v2204_v60  ;;  %v1996_v60 = vunpack.c.l.bf16 %v1932_v3  ;;  %5535 = vmatpush1.msra.mxu1 %v3614_v23  ;;  %v1964_v39 = vld [vmem:[#allocation10 + $0x168] sm:$0xff]  }
 0x239   :  { %v7021_v20 = vsel %vm4031_vm4, %v4999_v57, %v6975_v38  ;;  %2906 = vadd.xlane.f32.xlu0 %v2187_v52  ;;  %v3179_v14 = vpop.xlane.xlu1 %3178  ;;  %v3611_v38 = vld [vmem:[#allocation12 + $0xcc8] sm:$0xff]  ;;  %v1949_v52 = vld [vmem:[#allocation10 + $0xf0] sm:$0xff]   ;;  %5477 = vmatprep.subr.mxu0 %v3459_v9  ;;  %v1678_v57 = vadd.f32 %v1614_v7, %v1486_v16  ;;  %v1950_v9 = vld [vmem:[#allocation10 + $0xf8] sm:$0xff]  }
 0x23a   :  { %v3145_v34 = vpop.xlane.xlu0 %3144  ;;  %v5231_v6 = vrot.slane %v3179_v14, %v7396_v18  ;;  %5536 = vmatprep.subr.mxu1 %v3611_v38  ;;  %5478 = vmatpush1.msra.mxu0 %v3458_v21  ;;  %v2188_v10 = vadd.f32 %v2124_v51, %v1996_v60  ;;  %v2141_v3 = vunpack.c.h.bf16 %v1949_v52  ;;  %v3575_v14 = vld [vmem:[#allocation12 + $0xba8] sm:$0xff]  ;;  %v3574_v38 = vld [vmem:[#allocation12 + $0xba0] sm:$0xff] }
 0x23b   :  { %v5147_v32 = vrot.slane %v3145_v34, %v6268_v44  ;;  %5537 = vmatpush1.msra.mxu1 %v3610_v37  ;;  %5479 = vmatprep.subr.mxu0 %v3583_v31  ;;  %v2045_v34 = vunpack.c.l.bf16 %v1981_v24  ;;  %v3598_v60 = vld [vmem:[#allocation12 + $0xc60] sm:$0xff]  ;;  %v3595_v21 = vld [vmem:[#allocation12 + $0xc48] sm:$0xff]  ;;  %v1933_v31 = vld [vmem:[#allocation10 + $0x70] sm:$0xff]  }
 0x23c   :  { %v7027_v59 = vsel %vm4024_vm3, %v5231_v6, %v6981_v62  ;;  %3136 = vadd.xlane.f32.xlu1 %v1726_v41  ;;  %v1518_v62 = vunpack.c.l.bf16 %v1454_v42  ;;  %5538 = vmatprep.subr.mxu1 %v3607_v11  ;;  %v2173_v6 = vunpack.c.h.bf16 %v1981_v24  ;;  %v3571_v42 = vld [vmem:[#allocation12 + $0xb88] sm:$0xff]  ;;  %v2125_v24 = vunpack.c.h.bf16 %v1933_v31 }
 0x23d   :  { %v7031_v44 = vsel %vm4017_vm2, %v5147_v32, %v6985_v46  ;;  %3102 = vadd.xlane.f32.xlu0 %v1709_v27  ;;  %v2865_v40 = vpop.xlane.xlu1 %2864  ;;  %v3606_v46 = vld [vmem:[#allocation12 + $0xca0] sm:$0xff]  ;;  %v2013_v27 = vunpack.c.l.bf16 %v1949_v52  ;;  %5480 = vmatpush2.msra.mxu0 %v3582_v13  ;;  %v2028_v32 = vunpack.c.l.bf16 %v1964_v39  ;;  %v3591_v13 = vld [vmem:[#allocation12 + $0xc28] sm:$0xff] }
 0x23e   :  { %v2831_v54 = vpop.xlane.xlu0 %2830  ;;  %v4456_v53 = vrot.slane %v2865_v40, %v7399_v50  ;;  %5539 = vmatpush1.msra.mxu1 %v3606_v46  ;;  %v1710_v23 = vadd.f32 %v1646_v61, %v1518_v62  ;;  %5481 = vmatprep.subr.mxu0 %v3579_v4  ;;  %v3570_v52 = vld [vmem:[#allocation12 + $0xb80] sm:$0xff]  ;;  %v1982_v62 = vld [vmem:[#allocation10 + $0x1f8] sm:$0xff]   ;;  %v3567_v61 = vld [vmem:[#allocation12 + $0xb68] sm:$0xff] }
 0x23f   :  { %v4372_v49 = vrot.slane %v2831_v54, %v7398_v35  ;;  %5540 = vmatprep.subr.mxu1 %v3603_v33  ;;  %5482 = vmatpush2.msra.mxu0 %v3578_v47  ;;  %v2205_v7 = vadd.f32 %v2141_v3, %v2013_v27  ;;  %v2142_v54 = vunpack.c.h.bf16 %v1950_v9  ;;  %v1965_v4 = vld [vmem:[#allocation10 + $0x170] sm:$0xff]   ;;  %v3566_v33 = vld [vmem:[#allocation12 + $0xb60] sm:$0xff] }
 0x240   :  { %v7037_v45 = vsel %vm4045_vm6, %v4456_v53, %v6995_v36  ;;  %3196 = vadd.xlane.f32.xlu1 %v2236_v55  ;;  %v2156_v55 = vunpack.c.h.bf16 %v1964_v39  ;;  %5541 = vmatpush1.msra.mxu1 %v3602_v15  ;;  %v2237_v53 = vadd.f32 %v2173_v6, %v2045_v34  ;;  %v3590_v27 = vld [vmem:[#allocation12 + $0xc20] sm:$0xff] }
 0x241   :  { %v7041_v41 = vsel %vm4038_vm5, %v4372_v49, %v6999_v19  ;;  %3162 = vadd.xlane.f32.xlu0 %v2219_v28  ;;  %v2925_v2 = vpop.xlane.xlu1 %2924  ;;  %v3599_v19 = vld [vmem:[#allocation12 + $0xc68] sm:$0xff]  ;;  %5483 = vmatprep.subr.mxu0 %v3575_v14  ;;  %v3562_v14 = vld [vmem:[#allocation12 + $0xb40] sm:$0xff] }
 0x242   :  { %v2891_v26 = vpop.xlane.xlu0 %2890  ;;  %v4604_v25 = vrot.slane %v2925_v2, %v7397_v0  ;;  %5542 = vmatprep.subr.mxu1 %v3599_v19  ;;  %5484 = vmatpush2.msra.mxu0 %v3574_v38  ;;  %v2220_v49 = vadd.f32 %v2156_v55, %v2028_v32  ;;  %v3563_v2 = vld [vmem:[#allocation12 + $0xb48] sm:$0xff]  ;;  %v3586_v19 = vld [vmem:[#allocation12 + $0xc00] sm:$0xff]  ;;  %v1966_v32 = vld [vmem:[#allocation10 + $0x178] sm:$0xff]  }
 0x243   :  { %v4520_v36 = vrot.slane %v2891_v26, %v7396_v18  ;;  %5543 = vmatpush1.msra.mxu1 %v3598_v60  ;;  %5485 = vmatprep.subr.mxu0 %v3571_v42  ;;  %v2046_v26 = vunpack.c.l.bf16 %v1982_v62  ;;  %v3559_v55 = vld [vmem:[#allocation12 + $0xb28] sm:$0xff]  ;;  %v7400_v42 = vld [vmem:[#allocation27_spill] sm:$0xff] }
 0x244   :  { %v7047_v51 = vsel %vm4031_vm4, %v4604_v25, %v7008_v58  ;;  %2908 = vadd.xlane.f32.xlu1 %v2188_v10  ;;  %v2014_v58 = vunpack.c.l.bf16 %v1950_v9  ;;  %5544 = vmatprep.subr.mxu1 %v3595_v21  ;;  %v2174_v25 = vunpack.c.h.bf16 %v1982_v62  ;;  %v3711_v9 = vld [vmem:[#allocation12 + $0xfe8] sm:$0xff]  ;;  %v3554_v62 = vld [vmem:[#allocation12 + $0xb00] sm:$0xff] }
 0x245   :  { %v7051_v16 = vsel %vm4024_vm3, %v4520_v36, %v7011_v12  ;;  %2848 = vadd.xlane.f32.xlu0 %v1678_v57  ;;  %v3121_v37 = vpop.xlane.xlu1 %3120  ;;  %v3594_v12 = vld [vmem:[#allocation12 + $0xc40] sm:$0xff]  ;;  %v1997_v57 = vunpack.c.l.bf16 %v1933_v31  ;;  %5486 = vmatpush2.msra.mxu0 %v3570_v52  ;;  %v2029_v36 = vunpack.c.l.bf16 %v1965_v4 }
 0x246   :  { %v3087_v28 = vpop.xlane.xlu0 %3086  ;;  %v5088_v11 = vrot.slane %v3121_v37, %v7399_v50  ;;  %5545 = vmatpush1.msra.mxu1 %v3594_v12  ;;  %v2206_v15 = vadd.f32 %v2142_v54, %v2014_v58  ;;  %5487 = vmatprep.subr.mxu0 %v3567_v61  ;;  %v3558_v37 = vld [vmem:[#allocation12 + $0xb20] sm:$0xff]  ;;  %v3555_v58 = vld [vmem:[#allocation12 + $0xb08] sm:$0xff] }
 0x247   :  { %v5004_v40 = vrot.slane %v3087_v28, %v7398_v35  ;;  %5546 = vmatprep.subr.mxu1 %v3591_v13  ;;  %5488 = vmatpush2.msra.mxu0 %v3566_v33  ;;  %v2189_v6 = vadd.f32 %v2125_v24, %v1997_v57  ;;  %v2238_v28 = vadd.f32 %v2174_v25, %v2046_v26  ;;  %v3707_v54 = vld [vmem:[#allocation12 + $0xfc8] sm:$0xff]  ;;  %v3706_v61 = vld [vmem:[#allocation12 + $0xfc0] sm:$0xff] }
 0x248   :  { %v7057_v46 = vsel %vm4045_vm6, %v5088_v11, %v7017_v48  ;;  %3104 = vadd.xlane.f32.xlu1 %v1710_v23  ;;  %v2157_v23 = vunpack.c.h.bf16 %v1965_v4  ;;  %5547 = vmatpush1.msra.mxu1 %v3590_v27  ;;  %v2030_v11 = vunpack.c.l.bf16 %v1966_v32  ;;  %v3703_v33 = vld [vmem:[#allocation12 + $0xfa8] sm:$0xff]  ;;  %v3550_v27 = vld [vmem:[#allocation12 + $0xae0] sm:$0xff] }
 0x249   :  { %v7061_v10 = vsel %vm4038_vm5, %v5004_v40, %v7021_v20  ;;  %2942 = vadd.xlane.f32.xlu0 %v2205_v7  ;;  %v3181_v3 = vpop.xlane.xlu1 %3180  ;;  %v3587_v20 = vld [vmem:[#allocation12 + $0xc08] sm:$0xff]  ;;  %v1934_v7 = vld [vmem:[#allocation10 + $0x78] sm:$0xff]   ;;  %5489 = vmatprep.subr.mxu0 %v3563_v2  ;;  %v2158_v40 = vunpack.c.h.bf16 %v1966_v32  ;;  %v3542_v32 = vld [vmem:[#allocation12 + $0xaa0] sm:$0xff] }
 0x24a   :  { %v3147_v39 = vpop.xlane.xlu0 %3146  ;;  %v5236_v47 = vrot.slane %v3181_v3, %v7397_v0  ;;  %5548 = vmatprep.subr.mxu1 %v3587_v20  ;;  %5490 = vmatpush2.msra.mxu0 %v3562_v14  ;;  %v2221_v31 = vadd.f32 %v2157_v23, %v2029_v36  ;;  %v3702_v3 = vld [vmem:[#allocation12 + $0xfa0] sm:$0xff]  ;;  %v3699_v2 = vld [vmem:[#allocation12 + $0xf88] sm:$0xff] }
 0x24b   :  { %v5152_v48 = vrot.slane %v3147_v39, %v7396_v18  ;;  %5549 = vmatpush1.msra.mxu1 %v3586_v19  ;;  %5491 = vmatprep.subr.mxu0 %v3559_v55  ;;  %v3698_v23 = vld [vmem:[#allocation12 + $0xf80] sm:$0xff]  ;;  %v3695_v14 = vld [vmem:[#allocation12 + $0xf68] sm:$0xff] }
 0x24c   :  { %v7067_v34 = vsel %vm4031_vm4, %v5236_v47, %v7027_v59  ;;  %3198 = vadd.xlane.f32.xlu1 %v2237_v53  ;;  %5550 = vmatprep.subr.mxu1 %v3711_v9  ;;  %v1998_v53 = vunpack.c.l.bf16 %v1934_v7  ;;  %v3694_v55 = vld [vmem:[#allocation12 + $0xf60] sm:$0xff] }
 0x24d   :  { %v7071_v18 = vsel %vm4024_vm3, %v5152_v48, %v7031_v44  ;;  %3164 = vadd.xlane.f32.xlu0 %v2220_v49  ;;  %v2867_v38 = vpop.xlane.xlu1 %2866  ;;  %v3710_v44 = vld [vmem:[#allocation12 + $0xfe0] sm:$0xff]  ;;  %v2126_v49 = vunpack.c.h.bf16 %v1934_v7  ;;  %5492 = vmatpush2.msra.mxu0 %v3558_v37  ;;  %v3691_v7 = vld [vmem:[#allocation12 + $0xf48] sm:$0xff] }
 0x24e   :  { %v2833_v60 = vpop.xlane.xlu0 %2832  ;;  %v4461_v21 = vrot.slane %v2867_v38, %v7400_v42  ;;  %5551 = vmatpush2.msra.mxu1 %v3710_v44  ;;  %5493 = vmatprep.subr.mxu0 %v3555_v58  ;;  %v3690_v37 = vld [vmem:[#allocation12 + $0xf40] sm:$0xff]  ;;  %v3687_v44 = vld [vmem:[#allocation12 + $0xf28] sm:$0xff] }
 0x24f   :  { %v4377_v59 = vrot.slane %v2833_v60, %v7399_v50  ;;  %5552 = vmatprep.subr.mxu1 %v3707_v54  ;;  %5494 = vmatpush2.msra.mxu0 %v3554_v62  ;;  %v2190_v48 = vadd.f32 %v2126_v49, %v1998_v53  ;;  %v3539_v60 = vld [vmem:[#allocation12 + $0xa88] sm:$0xff]  ;;  %v7401_v49 = vld [vmem:[#allocation28_spill] sm:$0xff] }
 0x250   :  { %v7077_v52 = vsel %vm4052_vm7, %v4461_v21, %v7037_v45  ;;  %2944 = vadd.xlane.f32.xlu1 %v2206_v15  ;;  %v3551_v45 = vld [vmem:[#allocation12 + $0xae8] sm:$0xff]  ;;  %5553 = vmatpush2.msra.mxu1 %v3706_v61 }
 0x251   :  { %v7081_v12 = vsel %vm4045_vm6, %v4377_v59, %v7041_v41  ;;  %2910 = vadd.xlane.f32.xlu0 %v2189_v6  ;;  %v2927_v13 = vpop.xlane.xlu1 %2926  ;;  %v2222_v41 = vadd.f32 %v2158_v40, %v2030_v11  ;;  %v3547_v15 = vld [vmem:[#allocation12 + $0xac8] sm:$0xff]  ;;  %5495 = vmatprep.subr.mxu0 %v3551_v45  ;;  %v3534_v11 = vld [vmem:[#allocation12 + $0xa60] sm:$0xff] }
 0x252   :  { %v2893_v57 = vpop.xlane.xlu0 %2892  ;;  %v4609_v24 = vrot.slane %v2927_v13, %v7398_v35  ;;  %5554 = vmatprep.subr.mxu1 %v3703_v33  ;;  %5496 = vmatpush2.msra.mxu0 %v3550_v27  ;;  %v3531_v54 = vld [vmem:[#allocation12 + $0xa48] sm:$0xff]  ;;  %v3682_v13 = vld [vmem:[#allocation12 + $0xf00] sm:$0xff] }
 0x253   :  { %v4525_v4 = vrot.slane %v2893_v57, %v7397_v0  ;;  %5555 = vmatpush2.msra.mxu1 %v3702_v3  ;;  %5497 = vmatprep.subr.mxu0 %v3547_v15  ;;  %v3683_v53 = vld [vmem:[#allocation12 + $0xf08] sm:$0xff]  ;;  %v3526_v45 = vld [vmem:[#allocation12 + $0xa20] sm:$0xff] }
 0x254   :  { %v7087_v39 = vsel %vm4038_vm5, %v4609_v24, %v7047_v51  ;;  %3200 = vadd.xlane.f32.xlu1 %v2238_v28  ;;  %v3546_v51 = vld [vmem:[#allocation12 + $0xac0] sm:$0xff]  ;;  %5556 = vmatprep.subr.mxu1 %v3699_v2  ;;  %v3679_v57 = vld [vmem:[#allocation12 + $0xee8] sm:$0xff] }
 0x255   :  { %v7091_v47 = vsel %vm4031_vm4, %v4525_v4, %v7051_v16  ;;  %3166 = vadd.xlane.f32.xlu0 %v2221_v31  ;;  %v3123_v20 = vpop.xlane.xlu1 %3122  ;;  %v3543_v16 = vld [vmem:[#allocation12 + $0xaa8] sm:$0xff]  ;;  %5498 = vmatpush2.msra.mxu0 %v3546_v51  ;;  %v3678_v33 = vld [vmem:[#allocation12 + $0xee0] sm:$0xff] }
 0x256   :  { %v3089_v26 = vpop.xlane.xlu0 %3088  ;;  %v5093_v25 = vrot.slane %v3123_v20, %v7400_v42  ;;  %5557 = vmatpush2.msra.mxu1 %v3698_v23  ;;  %5499 = vmatprep.subr.mxu0 %v3543_v16  ;;  %v3523_v3 = vld [vmem:[#allocation12 + $0xa08] sm:$0xff]  ;;  %v3674_v20 = vld [vmem:[#allocation12 + $0xec0] sm:$0xff] }
 0x257   :  { %v5009_v36 = vrot.slane %v3089_v26, %v7399_v50  ;;  %5558 = vmatprep.subr.mxu1 %v3695_v14  ;;  %5500 = vmatpush2.msra.mxu0 %v3542_v32  ;;  %v3671_v26 = vld [vmem:[#allocation12 + $0xea8] sm:$0xff]  ;;  %v3670_v51 = vld [vmem:[#allocation12 + $0xea0] sm:$0xff] }
 0x258   :  { %v7097_v19 = vsel %vm4052_vm7, %v5093_v25, %v7057_v46  ;;  %3168 = vadd.xlane.f32.xlu1 %v2222_v41  ;;  %v3538_v46 = vld [vmem:[#allocation12 + $0xa80] sm:$0xff]  ;;  %5559 = vmatpush2.msra.mxu1 %v3694_v55  ;;  %v3667_v14 = vld [vmem:[#allocation12 + $0xe88] sm:$0xff] }
 0x259   :  { %v7101_v6 = vsel %vm4045_vm6, %v5009_v36, %v7061_v10  ;;  %2912 = vadd.xlane.f32.xlu0 %v2190_v48  ;;  %v3183_v9 = vpop.xlane.xlu1 %3182  ;;  %v3535_v10 = vld [vmem:[#allocation12 + $0xa68] sm:$0xff]  ;;  %5501 = vmatprep.subr.mxu0 %v3539_v60  ;;  %v3662_v60 = vld [vmem:[#allocation12 + $0xe60] sm:$0xff] }
 0x25a   :  { %v3149_v38 = vpop.xlane.xlu0 %3148  ;;  %v5241_v21 = vrot.slane %v3183_v9, %v7398_v35  ;;  %5560 = vmatprep.subr.mxu1 %v3691_v7  ;;  %5502 = vmatpush2.msra.mxu0 %v3538_v46  ;;  %v3675_v48 = vld [vmem:[#allocation12 + $0xec8] sm:$0xff]  ;;  %v3666_v9 = vld [vmem:[#allocation12 + $0xe80] sm:$0xff] }
 0x25b   :  { %v5157_v59 = vrot.slane %v3149_v38, %v7397_v0  ;;  %v3686_v0 = vld [vmem:[#allocation12 + $0xf20] sm:$0xff]  ;;  %5561 = vmatpush2.msra.mxu1 %v3690_v37  ;;  %5503 = vmatprep.subr.mxu0 %v3535_v10 }
 0x25c   :  { %v7107_v28 = vsel %vm4038_vm5, %v5241_v21, %v7067_v34  ;;  %v3530_v34 = vld [vmem:[#allocation12 + $0xa40] sm:$0xff]  ;;  %5562 = vmatprep.subr.mxu1 %v3687_v44  ;;  %5504 = vmatpush2.msra.mxu0 %v3534_v11  ;;  %v3655_v44 = vld [vmem:[#allocation12 + $0xe28] sm:$0xff] }
 0x25d   :  { %v7111_v31 = vsel %vm4031_vm4, %v5157_v59, %v7071_v18  ;;  %v2869_v40 = vpop.xlane.xlu1 %2868  ;;  %v3527_v18 = vld [vmem:[#allocation12 + $0xa28] sm:$0xff]  ;;  %5563 = vmatpush2.msra.mxu1 %v3686_v0  ;;  %5505 = vmatprep.subr.mxu0 %v3531_v54  ;;  %v3658_v10 = vld [vmem:[#allocation12 + $0xe40] sm:$0xff] }
 0x25e   :  { %v2835_v58 = vpop.xlane.xlu0 %2834  ;;  %v4466_v62 = vrot.slane %v2869_v40, %v7401_v49  ;;  %5564 = vmatprep.subr.mxu1 %v3683_v53  ;;  %5506 = vmatpush2.msra.mxu0 %v3530_v34  ;;  %v3659_v59 = vld [vmem:[#allocation12 + $0xe48] sm:$0xff]  ;;  %v3654_v11 = vld [vmem:[#allocation12 + $0xe20] sm:$0xff] }
 0x25f   :  { %v4382_v61 = vrot.slane %v2835_v58, %v7400_v42  ;;  %5565 = vmatpush2.msra.mxu1 %v3682_v13  ;;  %5507 = vmatprep.subr.mxu0 %v3527_v18  ;;  %v3651_v58 = vld [vmem:[#allocation12 + $0xe08] sm:$0xff]  ;;  %v3650_v53 = vld [vmem:[#allocation12 + $0xe00] sm:$0xff] }
 0x260   :  { %v7117_v24 = vsel %vm4059_vm8, %v4466_v62, %v7077_v52  ;;  %v3522_v52 = vld [vmem:[#allocation12 + $0xa00] sm:$0xff]  ;;  %5566 = vmatprep.subr.mxu1 %v3679_v57  ;;  %5508 = vmatpush2.msra.mxu0 %v3526_v45  ;;  %v3393_v62 = vld [vmem:[#allocation12 + $0x5f8] sm:$0xff] }
 0x261   :  { %v7121_v4 = vsel %vm4052_vm7, %v4382_v61, %v7081_v12  ;;  %v2929_v41 = vpop.xlane.xlu1 %2928  ;;  %v3265_v12 = vld [vmem:[#allocation12 + $0x1f8] sm:$0xff]  ;;  %5567 = vmatpush2.msra.mxu1 %v3678_v33  ;;  %5509 = vmatprep.subr.mxu0 %v3523_v3 }
 0x262   :  { %v2895_v27 = vpop.xlane.xlu0 %2894  ;;  %v4614_v15 = vrot.slane %v2929_v41, %v7399_v50  ;;  %5568 = vmatprep.subr.mxu1 %v3675_v48  ;;  %5510 = vmatpush2.msra.mxu0 %v3522_v52 }
 0x263   :  { %v4530_v2 = vrot.slane %v2895_v27, %v7398_v35  ;;  %5569 = vmatpush2.msra.mxu1 %v3674_v20  ;;  %5589 = vmatprep.subr.mxu0 %v3265_v12 }
 0x264   :  { %v4615_v25 = vsel %vm4045_vm6, %v4614_v15, %v7087_v39  ;;  %5570 = vmatprep.subr.mxu1 %v3671_v26  ;;  %v3663_v39 = vld [vmem:[#allocation12 + $0xe68] sm:$0xff] }
 0x265   :  { %v4531_v36 = vsel %vm4038_vm5, %v4530_v2, %v7091_v47  ;;  %v3125_v23 = vpop.xlane.xlu1 %3124  ;;  %5571 = vmatpush2.msra.mxu1 %v3670_v51 }
 0x266   :  { %v3091_v16 = vpop.xlane.xlu0 %3090  ;;  %v5098_v32 = vrot.slane %v3125_v23, %v7401_v49  ;;  %5572 = vmatprep.subr.mxu1 %v3667_v14 }
 0x267   :  { %v5014_v55 = vrot.slane %v3091_v16, %v7400_v42  ;;  %5573 = vmatpush2.msra.mxu1 %v3666_v9 }
 0x268   :  { %v5099_v47 = vsel %vm4059_vm8, %v5098_v32, %v7097_v19  ;;  %5574 = vmatprep.subr.mxu1 %v3663_v39 }
 0x269   :  { %v5015_v38 = vsel %vm4052_vm7, %v5014_v55, %v7101_v6  ;;  %v3185_v7 = vpop.xlane.xlu1 %3184  ;;  %5575 = vmatpush2.msra.mxu1 %v3662_v60 }
 0x26a   :  { %v3151_v21 = vpop.xlane.xlu0 %3150  ;;  %v5246_v46 = vrot.slane %v3185_v7, %v7399_v50  ;;  %5576 = vmatprep.subr.mxu1 %v3659_v59 }
 0x26b   :  { %v5162_v37 = vrot.slane %v3151_v21, %v7398_v35  ;;  %5577 = vmatpush2.msra.mxu1 %v3658_v10 }
 0x26c   :  { %v5247_v19 = vsel %vm4045_vm6, %v5246_v46, %v7107_v28  ;;  %5578 = vmatprep.subr.mxu1 %v3655_v44 }
 0x26d   :  { %v5163_v6 = vsel %vm4038_vm5, %v5162_v37, %v7111_v31  ;;  %v2871_v0 = vpop.xlane.xlu1 %2870  ;;  %5579 = vmatpush2.msra.mxu1 %v3654_v11 }
 0x26e   :  { %v2837_v40 = vpop.xlane.xlu0 %2836  ;;  %v4471_v54 = vrot.slane %v2871_v0, %v6554_v5  ;;  %5580 = vmatprep.subr.mxu1 %v3651_v58 }
 0x26f   :  { %v4387_v35 = vrot.slane %v2837_v40, %v7401_v49  ;;  %5581 = vmatpush2.msra.mxu1 %v3650_v53 }
 0x270   :  { %v4472_v28 = vsel %vm4066_vm9, %v4471_v54, %v7117_v24  ;;  %5660 = vmatprep.subr.mxu1 %v3393_v62 }
 0x271   :  { %v4388_v31 = vsel %vm4059_vm8, %v4387_v35, %v7121_v4  ;;  %v2931_v61 = vpop.xlane.xlu1 %2930 }
 0x272   :  { %v2897_v34 = vpop.xlane.xlu0 %2896  ;;  %v4619_v13 = vrot.slane %v2931_v61, %v7400_v42 }
 0x273   :  { %v4535_v18 = vrot.slane %v2897_v34, %v7399_v50 }
 0x274   :  { %v4620_v57 = vsel %vm4052_vm7, %v4619_v13, %v4615_v25 }
 0x275   :  { %v4536_v45 = vsel %vm4045_vm6, %v4535_v18, %v4531_v36  ;;  %v3127_v33 = vpop.xlane.xlu1 %3126 }
 0x276   :  { %v3093_v41 = vpop.xlane.xlu0 %3092  ;;  %v5103_v24 = vrot.slane %v3127_v33, %v6554_v5 }
 0x277   :  { %v5019_v27 = vrot.slane %v3093_v41, %v7401_v49 }
 0x278   :  { %v7154_v4 = vsel %vm4066_vm9, %v5103_v24, %v5099_v47 }
 0x279   :  { %v5020_v3 = vsel %vm4059_vm8, %v5019_v27, %v5015_v38  ;;  %v3187_v48 = vpop.xlane.xlu1 %3186 }
 0x27a   :  { %v3153_v15 = vpop.xlane.xlu0 %3152  ;;  %v5251_v2 = vrot.slane %v3187_v48, %v7400_v42 }
 0x27b   :  { %v5167_v52 = vrot.slane %v3153_v15, %v7399_v50 }
 0x27c   :  { %v5252_v20 = vsel %vm4052_vm7, %v5251_v2, %v5247_v19 }
 0x27d   :  { %v5168_v12 = vsel %vm4045_vm6, %v5167_v52, %v5163_v6  ;;  %v2873_v26 = vpop.xlane.xlu1 %2872 }
 0x27e   :  { %v2839_v25 = vpop.xlane.xlu0 %2838  ;;  %v4476_v36 = vrot.slane %v2873_v26, %v6598_v43 }
 0x27f   :  { %v4392_v51 = vrot.slane %v2839_v25, %v6554_v5 }
 0x280   :  { %v7164_v23 = vsel %vm4073_vm10, %v4476_v36, %v4472_v28 }
 0x281   :  { %v4393_v16 = vsel %vm4066_vm9, %v4392_v51, %v4388_v31  ;;  %v2933_v14 = vpop.xlane.xlu1 %2932 }
 0x282   :  { %v2899_v32 = vpop.xlane.xlu0 %2898  ;;  %v4624_v55 = vrot.slane %v2933_v14, %v7401_v49 }
 0x283   :  { %v4540_v50 = vrot.slane %v2899_v32, %v7400_v42 }
 0x284   :  { %v4625_v9 = vsel %vm4059_vm8, %v4624_v55, %v4620_v57 }
 0x285   :  { %v4541_v39 = vsel %vm4052_vm7, %v4540_v50, %v4536_v45  ;;  %v3129_v47 = vpop.xlane.xlu1 %3128 }
 0x286   :  { %v3095_v38 = vpop.xlane.xlu0 %3094  ;;  %v5108_v51 = vrot.slane %v3129_v47, %v6598_v43 }
 0x287   :  { %v5024_v60 = vrot.slane %v3095_v38, %v6554_v5 }
 0x289   :  { %v7173_v7 = vsel %vm4066_vm9, %v5024_v60, %v5020_v3  ;;  %v3189_v21 = vpop.xlane.xlu1 %3188  ;;  %v5109_v60 = vsel %vm4073_vm10, %v5108_v51, %v7154_v4 }
 0x28a   :  { %v3155_v59 = vpop.xlane.xlu0 %3154  ;;  %v5256_v46 = vrot.slane %v3189_v21, %v7401_v49 }
 0x28b   :  { %v5172_v37 = vrot.slane %v3155_v59, %v7400_v42 }
 0x28c   :  { %v7178_v10 = vsel %vm4059_vm8, %v5256_v46, %v5252_v20 }
 0x28d   :  { %v5173_v44 = vsel %vm4052_vm7, %v5172_v37, %v5168_v12  ;;  %v2875_v19 = vpop.xlane.xlu1 %2874 }
 0x28e   :  { %v2841_v6 = vpop.xlane.xlu0 %2840 }
 0x28f   :  { %v4397_v11 = vrot.slane %v2841_v6, %v6598_v43 }
 0x291   :  { %v7183_v0 = vsel %vm4073_vm10, %v4397_v11, %v4393_v16  ;;  %v2935_v40 = vpop.xlane.xlu1 %2934  ;;  %v4481_v16 = vrot.slane %v2875_v19, %v6700_v1 }
 0x292   :  { %v2901_v58 = vpop.xlane.xlu0 %2900  ;;  %v4629_v54 = vrot.slane %v2935_v40, %v6554_v5 }
 0x293   :  { %v4545_v35 = vrot.slane %v2901_v58, %v7401_v49  ;;  %v4482_v21 = vsel %vm4080_vm11, %v4481_v16, %v7164_v23 }
 0x294   :  { %v7188_v42 = vsel %vm4066_vm9, %v4629_v54, %v4625_v9 }
 0x295   :  { %v7191_v53 = vsel %vm4059_vm8, %v4545_v35, %v4541_v39  ;;  %v3131_v62 = vpop.xlane.xlu1 %3130 }
 0x296   :  { %v3097_v28 = vpop.xlane.xlu0 %3096  ;;  %v5113_v14 = vrot.slane %v3131_v62, %v6700_v1 }
 0x297   :  { %v5029_v62 = vrot.slane %v3097_v28, %v6598_v43 }
 0x298   :  { %v5114_v59 = vsel %vm4080_vm11, %v5113_v14, %v5109_v60 }
 0x299   :  { %v7193_v31 = vpop.xlane.xlu1 %3190  ;;  %v5030_v16 = vsel %vm4073_vm10, %v5029_v62, %v7173_v7 }
 0x29a   :  { %v3157_v61 = vpop.xlane.xlu0 %3156  ;;  %v5261_v60 = vrot.slane %v7193_v31, %v6554_v5 }
 0x29b   :  { %v5177_v34 = vrot.slane %v3157_v61, %v7401_v49 }
 0x29d   :  { %v7197_v13 = vsel %vm4059_vm8, %v5177_v34, %v5173_v44  ;;  %v2877_v18 = vpop.xlane.xlu1 %2876 }
 0x29e   :  { %v2843_v57 = vpop.xlane.xlu0 %2842  ;;  %v4486_v50 = vrot.slane %v2877_v18, %v6705_v30 }
 0x29f   :  { %v4402_v61 = vrot.slane %v2843_v57, %v6700_v1 }
 0x2a0   :  { %v4487_v44 = vsel %vm4087_vm12, %v4486_v50, %v4482_v21 }
 0x2a1   :  { %v7199_v45 = vpop.xlane.xlu1 %2936  ;;  %v4403_v57 = vsel %vm4080_vm11, %v4402_v61, %v7183_v0  ;;  %v3264_v0 = vld [vmem:[#allocation12 + $0x1f0] sm:$0xff] }
 0x2a2   :  { %v7201_v33 = vpop.xlane.xlu0 %2902 }
 0x2a5   :  { %v3133_v41 = vpop.xlane.xlu1 %3132 }
 0x2a6   :  { %v3099_v24 = vpop.xlane.xlu0 %3098  ;;  %v5118_v9 = vrot.slane %v3133_v41, %v6705_v30 }
 0x2a7   :  { %v5034_v34 = vrot.slane %v3099_v24, %v6700_v1 }
 0x2a8   :  { %v5119_v19 = vsel %vm4087_vm12, %v5118_v9, %v5114_v59 }
 0x2a9   :  { %v7203_v27 = vpop.xlane.xlu1 %3192  ;;  %v5035_v24 = vsel %vm4080_vm11, %v5034_v34, %v5030_v16 }
 0x2aa   :  { %v7205_v3 = vpop.xlane.xlu0 %3158 }
 0x2ab   :  { %v5182_v31 = vrot.slane %v7205_v3, %v6554_v5 }
 0x2ad   :  { %v2879_v48 = vpop.xlane.xlu1 %2878  ;;  %v5183_v61 = vsel %vm4066_vm9, %v5182_v31, %v7197_v13 }
 0x2ae   :  { %v2845_v15 = vpop.xlane.xlu0 %2844  ;;  %v4491_v39 = vrot.slane %v2879_v48, %v6708_v8 }
 0x2af   :  { %v4407_v48 = vrot.slane %v2845_v15, %v6705_v30 }
 0x2b0   :  { %v4492_v11 = vsel %vm4094_vm13, %v4491_v39, %v4487_v44  ;;  %v4550_v44 = vrot.slane %v7201_v33, %v6554_v5  ;;  %v5262_v33 = vsel %vm4066_vm9, %v5261_v60, %v7178_v10 }
 0x2b1   :  { %v7207_v2 = vpop.xlane.xlu1 %2938  ;;  %v4408_v15 = vsel %vm4087_vm12, %v4407_v48, %v4403_v57 }
 0x2b2   :  { %v7209_v49 = vpop.xlane.xlu0 %2904 }
 0x2b5   :  { %v3135_v52 = vpop.xlane.xlu1 %3134 }
 0x2b6   :  { %v3101_v20 = vpop.xlane.xlu0 %3100  ;;  %v5123_v38 = vrot.slane %v3135_v52, %v6708_v8 }
 0x2b7   :  { %v5039_v52 = vrot.slane %v3101_v20, %v6705_v30 }
 0x2b8   :  { %v5124_v40 = vsel %vm4094_vm13, %v5123_v38, %v5119_v19  ;;  %v3260_v19 = vld [vmem:[#allocation12 + $0x1d0] sm:$0xff] }
 0x2b9   :  { %v7211_v12 = vpop.xlane.xlu1 %3194  ;;  %v5040_v20 = vsel %vm4087_vm12, %v5039_v52, %v5035_v24  ;;  %v3248_v52 = vld [vmem:[#allocation12 + $0x170] sm:$0xff] }
 0x2ba   :  { %v7213_v26 = vpop.xlane.xlu0 %3160 }
 0x2bd   :  { %v2881_v25 = vpop.xlane.xlu1 %2880 }
 0x2be   :  { %v2847_v36 = vpop.xlane.xlu0 %2846  ;;  %v4496_v47 = vrot.slane %v2881_v25, %v6711_v29 }
 0x2bf   :  { %v4412_v25 = vrot.slane %v2847_v36, %v6708_v8 }
 0x2c0   :  { %v4497_v4 = vsel %vm4101_vm14, %v4496_v47, %v4492_v11  ;;  %v3257_v11 = vld [vmem:[#allocation12 + $0x1b8] sm:$0xff] }
 0x2c1   :  { %v7218_v32 = vpop.xlane.xlu1 %2940  ;;  %v4413_v9 = vsel %vm4094_vm13, %v4412_v25, %v4408_v15 }
 0x2c2   :  { %v7220_v55 = vpop.xlane.xlu0 %2906  ;;  %v4644_v62 = vrot.slane %v7218_v32, %v6705_v30  ;;  %v5187_v32 = vrot.slane %v7213_v26, %v6598_v43  ;;  %v3245_v26 = vld [vmem:[#allocation12 + $0x158] sm:$0xff] }
 0x2c5   :  { %v3137_v46 = vpop.xlane.xlu1 %3136 }
 0x2c6   :  { %v3103_v37 = vpop.xlane.xlu0 %3102  ;;  %v5128_v6 = vrot.slane %v3137_v46, %v6711_v29  ;;  %v3261_v46 = vld [vmem:[#allocation12 + $0x1d8] sm:$0xff] }
 0x2c7   :  { %v5044_v51 = vrot.slane %v3103_v37, %v6708_v8  ;;  %v4634_v37 = vrot.slane %v7199_v45, %v6598_v43  ;;  %v3256_v45 = vld [vmem:[#allocation12 + $0x1b0] sm:$0xff] }
 0x2c8   :  { %v5129_v58 = vsel %vm4101_vm14, %v5128_v6, %v5124_v40  ;;  %v5266_v6 = vrot.slane %v7203_v27, %v6598_v43  ;;  %v4639_v40 = vrot.slane %v7207_v2, %v6700_v1  ;;  %v5271_v27 = vrot.slane %v7211_v12, %v6700_v1 }
 0x2c9   :  { %v7239_v54 = vpop.xlane.xlu1 %3196  ;;  %v7244_v35 = vsel %vm5288_vm15, %v5129_v58, %v4497_v4  ;;  %v5045_v7 = vsel %vm4094_vm13, %v5044_v51, %v5040_v20  ;;  %v4555_v4 = vrot.slane %v7209_v49, %v6598_v43  ;;  %v3253_v58 = vld [vmem:[#allocation12 + $0x198] sm:$0xff]  ;;  %v4551_v2 = vsel %vm4066_vm9, %v4550_v44, %v7191_v53  ;;  %v3252_v49 = vld [vmem:[#allocation12 + $0x190] sm:$0xff] }
 0x2ca   :  { %v7241_v23 = vpop.xlane.xlu0 %3162  ;;  %5511 = vmatprep.mubr.f32.mxu0 %v7244_v35  ;;  %v5276_v10 = vrot.slane %v7239_v54, %v6705_v30  ;;  %v5267_v12 = vsel %vm4073_vm10, %v5266_v6, %v5262_v33  ;;  %v3249_v53 = vld [vmem:[#allocation12 + $0x178] sm:$0xff]  ;;  %v4560_v54 = vrot.slane %v7220_v55, %v6700_v1  ;;  %v3232_v33 = vld [vmem:[#allocation12 + $0xf0] sm:$0xff] }
 0x2cb   :  { %v4556_v13 = vsel %vm4073_vm10, %v4555_v4, %v4551_v2  ;;  %v5272_v25 = vsel %vm4080_vm11, %v5271_v27, %v5267_v12  ;;  %v5192_v51 = vrot.slane %v7241_v23, %v6700_v1  ;;  %v3241_v20 = vld [vmem:[#allocation12 + $0x138] sm:$0xff]  ;;  %v3392_v4 = vld [vmem:[#allocation12 + $0x5f0] sm:$0xff] }
 0x2cc   :  { %v5277_v57 = vsel %vm4087_vm12, %v5276_v10, %v5272_v25  ;;  %v3385_v2 = vld [vmem:[#allocation12 + $0x5b8] sm:$0xff]  ;;  %v3384_v10 = vld [vmem:[#allocation12 + $0x5b0] sm:$0xff] }
 0x2cd   :  { %v7250_v18 = vpop.xlane.xlu1 %2908  ;;  %v3381_v12 = vld [vmem:[#allocation12 + $0x598] sm:$0xff] }
 0x2ce   :  { %v2849_v41 = vpop.xlane.xlu0 %2848  ;;  %v4565_v16 = vrot.slane %v7250_v18, %v6705_v30  ;;  %v3369_v25 = vld [vmem:[#allocation12 + $0x538] sm:$0xff] }
 0x2cf   :  { %v4417_v28 = vrot.slane %v2849_v41, %v6711_v29 }
 0x2d1   :  { %v3105_v14 = vpop.xlane.xlu1 %3104  ;;  %v4418_v39 = vsel %vm4101_vm14, %v4417_v28, %v4413_v9  ;;  %v4561_v9 = vsel %vm4080_vm11, %v4560_v54, %v4556_v13  ;;  %v3213_v54 = vld [vmem:[#allocation12 + $0x58] sm:$0xff] }
 0x2d2   :  { %v7262_v50 = vpop.xlane.xlu0 %2942  ;;  %v5049_v36 = vrot.slane %v3105_v14, %v6711_v29  ;;  %v3209_v13 = vld [vmem:[#allocation12 + $0x38] sm:$0xff] }
 0x2d3   :  { %v4649_v34 = vrot.slane %v7262_v50, %v6708_v8  ;;  %v3244_v50 = vld [vmem:[#allocation12 + $0x150] sm:$0xff] }
 0x2d4   :  { %v5050_v38 = vsel %vm4101_vm14, %v5049_v36, %v5045_v7  ;;  %v5188_v36 = vsel %vm4073_vm10, %v5187_v32, %v5183_v61  ;;  %v3220_v61 = vld [vmem:[#allocation12 + $0x90] sm:$0xff] }
 0x2d5   :  { %v3199_v47 = vpop.xlane.xlu1 %3198  ;;  %v7276_v59 = vsel %vm5288_vm15, %v5050_v38, %v4418_v39  ;;  %v3240_v39 = vld [vmem:[#allocation12 + $0x130] sm:$0xff]  ;;  %v5193_v38 = vsel %vm4080_vm11, %v5192_v51, %v5188_v36  ;;  %v3353_v36 = vld [vmem:[#allocation12 + $0x4b8] sm:$0xff] }
 0x2d6   :  { %v7273_v21 = vpop.xlane.xlu0 %3164  ;;  %5512 = vmatmul.mubr.f32.vlgmr.msra.gmra.mxu0 %v7276_v59  ;;  %v3376_v32 = vld [vmem:[#allocation12 + $0x570] sm:$0xff] }
 0x2d7   :  { %5590 = vmatpush1.msra.mxu0 %v3264_v0  ;;  %5653 = vmatprep.mubr.f32.mxu0 %v6751_v56  ;;  %v4635_v56 = vsel %vm4073_vm10, %v4634_v37, %v7188_v42  ;;  %v5281_v42 = vrot.slane %v3199_v47, %v6708_v8  ;;  %v5197_v24 = vrot.slane %v7273_v21, %v6705_v30  ;;  %v3237_v21 = vld [vmem:[#allocation12 + $0x118] sm:$0xff]  ;;  %v3208_v51 = vld [vmem:[#allocation12 + $0x30] sm:$0xff] }
 0x2d8   :  { %5591 = vmatprep.subr.mxu0 %v3261_v46  ;;  %v4640_v41 = vsel %vm4080_vm11, %v4639_v40, %v4635_v56  ;;  %v4566_v0 = vsel %vm4087_vm12, %v4565_v16, %v4561_v9  ;;  %v3225_v56 = vld [vmem:[#allocation12 + $0xb8] sm:$0xff]  ;;  %v3368_v16 = vld [vmem:[#allocation12 + $0x530] sm:$0xff] }
 0x2d9   :  { %5592 = vmatpush1.msra.mxu0 %v3260_v19  ;;  %v2945_v5 = vpop.xlane.xlu1 %2944  ;;  %v4645_v55 = vsel %vm4087_vm12, %v4644_v62, %v4640_v41  ;;  %v5282_v23 = vsel %vm4094_vm13, %v5281_v42, %v5277_v57  ;;  %v5198_v46 = vsel %vm4087_vm12, %v5197_v24, %v5193_v38  ;;  %v3236_v19 = vld [vmem:[#allocation12 + $0x110] sm:$0xff]  ;;  %v3217_v42 = vld [vmem:[#allocation12 + $0x78] sm:$0xff] }
 0x2da   :  { %v2911_v3 = vpop.xlane.xlu0 %2910  ;;  %5593 = vmatprep.subr.mxu0 %v3257_v11  ;;  %v4654_v48 = vrot.slane %v2945_v5, %v6711_v29  ;;  %v4650_v1 = vsel %vm4094_vm13, %v4649_v34, %v4645_v55  ;;  %v3233_v11 = vld [vmem:[#allocation12 + $0xf8] sm:$0xff]  ;;  %v3224_v62 = vld [vmem:[#allocation12 + $0xb0] sm:$0xff] }
 0x2db   :  { %5594 = vmatpush1.msra.mxu0 %v3256_v45  ;;  %v4570_v18 = vrot.slane %v2911_v3, %v6708_v8  ;;  %v3389_v5 = vld [vmem:[#allocation12 + $0x5d8] sm:$0xff]  ;;  %v3228_v3 = vld [vmem:[#allocation12 + $0xd0] sm:$0xff] }
 0x2dc   :  { %5595 = vmatprep.subr.mxu0 %v3253_v58  ;;  %v4655_v30 = vsel %vm4101_vm14, %v4654_v48, %v4650_v1  ;;  %v3388_v58 = vld [vmem:[#allocation12 + $0x5d0] sm:$0xff]  ;;  %v3329_v57 = vld [vmem:[#allocation12 + $0x3f8] sm:$0xff] }
 0x2dd   :  { %5596 = vmatpush1.msra.mxu0 %v3252_v49  ;;  %v3201_v28 = vpop.xlane.xlu1 %3200  ;;  %v4571_v6 = vsel %vm4094_vm13, %v4570_v18, %v4566_v0  ;;  %v3221_v49 = vld [vmem:[#allocation12 + $0x98] sm:$0xff]  ;;  %v3380_v34 = vld [vmem:[#allocation12 + $0x590] sm:$0xff] }
 0x2de   :  { %v3167_v43 = vpop.xlane.xlu0 %3166  ;;  %v5286_v14 = vrot.slane %v3201_v28, %v6711_v29  ;;  %5597 = vmatprep.subr.mxu0 %v3249_v53  ;;  %v3377_v53 = vld [vmem:[#allocation12 + $0x578] sm:$0xff]  ;;  %v3216_v41 = vld [vmem:[#allocation12 + $0x70] sm:$0xff] }
 0x2df   :  { %v5202_v15 = vrot.slane %v3167_v43, %v6708_v8  ;;  %5598 = vmatpush1.msra.mxu0 %v3248_v52  ;;  %v3212_v48 = vld [vmem:[#allocation12 + $0x50] sm:$0xff]  ;;  %v3205_v28 = vld [vmem:[#allocation12 + $0x18] sm:$0xff] }
 0x2e0   :  { %5599 = vmatprep.subr.mxu0 %v3245_v26  ;;  %v5287_v7 = vsel %vm4101_vm14, %v5286_v14, %v5282_v23  ;;  %v3372_v52 = vld [vmem:[#allocation12 + $0x550] sm:$0xff]  ;;  %v3365_v43 = vld [vmem:[#allocation12 + $0x518] sm:$0xff] }
 0x2e1   :  { %5600 = vmatpush1.msra.mxu0 %v3244_v50  ;;  %v3169_v60 = vpop.xlane.xlu1 %3168  ;;  %v7338_v8 = vsel %vm5288_vm15, %v5287_v7, %v4655_v30  ;;  %v5203_v31 = vsel %vm4094_vm13, %v5202_v15, %v5198_v46  ;;  %v3204_v26 = vld [vmem:[#allocation12 + $0x10] sm:$0xff]  ;;  %v3361_v24 = vld [vmem:[#allocation12 + $0x4f8] sm:$0xff] }
 0x2e2   :  { %v2913_v47 = vpop.xlane.xlu0 %2912  ;;  %v5207_v37 = vrot.slane %v3169_v60, %v6711_v29  ;;  %5601 = vmatprep.subr.mxu0 %v3241_v20  ;;  %5582 = vmatprep.mubr.f32.mxu1 %v7338_v8  ;;  %v3364_v55 = vld [vmem:[#allocation12 + $0x510] sm:$0xff]  ;;  %v3325_v1 = vld [vmem:[#allocation12 + $0x3d8] sm:$0xff] }
 0x2e3   :  { %v4575_v44 = vrot.slane %v2913_v47, %v6711_v29  ;;  %5602 = vmatpush1.msra.mxu0 %v3240_v39  ;;  %v3229_v29 = vld [vmem:[#allocation12 + $0xd8] sm:$0xff]  ;;  %v3328_v14 = vld [vmem:[#allocation12 + $0x3f0] sm:$0xff] }
 0x2e4   :  { %v5208_v40 = vsel %vm4101_vm14, %v5207_v37, %v5203_v31  ;;  %5603 = vmatprep.subr.mxu0 %v3237_v21  ;;  %v3360_v50 = vld [vmem:[#allocation12 + $0x4f0] sm:$0xff]  ;;  %v3357_v23 = vld [vmem:[#allocation12 + $0x4d8] sm:$0xff] }
 0x2e5   :  { %v4576_v45 = vsel %vm4101_vm14, %v4575_v44, %v4571_v6  ;;  %5604 = vmatpush1.msra.mxu0 %v3236_v19  ;;  %v3324_v18 = vld [vmem:[#allocation12 + $0x3d0] sm:$0xff]  ;;  %v3321_v20 = vld [vmem:[#allocation12 + $0x3b8] sm:$0xff] }
 0x2e6   :  { %v7349_v27 = vsel %vm5288_vm15, %v5208_v40, %v4576_v45  ;;  %5605 = vmatprep.subr.mxu0 %v3233_v11  ;;  %v3356_v15 = vld [vmem:[#allocation12 + $0x4d0] sm:$0xff]  ;;  %v3317_v7 = vld [vmem:[#allocation12 + $0x398] sm:$0xff] }
 0x2e7   :  { %5583 = vmatmul.mubr.f32.vlgmr.msra.gmra.mxu1 %v7349_v27  ;;  %5606 = vmatpush1.msra.mxu0 %v3232_v33  ;;  %v3320_v9 = vld [vmem:[#allocation12 + $0x3b0] sm:$0xff]  ;;  %v3349_v39 = vld [vmem:[#allocation12 + $0x498] sm:$0xff] }
 0x2e8   :  { %5661 = vmatpush1.msra.mxu1 %v3392_v4  ;;  %5607 = vmatprep.subr.mxu0 %v3229_v29  ;;  %v3352_v30 = vld [vmem:[#allocation12 + $0x4b0] sm:$0xff]  ;;  %v3313_v60 = vld [vmem:[#allocation12 + $0x378] sm:$0xff] }
 0x2e9   :  { %5662 = vmatprep.subr.mxu1 %v3389_v5  ;;  %5724 = vmatprep.mubr.f32.mxu1 %v6855_v63  ;;  %v3373_v63 = vld [vmem:[#allocation12 + $0x558] sm:$0xff]  ;;  %v3316_v38 = vld [vmem:[#allocation12 + $0x390] sm:$0xff] }
 0x2ea   :  { %5608 = vmatpush1.msra.mxu0 %v3228_v3  ;;  %5663 = vmatpush1.msra.mxu1 %v3388_v58  ;;  %v3348_v0 = vld [vmem:[#allocation12 + $0x490] sm:$0xff]  ;;  %v3345_v47 = vld [vmem:[#allocation12 + $0x478] sm:$0xff] }
 0x2eb   :  { %5609 = vmatprep.subr.mxu0 %v3225_v56  ;;  %5664 = vmatprep.subr.mxu1 %v3385_v2  ;;  %v3312_v21 = vld [vmem:[#allocation12 + $0x370] sm:$0xff]  ;;  %v3309_v37 = vld [vmem:[#allocation12 + $0x358] sm:$0xff] }
 0x2ec   :  { %5610 = vmatpush1.msra.mxu0 %v3224_v62  ;;  %5665 = vmatpush1.msra.mxu1 %v3384_v10  ;;  %v3344_v46 = vld [vmem:[#allocation12 + $0x470] sm:$0xff]  ;;  %v3341_v44 = vld [vmem:[#allocation12 + $0x458] sm:$0xff] }
 0x2ed   :  { %5611 = vmatprep.subr.mxu0 %v3221_v49  ;;  %5666 = vmatprep.subr.mxu1 %v3381_v12  ;;  %v3308_v19 = vld [vmem:[#allocation12 + $0x350] sm:$0xff]  ;;  %v3305_v31 = vld [vmem:[#allocation12 + $0x338] sm:$0xff] }
 0x2ee   :  { %5612 = vmatpush1.msra.mxu0 %v3220_v61  ;;  %5667 = vmatpush1.msra.mxu1 %v3380_v34  ;;  %v3340_v6 = vld [vmem:[#allocation12 + $0x450] sm:$0xff]  ;;  %v3337_v11 = vld [vmem:[#allocation12 + $0x438] sm:$0xff] }
 0x2ef   :  { %5613 = vmatprep.subr.mxu0 %v3217_v42  ;;  %5668 = vmatprep.subr.mxu1 %v3377_v53  ;;  %v3304_v40 = vld [vmem:[#allocation12 + $0x330] sm:$0xff]  ;;  %v3301_v33 = vld [vmem:[#allocation12 + $0x318] sm:$0xff] }
 0x2f0   :  { %5614 = vmatpush1.msra.mxu0 %v3216_v41  ;;  %5669 = vmatpush1.msra.mxu1 %v3376_v32  ;;  %v3336_v45 = vld [vmem:[#allocation12 + $0x430] sm:$0xff]  ;;  %v3333_v4 = vld [vmem:[#allocation12 + $0x418] sm:$0xff] }
 0x2f1   :  { %5615 = vmatprep.subr.mxu0 %v3213_v54  ;;  %5670 = vmatprep.subr.mxu1 %v3373_v63  ;;  %v3300_v29 = vld [vmem:[#allocation12 + $0x310] sm:$0xff]  ;;  %v3297_v3 = vld [vmem:[#allocation12 + $0x2f8] sm:$0xff] }
 0x2f2   :  { %5616 = vmatpush1.msra.mxu0 %v3212_v48  ;;  %5671 = vmatpush1.msra.mxu1 %v3372_v52  ;;  %v3332_v5 = vld [vmem:[#allocation12 + $0x410] sm:$0xff]  ;;  %v3457_v58 = vld [vmem:[#allocation12 + $0x7f8] sm:$0xff] }
 0x2f3   :  { %5617 = vmatprep.subr.mxu0 %v3209_v13  ;;  %5672 = vmatprep.subr.mxu1 %v3369_v25  ;;  %v3296_v56 = vld [vmem:[#allocation12 + $0x2f0] sm:$0xff]  ;;  %v3293_v62 = vld [vmem:[#allocation12 + $0x2d8] sm:$0xff] }
 0x2f4   :  { %5618 = vmatpush1.msra.mxu0 %v3208_v51  ;;  %5673 = vmatpush1.msra.mxu1 %v3368_v16  ;;  %v3456_v2 = vld [vmem:[#allocation12 + $0x7f0] sm:$0xff]  ;;  %v3453_v10 = vld [vmem:[#allocation12 + $0x7d8] sm:$0xff] }
 0x2f5   :  { %5619 = vmatprep.subr.mxu0 %v3205_v28  ;;  %5674 = vmatprep.subr.mxu1 %v3365_v43  ;;  %v3292_v49 = vld [vmem:[#allocation12 + $0x2d0] sm:$0xff]  ;;  %v3289_v61 = vld [vmem:[#allocation12 + $0x2b8] sm:$0xff] }
 0x2f6   :  { %5620 = vmatpush1.msra.mxu0 %v3204_v26  ;;  %5675 = vmatpush1.msra.mxu1 %v3364_v55  ;;  %v3452_v12 = vld [vmem:[#allocation12 + $0x7d0] sm:$0xff]  ;;  %v3449_v34 = vld [vmem:[#allocation12 + $0x7b8] sm:$0xff] }
 0x2f7   :  { %5621 = vmatprep.subr.mxu0 %v3329_v57  ;;  %5676 = vmatprep.subr.mxu1 %v3361_v24  ;;  %v3288_v42 = vld [vmem:[#allocation12 + $0x2b0] sm:$0xff]  ;;  %v3285_v41 = vld [vmem:[#allocation12 + $0x298] sm:$0xff] }
 0x2f8   :  { %5622 = vmatpush2.msra.mxu0 %v3328_v14  ;;  %5677 = vmatpush1.msra.mxu1 %v3360_v50  ;;  %v3448_v53 = vld [vmem:[#allocation12 + $0x7b0] sm:$0xff]  ;;  %v3445_v32 = vld [vmem:[#allocation12 + $0x798] sm:$0xff] }
 0x2f9   :  { %5623 = vmatprep.subr.mxu0 %v3325_v1  ;;  %5678 = vmatprep.subr.mxu1 %v3357_v23  ;;  %v3284_v54 = vld [vmem:[#allocation12 + $0x290] sm:$0xff]  ;;  %v3281_v48 = vld [vmem:[#allocation12 + $0x278] sm:$0xff] }
 0x2fa   :  { %5624 = vmatpush2.msra.mxu0 %v3324_v18  ;;  %5679 = vmatpush1.msra.mxu1 %v3356_v15  ;;  %v3444_v63 = vld [vmem:[#allocation12 + $0x790] sm:$0xff]  ;;  %v3441_v52 = vld [vmem:[#allocation12 + $0x778] sm:$0xff] }
 0x2fb   :  { %5625 = vmatprep.subr.mxu0 %v3321_v20  ;;  %5680 = vmatprep.subr.mxu1 %v3353_v36  ;;  %v3280_v13 = vld [vmem:[#allocation12 + $0x270] sm:$0xff]  ;;  %v3277_v51 = vld [vmem:[#allocation12 + $0x258] sm:$0xff] }
 0x2fc   :  { %5626 = vmatpush2.msra.mxu0 %v3320_v9  ;;  %5681 = vmatpush1.msra.mxu1 %v3352_v30  ;;  %v3440_v25 = vld [vmem:[#allocation12 + $0x770] sm:$0xff]  ;;  %v3437_v16 = vld [vmem:[#allocation12 + $0x758] sm:$0xff] }
 0x2fd   :  { %5627 = vmatprep.subr.mxu0 %v3317_v7  ;;  %5682 = vmatprep.subr.mxu1 %v3349_v39  ;;  %v3276_v28 = vld [vmem:[#allocation12 + $0x250] sm:$0xff]  ;;  %v3273_v26 = vld [vmem:[#allocation12 + $0x238] sm:$0xff] }
 0x2fe   :  { %5628 = vmatpush2.msra.mxu0 %v3316_v38  ;;  %5683 = vmatpush1.msra.mxu1 %v3348_v0  ;;  %v3436_v43 = vld [vmem:[#allocation12 + $0x750] sm:$0xff]  ;;  %v3433_v55 = vld [vmem:[#allocation12 + $0x738] sm:$0xff] }
 0x2ff   :  { %5629 = vmatprep.subr.mxu0 %v3313_v60  ;;  %5684 = vmatprep.subr.mxu1 %v3345_v47  ;;  %v3272_v57 = vld [vmem:[#allocation12 + $0x230] sm:$0xff]  ;;  %v3269_v14 = vld [vmem:[#allocation12 + $0x218] sm:$0xff] }
 0x300   :  { %5630 = vmatpush2.msra.mxu0 %v3312_v21  ;;  %5685 = vmatpush1.msra.mxu1 %v3344_v46  ;;  %v3432_v24 = vld [vmem:[#allocation12 + $0x730] sm:$0xff]  ;;  %v3429_v50 = vld [vmem:[#allocation12 + $0x718] sm:$0xff] }
 0x301   :  { %5631 = vmatprep.subr.mxu0 %v3309_v37  ;;  %5686 = vmatprep.subr.mxu1 %v3341_v44  ;;  %v3268_v1 = vld [vmem:[#allocation12 + $0x210] sm:$0xff]  ;;  %v3425_v18 = vld [vmem:[#allocation12 + $0x6f8] sm:$0xff] }
 0x302   :  { %5632 = vmatpush2.msra.mxu0 %v3308_v19  ;;  %5687 = vmatpush1.msra.mxu1 %v3340_v6  ;;  %v3428_v23 = vld [vmem:[#allocation12 + $0x710] sm:$0xff]  ;;  %v3521_v15 = vld [vmem:[#allocation12 + $0x9f8] sm:$0xff] }
 0x303   :  { %5633 = vmatprep.subr.mxu0 %v3305_v31  ;;  %5688 = vmatprep.subr.mxu1 %v3337_v11  ;;  %v3424_v20 = vld [vmem:[#allocation12 + $0x6f0] sm:$0xff]  ;;  %v3421_v9 = vld [vmem:[#allocation12 + $0x6d8] sm:$0xff] }
 0x304   :  { %5634 = vmatpush2.msra.mxu0 %v3304_v40  ;;  %5689 = vmatpush1.msra.mxu1 %v3336_v45  ;;  %v3520_v36 = vld [vmem:[#allocation12 + $0x9f0] sm:$0xff]  ;;  %v3517_v30 = vld [vmem:[#allocation12 + $0x9d8] sm:$0xff] }
 0x305   :  { %5635 = vmatprep.subr.mxu0 %v3301_v33  ;;  %5690 = vmatprep.subr.mxu1 %v3333_v4  ;;  %v3420_v7 = vld [vmem:[#allocation12 + $0x6d0] sm:$0xff]  ;;  %v3417_v38 = vld [vmem:[#allocation12 + $0x6b8] sm:$0xff] }
 0x306   :  { %5636 = vmatpush2.msra.mxu0 %v3300_v29  ;;  %5691 = vmatpush1.msra.mxu1 %v3332_v5  ;;  %v3516_v39 = vld [vmem:[#allocation12 + $0x9d0] sm:$0xff]  ;;  %v3513_v0 = vld [vmem:[#allocation12 + $0x9b8] sm:$0xff] }
 0x307   :  { %5637 = vmatprep.subr.mxu0 %v3297_v3  ;;  %5692 = vmatprep.subr.mxu1 %v3457_v58  ;;  %v3416_v60 = vld [vmem:[#allocation12 + $0x6b0] sm:$0xff]  ;;  %v3413_v21 = vld [vmem:[#allocation12 + $0x698] sm:$0xff] }
 0x308   :  { %5638 = vmatpush2.msra.mxu0 %v3296_v56  ;;  %5693 = vmatpush2.msra.mxu1 %v3456_v2  ;;  %v3512_v47 = vld [vmem:[#allocation12 + $0x9b0] sm:$0xff]  ;;  %v3409_v44 = vld [vmem:[#allocation12 + $0x678] sm:$0xff] }
 0x309   :  { %5639 = vmatprep.subr.mxu0 %v3293_v62  ;;  %5694 = vmatprep.subr.mxu1 %v3453_v10  ;;  %v3412_v46 = vld [vmem:[#allocation12 + $0x690] sm:$0xff]  ;;  %v3505_v19 = vld [vmem:[#allocation12 + $0x978] sm:$0xff] }
 0x30a   :  { %5640 = vmatpush2.msra.mxu0 %v3292_v49  ;;  %5695 = vmatpush2.msra.mxu1 %v3452_v12  ;;  %v3508_v37 = vld [vmem:[#allocation12 + $0x990] sm:$0xff]  ;;  %v3405_v31 = vld [vmem:[#allocation12 + $0x658] sm:$0xff] }
 0x30b   :  { %5641 = vmatprep.subr.mxu0 %v3289_v61  ;;  %5696 = vmatprep.subr.mxu1 %v3449_v34  ;;  %v3408_v6 = vld [vmem:[#allocation12 + $0x670] sm:$0xff]  ;;  %v3501_v11 = vld [vmem:[#allocation12 + $0x958] sm:$0xff] }
 0x30c   :  { %5642 = vmatpush2.msra.mxu0 %v3288_v42  ;;  %5697 = vmatpush2.msra.mxu1 %v3448_v53  ;;  %v3404_v40 = vld [vmem:[#allocation12 + $0x650] sm:$0xff]  ;;  %v3401_v33 = vld [vmem:[#allocation12 + $0x638] sm:$0xff] }
 0x30d   :  { %5643 = vmatprep.subr.mxu0 %v3285_v41  ;;  %5698 = vmatprep.subr.mxu1 %v3445_v32  ;;  %v3500_v45 = vld [vmem:[#allocation12 + $0x950] sm:$0xff]  ;;  %v3497_v4 = vld [vmem:[#allocation12 + $0x938] sm:$0xff] }
 0x30e   :  { %5644 = vmatpush2.msra.mxu0 %v3284_v54  ;;  %5699 = vmatpush2.msra.mxu1 %v3444_v63  ;;  %v3400_v29 = vld [vmem:[#allocation12 + $0x630] sm:$0xff]  ;;  %v3397_v3 = vld [vmem:[#allocation12 + $0x618] sm:$0xff] }
 0x30f   :  { %5645 = vmatprep.subr.mxu0 %v3281_v48  ;;  %5700 = vmatprep.subr.mxu1 %v3441_v52  ;;  %v3496_v5 = vld [vmem:[#allocation12 + $0x930] sm:$0xff]  ;;  %v3493_v58 = vld [vmem:[#allocation12 + $0x918] sm:$0xff] }
 0x310   :  { %5646 = vmatpush2.msra.mxu0 %v3280_v13  ;;  %5701 = vmatpush2.msra.mxu1 %v3440_v25  ;;  %v3396_v56 = vld [vmem:[#allocation12 + $0x610] sm:$0xff]  ;;  %v3489_v62 = vld [vmem:[#allocation12 + $0x8f8] sm:$0xff] }
 0x311   :  { %5647 = vmatprep.subr.mxu0 %v3277_v51  ;;  %5702 = vmatprep.subr.mxu1 %v3437_v16  ;;  %v3492_v2 = vld [vmem:[#allocation12 + $0x910] sm:$0xff]  ;;  %v3649_v10 = vld [vmem:[#allocation12 + $0xdf8] sm:$0xff] }
 0x312   :  { %5648 = vmatpush2.msra.mxu0 %v3276_v28  ;;  %5703 = vmatpush2.msra.mxu1 %v3436_v43  ;;  %v3488_v49 = vld [vmem:[#allocation12 + $0x8f0] sm:$0xff]  ;;  %v3485_v61 = vld [vmem:[#allocation12 + $0x8d8] sm:$0xff] }
 0x313   :  { %5649 = vmatprep.subr.mxu0 %v3273_v26  ;;  %5704 = vmatprep.subr.mxu1 %v3433_v55  ;;  %v3648_v12 = vld [vmem:[#allocation12 + $0xdf0] sm:$0xff]  ;;  %v3645_v34 = vld [vmem:[#allocation12 + $0xdd8] sm:$0xff] }
 0x314   :  { %5650 = vmatpush2.msra.mxu0 %v3272_v57  ;;  %5705 = vmatpush2.msra.mxu1 %v3432_v24  ;;  %v3484_v42 = vld [vmem:[#allocation12 + $0x8d0] sm:$0xff]  ;;  %v3481_v41 = vld [vmem:[#allocation12 + $0x8b8] sm:$0xff] }
 0x315   :  { %5651 = vmatprep.subr.mxu0 %v3269_v14  ;;  %5706 = vmatprep.subr.mxu1 %v3429_v50  ;;  %v3644_v53 = vld [vmem:[#allocation12 + $0xdd0] sm:$0xff]  ;;  %v3641_v32 = vld [vmem:[#allocation12 + $0xdb8] sm:$0xff] }
 0x316   :  { %5652 = vmatpush2.msra.mxu0 %v3268_v1  ;;  %5707 = vmatpush2.msra.mxu1 %v3428_v23  ;;  %v3480_v54 = vld [vmem:[#allocation12 + $0x8b0] sm:$0xff]  ;;  %v3477_v48 = vld [vmem:[#allocation12 + $0x898] sm:$0xff] }
 0x317   :  { %5654 = vmatmul.mubr.f32.vlgmr.msra.gmra.mxu0 %v6792_v17  ;;  %5708 = vmatprep.subr.mxu1 %v3425_v18  ;;  %v3509_v17 = vld [vmem:[#allocation12 + $0x998] sm:$0xff]  ;;  %v3640_v63 = vld [vmem:[#allocation12 + $0xdb0] sm:$0xff] }
 0x318   :  { %5731 = vmatprep.subr.mxu0 %v3521_v15  ;;  %5709 = vmatpush2.msra.mxu1 %v3424_v20  ;;  %v3476_v52 = vld [vmem:[#allocation12 + $0x890] sm:$0xff]  ;;  %v3473_v25 = vld [vmem:[#allocation12 + $0x878] sm:$0xff] }
 0x319   :  { %5732 = vmatpush1.msra.mxu0 %v3520_v36  ;;  %5795 = vmatprep.mubr.f32.mxu0 %v7244_v35  ;;  %v3504_v35 = vld [vmem:[#allocation12 + $0x970] sm:$0xff]  ;;  %v3633_v51 = vld [vmem:[#allocation12 + $0xd78] sm:$0xff] }
 0x31a   :  { %5710 = vmatprep.subr.mxu1 %v3421_v9  ;;  %5733 = vmatprep.subr.mxu0 %v3517_v30  ;;  %v3636_v13 = vld [vmem:[#allocation12 + $0xd90] sm:$0xff]  ;;  %v3469_v28 = vld [vmem:[#allocation12 + $0x858] sm:$0xff] }
 0x31b   :  { %5711 = vmatpush2.msra.mxu1 %v3420_v7  ;;  %5734 = vmatpush1.msra.mxu0 %v3516_v39  ;;  %v3472_v16 = vld [vmem:[#allocation12 + $0x870] sm:$0xff]  ;;  %v3629_v43 = vld [vmem:[#allocation12 + $0xd58] sm:$0xff] }
 0x31c   :  { %5712 = vmatprep.subr.mxu1 %v3417_v38  ;;  %5735 = vmatprep.subr.mxu0 %v3513_v0  ;;  %v3468_v26 = vld [vmem:[#allocation12 + $0x850] sm:$0xff]  ;;  %v3465_v57 = vld [vmem:[#allocation12 + $0x838] sm:$0xff] }
 0x31d   :  { %5713 = vmatpush2.msra.mxu1 %v3416_v60  ;;  %5736 = vmatpush1.msra.mxu0 %v3512_v47  ;;  %v3628_v55 = vld [vmem:[#allocation12 + $0xd50] sm:$0xff]  ;;  %v3625_v24 = vld [vmem:[#allocation12 + $0xd38] sm:$0xff] }
 0x31e   :  { %5714 = vmatprep.subr.mxu1 %v3413_v21  ;;  %5737 = vmatprep.subr.mxu0 %v3509_v17  ;;  %v3464_v14 = vld [vmem:[#allocation12 + $0x830] sm:$0xff]  ;;  %v3461_v1 = vld [vmem:[#allocation12 + $0x818] sm:$0xff] }
 0x31f   :  { %5715 = vmatpush2.msra.mxu1 %v3412_v46  ;;  %5738 = vmatpush1.msra.mxu0 %v3508_v37  ;;  %v3624_v50 = vld [vmem:[#allocation12 + $0xd30] sm:$0xff]  ;;  %v3621_v23 = vld [vmem:[#allocation12 + $0xd18] sm:$0xff] }
 0x320   :  { %5716 = vmatprep.subr.mxu1 %v3409_v44  ;;  %5739 = vmatprep.subr.mxu0 %v3505_v19  ;;  %v3460_v18 = vld [vmem:[#allocation12 + $0x810] sm:$0xff]  ;;  %v3585_v20 = vld [vmem:[#allocation12 + $0xbf8] sm:$0xff] }
 0x321   :  { %5717 = vmatpush2.msra.mxu1 %v3408_v6  ;;  %5740 = vmatpush1.msra.mxu0 %v3504_v35  ;;  %v3620_v15 = vld [vmem:[#allocation12 + $0xd10] sm:$0xff]  ;;  %v3617_v36 = vld [vmem:[#allocation12 + $0xcf8] sm:$0xff] }
 0x322   :  { %5718 = vmatprep.subr.mxu1 %v3405_v31  ;;  %5741 = vmatprep.subr.mxu0 %v3501_v11  ;;  %v3584_v9 = vld [vmem:[#allocation12 + $0xbf0] sm:$0xff]  ;;  %v3581_v7 = vld [vmem:[#allocation12 + $0xbd8] sm:$0xff] }
 0x323   :  { %5719 = vmatpush2.msra.mxu1 %v3404_v40  ;;  %5742 = vmatpush1.msra.mxu0 %v3500_v45  ;;  %v3616_v30 = vld [vmem:[#allocation12 + $0xcf0] sm:$0xff]  ;;  %v3613_v39 = vld [vmem:[#allocation12 + $0xcd8] sm:$0xff] }
 0x324   :  { %5720 = vmatprep.subr.mxu1 %v3401_v33  ;;  %5743 = vmatprep.subr.mxu0 %v3497_v4  ;;  %v3580_v38 = vld [vmem:[#allocation12 + $0xbd0] sm:$0xff]  ;;  %v3577_v60 = vld [vmem:[#allocation12 + $0xbb8] sm:$0xff] }
 0x325   :  { %5721 = vmatpush2.msra.mxu1 %v3400_v29  ;;  %5744 = vmatpush1.msra.mxu0 %v3496_v5  ;;  %v3612_v0 = vld [vmem:[#allocation12 + $0xcd0] sm:$0xff]  ;;  %v3609_v47 = vld [vmem:[#allocation12 + $0xcb8] sm:$0xff] }
 0x326   :  { %5722 = vmatprep.subr.mxu1 %v3397_v3  ;;  %5745 = vmatprep.subr.mxu0 %v3493_v58  ;;  %v3576_v21 = vld [vmem:[#allocation12 + $0xbb0] sm:$0xff]  ;;  %v3573_v46 = vld [vmem:[#allocation12 + $0xb98] sm:$0xff] }
 0x327   :  { %5723 = vmatpush2.msra.mxu1 %v3396_v56  ;;  %5746 = vmatpush1.msra.mxu0 %v3492_v2  ;;  %v3608_v17 = vld [vmem:[#allocation12 + $0xcb0] sm:$0xff]  ;;  %v3605_v37 = vld [vmem:[#allocation12 + $0xc98] sm:$0xff] }
 0x328   :  { %5725 = vmatmul.mubr.f32.vlgmr.msra.gmra.mxu1 %v6867_v22  ;;  %5747 = vmatprep.subr.mxu0 %v3489_v62  ;;  %v3637_v22 = vld [vmem:[#allocation12 + $0xd98] sm:$0xff]  ;;  %v3572_v44 = vld [vmem:[#allocation12 + $0xb90] sm:$0xff] }
 0x329   :  { %5802 = vmatprep.subr.mxu1 %v3649_v10  ;;  %5748 = vmatpush1.msra.mxu0 %v3488_v49  ;;  %v3604_v19 = vld [vmem:[#allocation12 + $0xc90] sm:$0xff]  ;;  %v3569_v6 = vld [vmem:[#allocation12 + $0xb78] sm:$0xff] }
 0x32a   :  { %5803 = vmatpush1.msra.mxu1 %v3648_v12  ;;  %5866 = vmatprep.mubr.f32.mxu1 %v7338_v8  ;;  %v3632_v8 = vld [vmem:[#allocation12 + $0xd70] sm:$0xff]  ;;  %v3601_v35 = vld [vmem:[#allocation12 + $0xc78] sm:$0xff] }
 0x32b   :  { %5749 = vmatprep.subr.mxu0 %v3485_v61  ;;  %5804 = vmatprep.subr.mxu1 %v3645_v34  ;;  %v3568_v31 = vld [vmem:[#allocation12 + $0xb70] sm:$0xff]  ;;  %v3565_v40 = vld [vmem:[#allocation12 + $0xb58] sm:$0xff] }
 0x32c   :  { %5750 = vmatpush1.msra.mxu0 %v3484_v42  ;;  %5805 = vmatpush1.msra.mxu1 %v3644_v53  ;;  %v3600_v11 = vld [vmem:[#allocation12 + $0xc70] sm:$0xff]  ;;  %v3597_v45 = vld [vmem:[#allocation12 + $0xc58] sm:$0xff] }
 0x32d   :  { %5751 = vmatprep.subr.mxu0 %v3481_v41  ;;  %5806 = vmatprep.subr.mxu1 %v3641_v32  ;;  %v3564_v33 = vld [vmem:[#allocation12 + $0xb50] sm:$0xff]  ;;  %v3561_v29 = vld [vmem:[#allocation12 + $0xb38] sm:$0xff] }
 0x32e   :  { %5752 = vmatpush1.msra.mxu0 %v3480_v54  ;;  %5807 = vmatpush1.msra.mxu1 %v3640_v63  ;;  %v3596_v4 = vld [vmem:[#allocation12 + $0xc50] sm:$0xff]  ;;  %v3593_v5 = vld [vmem:[#allocation12 + $0xc38] sm:$0xff] }
 0x32f   :  { %5753 = vmatprep.subr.mxu0 %v3477_v48  ;;  %5808 = vmatprep.subr.mxu1 %v3637_v22  ;;  %v3560_v3 = vld [vmem:[#allocation12 + $0xb30] sm:$0xff]  ;;  %v3557_v56 = vld [vmem:[#allocation12 + $0xb18] sm:$0xff] }
 0x330   :  { %5754 = vmatpush1.msra.mxu0 %v3476_v52  ;;  %5809 = vmatpush1.msra.mxu1 %v3636_v13  ;;  %v3592_v58 = vld [vmem:[#allocation12 + $0xc30] sm:$0xff]  ;;  %v3589_v2 = vld [vmem:[#allocation12 + $0xc18] sm:$0xff] }
 0x331   :  { %5755 = vmatprep.subr.mxu0 %v3473_v25  ;;  %5810 = vmatprep.subr.mxu1 %v3633_v51  ;;  %v3556_v62 = vld [vmem:[#allocation12 + $0xb10] sm:$0xff]  ;;  %v3553_v49 = vld [vmem:[#allocation12 + $0xaf8] sm:$0xff] }
 0x332   :  { %5756 = vmatpush1.msra.mxu0 %v3472_v16  ;;  %5811 = vmatpush1.msra.mxu1 %v3632_v8  ;;  %v3588_v10 = vld [vmem:[#allocation12 + $0xc10] sm:$0xff]  ;;  %v3713_v12 = vld [vmem:[#allocation12 + $0xff8] sm:$0xff] }
 0x333   :  { %5757 = vmatprep.subr.mxu0 %v3469_v28  ;;  %5812 = vmatprep.subr.mxu1 %v3629_v43  ;;  %v3552_v61 = vld [vmem:[#allocation12 + $0xaf0] sm:$0xff]  ;;  %v3549_v42 = vld [vmem:[#allocation12 + $0xad8] sm:$0xff] }
 0x334   :  { %5758 = vmatpush1.msra.mxu0 %v3468_v26  ;;  %5813 = vmatpush1.msra.mxu1 %v3628_v55  ;;  %v3712_v34 = vld [vmem:[#allocation12 + $0xff0] sm:$0xff]  ;;  %v3709_v53 = vld [vmem:[#allocation12 + $0xfd8] sm:$0xff] }
 0x335   :  { %5759 = vmatprep.subr.mxu0 %v3465_v57  ;;  %5814 = vmatprep.subr.mxu1 %v3625_v24  ;;  %v3548_v41 = vld [vmem:[#allocation12 + $0xad0] sm:$0xff]  ;;  %v3545_v54 = vld [vmem:[#allocation12 + $0xab8] sm:$0xff] }
 0x336   :  { %5760 = vmatpush1.msra.mxu0 %v3464_v14  ;;  %5815 = vmatpush1.msra.mxu1 %v3624_v50  ;;  %v3708_v32 = vld [vmem:[#allocation12 + $0xfd0] sm:$0xff]  ;;  %v3705_v63 = vld [vmem:[#allocation12 + $0xfb8] sm:$0xff] }
 0x337   :  { %5761 = vmatprep.subr.mxu0 %v3461_v1  ;;  %5816 = vmatprep.subr.mxu1 %v3621_v23  ;;  %v3544_v48 = vld [vmem:[#allocation12 + $0xab0] sm:$0xff]  ;;  %v3541_v52 = vld [vmem:[#allocation12 + $0xa98] sm:$0xff] }
 0x338   :  { %5762 = vmatpush1.msra.mxu0 %v3460_v18  ;;  %5817 = vmatpush1.msra.mxu1 %v3620_v15  ;;  %v3704_v22 = vld [vmem:[#allocation12 + $0xfb0] sm:$0xff]  ;;  %v3701_v13 = vld [vmem:[#allocation12 + $0xf98] sm:$0xff] }
 0x339   :  { %5763 = vmatprep.subr.mxu0 %v3585_v20  ;;  %5818 = vmatprep.subr.mxu1 %v3617_v36  ;;  %v3540_v25 = vld [vmem:[#allocation12 + $0xa90] sm:$0xff]  ;;  %v3537_v16 = vld [vmem:[#allocation12 + $0xa78] sm:$0xff] }
 0x33a   :  { %5764 = vmatpush2.msra.mxu0 %v3584_v9  ;;  %5819 = vmatpush1.msra.mxu1 %v3616_v30  ;;  %v3700_v51 = vld [vmem:[#allocation12 + $0xf90] sm:$0xff]  ;;  %v3697_v8 = vld [vmem:[#allocation12 + $0xf78] sm:$0xff] }
 0x33b   :  { %5765 = vmatprep.subr.mxu0 %v3581_v7  ;;  %5820 = vmatprep.subr.mxu1 %v3613_v39  ;;  %v3536_v28 = vld [vmem:[#allocation12 + $0xa70] sm:$0xff]  ;;  %v3533_v26 = vld [vmem:[#allocation12 + $0xa58] sm:$0xff] }
 0x33c   :  { %5766 = vmatpush2.msra.mxu0 %v3580_v38  ;;  %5821 = vmatpush1.msra.mxu1 %v3612_v0  ;;  %v3696_v43 = vld [vmem:[#allocation12 + $0xf70] sm:$0xff]  ;;  %v3693_v55 = vld [vmem:[#allocation12 + $0xf58] sm:$0xff] }
 0x33d   :  { %5767 = vmatprep.subr.mxu0 %v3577_v60  ;;  %5822 = vmatprep.subr.mxu1 %v3609_v47  ;;  %v3532_v57 = vld [vmem:[#allocation12 + $0xa50] sm:$0xff]  ;;  %v3529_v14 = vld [vmem:[#allocation12 + $0xa38] sm:$0xff] }
 0x33e   :  { %5768 = vmatpush2.msra.mxu0 %v3576_v21  ;;  %5823 = vmatpush1.msra.mxu1 %v3608_v17  ;;  %v3692_v24 = vld [vmem:[#allocation12 + $0xf50] sm:$0xff]  ;;  %v3689_v50 = vld [vmem:[#allocation12 + $0xf38] sm:$0xff] }
 0x33f   :  { %5769 = vmatprep.subr.mxu0 %v3573_v46  ;;  %5824 = vmatprep.subr.mxu1 %v3605_v37  ;;  %v3528_v1 = vld [vmem:[#allocation12 + $0xa30] sm:$0xff]  ;;  %v3525_v18 = vld [vmem:[#allocation12 + $0xa18] sm:$0xff] }
 0x340   :  { %5770 = vmatpush2.msra.mxu0 %v3572_v44  ;;  %5825 = vmatpush1.msra.mxu1 %v3604_v19  ;;  %v3688_v23 = vld [vmem:[#allocation12 + $0xf30] sm:$0xff]  ;;  %v3685_v15 = vld [vmem:[#allocation12 + $0xf18] sm:$0xff] }
 0x341   :  { %5771 = vmatprep.subr.mxu0 %v3569_v6  ;;  %5826 = vmatprep.subr.mxu1 %v3601_v35  ;;  %v3524_v20 = vld [vmem:[#allocation12 + $0xa10] sm:$0xff]  ;;  %v3681_v9 = vld [vmem:[#allocation12 + $0xef8] sm:$0xff]  ;;  %v5371_v35 = vpop.f32.mrf.mxu0 }
 0x342   :  { %5772 = vmatpush2.msra.mxu0 %v3568_v31  ;;  %5827 = vmatpush1.msra.mxu1 %v3600_v11  ;;  %v3684_v36 = vld [vmem:[#allocation12 + $0xf10] sm:$0xff]  ;;  %v3677_v7 = vld [vmem:[#allocation12 + $0xed8] sm:$0xff] }
 0x343   :  { %5773 = vmatprep.subr.mxu0 %v3565_v40  ;;  %5828 = vmatprep.subr.mxu1 %v3597_v45  ;;  %v3680_v30 = vld [vmem:[#allocation12 + $0xef0] sm:$0xff]  ;;  %v3673_v38 = vld [vmem:[#allocation12 + $0xeb8] sm:$0xff]  ;;  %v5442_v40 = vpop.f32.mrf.mxu1 }
 0x344   :  { %5774 = vmatpush2.msra.mxu0 %v3564_v33  ;;  %5829 = vmatpush1.msra.mxu1 %v3596_v4  ;;  %v3676_v39 = vld [vmem:[#allocation12 + $0xed0] sm:$0xff]  ;;  %v3669_v60 = vld [vmem:[#allocation12 + $0xe98] sm:$0xff]  ;;  %v3714_v33 = vld [vmem:[#allocation13] sm:$0xf]  ;;  %v5373_v4 = vpop.f32.mrf.mxu0 }
 0x345   :  { %5775 = vmatprep.subr.mxu0 %v3561_v29  ;;  %5830 = vmatprep.subr.mxu1 %v3593_v5  ;;  %v3672_v0 = vld [vmem:[#allocation12 + $0xeb0] sm:$0xff]  ;;  %v3665_v21 = vld [vmem:[#allocation12 + $0xe78] sm:$0xff]  ;;  %v5444_v5 = vpop.f32.mrf.mxu1 }
 0x346   :  { %5776 = vmatpush2.msra.mxu0 %v3560_v3  ;;  %5831 = vmatpush1.msra.mxu1 %v3592_v58  ;;  %v3668_v47 = vld [vmem:[#allocation12 + $0xe90] sm:$0xff]  ;;  %v3661_v46 = vld [vmem:[#allocation12 + $0xe58] sm:$0xff] }
 0x347   :  { %5777 = vmatprep.subr.mxu0 %v3557_v56  ;;  %5832 = vmatprep.subr.mxu1 %v3589_v2  ;;  %v3664_v17 = vld [vmem:[#allocation12 + $0xe70] sm:$0xff]  ;;  %v3653_v19 = vld [vmem:[#allocation12 + $0xe18] sm:$0xff] }
 0x348   :  { %5778 = vmatpush2.msra.mxu0 %v3556_v62  ;;  %5833 = vmatpush1.msra.mxu1 %v3588_v10  ;;  %v3660_v37 = vld [vmem:[#allocation12 + $0xe50] sm:$0xff] }
 0x349   :  { %5779 = vmatprep.subr.mxu0 %v3553_v49  ;;  %5834 = vmatprep.subr.mxu1 %v3713_v12  ;;  %v3656_v44 = vld [vmem:[#allocation12 + $0xe30] sm:$0xff] }
 0x34a   :  { %5780 = vmatpush2.msra.mxu0 %v3552_v61  ;;  %5835 = vmatpush2.msra.mxu1 %v3712_v34  ;;  %v3652_v6 = vld [vmem:[#allocation12 + $0xe10] sm:$0xff] }
 0x34b   :  { %5781 = vmatprep.subr.mxu0 %v3549_v42  ;;  %5836 = vmatprep.subr.mxu1 %v3709_v53  ;;  %v7402_v31 = vld [vmem:[#allocation22_spill] sm:$0xff] }
 0x34c   :  { %5782 = vmatpush2.msra.mxu0 %v3548_v41  ;;  %5837 = vmatpush2.msra.mxu1 %v3708_v32  ;;  %v3722_v11 = vsub.s32 1, %v7402_v31  ;;  %v3718_v45 = vsub.s32 0, %v7402_v31  ;;  %v3726_v12 = vsub.s32 2, %v7402_v31  ;;  %v3730_v53 = vsub.s32 3, %v7402_v31 }
 0x34d   :  { %5783 = vmatprep.subr.mxu0 %v3545_v54  ;;  %5838 = vmatprep.subr.mxu1 %v3705_v63 }
 0x34e   :  { %5784 = vmatpush2.msra.mxu0 %v3544_v48  ;;  %5839 = vmatpush2.msra.mxu1 %v3704_v22  ;;  %v3723_v29 = vrot.slane %v3714_v33, %v3722_v11  ;;  %v3719_v58 = vrot.slane %v3714_v33, %v3718_v45  ;;  %v3727_v54 = vrot.slane %v3714_v33, %v3726_v12 }
 0x34f   :  { %5785 = vmatprep.subr.mxu0 %v3541_v52  ;;  %5840 = vmatprep.subr.mxu1 %v3701_v13  ;;  %v3731_v52 = vrot.slane %v3714_v33, %v3730_v53  ;;  %v5877_v13 = vld [vmem:[#allocation15] sm:$0xf] }
 0x350   :  { %5786 = vmatpush2.msra.mxu0 %v3540_v25  ;;  %5841 = vmatpush2.msra.mxu1 %v3700_v51  ;;  %v5374_v2 = vadd.f32 %v5373_v4, %v3723_v29  ;;  %v5372_v10 = vadd.f32 %v5371_v35, %v3719_v58 }
 0x351   :  { %5787 = vmatprep.subr.mxu0 %v3537_v16  ;;  %5842 = vmatprep.subr.mxu1 %v3697_v8  ;;  %v5886_v16 = vrot.slane %v5877_v13, %v3722_v11 }
 0x352   :  { %5788 = vmatpush2.msra.mxu0 %v3536_v28  ;;  %5843 = vmatpush2.msra.mxu1 %v3696_v43  ;;  %v5445_v49 = vadd.f32 %v5444_v5, %v5374_v2  ;;  %v5443_v34 = vadd.f32 %v5442_v40, %v5372_v10 }
 0x353   :  { %5789 = vmatprep.subr.mxu0 %v3533_v26  ;;  %5844 = vmatprep.subr.mxu1 %v3693_v55  ;;  %v5882_v26 = vrot.slane %v5877_v13, %v3718_v45 }
 0x354   :  { %5790 = vmatpush2.msra.mxu0 %v3532_v57  ;;  %5845 = vmatpush2.msra.mxu1 %v3692_v24 }
 0x355   :  { %5791 = vmatprep.subr.mxu0 %v3529_v14  ;;  %5846 = vmatprep.subr.mxu1 %v3689_v50 }
 0x356   :  { %5792 = vmatpush2.msra.mxu0 %v3528_v1  ;;  %5847 = vmatpush2.msra.mxu1 %v3688_v23 }
 0x357   :  { %5793 = vmatprep.subr.mxu0 %v3525_v18  ;;  %5848 = vmatprep.subr.mxu1 %v3685_v15 }
 0x358   :  { %5794 = vmatpush2.msra.mxu0 %v3524_v20  ;;  %5849 = vmatpush2.msra.mxu1 %v3684_v36  ;;  %v5890_v36 = vrot.slane %v5877_v13, %v3726_v12 }
 0x359   :  { %5796 = vmatmul.mubr.f32.vlgmr.msra.gmra.mxu0 %v7276_v59  ;;  %5850 = vmatprep.subr.mxu1 %v3681_v9  ;;  %v3657_v59 = vld [vmem:[#allocation12 + $0xe38] sm:$0xff] }
 0x35a   :  { %5851 = vmatpush2.msra.mxu1 %v3680_v30 }
 0x35b   :  { %5852 = vmatprep.subr.mxu1 %v3677_v7 }
 0x35c   :  { %5853 = vmatpush2.msra.mxu1 %v3676_v39 }
 0x35d   :  { %5854 = vmatprep.subr.mxu1 %v3673_v38  ;;  %v5894_v38 = vrot.slane %v5877_v13, %v3730_v53 }
 0x35e   :  { %5855 = vmatpush2.msra.mxu1 %v3672_v0 }
 0x35f   :  { %5856 = vmatprep.subr.mxu1 %v3669_v60 }
 0x360   :  { %5857 = vmatpush2.msra.mxu1 %v3668_v47 }
 0x361   :  { %5858 = vmatprep.subr.mxu1 %v3665_v21 }
 0x362   :  { %5859 = vmatpush2.msra.mxu1 %v3664_v17 }
 0x363   :  { %5860 = vmatprep.subr.mxu1 %v3661_v46 }
 0x364   :  { %5861 = vmatpush2.msra.mxu1 %v3660_v37 }
 0x365   :  { %5862 = vmatprep.subr.mxu1 %v3657_v59 }
 0x366   :  { %5863 = vmatpush2.msra.mxu1 %v3656_v44 }
 0x367   :  { %5864 = vmatprep.subr.mxu1 %v3653_v19  ;;  %v6153_v19 = vmov 0  }
 0x368   :  { %5865 = vmatpush2.msra.mxu1 %v3652_v6  ;;  %5966 = vset.pattern.permute.xlu1 %v6153_v19  ;;  %v5951_v6 = vld [vmem:[#allocation3] ss:$0 sm:$0xff] }
 0x369   :  { %5867 = vmatmul.mubr.f32.vlgmr.msra.gmra.mxu1 %v7349_v27  ;;  %5967 = vset.pattern.permute.xlu0 %v6153_v19 }
 0x396   :  { %v5513_v3 = vpop.f32.mrf.mxu0 }
 0x397   :  { %v5514_v41 = vadd.f32 %v5513_v3, %v5443_v34 }
 0x398   :  { %v5515_v62 = vpop.f32.mrf.mxu0 }
 0x399   :  { %v5516_v42 = vadd.f32 %v5515_v62, %v5445_v49 }
 0x3a7   :  { %v5584_v56 = vpop.f32.mrf.mxu1 }
 0x3a8   :  { %v5585_v22 = vadd.f32 %v5584_v56, %v5514_v41 }
 0x3a9   :  { %v5586_v27 = vpop.f32.mrf.mxu1 }
 0x3aa   :  { %v5587_v32 = vadd.f32 %v5586_v27, %v5516_v42  ;;  %v5873_v43 = vmax.f32 %v5585_v22, 0.0 }
 0x3ac   :  { %v5874_v51 = vmax.f32 %v5587_v32, 0.0  ;;  %v5899_v18 = vmul.f32 %v5882_v26, %v5873_v43 }
 0x3ae   :  { %v5900_v14 = vmul.f32 %v5886_v16, %v5874_v51  ;;  %v5904_v0 = vsel %vm5903_vm0, %v5899_v18, 0.0 }
 0x3b0   :  { %v5905_v30 = vsel %vm5903_vm0, %v5900_v14, 0.0 }
 0x3b1   :  { %v5906_v21 = vadd.f32 %v5905_v30, %v5904_v0 }
 0x3d7   :  { %v5655_v61 = vpop.f32.mrf.mxu0 }
 0x3d8   :  { %v5656_v8 = vadd.f32 %v5655_v61, %v3727_v54 }
 0x3d9   :  { %v5657_v63 = vpop.f32.mrf.mxu0 }
 0x3da   :  { %v5658_v55 = vadd.f32 %v5657_v63, %v3731_v52 }
 0x3e8   :  { %v5726_v48 = vpop.f32.mrf.mxu1 }
 0x3e9   :  { %v5727_v57 = vadd.f32 %v5726_v48, %v5656_v8 }
 0x3ea   :  { %v5728_v28 = vpop.f32.mrf.mxu1 }
 0x3eb   :  { %v5729_v50 = vadd.f32 %v5728_v28, %v5658_v55 }
 0x419   :  { %v5797_v25 = vpop.f32.mrf.mxu0 }
 0x41a   :  { %v5798_v1 = vadd.f32 %v5797_v25, %v5727_v57 }
 0x41b   :  { %v5799_v24 = vpop.f32.mrf.mxu0 }
 0x41c   :  { %v5800_v15 = vadd.f32 %v5799_v24, %v5729_v50 }
 0x429   :  { %v5868_v23 = vpop.f32.mrf.mxu1 }
 0x42a   :  { %v5869_v20 = vadd.f32 %v5868_v23, %v5798_v1 }
 0x42b   :  { %v5870_v9 = vpop.f32.mrf.mxu1 }
 0x42c   :  { %v5875_v7 = vmax.f32 %v5869_v20, 0.0  ;;  %v5871_v39 = vadd.f32 %v5870_v9, %v5800_v15 }
 0x42e   :  { %v5901_v60 = vmul.f32 %v5890_v36, %v5875_v7  ;;  %v5876_v47 = vmax.f32 %v5871_v39, 0.0 }
 0x430   :  { %v5907_v17 = vsel %vm5903_vm0, %v5901_v60, 0.0  ;;  %v5902_v46 = vmul.f32 %v5894_v38, %v5876_v47 }
 0x431   :  { %v5908_v37 = vadd.f32 %v5907_v17, %v5906_v21 }
 0x432   :  { %v5909_v59 = vsel %vm5903_vm0, %v5902_v46, 0.0 }
 0x433   :  { %v5910_v44 = vadd.f32 %v5909_v59, %v5908_v37 }
 0x435   :  { %5911 = vadd.xlane.f32.xlu0 %v5910_v44 }
 0x4be   :  { %v5912_v35 = vpop.xlane.xlu0 %5911 }
 0x4bf   :  { %v5920_v31 = vadd.f32 %v5951_v6, %v5912_v35 }
 0x4c1   :  { %v5952_v11 = vmul.f32 -1.442695, %v5920_v31 }
 0x4c3   :  { %5968 = vpow2.f32 %v5952_v11 }
 0x4d0   :  { %v5969_v40 = vpop.eup %5968 }
 0x4d1   :  { %v5924_v45 = vadd.f32 1.0, %v5969_v40 }
 0x4d3   :  { %5970 = vrcp.f32 %v5924_v45 }
 0x4e0   :  { %v5971_v33 = vpop.eup %5970 }
 0x4e1   :  { %5929 = vperm.xlu1 %5966, %v5971_v33  }
 0x55c   :  { %v5930_v4 = vpop.permute.xlu1 %5929 }
 0x55d   :  { %5932 = vst [vmem:[#allocation16] sm:$0x3] %v5930_v4 }
 0x55e   :  { %6123 = shalt.err (!%p6120_p11)
}
 0x55f   :  { %5942 = dma.vmem_to_hbm [thread:$0]  %s5940_s6, 32, %s7374_s8, [#allocation6]  }
 0x560   :  { %6140 = dma.done.wait [#allocation6], 32  }
 0x561   :  { %6141 = vsyncadd [#allocation6], 4294967264 }
 0x562   :  { %5946 = vsyncpa [#allocation5], 1 }
 0x563   :  { %5947 = vsyncpa [#allocation8], 1 }
 0x564   :  { %5948 = vsyncpa [#allocation11], 1 }
 0x565   :  { %5949 = vsyncpa [#allocation14], 1 }
 0x566   :  { %5950 = vsyncpa [#allocation6], 1 }

// kernel: tpu_custom_call.1
= control target key start
LH: loop header
LB: loop body
LE: loop exit
PB: predicated region body
PF: predicated region fallthrough
CT: control target
= control target key end

     0   :  { %s7366_s0 = inlined_call_operand.hbm [shape: bf16[2,256,256], index: 0, kind: input, shape index: {}]   ;;  %s7367_s1 = inlined_call_operand.hbm [shape: bf16[2,256,256], index: 1, kind: input, shape index: {}]   ;;  %s7368_s2 = inlined_call_operand.hbm [shape: bf16[2,256,256], index: 2, kind: input, shape index: {}]   ;;  %s7369_s3 = inlined_call_operand.hbm [shape: bf16[2,256,256], index: 3, kind: input, shape index: {}]   ;;  %s7370_s4 = inlined_call_operand.hbm [shape: f32[1024,512], index: 4, kind: input, shape index: {}]   ;;  %s7371_s5 = inlined_call_operand.hbm [shape: f32[1,512], index: 5, kind: input, shape index: {}]   ;;  %s7372_s6 = inlined_call_operand.hbm [shape: f32[1,512], index: 6, kind: input, shape index: {}]   ;;  %s7373_s7 = inlined_call_operand.<no memory space> [shape: f32[1,1], index: 7, kind: input, shape index: {}]   ;;  %s7374_s8 = inlined_call_operand.hbm [shape: f32[2,128], index: 8, kind: output, shape index: {}]  }
   0x1   :  { %v13_v0 = vstv %s7373_s7 }
   0x2   :  { %14 = vst [vmem:[#allocation3] sm:$0x1] %v13_v0 }
   0x3   :  { %15 = vsyncpa [#allocation5], 0 }
   0x4   :  { %16 = vsyncpa [#allocation8], 0 }
   0x5   :  { %17 = vsyncpa [#allocation11], 0 }
   0x6   :  { %18 = vsyncpa [#allocation14], 0 }
   0x7   :  { %19 = vsyncpa [#allocation6], 0  ;;  %s6142_s29 = smov [#allocation7]   ;;  %s6143_s9 = smov [#allocation10]  }
   0x8   :  { %s37_s30 = sshll.u32 %s6142_s29, 4  ;;  %s61_s10 = sshll.u32 %s6143_s9, 4  ;;  %s38_s30 = int_to_ptr.vmem [resolvable:$true] %s37_s30  ;;  %s62_s10 = int_to_ptr.vmem [resolvable:$true] %s61_s10 }
   0x9   :  { %s5980_s11 = scalar_lea.vmem %s38_s30, 8192  ;;  %p5985_p1 = scmp.lt.s32.totalorder %s38_s30, %s38_s30 }
   0xa   :  { %p5981_p0 = scmp.ne.s32.totalorder %s38_s30, %s5980_s11  ;;  %p5986_p2 = scmp.lt.s32.totalorder %s5980_s11, %s5980_s11 }
   0xc   :  { %p5987_p3 = por %p5986_p2, %p5985_p1 }
   0xe   :  { %p5988_p4 = pnand %p5987_p3, %p5981_p0 }
  0x10   :  { %5991 = shalt.err (!%p5988_p4)
}
  0x11   :  { %s6144_s7 = smov 128   ;;  %s6145_s12 = smov 8  }
  0x12   :  { %43 = dma.hbm_to_vmem [thread:$0]  %s7367_s1, 8192, %s38_s30, [#allocation8], %s6144_s7, %s6144_s7, %s6145_s12  }
  0x13   :  { %s6000_s15 = scalar_lea.vmem %s62_s10, 8192  ;;  %p6005_p6 = scmp.lt.s32.totalorder %s62_s10, %s62_s10 }
  0x14   :  { %p6001_p5 = scmp.ne.s32.totalorder %s62_s10, %s6000_s15  ;;  %p6006_p7 = scmp.lt.s32.totalorder %s6000_s15, %s6000_s15 }
  0x16   :  { %p6007_p8 = por %p6006_p7, %p6005_p6 }
  0x18   :  { %p6008_p9 = pnand %p6007_p8, %p6001_p5 }
  0x1a   :  { %6011 = shalt.err (!%p6008_p9)
}
  0x1b   :  { %67 = dma.hbm_to_vmem [thread:$0]  %s7369_s3, 8192, %s62_s10, [#allocation11], %s6144_s7, %s6144_s7, %s6145_s12  }
  0x1c   :  { %s6146_s18 = smov [#allocation13]   ;;  %s6147_s20 = smov [#allocation4]  }
  0x1d   :  { %s86_s19 = sshll.u32 %s6146_s18, 4  ;;  %s25_s21 = sshll.u32 %s6147_s20, 4  ;;  %s87_s19 = int_to_ptr.vmem [resolvable:$true] %s86_s19  ;;  %s26_s21 = int_to_ptr.vmem [resolvable:$true] %s25_s21 }
  0x1e   :  { %s6020_s1 = scalar_lea.vmem %s87_s19, 64  ;;  %p6025_p11 = scmp.lt.s32.totalorder %s87_s19, %s87_s19 }
  0x1f   :  { %p6021_p10 = scmp.ne.s32.totalorder %s87_s19, %s6020_s1  ;;  %p6026_p12 = scmp.lt.s32.totalorder %s6020_s1, %s6020_s1 }
  0x21   :  { %p6027_p13 = por %p6026_p12, %p6025_p11 }
  0x23   :  { %p6028_p0 = pnand %p6027_p13, %p6021_p10 }
  0x25   :  { %6031 = shalt.err (!%p6028_p0)
}
  0x26   :  { %89 = dma.hbm_to_vmem [thread:$0]  %s7371_s5, 64, %s87_s19, [#allocation14]  }
  0x27   :  { %s6040_s24 = scalar_lea.vmem %s26_s21, 8192  ;;  %p6045_p2 = scmp.lt.s32.totalorder %s26_s21, %s26_s21 }
  0x28   :  { %p6041_p1 = scmp.ne.s32.totalorder %s26_s21, %s6040_s24  ;;  %p6046_p3 = scmp.lt.s32.totalorder %s6040_s24, %s6040_s24 }
  0x2a   :  { %p6047_p4 = por %p6046_p3, %p6045_p2 }
  0x2c   :  { %p6048_p5 = pnand %p6047_p4, %p6041_p1 }
  0x2e   :  { %6051 = shalt.err (!%p6048_p5)
}
  0x2f   :  { %31 = dma.hbm_to_vmem [thread:$0]  %s7366_s0, 8192, %s26_s21, [#allocation5], %s6144_s7, %s6144_s7, %s6145_s12  }
  0x30   :  { %s6148_s26 = smov [#allocation9]   ;;  %s6149_s28 = smov [#allocation12]  }
  0x31   :  { %s49_s27 = sshll.u32 %s6148_s26, 4  ;;  %s73_s29 = sshll.u32 %s6149_s28, 4  ;;  %s50_s27 = int_to_ptr.vmem [resolvable:$true] %s49_s27  ;;  %s74_s29 = int_to_ptr.vmem [resolvable:$true] %s73_s29 }
  0x32   :  { %s6060_s5 = scalar_lea.vmem %s50_s27, 8192  ;;  %p6065_p7 = scmp.lt.s32.totalorder %s50_s27, %s50_s27 }
  0x33   :  { %p6061_p6 = scmp.ne.s32.totalorder %s50_s27, %s6060_s5  ;;  %p6066_p8 = scmp.lt.s32.totalorder %s6060_s5, %s6060_s5 }
  0x35   :  { %p6067_p9 = por %p6066_p8, %p6065_p7 }
  0x37   :  { %p6068_p10 = pnand %p6067_p9, %p6061_p6 }
  0x39   :  { %6071 = shalt.err (!%p6068_p10)
}
  0x3a   :  { %55 = dma.hbm_to_vmem [thread:$0]  %s7368_s2, 8192, %s50_s27, [#allocation8], %s6144_s7, %s6144_s7, %s6145_s12  }
  0x3b   :  { %s6080_s0 = scalar_lea.vmem %s74_s29, 65536  ;;  %p6085_p12 = scmp.lt.s32.totalorder %s74_s29, %s74_s29 }
  0x3c   :  { %p6081_p11 = scmp.ne.s32.totalorder %s74_s29, %s6080_s0  ;;  %p6086_p13 = scmp.lt.s32.totalorder %s6080_s0, %s6080_s0 }
  0x3e   :  { %p6087_p0 = por %p6086_p13, %p6085_p12 }
  0x40   :  { %p6088_p1 = pnand %p6087_p0, %p6081_p11 }
  0x42   :  { %6091 = shalt.err (!%p6088_p1)
}
  0x43   :  { %s6150_s10 = smov 512   ;;  %s6151_s11 = smov 32  }
  0x44   :  { %79 = dma.hbm_to_vmem [thread:$0]  %s7370_s4, 65536, %s74_s29, [#allocation11], %s6150_s10, %s6150_s10, %s6151_s11  }
  0x45   :  { %s6152_s15 = smov [#allocation15]  }
  0x46   :  { %s96_s16 = sshll.u32 %s6152_s15, 4  ;;  %s97_s16 = int_to_ptr.vmem [resolvable:$true] %s96_s16 }
  0x47   :  { %s6100_s17 = scalar_lea.vmem %s97_s16, 64  ;;  %p6105_p3 = scmp.lt.s32.totalorder %s97_s16, %s97_s16 }
  0x48   :  { %p6101_p2 = scmp.ne.s32.totalorder %s97_s16, %s6100_s17  ;;  %p6106_p4 = scmp.lt.s32.totalorder %s6100_s17, %s6100_s17 }
  0x4a   :  { %p6107_p5 = por %p6106_p4, %p6105_p3 }
  0x4c   :  { %p6108_p6 = pnand %p6107_p5, %p6101_p2 }
  0x4e   :  { %6111 = shalt.err (!%p6108_p6)
}
  0x4f   :  { %99 = dma.hbm_to_vmem [thread:$0]  %s7372_s6, 64, %s97_s16, [#allocation14]  }
  0x50   :  { %6132 = dma.done.wait [#allocation5], 8192  }
  0x51   :  { %6133 = vsyncadd [#allocation5], 4294959104 }
  0x52   :  { %6134 = dma.done.wait [#allocation8], 16384  }
  0x53   :  { %6135 = vsyncadd [#allocation8], 4294950912 }
  0x54   :  { %6136 = dma.done.wait [#allocation11], 73728  }
  0x55   :  { %6137 = vsyncadd [#allocation11], 4294893568 }
  0x56   :  { %6138 = dma.done.wait [#allocation14], 128  }
  0x57   :  { %6139 = vsyncadd [#allocation14], 4294967168  ;;  %v431_v1 = vld [vmem:[#allocation4 + $0x180] sm:$0xff]   ;;  %v432_v3 = vld [vmem:[#allocation4 + $0x188] sm:$0xff]   ;;  %vm4003_vm0 = vcmask 130112   ;;  %vm4010_vm1 = vcmask 195712  }
  0x58   :  { %v399_v2 = vld [vmem:[#allocation4 + $0x80] sm:$0xff]   ;;  %v495_v4 = vunpack.c.l.bf16 %v431_v1  ;;  %v623_v5 = vunpack.c.h.bf16 %v431_v1  ;;  %v400_v8 = vld [vmem:[#allocation4 + $0x88] sm:$0xff]   ;;  %v496_v10 = vunpack.c.l.bf16 %v432_v3  ;;  %v624_v11 = vunpack.c.h.bf16 %v432_v3  ;;  %v401_v24 = vld [vmem:[#allocation4 + $0x90] sm:$0xff]   ;;  %s6154_s4 = smov [#allocation16]  }
  0x59   :  { %v463_v6 = vunpack.c.l.bf16 %v399_v2  ;;  %v591_v7 = vunpack.c.h.bf16 %v399_v2  ;;  %v384_v9 = vld [vmem:[#allocation4 + $0x8] sm:$0xff]   ;;  %v464_v12 = vunpack.c.l.bf16 %v400_v8  ;;  %v592_v13 = vunpack.c.h.bf16 %v400_v8  ;;  %v383_v14 = vld [vmem:[#allocation4] sm:$0xff]   ;;  %v433_v31 = vld [vmem:[#allocation4 + $0x190] sm:$0xff]   ;;  %s5939_s6 = sshll.u32 %s6154_s4, 4  ;;  %s5940_s6 = int_to_ptr.vmem [resolvable:$true] %s5939_s6 }
  0x5a   :  { %v687_v15 = vadd.f32 %v623_v5, %v495_v4  ;;  %v448_v17 = vunpack.c.l.bf16 %v384_v9  ;;  %v576_v18 = vunpack.c.h.bf16 %v384_v9  ;;  %v688_v19 = vadd.f32 %v624_v11, %v496_v10  ;;  %v415_v23 = vld [vmem:[#allocation4 + $0x100] sm:$0xff]   ;;  %v416_v32 = vld [vmem:[#allocation4 + $0x108] sm:$0xff]   ;;  %v402_v39 = vld [vmem:[#allocation4 + $0x98] sm:$0xff]   ;;  %s6112_s12 = scalar_lea.vmem %s5940_s6, 32  ;;  %p6117_p8 = scmp.lt.s32.totalorder %s5940_s6, %s5940_s6 }
  0x5b   :  { %v655_v16 = vadd.f32 %v591_v7, %v463_v6  ;;  %v656_v20 = vadd.f32 %v592_v13, %v464_v12  ;;  %v447_v21 = vunpack.c.l.bf16 %v383_v14  ;;  %v575_v22 = vunpack.c.h.bf16 %v383_v14  ;;  %v385_v40 = vld [vmem:[#allocation4 + $0x10] sm:$0xff]   ;;  %v912_v47 = vld [vmem:[#allocation7 + $0x88] sm:$0xff]   ;;  %v911_v48 = vld [vmem:[#allocation7 + $0x80] sm:$0xff]   ;;  %p6113_p7 = scmp.ne.s32.totalorder %s5940_s6, %s6112_s12  ;;  %p6118_p9 = scmp.lt.s32.totalorder %s6112_s12, %s6112_s12 }
  0x5c   :  { %2978 = vadd.xlane.f32.xlu1 %v687_v15  ;;  %v640_v25 = vadd.f32 %v576_v18, %v448_v17  ;;  %v479_v26 = vunpack.c.l.bf16 %v415_v23  ;;  %v607_v28 = vunpack.c.h.bf16 %v415_v23  ;;  %v465_v29 = vunpack.c.l.bf16 %v401_v24  ;;  %v434_v55 = vld [vmem:[#allocation4 + $0x198] sm:$0xff]   ;;  %v417_v56 = vld [vmem:[#allocation4 + $0x110] sm:$0xff]   ;;  %v944_v63 = vld [vmem:[#allocation7 + $0x188] sm:$0xff]  }
  0x5d   :  { %2722 = vadd.xlane.f32.xlu0 %v655_v16  ;;  %v639_v27 = vadd.f32 %v575_v22, %v447_v21  ;;  %v593_v30 = vunpack.c.h.bf16 %v401_v24  ;;  %v497_v33 = vunpack.c.l.bf16 %v433_v31  ;;  %v625_v34 = vunpack.c.h.bf16 %v433_v31  ;;  %v943_v0 = vld [vmem:[#allocation7 + $0x180] sm:$0xff]   ;;  %v386_v8 = vld [vmem:[#allocation4 + $0x18] sm:$0xff]   ;;  %v896_v15 = vld [vmem:[#allocation7 + $0x8] sm:$0xff]   ;;  %p6119_p10 = por %p6118_p9, %p6117_p8 }
  0x5e   :  { %v671_v35 = vadd.f32 %v607_v28, %v479_v26  ;;  %v480_v37 = vunpack.c.l.bf16 %v416_v32  ;;  %v608_v38 = vunpack.c.h.bf16 %v416_v32  ;;  %v466_v42 = vunpack.c.l.bf16 %v402_v39  ;;  %v403_v7 = vld [vmem:[#allocation4 + $0xa0] sm:$0xff]   ;;  %v418_v23 = vld [vmem:[#allocation4 + $0x118] sm:$0xff]   ;;  %v913_v24 = vld [vmem:[#allocation7 + $0x90] sm:$0xff]  }
  0x5f   :  { %v657_v36 = vadd.f32 %v593_v30, %v465_v29  ;;  %v689_v41 = vadd.f32 %v625_v34, %v497_v33  ;;  %v594_v44 = vunpack.c.h.bf16 %v402_v39  ;;  %v449_v45 = vunpack.c.l.bf16 %v385_v40  ;;  %v895_v16 = vld [vmem:[#allocation7] sm:$0xff]   ;;  %v945_v39 = vld [vmem:[#allocation7 + $0x190] sm:$0xff]   ;;  %p6120_p11 = pnand %p6119_p10, %p6113_p7 }
  0x60   :  { %2980 = vadd.xlane.f32.xlu1 %v688_v19  ;;  %v672_v43 = vadd.f32 %v608_v38, %v480_v37  ;;  %v577_v46 = vunpack.c.h.bf16 %v385_v40  ;;  %v976_v49 = vunpack.c.l.bf16 %v912_v47  ;;  %v1104_v50 = vunpack.c.h.bf16 %v912_v47  ;;  %v927_v31 = vld [vmem:[#allocation7 + $0x100] sm:$0xff]   ;;  %v928_v40 = vld [vmem:[#allocation7 + $0x108] sm:$0xff]  }
  0x61   :  { %2724 = vadd.xlane.f32.xlu0 %v656_v20  ;;  %v658_v51 = vadd.f32 %v594_v44, %v466_v42  ;;  %v975_v53 = vunpack.c.l.bf16 %v911_v48  ;;  %v1103_v54 = vunpack.c.h.bf16 %v911_v48  ;;  %v498_v58 = vunpack.c.l.bf16 %v434_v55  ;;  %v435_v32 = vld [vmem:[#allocation4 + $0x1a0] sm:$0xff]   ;;  %v404_v47 = vld [vmem:[#allocation4 + $0xa8] sm:$0xff]  }
  0x62   :  { %v641_v52 = vadd.f32 %v577_v46, %v449_v45  ;;  %v1168_v57 = vadd.f32 %v1104_v50, %v976_v49  ;;  %v626_v60 = vunpack.c.h.bf16 %v434_v55  ;;  %v481_v61 = vunpack.c.l.bf16 %v417_v56  ;;  %v387_v48 = vld [vmem:[#allocation4 + $0x20] sm:$0xff]   ;;  %v914_v55 = vld [vmem:[#allocation7 + $0x98] sm:$0xff]  }
  0x63   :  { %v1167_v59 = vadd.f32 %v1103_v54, %v975_v53  ;;  %v609_v62 = vunpack.c.h.bf16 %v417_v56  ;;  %v1008_v1 = vunpack.c.l.bf16 %v944_v63  ;;  %v1136_v2 = vunpack.c.h.bf16 %v944_v63  ;;  %v897_v56 = vld [vmem:[#allocation7 + $0x10] sm:$0xff]   ;;  %v436_v63 = vld [vmem:[#allocation4 + $0x1a8] sm:$0xff]  }
  0x64   :  { %2692 = vadd.xlane.f32.xlu1 %v640_v25  ;;  %v690_v3 = vadd.f32 %v626_v60, %v498_v58  ;;  %v1007_v5 = vunpack.c.l.bf16 %v943_v0  ;;  %v1135_v6 = vunpack.c.h.bf16 %v943_v0  ;;  %v467_v10 = vunpack.c.l.bf16 %v403_v7  ;;  %v419_v0 = vld [vmem:[#allocation4 + $0x120] sm:$0xff]  }
  0x65   :  { %2690 = vadd.xlane.f32.xlu0 %v639_v27  ;;  %v673_v4 = vadd.f32 %v609_v62, %v481_v61  ;;  %v1200_v9 = vadd.f32 %v1136_v2, %v1008_v1  ;;  %v595_v12 = vunpack.c.h.bf16 %v403_v7  ;;  %v450_v13 = vunpack.c.l.bf16 %v386_v8  ;;  %v946_v7 = vld [vmem:[#allocation7 + $0x198] sm:$0xff]  }
  0x66   :  { %v1199_v11 = vadd.f32 %v1135_v6, %v1007_v5  ;;  %v578_v14 = vunpack.c.h.bf16 %v386_v8  ;;  %v960_v17 = vunpack.c.l.bf16 %v896_v15  ;;  %v1088_v18 = vunpack.c.h.bf16 %v896_v15  ;;  %v929_v8 = vld [vmem:[#allocation7 + $0x110] sm:$0xff]  }
  0x67   :  { %v659_v19 = vadd.f32 %v595_v12, %v467_v10  ;;  %v959_v21 = vunpack.c.l.bf16 %v895_v16  ;;  %v1087_v22 = vunpack.c.h.bf16 %v895_v16  ;;  %v482_v26 = vunpack.c.l.bf16 %v418_v23  ;;  %v405_v15 = vld [vmem:[#allocation4 + $0xb0] sm:$0xff]   ;;  %v388_v16 = vld [vmem:[#allocation4 + $0x28] sm:$0xff]  }
  0x68   :  { %2946 = vadd.xlane.f32.xlu1 %v671_v35  ;;  %v642_v20 = vadd.f32 %v578_v14, %v450_v13  ;;  %v1152_v25 = vadd.f32 %v1088_v18, %v960_v17  ;;  %v610_v28 = vunpack.c.h.bf16 %v418_v23  ;;  %v977_v29 = vunpack.c.l.bf16 %v913_v24  ;;  %v915_v23 = vld [vmem:[#allocation7 + $0xa0] sm:$0xff]  }
  0x69   :  { %2726 = vadd.xlane.f32.xlu0 %v657_v36  ;;  %v1151_v27 = vadd.f32 %v1087_v22, %v959_v21  ;;  %v1105_v30 = vunpack.c.h.bf16 %v913_v24  ;;  %v991_v33 = vunpack.c.l.bf16 %v927_v31  ;;  %v1119_v34 = vunpack.c.h.bf16 %v927_v31  ;;  %v898_v24 = vld [vmem:[#allocation7 + $0x18] sm:$0xff]   ;;  %v437_v31 = vld [vmem:[#allocation4 + $0x1b0] sm:$0xff]  }
  0x6a   :  { %v674_v35 = vadd.f32 %v610_v28, %v482_v26  ;;  %v499_v37 = vunpack.c.l.bf16 %v435_v32  ;;  %v627_v38 = vunpack.c.h.bf16 %v435_v32  ;;  %v1009_v42 = vunpack.c.l.bf16 %v945_v39  ;;  %v420_v32 = vld [vmem:[#allocation4 + $0x128] sm:$0xff]  }
  0x6b   :  { %v1169_v36 = vadd.f32 %v1105_v30, %v977_v29  ;;  %v1137_v44 = vunpack.c.h.bf16 %v945_v39  ;;  %v992_v45 = vunpack.c.l.bf16 %v928_v40  ;;  %v1120_v46 = vunpack.c.h.bf16 %v928_v40  ;;  %v947_v39 = vld [vmem:[#allocation7 + $0x1a0] sm:$0xff]   ;;  %v930_v40 = vld [vmem:[#allocation7 + $0x118] sm:$0xff]  }
  0x6c   :  { %2982 = vadd.xlane.f32.xlu1 %v689_v41  ;;  %v1183_v41 = vadd.f32 %v1119_v34, %v991_v33  ;;  %v468_v49 = vunpack.c.l.bf16 %v404_v47  ;;  %v596_v50 = vunpack.c.h.bf16 %v404_v47  ;;  %v451_v53 = vunpack.c.l.bf16 %v387_v48  ;;  %v406_v47 = vld [vmem:[#allocation4 + $0xb8] sm:$0xff]  }
  0x6d   :  { %2948 = vadd.xlane.f32.xlu0 %v672_v43  ;;  %v691_v43 = vadd.f32 %v627_v38, %v499_v37  ;;  %v579_v54 = vunpack.c.h.bf16 %v387_v48  ;;  %v978_v58 = vunpack.c.l.bf16 %v914_v55  ;;  %v1106_v60 = vunpack.c.h.bf16 %v914_v55  ;;  %v389_v48 = vld [vmem:[#allocation4 + $0x30] sm:$0xff]   ;;  %v916_v55 = vld [vmem:[#allocation7 + $0xa8] sm:$0xff]  }
  0x6e   :  { %v961_v61 = vunpack.c.l.bf16 %v897_v56  ;;  %v1089_v62 = vunpack.c.h.bf16 %v897_v56  ;;  %v500_v1 = vunpack.c.l.bf16 %v436_v63  ;;  %v628_v2 = vunpack.c.h.bf16 %v436_v63  ;;  %v899_v56 = vld [vmem:[#allocation7 + $0x20] sm:$0xff]   ;;  %v438_v63 = vld [vmem:[#allocation4 + $0x1b8] sm:$0xff]  }
  0x6f   :  { %v483_v5 = vunpack.c.l.bf16 %v419_v0  ;;  %v611_v6 = vunpack.c.h.bf16 %v419_v0  ;;  %v1010_v10 = vunpack.c.l.bf16 %v946_v7  ;;  %v1138_v12 = vunpack.c.h.bf16 %v946_v7  ;;  %v421_v0 = vld [vmem:[#allocation4 + $0x130] sm:$0xff]   ;;  %v948_v7 = vld [vmem:[#allocation7 + $0x1a8] sm:$0xff]  }
  0x70   :  { %2728 = vadd.xlane.f32.xlu1 %v658_v51  ;;  %v1201_v51 = vadd.f32 %v1137_v44, %v1009_v42  ;;  %v993_v13 = vunpack.c.l.bf16 %v929_v8  ;;  %v1121_v14 = vunpack.c.h.bf16 %v929_v8  ;;  %v469_v17 = vunpack.c.l.bf16 %v405_v15  ;;  %v931_v8 = vld [vmem:[#allocation7 + $0x120] sm:$0xff]  }
  0x71   :  { %2694 = vadd.xlane.f32.xlu0 %v641_v52  ;;  %v1184_v52 = vadd.f32 %v1120_v46, %v992_v45  ;;  %v597_v18 = vunpack.c.h.bf16 %v405_v15  ;;  %v452_v21 = vunpack.c.l.bf16 %v388_v16  ;;  %v580_v22 = vunpack.c.h.bf16 %v388_v16  ;;  %v407_v15 = vld [vmem:[#allocation4 + $0xc0] sm:$0xff]   ;;  %v390_v16 = vld [vmem:[#allocation4 + $0x38] sm:$0xff]  }
  0x72   :  { %v979_v26 = vunpack.c.l.bf16 %v915_v23  ;;  %v1107_v28 = vunpack.c.h.bf16 %v915_v23  ;;  %v962_v29 = vunpack.c.l.bf16 %v898_v24  ;;  %v1090_v30 = vunpack.c.h.bf16 %v898_v24  ;;  %v917_v23 = vld [vmem:[#allocation7 + $0xb0] sm:$0xff]   ;;  %v900_v24 = vld [vmem:[#allocation7 + $0x28] sm:$0xff]  }
  0x73   :  { %v501_v33 = vunpack.c.l.bf16 %v437_v31  ;;  %v629_v34 = vunpack.c.h.bf16 %v437_v31  ;;  %v484_v37 = vunpack.c.l.bf16 %v420_v32  ;;  %v612_v38 = vunpack.c.h.bf16 %v420_v32  ;;  %v439_v31 = vld [vmem:[#allocation4 + $0x1c0] sm:$0xff]   ;;  %v422_v32 = vld [vmem:[#allocation4 + $0x138] sm:$0xff]  }
  0x74   :  { %2788 = vadd.xlane.f32.xlu1 %v1168_v57  ;;  %v660_v57 = vadd.f32 %v596_v50, %v468_v49  ;;  %v1011_v42 = vunpack.c.l.bf16 %v947_v39  ;;  %v1139_v44 = vunpack.c.h.bf16 %v947_v39  ;;  %v994_v45 = vunpack.c.l.bf16 %v930_v40  ;;  %v949_v39 = vld [vmem:[#allocation7 + $0x1b0] sm:$0xff]  }
  0x75   :  { %2786 = vadd.xlane.f32.xlu0 %v1167_v59  ;;  %v643_v59 = vadd.f32 %v579_v54, %v451_v53  ;;  %v1122_v46 = vunpack.c.h.bf16 %v930_v40  ;;  %v470_v49 = vunpack.c.l.bf16 %v406_v47  ;;  %v598_v50 = vunpack.c.h.bf16 %v406_v47  ;;  %v932_v40 = vld [vmem:[#allocation7 + $0x128] sm:$0xff]  }
  0x76   :  { %v453_v53 = vunpack.c.l.bf16 %v389_v48  ;;  %v581_v54 = vunpack.c.h.bf16 %v389_v48  ;;  %v408_v47 = vld [vmem:[#allocation4 + $0xc8] sm:$0xff]   ;;  %v391_v48 = vld [vmem:[#allocation4 + $0x40] sm:$0xff]   ;;  %vm4017_vm2 = vcmask 261312   ;;  %vm4024_vm3 = vcmask 326912  }
  0x77   :  { %vm4031_vm4 = vcmask 392512   ;;  %vm4038_vm5 = vcmask 458112   ;;  %vm4045_vm6 = vcmask 523712   ;;  %vm4052_vm7 = vcmask 589312  }
  0x78   :  { %2984 = vadd.xlane.f32.xlu1 %v690_v3  ;;  %v1170_v3 = vadd.f32 %v1106_v60, %v978_v58  ;;  %v980_v58 = vunpack.c.l.bf16 %v916_v55  ;;  %v1108_v60 = vunpack.c.h.bf16 %v916_v55  ;;  %v918_v55 = vld [vmem:[#allocation7 + $0xb8] sm:$0xff]   ;;  %vm4059_vm8 = vcmask 654912  }
  0x79   :  { %2950 = vadd.xlane.f32.xlu0 %v673_v4  ;;  %v1153_v4 = vadd.f32 %v1089_v62, %v961_v61  ;;  %v963_v61 = vunpack.c.l.bf16 %v899_v56  ;;  %v1091_v62 = vunpack.c.h.bf16 %v899_v56  ;;  %v901_v56 = vld [vmem:[#allocation7 + $0x30] sm:$0xff]   ;;  %vm4066_vm9 = vcmask 720512  }
  0x7a   :  { %vm4073_vm10 = vcmask 786112   ;;  %vm4080_vm11 = vcmask 851712   ;;  %vm4087_vm12 = vcmask 917312   ;;  %vm4094_vm13 = vcmask 982912  }
  0x7b   :  { %vm4101_vm14 = vcmask 1048512   ;;  %vm5288_vm15 = vcmask 1041409  }
  0x7c   :  { %3044 = vadd.xlane.f32.xlu1 %v1200_v9  ;;  %v692_v9 = vadd.f32 %v628_v2, %v500_v1  ;;  %v502_v1 = vunpack.c.l.bf16 %v438_v63  ;;  %v630_v2 = vunpack.c.h.bf16 %v438_v63  ;;  %v440_v63 = vld [vmem:[#allocation4 + $0x1c8] sm:$0xff]  }
  0x7d   :  { %3042 = vadd.xlane.f32.xlu0 %v1199_v11  ;;  %v675_v11 = vadd.f32 %v611_v6, %v483_v5  ;;  %v485_v5 = vunpack.c.l.bf16 %v421_v0  ;;  %v613_v6 = vunpack.c.h.bf16 %v421_v0  ;;  %v423_v0 = vld [vmem:[#allocation4 + $0x140] sm:$0xff]  }
  0x80   :  { %2730 = vadd.xlane.f32.xlu1 %v659_v19  ;;  %v1202_v19 = vadd.f32 %v1138_v12, %v1010_v10  ;;  %v1012_v10 = vunpack.c.l.bf16 %v948_v7  ;;  %v1140_v12 = vunpack.c.h.bf16 %v948_v7  ;;  %v950_v7 = vld [vmem:[#allocation7 + $0x1b8] sm:$0xff]  }
  0x81   :  { %2696 = vadd.xlane.f32.xlu0 %v642_v20  ;;  %v1185_v20 = vadd.f32 %v1121_v14, %v993_v13  ;;  %v995_v13 = vunpack.c.l.bf16 %v931_v8  ;;  %v1123_v14 = vunpack.c.h.bf16 %v931_v8  ;;  %v933_v8 = vld [vmem:[#allocation7 + $0x130] sm:$0xff]  }
  0x84   :  { %2756 = vadd.xlane.f32.xlu1 %v1152_v25  ;;  %v661_v25 = vadd.f32 %v597_v18, %v469_v17  ;;  %v471_v17 = vunpack.c.l.bf16 %v407_v15  ;;  %v599_v18 = vunpack.c.h.bf16 %v407_v15  ;;  %v409_v15 = vld [vmem:[#allocation4 + $0xd0] sm:$0xff]  }
  0x85   :  { %2754 = vadd.xlane.f32.xlu0 %v1151_v27  ;;  %v644_v27 = vadd.f32 %v580_v22, %v452_v21  ;;  %v454_v21 = vunpack.c.l.bf16 %v390_v16  ;;  %v582_v22 = vunpack.c.h.bf16 %v390_v16  ;;  %v392_v16 = vld [vmem:[#allocation4 + $0x48] sm:$0xff]  }
  0x88   :  { %2952 = vadd.xlane.f32.xlu1 %v674_v35  ;;  %v1171_v35 = vadd.f32 %v1107_v28, %v979_v26  ;;  %v981_v26 = vunpack.c.l.bf16 %v917_v23  ;;  %v1109_v28 = vunpack.c.h.bf16 %v917_v23  ;;  %v3716_v23 = vlaneseq }
  0x89   :  { %2790 = vadd.xlane.f32.xlu0 %v1169_v36  ;;  %v1154_v36 = vadd.f32 %v1090_v30, %v962_v29  ;;  %v964_v29 = vunpack.c.l.bf16 %v900_v24  ;;  %v1092_v30 = vunpack.c.h.bf16 %v900_v24  ;;  %v919_v24 = vld [vmem:[#allocation7 + $0xc0] sm:$0xff]  }
  0x8c   :  { %3010 = vadd.xlane.f32.xlu1 %v1183_v41  ;;  %v693_v41 = vadd.f32 %v629_v34, %v501_v33  ;;  %v503_v33 = vunpack.c.l.bf16 %v439_v31  ;;  %v631_v34 = vunpack.c.h.bf16 %v439_v31 }
  0x8d   :  { %2986 = vadd.xlane.f32.xlu0 %v691_v43  ;;  %v676_v43 = vadd.f32 %v612_v38, %v484_v37  ;;  %v486_v37 = vunpack.c.l.bf16 %v422_v32  ;;  %v614_v38 = vunpack.c.h.bf16 %v422_v32 }
  0x90   :  { %3046 = vadd.xlane.f32.xlu1 %v1201_v51  ;;  %v1203_v51 = vadd.f32 %v1139_v44, %v1011_v42  ;;  %v1013_v42 = vunpack.c.l.bf16 %v949_v39  ;;  %v1141_v44 = vunpack.c.h.bf16 %v949_v39 }
  0x91   :  { %3012 = vadd.xlane.f32.xlu0 %v1184_v52  ;;  %v1186_v52 = vadd.f32 %v1122_v46, %v994_v45  ;;  %v996_v45 = vunpack.c.l.bf16 %v932_v40  ;;  %v1124_v46 = vunpack.c.h.bf16 %v932_v40 }
  0x94   :  { %2732 = vadd.xlane.f32.xlu1 %v660_v57  ;;  %v662_v57 = vadd.f32 %v598_v50, %v470_v49  ;;  %v472_v49 = vunpack.c.l.bf16 %v408_v47  ;;  %v600_v50 = vunpack.c.h.bf16 %v408_v47 }
  0x95   :  { %2698 = vadd.xlane.f32.xlu0 %v643_v59  ;;  %v645_v59 = vadd.f32 %v581_v54, %v453_v53  ;;  %v455_v53 = vunpack.c.l.bf16 %v391_v48  ;;  %v583_v54 = vunpack.c.h.bf16 %v391_v48 }
  0x98   :  { %2792 = vadd.xlane.f32.xlu1 %v1170_v3  ;;  %v1172_v3 = vadd.f32 %v1108_v60, %v980_v58  ;;  %v982_v58 = vunpack.c.l.bf16 %v918_v55  ;;  %v1110_v60 = vunpack.c.h.bf16 %v918_v55  ;;  %v410_v55 = vld [vmem:[#allocation4 + $0xd8] sm:$0xff]  }
  0x99   :  { %2758 = vadd.xlane.f32.xlu0 %v1153_v4  ;;  %v1155_v4 = vadd.f32 %v1091_v62, %v963_v61  ;;  %v965_v61 = vunpack.c.l.bf16 %v901_v56  ;;  %v1093_v62 = vunpack.c.h.bf16 %v901_v56 }
  0x9c   :  { %2988 = vadd.xlane.f32.xlu1 %v692_v9  ;;  %v694_v9 = vadd.f32 %v630_v2, %v502_v1  ;;  %v504_v1 = vunpack.c.l.bf16 %v440_v63  ;;  %v632_v2 = vunpack.c.h.bf16 %v440_v63 }
  0x9d   :  { %2954 = vadd.xlane.f32.xlu0 %v675_v11  ;;  %v677_v11 = vadd.f32 %v613_v6, %v485_v5  ;;  %v487_v5 = vunpack.c.l.bf16 %v423_v0  ;;  %v615_v6 = vunpack.c.h.bf16 %v423_v0 }
  0xa0   :  { %3048 = vadd.xlane.f32.xlu1 %v1202_v19  ;;  %v1204_v19 = vadd.f32 %v1140_v12, %v1012_v10  ;;  %v1142_v10 = vunpack.c.h.bf16 %v950_v7  ;;  %v679_v12 = vadd.f32 %v615_v6, %v487_v5 }
  0xa1   :  { %3014 = vadd.xlane.f32.xlu0 %v1185_v20  ;;  %v1187_v20 = vadd.f32 %v1123_v14, %v995_v13  ;;  %v997_v13 = vunpack.c.l.bf16 %v933_v8  ;;  %v1125_v14 = vunpack.c.h.bf16 %v933_v8  ;;  %v920_v8 = vld [vmem:[#allocation7 + $0xc8] sm:$0xff]  }
  0xa4   :  { %2734 = vadd.xlane.f32.xlu1 %v661_v25  ;;  %v663_v25 = vadd.f32 %v599_v18, %v471_v17  ;;  %v473_v18 = vunpack.c.l.bf16 %v409_v15 }
  0xa5   :  { %2700 = vadd.xlane.f32.xlu0 %v644_v27  ;;  %v646_v27 = vadd.f32 %v582_v22, %v454_v21  ;;  %v456_v21 = vunpack.c.l.bf16 %v392_v16  ;;  %v584_v22 = vunpack.c.h.bf16 %v392_v16  ;;  %v984_v16 = vunpack.c.l.bf16 %v920_v8 }
  0xa8   :  { %2794 = vadd.xlane.f32.xlu1 %v1171_v35  ;;  %v1173_v35 = vadd.f32 %v1109_v28, %v981_v26  ;;  %v1111_v28 = vunpack.c.h.bf16 %v919_v24 }
  0xa9   :  { %2760 = vadd.xlane.f32.xlu0 %v1154_v36  ;;  %v1156_v36 = vadd.f32 %v1092_v30, %v964_v29  ;;  %v648_v29 = vadd.f32 %v584_v22, %v456_v21  ;;  %v6236_v30 = vand.u32 127, %v3716_v23  ;;  %v442_v22 = vld [vmem:[#allocation4 + $0x1d8] sm:$0xff]  }
  0xac   :  { %2990 = vadd.xlane.f32.xlu1 %v693_v41  ;;  %v695_v41 = vadd.f32 %v631_v34, %v503_v33  ;;  %v441_v33 = vld [vmem:[#allocation4 + $0x1d0] sm:$0xff]   ;;  %v424_v34 = vld [vmem:[#allocation4 + $0x148] sm:$0xff]  }
  0xad   :  { %2956 = vadd.xlane.f32.xlu0 %v676_v43  ;;  %v678_v43 = vadd.f32 %v614_v38, %v486_v37  ;;  %v505_v38 = vunpack.c.l.bf16 %v441_v33  ;;  %v633_v40 = vunpack.c.h.bf16 %v441_v33 }
  0xb0   :  { %3050 = vadd.xlane.f32.xlu1 %v1203_v51  ;;  %v1205_v51 = vadd.f32 %v1141_v44, %v1013_v42  ;;  %v616_v42 = vunpack.c.h.bf16 %v424_v34  ;;  %v934_v44 = vld [vmem:[#allocation7 + $0x138] sm:$0xff]  }
  0xb1   :  { %3016 = vadd.xlane.f32.xlu0 %v1186_v52  ;;  %v1188_v52 = vadd.f32 %v1124_v46, %v996_v45 }
  0xb4   :  { %2736 = vadd.xlane.f32.xlu1 %v662_v57  ;;  %v664_v57 = vadd.f32 %v600_v50, %v472_v49 }
  0xb5   :  { %2702 = vadd.xlane.f32.xlu0 %v645_v59  ;;  %v647_v59 = vadd.f32 %v583_v54, %v455_v53  ;;  %v697_v53 = vadd.f32 %v633_v40, %v505_v38  ;;  %v935_v38 = vld [vmem:[#allocation7 + $0x140] sm:$0xff]  }
  0xb8   :  { %2796 = vadd.xlane.f32.xlu1 %v1172_v3  ;;  %v1174_v3 = vadd.f32 %v1110_v60, %v982_v58  ;;  %v4005_v58 = vadd.s32 4294967280, %v6236_v30 }
  0xb9   :  { %2762 = vadd.xlane.f32.xlu0 %v1155_v4  ;;  %v1157_v4 = vadd.f32 %v1093_v62, %v965_v61 }
  0xbc   :  { %2992 = vadd.xlane.f32.xlu1 %v694_v9  ;;  %v1014_v9 = vunpack.c.l.bf16 %v950_v7 }
  0xbd   :  { %2958 = vadd.xlane.f32.xlu0 %v677_v11  ;;  %v696_v11 = vadd.f32 %v632_v2, %v504_v1  ;;  %v474_v2 = vunpack.c.l.bf16 %v410_v55 }
  0xbe   :  { %v1206_v17 = vadd.f32 %v1142_v10, %v1014_v9 }
  0xc0   :  { %3052 = vadd.xlane.f32.xlu1 %v1204_v19  ;;  %v601_v19 = vunpack.c.h.bf16 %v409_v15 }
  0xc1   :  { %3018 = vadd.xlane.f32.xlu0 %v1187_v20  ;;  %v1189_v20 = vadd.f32 %v1125_v14, %v997_v13 }
  0xc2   :  { %v665_v26 = vadd.f32 %v601_v19, %v473_v18 }
  0xc4   :  { %2738 = vadd.xlane.f32.xlu1 %v663_v25  ;;  %v902_v25 = vld [vmem:[#allocation7 + $0x38] sm:$0xff]  }
  0xc5   :  { %2704 = vadd.xlane.f32.xlu0 %v646_v27  ;;  %v983_v27 = vunpack.c.l.bf16 %v919_v24  ;;  %v966_v31 = vunpack.c.l.bf16 %v902_v25  ;;  %v1094_v32 = vunpack.c.h.bf16 %v902_v25  ;;  %v425_v25 = vld [vmem:[#allocation4 + $0x150] sm:$0xff]  }
  0xc7   :  { %v1175_v37 = vadd.f32 %v1111_v28, %v983_v27  ;;  %v1158_v39 = vadd.f32 %v1094_v32, %v966_v31  ;;  %v4012_v27 = vadd.s32 4294967272, %v6236_v30  ;;  %v634_v31 = vunpack.c.h.bf16 %v442_v22 }
  0xc8   :  { %2798 = vadd.xlane.f32.xlu1 %v1173_v35  ;;  %v6238_v35 = vshrl.u32 %v3716_v23, 7 }
  0xc9   :  { %2764 = vadd.xlane.f32.xlu0 %v1156_v36  ;;  %v3998_v36 = vadd.s32 4294967288, %v6236_v30 }
  0xca   :  { %7389 = vst [vmem:[#allocation22_spill] sm:$0xff] %v6238_v35  ;;  %v6243_v47 = vsub.s32 %v6236_v30, %v6238_v35  ;;  %v6258_v14 = vsub.s32 %v4005_v58, %v6238_v35 }
  0xcb   :  { %v6246_v48 = vsub.s32 %v3998_v36, %v6238_v35  ;;  %v617_v36 = vunpack.c.h.bf16 %v425_v25 }
  0xcc   :  { %2994 = vadd.xlane.f32.xlu1 %v695_v41  ;;  %v488_v41 = vunpack.c.l.bf16 %v424_v34  ;;  %v489_v34 = vunpack.c.l.bf16 %v425_v25  ;;  %v4019_v25 = vadd.s32 4294967264, %v6236_v30 }
  0xcd   :  { %2960 = vadd.xlane.f32.xlu0 %v678_v43  ;;  %v951_v43 = vld [vmem:[#allocation7 + $0x1c0] sm:$0xff]  }
  0xce   :  { %v1015_v49 = vunpack.c.l.bf16 %v951_v43  ;;  %v1143_v50 = vunpack.c.h.bf16 %v951_v43  ;;  %v680_v54 = vadd.f32 %v616_v42, %v488_v41 }
  0xd0   :  { %3054 = vadd.xlane.f32.xlu1 %v1205_v51  ;;  %v998_v51 = vunpack.c.l.bf16 %v934_v44  ;;  %v1207_v0 = vadd.f32 %v1143_v50, %v1015_v49  ;;  %v999_v50 = vunpack.c.l.bf16 %v935_v38 }
  0xd1   :  { %3020 = vadd.xlane.f32.xlu0 %v1188_v52  ;;  %v1126_v52 = vunpack.c.h.bf16 %v934_v44  ;;  %v6268_v44 = vsub.s32 %v4012_v27, %v6238_v35 }
  0xd3   :  { %v1190_v1 = vadd.f32 %v1126_v52, %v998_v51 }
  0xd4   :  { %2740 = vadd.xlane.f32.xlu1 %v664_v57 }
  0xd5   :  { %2706 = vadd.xlane.f32.xlu0 %v647_v59  ;;  %v393_v59 = vld [vmem:[#allocation4 + $0x50] sm:$0xff]  }
  0xd6   :  { %v457_v6 = vunpack.c.l.bf16 %v393_v59  ;;  %v585_v7 = vunpack.c.h.bf16 %v393_v59 }
  0xd8   :  { %2800 = vadd.xlane.f32.xlu1 %v1174_v3  ;;  %v602_v3 = vunpack.c.h.bf16 %v410_v55  ;;  %v649_v19 = vadd.f32 %v585_v7, %v457_v6  ;;  %v411_v55 = vld [vmem:[#allocation4 + $0xe0] sm:$0xff]   ;;  %v904_v6 = vld [vmem:[#allocation7 + $0x48] sm:$0xff]  }
  0xd9   :  { %2766 = vadd.xlane.f32.xlu0 %v1157_v4 }
  0xda   :  { %v666_v15 = vadd.f32 %v602_v3, %v474_v2 }
  0xdc   :  { %2996 = vadd.xlane.f32.xlu1 %v696_v11  ;;  %v903_v11 = vld [vmem:[#allocation7 + $0x40] sm:$0xff]  }
  0xdd   :  { %2962 = vadd.xlane.f32.xlu0 %v679_v12  ;;  %v1095_v21 = vunpack.c.h.bf16 %v903_v11 }
  0xe0   :  { %3056 = vadd.xlane.f32.xlu1 %v1206_v17  ;;  %v1112_v17 = vunpack.c.h.bf16 %v920_v8 }
  0xe1   :  { %3022 = vadd.xlane.f32.xlu0 %v1189_v20  ;;  %v967_v20 = vunpack.c.l.bf16 %v903_v11 }
  0xe2   :  { %v1176_v28 = vadd.f32 %v1112_v17, %v984_v16 }
  0xe3   :  { %v1159_v33 = vadd.f32 %v1095_v21, %v967_v20 }
  0xe4   :  { %2742 = vadd.xlane.f32.xlu1 %v665_v26 }
  0xe5   :  { %2708 = vadd.xlane.f32.xlu0 %v648_v29  ;;  %v2979_v45 = vpop.xlane.xlu1 %2978  ;;  %v506_v29 = vunpack.c.l.bf16 %v442_v22  ;;  %v426_v22 = vld [vmem:[#allocation4 + $0x158] sm:$0xff]  }
  0xe6   :  { %v2723_v46 = vpop.xlane.xlu0 %2722  ;;  %v4738_v60 = vrot.slane %v2979_v45, %v6243_v47 }
  0xe7   :  { %v4106_v61 = vrot.slane %v2723_v46, %v6243_v47  ;;  %v698_v45 = vadd.f32 %v634_v31, %v506_v29 }
  0xe8   :  { %2802 = vadd.xlane.f32.xlu1 %v1175_v37  ;;  %v952_v37 = vld [vmem:[#allocation7 + $0x1c8] sm:$0xff]  }
  0xe9   :  { %2768 = vadd.xlane.f32.xlu0 %v1158_v39  ;;  %v2981_v56 = vpop.xlane.xlu1 %2980  ;;  %v1016_v46 = vunpack.c.l.bf16 %v952_v37  ;;  %v1144_v49 = vunpack.c.h.bf16 %v952_v37 }
  0xea   :  { %v2725_v57 = vpop.xlane.xlu0 %2724  ;;  %v4742_v62 = vrot.slane %v2981_v56, %v6246_v48  ;;  %v394_v56 = vld [vmem:[#allocation4 + $0x58] sm:$0xff]  }
  0xeb   :  { %v4110_v63 = vrot.slane %v2725_v57, %v6246_v48 }
  0xec   :  { %v4743_v4 = vsel %vm4003_vm0, %v4742_v62, %v4738_v60  ;;  %2998 = vadd.xlane.f32.xlu1 %v697_v53  ;;  %v681_v53 = vadd.f32 %v617_v36, %v489_v34  ;;  %v475_v62 = vunpack.c.l.bf16 %v411_v55  ;;  %v618_v34 = vunpack.c.h.bf16 %v426_v22  ;;  %v953_v36 = vld [vmem:[#allocation7 + $0x1d0] sm:$0xff]  }
  0xed   :  { %v4111_v5 = vsel %vm4003_vm0, %v4110_v63, %v4106_v61  ;;  %2964 = vadd.xlane.f32.xlu0 %v680_v54  ;;  %v2693_v9 = vpop.xlane.xlu1 %2692  ;;  %v1127_v54 = vunpack.c.h.bf16 %v935_v38  ;;  %v1208_v61 = vadd.f32 %v1144_v49, %v1016_v46  ;;  %v603_v63 = vunpack.c.h.bf16 %v411_v55 }
  0xee   :  { %v2691_v10 = vpop.xlane.xlu0 %2690  ;;  %v4002_v12 = vrot.slane %v2693_v9, %v6246_v48  ;;  %v1145_v46 = vunpack.c.h.bf16 %v953_v36 }
  0xef   :  { %v3997_v13 = vrot.slane %v2691_v10, %v6243_v47  ;;  %v1191_v3 = vadd.f32 %v1127_v54, %v999_v50  ;;  %v667_v17 = vadd.f32 %v603_v63, %v475_v62  ;;  %v395_v54 = vld [vmem:[#allocation4 + $0x60] sm:$0xff]  }
  0xf0   :  { %3058 = vadd.xlane.f32.xlu1 %v1207_v0  ;;  %v458_v0 = vunpack.c.l.bf16 %v394_v56  ;;  %v459_v62 = vunpack.c.l.bf16 %v395_v54 }
  0xf1   :  { %v4004_v18 = vsel %vm4003_vm0, %v4002_v12, %v3997_v13  ;;  %3024 = vadd.xlane.f32.xlu0 %v1190_v1  ;;  %v2947_v23 = vpop.xlane.xlu1 %2946  ;;  %v968_v13 = vunpack.c.l.bf16 %v904_v6 }
  0xf2   :  { %v2727_v24 = vpop.xlane.xlu0 %2726  ;;  %v4659_v41 = vrot.slane %v2947_v23, %v6243_v47 }
  0xf3   :  { %v4115_v26 = vrot.slane %v2727_v24, %v6258_v14 }
  0xf4   :  { %2744 = vadd.xlane.f32.xlu1 %v666_v15  ;;  %v1096_v15 = vunpack.c.h.bf16 %v904_v6 }
  0xf5   :  { %v4116_v32 = vsel %vm4010_vm1, %v4115_v26, %v4111_v5  ;;  %2710 = vadd.xlane.f32.xlu0 %v649_v19  ;;  %v2983_v39 = vpop.xlane.xlu1 %2982  ;;  %v921_v5 = vld [vmem:[#allocation7 + $0xd0] sm:$0xff]   ;;  %v443_v19 = vld [vmem:[#allocation4 + $0x1e0] sm:$0xff]  }
  0xf6   :  { %v2949_v40 = vpop.xlane.xlu0 %2948  ;;  %v4747_v42 = vrot.slane %v2983_v39, %v6258_v14  ;;  %v985_v11 = vunpack.c.l.bf16 %v921_v5  ;;  %v1113_v12 = vunpack.c.h.bf16 %v921_v5  ;;  %v1160_v27 = vadd.f32 %v1096_v15, %v968_v13  ;;  %v936_v39 = vld [vmem:[#allocation7 + $0x148] sm:$0xff]   ;;  %v922_v5 = vld [vmem:[#allocation7 + $0xd8] sm:$0xff]  }
  0xf7   :  { %v4663_v43 = vrot.slane %v2949_v40, %v6246_v48  ;;  %v635_v29 = vunpack.c.h.bf16 %v443_v19 }
  0xf8   :  { %v4748_v51 = vsel %vm4010_vm1, %v4747_v42, %v4743_v4  ;;  %2804 = vadd.xlane.f32.xlu1 %v1176_v28  ;;  %v586_v4 = vunpack.c.h.bf16 %v394_v56  ;;  %v1177_v26 = vadd.f32 %v1113_v12, %v985_v11  ;;  %v507_v28 = vunpack.c.l.bf16 %v443_v19  ;;  %v427_v19 = vld [vmem:[#allocation4 + $0x160] sm:$0xff]  }
  0xf9   :  { %v4664_v52 = vsel %vm4003_vm0, %v4663_v43, %v4659_v41  ;;  %2770 = vadd.xlane.f32.xlu0 %v1159_v33  ;;  %v2729_v57 = vpop.xlane.xlu1 %2728  ;;  %v490_v33 = vunpack.c.l.bf16 %v426_v22  ;;  %v6297_v42 = vsub.s32 %v4019_v25, %v6238_v35  ;;  %v986_v12 = vunpack.c.l.bf16 %v922_v5 }
  0xfa   :  { %v2695_v58 = vpop.xlane.xlu0 %2694  ;;  %v4120_v59 = vrot.slane %v2729_v57, %v6268_v44  ;;  %v699_v43 = vadd.f32 %v635_v29, %v507_v28 }
  0xfb   :  { %v4009_v60 = vrot.slane %v2695_v58, %v6258_v14  ;;  %7390 = vst [vmem:[#allocation23_spill] sm:$0xff] %v6297_v42  ;;  %v682_v50 = vadd.f32 %v618_v34, %v490_v33  ;;  %v619_v34 = vunpack.c.h.bf16 %v427_v19 }
  0xfc   :  { %v6275_v1 = vsel %vm4017_vm2, %v4120_v59, %v4116_v32  ;;  %3000 = vadd.xlane.f32.xlu1 %v698_v45  ;;  %v1017_v45 = vunpack.c.l.bf16 %v953_v36  ;;  %v954_v36 = vld [vmem:[#allocation7 + $0x1d8] sm:$0xff]  }
  0xfd   :  { %v6278_v2 = vsel %vm4010_vm1, %v4009_v60, %v4004_v18  ;;  %2966 = vadd.xlane.f32.xlu0 %v681_v53  ;;  %v2789_v7 = vpop.xlane.xlu1 %2788  ;;  %v650_v18 = vadd.f32 %v586_v4, %v458_v0  ;;  %v412_v53 = vld [vmem:[#allocation4 + $0xe8] sm:$0xff]   ;;  %v587_v4 = vunpack.c.h.bf16 %v395_v54 }
  0xfe   :  { %v2787_v8 = vpop.xlane.xlu0 %2786  ;;  %v4268_v9 = vrot.slane %v2789_v7, %v6246_v48  ;;  %v1209_v59 = vadd.f32 %v1145_v46, %v1017_v45  ;;  %v476_v60 = vunpack.c.l.bf16 %v412_v53  ;;  %v1018_v46 = vunpack.c.l.bf16 %v954_v36 }
  0xff   :  { %v4264_v10 = vrot.slane %v2787_v8, %v6243_v47  ;;  %v905_v8 = vld [vmem:[#allocation7 + $0x50] sm:$0xff]  }
 0x100   :  { %3060 = vadd.xlane.f32.xlu1 %v1208_v61  ;;  %v604_v61 = vunpack.c.h.bf16 %v412_v53  ;;  %v969_v15 = vunpack.c.l.bf16 %v905_v8 }
 0x101   :  { %v6283_v16 = vsel %vm4003_vm0, %v4268_v9, %v4264_v10  ;;  %3026 = vadd.xlane.f32.xlu0 %v1191_v3  ;;  %v2985_v20 = vpop.xlane.xlu1 %2984 }
 0x102   :  { %v2951_v21 = vpop.xlane.xlu0 %2950  ;;  %v4752_v23 = vrot.slane %v2985_v20, %v6268_v44  ;;  %v668_v11 = vadd.f32 %v604_v61, %v476_v60  ;;  %v3255_v60 = vld [vmem:[#allocation12 + $0x1a8] sm:$0xff] }
 0x103   :  { %v4668_v24 = vrot.slane %v2951_v21, %v6258_v14 }
 0x104   :  { %v6289_v31 = vsel %vm4017_vm2, %v4752_v23, %v4748_v51  ;;  %2746 = vadd.xlane.f32.xlu1 %v667_v17  ;;  %v1000_v51 = vunpack.c.l.bf16 %v936_v39  ;;  %v1097_v17 = vunpack.c.h.bf16 %v905_v8 }
 0x105   :  { %v6292_v32 = vsel %vm4010_vm1, %v4668_v24, %v4664_v52  ;;  %2712 = vadd.xlane.f32.xlu0 %v650_v18  ;;  %v3045_v37 = vpop.xlane.xlu1 %3044  ;;  %v1128_v52 = vunpack.c.h.bf16 %v936_v39  ;;  %v444_v18 = vld [vmem:[#allocation4 + $0x1e8] sm:$0xff]   ;;  %v937_v39 = vld [vmem:[#allocation7 + $0x150] sm:$0xff]  }
 0x106   :  { %v3043_v38 = vpop.xlane.xlu0 %3042  ;;  %v4900_v40 = vrot.slane %v3045_v37, %v6246_v48  ;;  %v508_v25 = vunpack.c.l.bf16 %v444_v18  ;;  %v1161_v33 = vadd.f32 %v1097_v17, %v969_v15  ;;  %v1001_v53 = vunpack.c.l.bf16 %v937_v39  ;;  %v906_v15 = vld [vmem:[#allocation7 + $0x58] sm:$0xff]   ;;  %v3250_v17 = vld [vmem:[#allocation12 + $0x180] sm:$0xff] }
 0x107   :  { %v4896_v41 = vrot.slane %v3043_v38, %v6243_v47  ;;  %v1192_v3 = vadd.f32 %v1128_v52, %v1000_v51  ;;  %v1129_v54 = vunpack.c.h.bf16 %v937_v39 }
 0x108   :  { %2806 = vadd.xlane.f32.xlu1 %v1177_v26  ;;  %v636_v26 = vunpack.c.h.bf16 %v444_v18 }
 0x109   :  { %v6300_v49 = vsel %vm4003_vm0, %v4900_v40, %v4896_v41  ;;  %2772 = vadd.xlane.f32.xlu0 %v1160_v27  ;;  %v2731_v55 = vpop.xlane.xlu1 %2730  ;;  %v491_v27 = vunpack.c.l.bf16 %v427_v19  ;;  %v3263_v40 = vld [vmem:[#allocation12 + $0x1e8] sm:$0xff] }
 0x10a   :  { %v2697_v56 = vpop.xlane.xlu0 %2696  ;;  %v4125_v57 = vrot.slane %v2731_v55, %v6297_v42  ;;  %5305 = vmatprep.subr.mxu0 %v3263_v40  ;;  %v700_v45 = vadd.f32 %v636_v26, %v508_v25  ;;  %v413_v55 = vld [vmem:[#allocation4 + $0xf0] sm:$0xff]   ;;  %v970_v25 = vunpack.c.l.bf16 %v906_v15  ;;  %v1098_v26 = vunpack.c.h.bf16 %v906_v15 }
 0x10b   :  { %v4016_v58 = vrot.slane %v2697_v56, %v6268_v44  ;;  %v683_v52 = vadd.f32 %v619_v34, %v491_v27  ;;  %v396_v56 = vld [vmem:[#allocation4 + $0x68] sm:$0xff]   ;;  %v445_v27 = vld [vmem:[#allocation4 + $0x1f0] sm:$0xff]  }
 0x10c   :  { %v6306_v63 = vsel %vm4024_vm3, %v4125_v57, %v6275_v1  ;;  %3002 = vadd.xlane.f32.xlu1 %v699_v43  ;;  %v1114_v1 = vunpack.c.h.bf16 %v922_v5  ;;  %v4026_v43 = vadd.s32 4294967256, %v6236_v30  ;;  %v3258_v57 = vld [vmem:[#allocation12 + $0x1c0] sm:$0xff]  ;;  %v460_v8 = vunpack.c.l.bf16 %v396_v56 }
 0x10d   :  { %v6310_v0 = vsel %vm4017_vm2, %v4016_v58, %v6278_v2  ;;  %2968 = vadd.xlane.f32.xlu0 %v682_v50  ;;  %v2757_v6 = vpop.xlane.xlu1 %2756  ;;  %v651_v2 = vadd.f32 %v587_v4, %v459_v62  ;;  %v1146_v50 = vunpack.c.h.bf16 %v954_v36  ;;  %v3254_v4 = vld [vmem:[#allocation12 + $0x1a0] sm:$0xff] }
 0x10e   :  { %v2755_v7 = vpop.xlane.xlu0 %2754  ;;  %v4189_v9 = vrot.slane %v2757_v6, %v6246_v48  ;;  %v1178_v24 = vadd.f32 %v1114_v1, %v986_v12  ;;  %v477_v6 = vunpack.c.l.bf16 %v413_v55  ;;  %v1193_v1 = vadd.f32 %v1129_v54, %v1001_v53 }
 0x10f   :  { %v4185_v10 = vrot.slane %v2755_v7, %v6243_v47  ;;  %v1210_v5 = vadd.f32 %v1146_v50, %v1018_v46  ;;  %v605_v7 = vunpack.c.h.bf16 %v413_v55  ;;  %v637_v46 = vunpack.c.h.bf16 %v445_v27 }
 0x110   :  { %3062 = vadd.xlane.f32.xlu1 %v1209_v59 }
 0x111   :  { %v6315_v13 = vsel %vm4003_vm0, %v4189_v9, %v4185_v10  ;;  %3028 = vadd.xlane.f32.xlu0 %v1192_v3  ;;  %v2953_v20 = vpop.xlane.xlu1 %2952  ;;  %v923_v9 = vld [vmem:[#allocation7 + $0xe0] sm:$0xff]   ;;  %v3251_v10 = vld [vmem:[#allocation12 + $0x188] sm:$0xff] }
 0x112   :  { %v2791_v21 = vpop.xlane.xlu0 %2790  ;;  %v4673_v22 = vrot.slane %v2953_v20, %v6268_v44 }
 0x113   :  { %v4273_v23 = vrot.slane %v2791_v21, %v6258_v14 }
 0x114   :  { %v6321_v28 = vsel %vm4017_vm2, %v4673_v22, %v6292_v32  ;;  %2748 = vadd.xlane.f32.xlu1 %v668_v11  ;;  %v3262_v32 = vld [vmem:[#allocation12 + $0x1e0] sm:$0xff]  ;;  %v987_v22 = vunpack.c.l.bf16 %v923_v9 }
 0x115   :  { %v6325_v29 = vsel %vm4010_vm1, %v4273_v23, %v6283_v16  ;;  %2714 = vadd.xlane.f32.xlu0 %v651_v2  ;;  %v3011_v37 = vpop.xlane.xlu1 %3010  ;;  %5306 = vmatpush1.msra.mxu0 %v3262_v32  ;;  %v3259_v16 = vld [vmem:[#allocation12 + $0x1c8] sm:$0xff]  ;;  %v588_v2 = vunpack.c.h.bf16 %v396_v56  ;;  %v669_v23 = vadd.f32 %v605_v7, %v477_v6  ;;  %v955_v56 = vld [vmem:[#allocation7 + $0x1e0] sm:$0xff]  }
 0x116   :  { %v2987_v38 = vpop.xlane.xlu0 %2986  ;;  %5307 = vmatprep.subr.mxu0 %v3259_v16  ;;  %v4817_v61 = vrot.slane %v3011_v37, %v6243_v47  ;;  %v1162_v16 = vadd.f32 %v1098_v26, %v970_v25  ;;  %v1019_v6 = vunpack.c.l.bf16 %v955_v56  ;;  %v1147_v7 = vunpack.c.h.bf16 %v955_v56 }
 0x117   :  { %v4757_v41 = vrot.slane %v2987_v38, %v6297_v42  ;;  %5308 = vmatpush1.msra.mxu0 %v3258_v57  ;;  %v652_v37 = vadd.f32 %v588_v2, %v460_v8  ;;  %v3243_v38 = vld [vmem:[#allocation12 + $0x148] sm:$0xff]  ;;  %v938_v57 = vld [vmem:[#allocation7 + $0x158] sm:$0xff]  }
 0x118   :  { %2808 = vadd.xlane.f32.xlu1 %v1178_v24  ;;  %5309 = vmatprep.subr.mxu0 %v3255_v60  ;;  %v1115_v24 = vunpack.c.h.bf16 %v923_v9  ;;  %v1002_v8 = vunpack.c.l.bf16 %v938_v57  ;;  %v1130_v9 = vunpack.c.h.bf16 %v938_v57  ;;  %v3387_v2 = vld [vmem:[#allocation12 + $0x5c8] sm:$0xff] }
 0x119   :  { %v6331_v51 = vsel %vm4024_vm3, %v4757_v41, %v6289_v31  ;;  %2774 = vadd.xlane.f32.xlu0 %v1161_v33  ;;  %v3047_v58 = vpop.xlane.xlu1 %3046  ;;  %v6337_v31 = vsub.s32 %v4026_v43, %v6238_v35  ;;  %5310 = vmatpush1.msra.mxu0 %v3254_v4  ;;  %v3246_v33 = vld [vmem:[#allocation12 + $0x160] sm:$0xff]  ;;  %v428_v41 = vld [vmem:[#allocation4 + $0x168] sm:$0xff]  }
 0x11a   :  { %v3013_v59 = vpop.xlane.xlu0 %3012  ;;  %v4905_v62 = vrot.slane %v3047_v58, %v6258_v14  ;;  %5311 = vmatprep.subr.mxu0 %v3251_v10  ;;  %v1179_v50 = vadd.f32 %v1115_v24, %v987_v22  ;;  %v492_v54 = vunpack.c.l.bf16 %v428_v41  ;;  %v620_v55 = vunpack.c.h.bf16 %v428_v41  ;;  %v3238_v58 = vld [vmem:[#allocation12 + $0x120] sm:$0xff]  ;;  %v414_v10 = vld [vmem:[#allocation4 + $0xf8] sm:$0xff]   ;;  %v3383_v24 = vld [vmem:[#allocation12 + $0x5a8] sm:$0xff] }
 0x11b   :  { %v4821_v3 = vrot.slane %v3013_v59, %v6246_v48  ;;  %7391 = vst [vmem:[#allocation24_spill] sm:$0xff] %v6337_v31  ;;  %5312 = vmatpush1.msra.mxu0 %v3250_v17  ;;  %v606_v26 = vunpack.c.h.bf16 %v414_v10  ;;  %v3379_v41 = vld [vmem:[#allocation12 + $0x588] sm:$0xff] }
 0x11c   :  { %v6341_v11 = vsel %vm4010_vm1, %v4905_v62, %v6300_v49  ;;  %3004 = vadd.xlane.f32.xlu1 %v700_v45  ;;  %v3247_v49 = vld [vmem:[#allocation12 + $0x168] sm:$0xff]  ;;  %v509_v45 = vunpack.c.l.bf16 %v445_v27  ;;  %v3230_v27 = vld [vmem:[#allocation12 + $0xe0] sm:$0xff] }
 0x11d   :  { %v6344_v12 = vsel %vm4003_vm0, %v4821_v3, %v4817_v61  ;;  %2970 = vadd.xlane.f32.xlu0 %v683_v52  ;;  %v2733_v18 = vpop.xlane.xlu1 %2732  ;;  %5313 = vmatprep.subr.mxu0 %v3247_v49  ;;  %v4033_v61 = vadd.s32 4294967248, %v6236_v30  ;;  %v3391_v62 = vld [vmem:[#allocation12 + $0x5e8] sm:$0xff] }
 0x11e   :  { %v2699_v19 = vpop.xlane.xlu0 %2698  ;;  %v4130_v20 = vrot.slane %v2733_v18, %v6337_v31  ;;  %5314 = vmatpush1.msra.mxu0 %v3246_v33  ;;  %v701_v4 = vadd.f32 %v637_v46, %v509_v45  ;;  %5376 = vmatprep.subr.mxu1 %v3391_v62  ;;  %v684_v18 = vadd.f32 %v620_v55, %v492_v54  ;;  %v3382_v33 = vld [vmem:[#allocation12 + $0x5a0] sm:$0xff]  ;;  %v3375_v57 = vld [vmem:[#allocation12 + $0x568] sm:$0xff]  ;;  %v446_v62 = vld [vmem:[#allocation4 + $0x1f8] sm:$0xff]  }
 0x11f   :  { %v4023_v21 = vrot.slane %v2699_v19, %v6297_v42  ;;  %5315 = vmatprep.subr.mxu0 %v3243_v38  ;;  %v3231_v19 = vld [vmem:[#allocation12 + $0xe8] sm:$0xff]  ;;  %v6378_v49 = vsub.s32 %v4033_v61, %v6238_v35  ;;  %v1194_v38 = vadd.f32 %v1130_v9, %v1002_v8 }
 0x120   :  { %v6350_v34 = vsel %vm4031_vm4, %v4130_v20, %v6306_v63  ;;  %3064 = vadd.xlane.f32.xlu1 %v1210_v5  ;;  %v3242_v63 = vld [vmem:[#allocation12 + $0x140] sm:$0xff] }
 0x121   :  { %v6354_v36 = vsel %vm4024_vm3, %v4023_v21, %v6310_v0  ;;  %3030 = vadd.xlane.f32.xlu0 %v1193_v1  ;;  %v2793_v39 = vpop.xlane.xlu1 %2792  ;;  %v3239_v0 = vld [vmem:[#allocation12 + $0x128] sm:$0xff]  ;;  %5316 = vmatpush1.msra.mxu0 %v3242_v63  ;;  %v3390_v5 = vld [vmem:[#allocation12 + $0x5e0] sm:$0xff]  ;;  %7392 = vst [vmem:[#allocation25_spill] sm:$0xff] %v6378_v49 }
 0x122   :  { %v2759_v40 = vpop.xlane.xlu0 %2758  ;;  %v4278_v43 = vrot.slane %v2793_v39, %v6268_v44  ;;  %5317 = vmatprep.subr.mxu0 %v3239_v0  ;;  %v3234_v1 = vld [vmem:[#allocation12 + $0x100] sm:$0xff]  ;;  %5377 = vmatpush1.msra.mxu1 %v3390_v5  ;;  %v924_v39 = vld [vmem:[#allocation7 + $0xe8] sm:$0xff]  }
 0x123   :  { %v4194_v32 = vrot.slane %v2759_v40, %v6258_v14  ;;  %5318 = vmatpush1.msra.mxu0 %v3238_v58  ;;  %v3386_v20 = vld [vmem:[#allocation12 + $0x5c0] sm:$0xff]  ;;  %5378 = vmatprep.subr.mxu1 %v3387_v2  ;;  %v3227_v40 = vld [vmem:[#allocation12 + $0xc8] sm:$0xff]  ;;  %v988_v58 = vunpack.c.l.bf16 %v924_v39 }
 0x124   :  { %v6360_v52 = vsel %vm4017_vm2, %v4278_v43, %v6325_v29  ;;  %2750 = vadd.xlane.f32.xlu1 %v669_v23  ;;  %v397_v23 = vld [vmem:[#allocation4 + $0x70] sm:$0xff]   ;;  %5379 = vmatpush1.msra.mxu1 %v3386_v20  ;;  %v907_v63 = vld [vmem:[#allocation7 + $0x60] sm:$0xff]  }
 0x125   :  { %v6364_v53 = vsel %vm4010_vm1, %v4194_v32, %v6315_v13  ;;  %2716 = vadd.xlane.f32.xlu0 %v652_v37  ;;  %v2989_v59 = vpop.xlane.xlu1 %2988  ;;  %v3235_v13 = vld [vmem:[#allocation12 + $0x108] sm:$0xff]  ;;  %v1211_v37 = vadd.f32 %v1147_v7, %v1019_v6  ;;  %5380 = vmatprep.subr.mxu1 %v3383_v24  ;;  %v461_v45 = vunpack.c.l.bf16 %v397_v23  ;;  %v589_v46 = vunpack.c.h.bf16 %v397_v23 }
 0x126   :  { %v2955_v60 = vpop.xlane.xlu0 %2954  ;;  %v4762_v29 = vrot.slane %v2989_v59, %v6337_v31  ;;  %5319 = vmatprep.subr.mxu0 %v3235_v13  ;;  %5381 = vmatpush1.msra.mxu1 %v3382_v33  ;;  %v1116_v59 = vunpack.c.h.bf16 %v924_v39  ;;  %v1099_v61 = vunpack.c.h.bf16 %v907_v63  ;;  %v3219_v6 = vld [vmem:[#allocation12 + $0x88] sm:$0xff]  ;;  %v3214_v33 = vld [vmem:[#allocation12 + $0x60] sm:$0xff] }
 0x127   :  { %v4678_v3 = vrot.slane %v2955_v60, %v6297_v42  ;;  %5320 = vmatpush1.msra.mxu0 %v3234_v1  ;;  %5382 = vmatprep.subr.mxu1 %v3379_v41  ;;  %v971_v60 = vunpack.c.l.bf16 %v907_v63  ;;  %v653_v5 = vadd.f32 %v589_v46, %v461_v45  ;;  %v3371_v7 = vld [vmem:[#allocation12 + $0x548] sm:$0xff] }
 0x128   :  { %v6371_v15 = vsel %vm4031_vm4, %v4762_v29, %v6331_v51  ;;  %2810 = vadd.xlane.f32.xlu1 %v1179_v50  ;;  %5321 = vmatprep.subr.mxu0 %v3231_v19  ;;  %v3226_v50 = vld [vmem:[#allocation12 + $0xc0] sm:$0xff]  ;;  %v1180_v20 = vadd.f32 %v1116_v59, %v988_v58  ;;  %v3215_v23 = vld [vmem:[#allocation12 + $0x68] sm:$0xff] }
 0x129   :  { %v6375_v17 = vsel %vm4024_vm3, %v4678_v3, %v6321_v28  ;;  %2776 = vadd.xlane.f32.xlu0 %v1162_v16  ;;  %v3049_v21 = vpop.xlane.xlu1 %3048  ;;  %v478_v28 = vunpack.c.l.bf16 %v414_v10  ;;  %v3378_v16 = vld [vmem:[#allocation12 + $0x580] sm:$0xff]  ;;  %5322 = vmatpush1.msra.mxu0 %v3230_v27  ;;  %v429_v10 = vld [vmem:[#allocation4 + $0x170] sm:$0xff]   ;;  %v3367_v24 = vld [vmem:[#allocation12 + $0x528] sm:$0xff] }
 0x12a   :  { %v3015_v22 = vpop.xlane.xlu0 %3014  ;;  %v4910_v51 = vrot.slane %v3049_v21, %v6268_v44  ;;  %5323 = vmatprep.subr.mxu0 %v3227_v40  ;;  %v3222_v29 = vld [vmem:[#allocation12 + $0xa0] sm:$0xff]  ;;  %5383 = vmatpush1.msra.mxu1 %v3378_v16  ;;  %v1163_v21 = vadd.f32 %v1099_v61, %v971_v60  ;;  %v4040_v40 = vadd.s32 4294967240, %v6236_v30  ;;  %v3363_v46 = vld [vmem:[#allocation12 + $0x508] sm:$0xff] }
 0x12b   :  { %v4826_v25 = vrot.slane %v3015_v22, %v6258_v14  ;;  %v670_v56 = vadd.f32 %v606_v26, %v478_v28  ;;  %5324 = vmatpush1.msra.mxu0 %v3226_v50  ;;  %v3374_v3 = vld [vmem:[#allocation12 + $0x560] sm:$0xff]  ;;  %5384 = vmatprep.subr.mxu1 %v3375_v57  ;;  %v956_v22 = vld [vmem:[#allocation7 + $0x1e8] sm:$0xff]   ;;  %v493_v28 = vunpack.c.l.bf16 %v429_v10  ;;  %v621_v26 = vunpack.c.h.bf16 %v429_v10  ;;  %v430_v10 = vld [vmem:[#allocation4 + $0x178] sm:$0xff]  }
 0x12c   :  { %v6384_v43 = vsel %vm4017_vm2, %v4910_v51, %v6341_v11  ;;  %3006 = vadd.xlane.f32.xlu1 %v701_v4  ;;  %v3218_v19 = vld [vmem:[#allocation12 + $0x80] sm:$0xff]  ;;  %5385 = vmatpush1.msra.mxu1 %v3374_v3  ;;  %v1020_v63 = vunpack.c.l.bf16 %v956_v22  ;;  %v1148_v50 = vunpack.c.h.bf16 %v956_v22  ;;  %v3207_v58 = vld [vmem:[#allocation12 + $0x28] sm:$0xff] }
 0x12d   :  { %v6388_v32 = vsel %vm4010_vm1, %v4826_v25, %v6344_v12  ;;  %2972 = vadd.xlane.f32.xlu0 %v684_v18  ;;  %v2735_v0 = vpop.xlane.xlu1 %2734  ;;  %v3223_v12 = vld [vmem:[#allocation12 + $0xa8] sm:$0xff]  ;;  %v638_v18 = vunpack.c.h.bf16 %v446_v62  ;;  %5386 = vmatprep.subr.mxu1 %v3371_v7  ;;  %v939_v27 = vld [vmem:[#allocation7 + $0x160] sm:$0xff]   ;;  %v685_v57 = vadd.f32 %v621_v26, %v493_v28 }
 0x12e   :  { %v2701_v54 = vpop.xlane.xlu0 %2700  ;;  %v4135_v55 = vrot.slane %v2735_v0, %v6378_v49  ;;  %5325 = vmatprep.subr.mxu0 %v3223_v12  ;;  %v1003_v16 = vunpack.c.l.bf16 %v939_v27  ;;  %v1131_v0 = vunpack.c.h.bf16 %v939_v27  ;;  %v3359_v59 = vld [vmem:[#allocation12 + $0x4e8] sm:$0xff]  ;;  %v3358_v7 = vld [vmem:[#allocation12 + $0x4e0] sm:$0xff] }
 0x12f   :  { %v4030_v11 = vrot.slane %v2701_v54, %v6337_v31  ;;  %5326 = vmatpush1.msra.mxu0 %v3222_v29  ;;  %v908_v54 = vld [vmem:[#allocation7 + $0x68] sm:$0xff]   ;;  %v398_v29 = vld [vmem:[#allocation4 + $0x78] sm:$0xff]   ;;  %v3354_v22 = vld [vmem:[#allocation12 + $0x4c0] sm:$0xff] }
 0x130   :  { %v6394_v4 = vsel %vm4038_vm5, %v4135_v55, %v6350_v34  ;;  %3066 = vadd.xlane.f32.xlu1 %v1211_v37  ;;  %v510_v34 = vunpack.c.l.bf16 %v446_v62  ;;  %5327 = vmatprep.subr.mxu0 %v3219_v6  ;;  %v3366_v37 = vld [vmem:[#allocation12 + $0x520] sm:$0xff]  ;;  %v6422_v62 = vsub.s32 %v4040_v40, %v6238_v35  ;;  %v3351_v27 = vld [vmem:[#allocation12 + $0x4a8] sm:$0xff]  ;;  %v957_v40 = vld [vmem:[#allocation7 + $0x1f0] sm:$0xff]  }
 0x131   :  { %v6398_v13 = vsel %vm4031_vm4, %v4030_v11, %v6354_v36  ;;  %3032 = vadd.xlane.f32.xlu0 %v1194_v38  ;;  %v2795_v8 = vpop.xlane.xlu1 %2794  ;;  %v3370_v36 = vld [vmem:[#allocation12 + $0x540] sm:$0xff]  ;;  %5328 = vmatpush1.msra.mxu0 %v3218_v19  ;;  %v462_v19 = vunpack.c.l.bf16 %v398_v29 }
 0x132   :  { %v2761_v9 = vpop.xlane.xlu0 %2760  ;;  %v4283_v1 = vrot.slane %v2795_v8, %v6297_v42  ;;  %5387 = vmatpush1.msra.mxu1 %v3370_v36  ;;  %v702_v45 = vadd.f32 %v638_v18, %v510_v34  ;;  %5329 = vmatprep.subr.mxu0 %v3215_v23  ;;  %v3210_v55 = vld [vmem:[#allocation12 + $0x40] sm:$0xff]  ;;  %7393 = vst [vmem:[#allocation26_spill] sm:$0xff] %v6422_v62  ;;  %v590_v36 = vunpack.c.h.bf16 %v398_v29  ;;  %v3319_v29 = vld [vmem:[#allocation12 + $0x3a8] sm:$0xff] }
 0x133   :  { %v4199_v2 = vrot.slane %v2761_v9, %v6268_v44  ;;  %5388 = vmatprep.subr.mxu1 %v3367_v24  ;;  %5330 = vmatpush1.msra.mxu0 %v3214_v33  ;;  %v3362_v11 = vld [vmem:[#allocation12 + $0x500] sm:$0xff]  ;;  %v1212_v8 = vadd.f32 %v1148_v50, %v1020_v63  ;;  %v1195_v9 = vadd.f32 %v1131_v0, %v1003_v16  ;;  %v494_v33 = vunpack.c.l.bf16 %v430_v10  ;;  %v3323_v63 = vld [vmem:[#allocation12 + $0x3c8] sm:$0xff] }
 0x134   :  { %v6404_v51 = vsel %vm4024_vm3, %v4283_v1, %v6360_v52  ;;  %2752 = vadd.xlane.f32.xlu1 %v670_v56  ;;  %5389 = vmatpush1.msra.mxu1 %v3366_v37  ;;  %v3206_v6 = vld [vmem:[#allocation12 + $0x20] sm:$0xff]  ;;  %v3203_v1 = vld [vmem:[#allocation12 + $0x8] sm:$0xff]  ;;  %v622_v37 = vunpack.c.h.bf16 %v430_v10 }
 0x135   :  { %v6408_v25 = vsel %vm4017_vm2, %v4199_v2, %v6364_v53  ;;  %2718 = vadd.xlane.f32.xlu0 %v653_v5  ;;  %v2991_v38 = vpop.xlane.xlu1 %2990  ;;  %v3211_v53 = vld [vmem:[#allocation12 + $0x48] sm:$0xff]  ;;  %5390 = vmatprep.subr.mxu1 %v3363_v46  ;;  %v972_v5 = vunpack.c.l.bf16 %v908_v54  ;;  %v654_v46 = vadd.f32 %v590_v36, %v462_v19 }
 0x136   :  { %v2957_v39 = vpop.xlane.xlu0 %2956  ;;  %v4767_v52 = vrot.slane %v2991_v38, %v6378_v49  ;;  %5331 = vmatprep.subr.mxu0 %v3211_v53  ;;  %5391 = vmatpush1.msra.mxu1 %v3362_v11  ;;  %v3355_v2 = vld [vmem:[#allocation12 + $0x4c8] sm:$0xff] }
 0x137   :  { %v4683_v41 = vrot.slane %v2957_v39, %v6337_v31  ;;  %5332 = vmatpush1.msra.mxu0 %v3210_v55  ;;  %5392 = vmatprep.subr.mxu1 %v3359_v59  ;;  %v3347_v50 = vld [vmem:[#allocation12 + $0x488] sm:$0xff]  ;;  %v686_v59 = vadd.f32 %v622_v37, %v494_v33 }
 0x138   :  { %v6415_v56 = vsel %vm4038_vm5, %v4767_v52, %v6371_v15  ;;  %2812 = vadd.xlane.f32.xlu1 %v1180_v20  ;;  %5333 = vmatprep.subr.mxu0 %v3207_v58  ;;  %v925_v20 = vld [vmem:[#allocation7 + $0xf0] sm:$0xff]   ;;  %v3326_v52 = vld [vmem:[#allocation12 + $0x3e0] sm:$0xff]  ;;  %v3311_v37 = vld [vmem:[#allocation12 + $0x368] sm:$0xff] }
 0x139   :  { %v6419_v12 = vsel %vm4031_vm4, %v4683_v41, %v6375_v17  ;;  %2778 = vadd.xlane.f32.xlu0 %v1163_v21  ;;  %v3051_v60 = vpop.xlane.xlu1 %3050  ;;  %v1100_v17 = vunpack.c.h.bf16 %v908_v54  ;;  %v3202_v21 = vld [vmem:[#allocation12] sm:$0xff]  ;;  %5334 = vmatpush1.msra.mxu0 %v3206_v6  ;;  %v989_v38 = vunpack.c.l.bf16 %v925_v20  ;;  %v1117_v39 = vunpack.c.h.bf16 %v925_v20  ;;  %v940_v54 = vld [vmem:[#allocation7 + $0x168] sm:$0xff]  }
 0x13a   :  { %v3017_v61 = vpop.xlane.xlu0 %3016  ;;  %v4915_v15 = vrot.slane %v3051_v60, %v6297_v42  ;;  %5393 = vmatpush1.msra.mxu1 %v3358_v7  ;;  %5335 = vmatprep.subr.mxu0 %v3203_v1  ;;  %v3350_v41 = vld [vmem:[#allocation12 + $0x4a0] sm:$0xff]  ;;  %v1132_v6 = vunpack.c.h.bf16 %v940_v54  ;;  %v909_v7 = vld [vmem:[#allocation7 + $0x70] sm:$0xff]   ;;  %v3339_v20 = vld [vmem:[#allocation12 + $0x448] sm:$0xff] }
 0x13b   :  { %v4831_v3 = vrot.slane %v3017_v61, %v6268_v44  ;;  %v1164_v26 = vadd.f32 %v1100_v17, %v972_v5  ;;  %5394 = vmatprep.subr.mxu1 %v3355_v2  ;;  %5336 = vmatpush1.msra.mxu0 %v3202_v21  ;;  %v3322_v58 = vld [vmem:[#allocation12 + $0x3c0] sm:$0xff]  ;;  %v1181_v60 = vadd.f32 %v1117_v39, %v989_v38  ;;  %v926_v61 = vld [vmem:[#allocation7 + $0xf8] sm:$0xff]   ;;  %v1004_v17 = vunpack.c.l.bf16 %v940_v54  ;;  %v3335_v38 = vld [vmem:[#allocation12 + $0x428] sm:$0xff] }
 0x13c   :  { %v6428_v34 = vsel %vm4024_vm3, %v4915_v15, %v6384_v43  ;;  %3008 = vadd.xlane.f32.xlu1 %v702_v45  ;;  %5395 = vmatpush1.msra.mxu1 %v3354_v22  ;;  %v3343_v15 = vld [vmem:[#allocation12 + $0x468] sm:$0xff]  ;;  %v4047_v2 = vadd.s32 4294967232, %v6236_v30  ;;  %v990_v21 = vunpack.c.l.bf16 %v926_v61  ;;  %v1118_v22 = vunpack.c.h.bf16 %v926_v61  ;;  %v3306_v61 = vld [vmem:[#allocation12 + $0x340] sm:$0xff] }
 0x13d   :  { %v6432_v18 = vsel %vm4017_vm2, %v4831_v3, %v6388_v32  ;;  %2974 = vadd.xlane.f32.xlu0 %v685_v57  ;;  %v2737_v23 = vpop.xlane.xlu1 %2736  ;;  %v3327_v32 = vld [vmem:[#allocation12 + $0x3e8] sm:$0xff]  ;;  %5396 = vmatprep.subr.mxu1 %v3351_v27  ;;  %v1149_v57 = vunpack.c.h.bf16 %v957_v40  ;;  %v1196_v33 = vadd.f32 %v1132_v6, %v1004_v17 }
 0x13e   :  { %v2703_v24 = vpop.xlane.xlu0 %2702  ;;  %v4140_v28 = vrot.slane %v2737_v23, %v6422_v62  ;;  %5337 = vmatprep.subr.mxu0 %v3327_v32  ;;  %5397 = vmatpush1.msra.mxu1 %v3350_v41  ;;  %v973_v23 = vunpack.c.l.bf16 %v909_v7  ;;  %v941_v41 = vld [vmem:[#allocation7 + $0x170] sm:$0xff]  }
 0x13f   :  { %v4037_v43 = vrot.slane %v2703_v24, %v6378_v49  ;;  %5338 = vmatpush2.msra.mxu0 %v3326_v52  ;;  %5398 = vmatprep.subr.mxu1 %v3347_v50  ;;  %v1101_v24 = vunpack.c.h.bf16 %v909_v7  ;;  %v6466_v52 = vsub.s32 %v4047_v2, %v6238_v35  ;;  %v3310_v50 = vld [vmem:[#allocation12 + $0x360] sm:$0xff] }
 0x140   :  { %v6438_v45 = vsel %vm4045_vm6, %v4140_v28, %v6394_v4  ;;  %3068 = vadd.xlane.f32.xlu1 %v1212_v8  ;;  %v1021_v4 = vunpack.c.l.bf16 %v957_v40  ;;  %5339 = vmatprep.subr.mxu0 %v3323_v63  ;;  %v3318_v8 = vld [vmem:[#allocation12 + $0x3a0] sm:$0xff]  ;;  %v958_v28 = vld [vmem:[#allocation7 + $0x1f8] sm:$0xff]  }
 0x141   :  { %v6442_v53 = vsel %vm4038_vm5, %v4037_v43, %v6398_v13  ;;  %3034 = vadd.xlane.f32.xlu0 %v1195_v9  ;;  %v2797_v16 = vpop.xlane.xlu1 %2796  ;;  %v3346_v13 = vld [vmem:[#allocation12 + $0x480] sm:$0xff]  ;;  %5340 = vmatpush2.msra.mxu0 %v3322_v58  ;;  %7394 = vst [vmem:[#allocation27_spill] sm:$0xff] %v6466_v52  ;;  %v1022_v63 = vunpack.c.l.bf16 %v958_v28  ;;  %v1165_v54 = vadd.f32 %v1101_v24, %v973_v23  ;;  %v3451_v23 = vld [vmem:[#allocation12 + $0x7c8] sm:$0xff] }
 0x142   :  { %v2763_v0 = vpop.xlane.xlu0 %2762  ;;  %v4288_v55 = vrot.slane %v2797_v16, %v6337_v31  ;;  %v3342_v9 = vld [vmem:[#allocation12 + $0x460] sm:$0xff]  ;;  %5399 = vmatpush1.msra.mxu1 %v3346_v13  ;;  %v1213_v36 = vadd.f32 %v1149_v57, %v1021_v4  ;;  %5341 = vmatprep.subr.mxu0 %v3319_v29  ;;  %v3331_v4 = vld [vmem:[#allocation12 + $0x408] sm:$0xff]  ;;  %v1005_v13 = vunpack.c.l.bf16 %v941_v41 }
 0x143   :  { %v4204_v11 = vrot.slane %v2763_v0, %v6297_v42  ;;  %5400 = vmatprep.subr.mxu1 %v3343_v15  ;;  %5342 = vmatpush2.msra.mxu0 %v3318_v8  ;;  %v3314_v43 = vld [vmem:[#allocation12 + $0x380] sm:$0xff]  ;;  %v1182_v0 = vadd.f32 %v1118_v22, %v990_v21  ;;  %v3455_v8 = vld [vmem:[#allocation12 + $0x7e8] sm:$0xff] }
 0x144   :  { %v6448_v3 = vsel %vm4031_vm4, %v4288_v55, %v6404_v51  ;;  %2780 = vadd.xlane.f32.xlu1 %v1164_v26  ;;  %5401 = vmatpush1.msra.mxu1 %v3342_v9  ;;  %v3338_v26 = vld [vmem:[#allocation12 + $0x440] sm:$0xff]  ;;  %v942_v55 = vld [vmem:[#allocation7 + $0x178] sm:$0xff]   ;;  %v3299_v22 = vld [vmem:[#allocation12 + $0x308] sm:$0xff] }
 0x145   :  { %v6452_v5 = vsel %vm4024_vm3, %v4204_v11, %v6408_v25  ;;  %2720 = vadd.xlane.f32.xlu0 %v654_v46  ;;  %v2993_v10 = vpop.xlane.xlu1 %2992  ;;  %v3315_v25 = vld [vmem:[#allocation12 + $0x388] sm:$0xff]  ;;  %5402 = vmatprep.subr.mxu1 %v3339_v20  ;;  %v3334_v16 = vld [vmem:[#allocation12 + $0x420] sm:$0xff]  ;;  %v1006_v9 = vunpack.c.l.bf16 %v942_v55 }
 0x146   :  { %v2959_v1 = vpop.xlane.xlu0 %2958  ;;  %v4772_v51 = vrot.slane %v2993_v10, %v6422_v62  ;;  %5343 = vmatprep.subr.mxu0 %v3315_v25  ;;  %5403 = vmatpush1.msra.mxu1 %v3338_v26  ;;  %v3307_v11 = vld [vmem:[#allocation12 + $0x348] sm:$0xff]  ;;  %v3330_v29 = vld [vmem:[#allocation12 + $0x400] sm:$0xff]  ;;  %v1134_v10 = vunpack.c.h.bf16 %v942_v55 }
 0x147   :  { %v4688_v19 = vrot.slane %v2959_v1, %v6378_v49  ;;  %5344 = vmatpush2.msra.mxu0 %v3314_v43  ;;  %5404 = vmatprep.subr.mxu1 %v3335_v38  ;;  %v1423_v43 = vld [vmem:[#allocation9 + $0x80] sm:$0xff]  }
 0x148   :  { %v6459_v32 = vsel %vm4045_vm6, %v4772_v51, %v6415_v56  ;;  %2976 = vadd.xlane.f32.xlu1 %v686_v59  ;;  %5345 = vmatprep.subr.mxu0 %v3311_v37  ;;  %v1133_v59 = vunpack.c.h.bf16 %v941_v41  ;;  %v1424_v51 = vld [vmem:[#allocation9 + $0x88] sm:$0xff]   ;;  %v3298_v38 = vld [vmem:[#allocation12 + $0x300] sm:$0xff] }
 0x149   :  { %v6463_v27 = vsel %vm4038_vm5, %v4688_v19, %v6419_v12  ;;  %2814 = vadd.xlane.f32.xlu0 %v1181_v60  ;;  %v3053_v39 = vpop.xlane.xlu1 %3052  ;;  %v1150_v12 = vunpack.c.h.bf16 %v958_v28  ;;  %v910_v60 = vld [vmem:[#allocation7 + $0x78] sm:$0xff]   ;;  %5346 = vmatpush2.msra.mxu0 %v3310_v50  ;;  %v3302_v19 = vld [vmem:[#allocation12 + $0x320] sm:$0xff]  ;;  %v1616_v37 = vunpack.c.h.bf16 %v1424_v51  ;;  %v1456_v41 = vld [vmem:[#allocation9 + $0x188] sm:$0xff]   ;;  %v1487_v50 = vunpack.c.l.bf16 %v1423_v43 }
 0x14a   :  { %v3019_v40 = vpop.xlane.xlu0 %3018  ;;  %v4920_v56 = vrot.slane %v3053_v39, %v6337_v31  ;;  %5405 = vmatpush1.msra.mxu1 %v3334_v16  ;;  %5347 = vmatprep.subr.mxu0 %v3307_v11  ;;  %v974_v1 = vunpack.c.l.bf16 %v910_v60  ;;  %v1102_v2 = vunpack.c.h.bf16 %v910_v60  ;;  %v1197_v21 = vadd.f32 %v1133_v59, %v1005_v13  ;;  %v3446_v55 = vld [vmem:[#allocation12 + $0x7a0] sm:$0xff] }
 0x14b   :  { %v4836_v46 = vrot.slane %v3019_v40, %v6297_v42  ;;  %v1214_v7 = vadd.f32 %v1150_v12, %v1022_v63  ;;  %5406 = vmatprep.subr.mxu1 %v3331_v4  ;;  %5348 = vmatpush2.msra.mxu0 %v3306_v61  ;;  %v1198_v39 = vadd.f32 %v1134_v10, %v1006_v9  ;;  %v1615_v16 = vunpack.c.h.bf16 %v1423_v43  ;;  %v3443_v61 = vld [vmem:[#allocation12 + $0x788] sm:$0xff] }
 0x14c   :  { %v6472_v57 = vsel %vm4031_vm4, %v4920_v56, %v6428_v34  ;;  %3070 = vadd.xlane.f32.xlu1 %v1213_v36  ;;  %5407 = vmatpush1.msra.mxu1 %v3330_v29  ;;  %v3454_v36 = vld [vmem:[#allocation12 + $0x7e0] sm:$0xff]  ;;  %v1166_v40 = vadd.f32 %v1102_v2, %v974_v1  ;;  %v3295_v56 = vld [vmem:[#allocation12 + $0x2e8] sm:$0xff]  ;;  %v4054_v13 = vadd.s32 4294967224, %v6236_v30  ;;  %v1520_v29 = vunpack.c.l.bf16 %v1456_v41 }
 0x14d   :  { %v6476_v58 = vsel %vm4024_vm3, %v4836_v46, %v6432_v18  ;;  %3036 = vadd.xlane.f32.xlu0 %v1196_v33  ;;  %v2739_v15 = vpop.xlane.xlu1 %2738  ;;  %v3303_v18 = vld [vmem:[#allocation12 + $0x328] sm:$0xff]  ;;  %5408 = vmatprep.subr.mxu1 %v3455_v8  ;;  %v1679_v10 = vadd.f32 %v1615_v16, %v1487_v50 }
 0x14e   :  { %v2705_v17 = vpop.xlane.xlu0 %2704  ;;  %v4145_v6 = vrot.slane %v2739_v15, %v6466_v52  ;;  %5349 = vmatprep.subr.mxu0 %v3303_v18  ;;  %5409 = vmatpush2.msra.mxu1 %v3454_v36  ;;  %v3447_v46 = vld [vmem:[#allocation12 + $0x7a8] sm:$0xff]  ;;  %v1648_v15 = vunpack.c.h.bf16 %v1456_v41  ;;  %v3442_v18 = vld [vmem:[#allocation12 + $0x780] sm:$0xff]  ;;  %v6510_v36 = vsub.s32 %v4054_v13, %v6238_v35  ;;  %v1425_v41 = vld [vmem:[#allocation9 + $0x90] sm:$0xff]  }
 0x14f   :  { %v4044_v34 = vrot.slane %v2705_v17, %v6422_v62  ;;  %5350 = vmatpush2.msra.mxu0 %v3302_v19  ;;  %5410 = vmatprep.subr.mxu1 %v3451_v23  ;;  %v3287_v1 = vld [vmem:[#allocation12 + $0x2a8] sm:$0xff]  ;;  %v1489_v13 = vunpack.c.l.bf16 %v1425_v41 }
 0x150   :  { %v6482_v25 = vsel %vm4052_vm7, %v4145_v6, %v6438_v45  ;;  %2816 = vadd.xlane.f32.xlu1 %v1182_v0  ;;  %v1488_v45 = vunpack.c.l.bf16 %v1424_v51  ;;  %5351 = vmatprep.subr.mxu0 %v3299_v22  ;;  %v1455_v0 = vld [vmem:[#allocation9 + $0x180] sm:$0xff]   ;;  %v3439_v2 = vld [vmem:[#allocation12 + $0x768] sm:$0xff]  ;;  %7395 = vst [vmem:[#allocation28_spill] sm:$0xff] %v6510_v36  ;;  %v1712_v43 = vadd.f32 %v1648_v15, %v1520_v29 }
 0x151   :  { %v6486_v20 = vsel %vm4045_vm6, %v4044_v34, %v6442_v53  ;;  %2782 = vadd.xlane.f32.xlu0 %v1165_v54  ;;  %v2799_v24 = vpop.xlane.xlu1 %2798  ;;  %v3450_v53 = vld [vmem:[#allocation12 + $0x7c0] sm:$0xff]  ;;  %5352 = vmatpush2.msra.mxu0 %v3298_v38  ;;  %v1519_v17 = vunpack.c.l.bf16 %v1455_v0  ;;  %v1647_v6 = vunpack.c.h.bf16 %v1455_v0  ;;  %v1408_v34 = vld [vmem:[#allocation9 + $0x8] sm:$0xff]  }
 0x152   :  { %v2765_v28 = vpop.xlane.xlu0 %2764  ;;  %v4293_v26 = vrot.slane %v2799_v24, %v6378_v49  ;;  %v3294_v54 = vld [vmem:[#allocation12 + $0x2e0] sm:$0xff]  ;;  %5411 = vmatpush2.msra.mxu1 %v3450_v53  ;;  %v1680_v60 = vadd.f32 %v1616_v37, %v1488_v45  ;;  %5353 = vmatprep.subr.mxu0 %v3295_v56  ;;  %v1472_v23 = vunpack.c.l.bf16 %v1408_v34  ;;  %v3283_v45 = vld [vmem:[#allocation12 + $0x288] sm:$0xff] }
 0x153   :  { %v4209_v33 = vrot.slane %v2765_v28, %v6337_v31  ;;  %5412 = vmatprep.subr.mxu1 %v3447_v46  ;;  %5354 = vmatpush2.msra.mxu0 %v3294_v54  ;;  %v3286_v24 = vld [vmem:[#allocation12 + $0x2a0] sm:$0xff]  ;;  %v3435_v37 = vld [vmem:[#allocation12 + $0x748] sm:$0xff] }
 0x154   :  { %v6492_v63 = vsel %vm4038_vm5, %v4293_v26, %v6448_v3  ;;  %3072 = vadd.xlane.f32.xlu1 %v1214_v7  ;;  %v3290_v7 = vld [vmem:[#allocation12 + $0x2c0] sm:$0xff]  ;;  %5413 = vmatpush2.msra.mxu1 %v3446_v55  ;;  %v1711_v26 = vadd.f32 %v1647_v6, %v1519_v17  ;;  %v3431_v55 = vld [vmem:[#allocation12 + $0x728] sm:$0xff] }
 0x155   :  { %v6496_v12 = vsel %vm4031_vm4, %v4209_v33, %v6452_v5  ;;  %3038 = vadd.xlane.f32.xlu0 %v1197_v21  ;;  %v2995_v11 = vpop.xlane.xlu1 %2994  ;;  %v3291_v5 = vld [vmem:[#allocation12 + $0x2c8] sm:$0xff]  ;;  %v1407_v21 = vld [vmem:[#allocation9] sm:$0xff]   ;;  %5414 = vmatprep.subr.mxu1 %v3443_v61 }
 0x156   :  { %v2961_v4 = vpop.xlane.xlu0 %2960  ;;  %v4777_v3 = vrot.slane %v2995_v11, %v6466_v52  ;;  %5355 = vmatprep.subr.mxu0 %v3291_v5  ;;  %5415 = vmatpush2.msra.mxu1 %v3442_v18  ;;  %v3438_v28 = vld [vmem:[#allocation12 + $0x760] sm:$0xff]  ;;  %v3275_v17 = vld [vmem:[#allocation12 + $0x248] sm:$0xff] }
 0x157   :  { %v4693_v59 = vrot.slane %v2961_v4, %v6422_v62  ;;  %5356 = vmatpush2.msra.mxu0 %v3290_v7  ;;  %v1439_v33 = vld [vmem:[#allocation9 + $0x100] sm:$0xff]   ;;  %5416 = vmatprep.subr.mxu1 %v3439_v2  ;;  %v3427_v6 = vld [vmem:[#allocation12 + $0x708] sm:$0xff] }
 0x158   :  { %v6503_v8 = vsel %vm4052_vm7, %v4777_v3, %v6459_v32  ;;  %3040 = vadd.xlane.f32.xlu1 %v1198_v39  ;;  %5357 = vmatprep.subr.mxu0 %v3287_v1  ;;  %v1471_v39 = vunpack.c.l.bf16 %v1407_v21  ;;  %v3282_v56 = vld [vmem:[#allocation12 + $0x280] sm:$0xff]  ;;  %v1503_v11 = vunpack.c.l.bf16 %v1439_v33  ;;  %v1631_v4 = vunpack.c.h.bf16 %v1439_v33  ;;  %v1440_v18 = vld [vmem:[#allocation9 + $0x108] sm:$0xff]  }
 0x159   :  { %v6507_v9 = vsel %vm4045_vm6, %v4693_v59, %v6463_v27  ;;  %2784 = vadd.xlane.f32.xlu0 %v1166_v40  ;;  %v3055_v51 = vpop.xlane.xlu1 %3054  ;;  %v1600_v27 = vunpack.c.h.bf16 %v1408_v34  ;;  %v1599_v40 = vunpack.c.h.bf16 %v1407_v21  ;;  %v3434_v46 = vld [vmem:[#allocation12 + $0x740] sm:$0xff]  ;;  %5358 = vmatpush2.msra.mxu0 %v3286_v24  ;;  %v1617_v3 = vunpack.c.h.bf16 %v1425_v41  ;;  %v1457_v59 = vld [vmem:[#allocation9 + $0x190] sm:$0xff]   ;;  %v1432_v42 = vld [vmem:[#allocation9 + $0xc8] sm:$0xff]  }
 0x15a   :  { %v3021_v19 = vpop.xlane.xlu0 %3020  ;;  %v4925_v32 = vrot.slane %v3055_v51, %v6378_v49  ;;  %5417 = vmatpush2.msra.mxu1 %v3438_v28  ;;  %5359 = vmatprep.subr.mxu0 %v3283_v45  ;;  %v3430_v5 = vld [vmem:[#allocation12 + $0x720] sm:$0xff]  ;;  %v1649_v2 = vunpack.c.h.bf16 %v1457_v59  ;;  %v1504_v28 = vunpack.c.l.bf16 %v1440_v18 }
 0x15b   :  { %v4841_v22 = vrot.slane %v3021_v19, %v6337_v31  ;;  %v1664_v54 = vadd.f32 %v1600_v27, %v1472_v23  ;;  %5418 = vmatprep.subr.mxu1 %v3435_v37  ;;  %5360 = vmatpush2.msra.mxu0 %v3282_v56  ;;  %v1663_v15 = vadd.f32 %v1599_v40, %v1471_v39  ;;  %v3274_v51 = vld [vmem:[#allocation12 + $0x240] sm:$0xff]  ;;  %v3423_v23 = vld [vmem:[#allocation12 + $0x6e8] sm:$0xff]  ;;  %v4061_v40 = vadd.s32 4294967216, %v6236_v30 }
 0x15c   :  { %v6516_v38 = vsel %vm4038_vm5, %v4925_v32, %v6472_v57  ;;  %2852 = vadd.xlane.f32.xlu1 %v1680_v60  ;;  %v3278_v60 = vld [vmem:[#allocation12 + $0x260] sm:$0xff]  ;;  %5419 = vmatpush2.msra.mxu1 %v3434_v46  ;;  %v1695_v19 = vadd.f32 %v1631_v4, %v1503_v11  ;;  %v1681_v21 = vadd.f32 %v1617_v3, %v1489_v13  ;;  %v1426_v32 = vld [vmem:[#allocation9 + $0x98] sm:$0xff]   ;;  %v3419_v46 = vld [vmem:[#allocation12 + $0x6c8] sm:$0xff] }
 0x15d   :  { %v6520_v53 = vsel %vm4031_vm4, %v4841_v22, %v6476_v58  ;;  %2850 = vadd.xlane.f32.xlu0 %v1679_v10  ;;  %v2741_v50 = vpop.xlane.xlu1 %2740  ;;  %v3279_v58 = vld [vmem:[#allocation12 + $0x268] sm:$0xff]  ;;  %5420 = vmatprep.subr.mxu1 %v3431_v55  ;;  %v3270_v33 = vld [vmem:[#allocation12 + $0x220] sm:$0xff] }
 0x15e   :  { %v2707_v16 = vpop.xlane.xlu0 %2706  ;;  %v4150_v0 = vrot.slane %v2741_v50, %v6510_v36  ;;  %5361 = vmatprep.subr.mxu0 %v3279_v58  ;;  %5421 = vmatpush2.msra.mxu1 %v3430_v5  ;;  %v3271_v22 = vld [vmem:[#allocation12 + $0x228] sm:$0xff]  ;;  %v3422_v45 = vld [vmem:[#allocation12 + $0x6e0] sm:$0xff]  ;;  %v1490_v50 = vunpack.c.l.bf16 %v1426_v32  ;;  %v6554_v5 = vsub.s32 %v4061_v40, %v6238_v35 }
 0x15f   :  { %v4051_v57 = vrot.slane %v2707_v16, %v6466_v52  ;;  %5362 = vmatpush2.msra.mxu0 %v3278_v60  ;;  %5422 = vmatprep.subr.mxu1 %v3427_v6  ;;  %v1618_v16 = vunpack.c.h.bf16 %v1426_v32  ;;  %v3266_v58 = vld [vmem:[#allocation12 + $0x200] sm:$0xff]  ;;  %v3415_v3 = vld [vmem:[#allocation12 + $0x6a8] sm:$0xff] }
 0x160   :  { %v6526_v61 = vsel %vm4059_vm8, %v4150_v0, %v6482_v25  ;;  %3108 = vadd.xlane.f32.xlu1 %v1712_v43  ;;  %v1521_v25 = vunpack.c.l.bf16 %v1457_v59  ;;  %5363 = vmatprep.subr.mxu0 %v3275_v17  ;;  %v1632_v43 = vunpack.c.h.bf16 %v1440_v18  ;;  %v3418_v55 = vld [vmem:[#allocation12 + $0x6c0] sm:$0xff] }
 0x161   :  { %v6530_v29 = vsel %vm4052_vm7, %v4051_v57, %v6486_v20  ;;  %3106 = vadd.xlane.f32.xlu0 %v1711_v26  ;;  %v2801_v34 = vpop.xlane.xlu1 %2800  ;;  %v3426_v20 = vld [vmem:[#allocation12 + $0x700] sm:$0xff]  ;;  %v1409_v26 = vld [vmem:[#allocation9 + $0x10] sm:$0xff]   ;;  %5364 = vmatpush2.msra.mxu0 %v3274_v51 }
 0x162   :  { %v2767_v7 = vpop.xlane.xlu0 %2766  ;;  %v4298_v10 = vrot.slane %v2801_v34, %v6422_v62  ;;  %5423 = vmatpush2.msra.mxu1 %v3426_v20  ;;  %v1713_v56 = vadd.f32 %v1649_v2, %v1521_v25  ;;  %5365 = vmatprep.subr.mxu0 %v3271_v22  ;;  %v1473_v0 = vunpack.c.l.bf16 %v1409_v26  ;;  %v1601_v57 = vunpack.c.h.bf16 %v1409_v26  ;;  %v1458_v20 = vld [vmem:[#allocation9 + $0x198] sm:$0xff]  }
 0x163   :  { %v4214_v1 = vrot.slane %v2767_v7, %v6378_v49  ;;  %5424 = vmatprep.subr.mxu1 %v3423_v23  ;;  %5366 = vmatpush2.msra.mxu0 %v3270_v33  ;;  %v1696_v13 = vadd.f32 %v1632_v43, %v1504_v28  ;;  %v1682_v7 = vadd.f32 %v1618_v16, %v1490_v50  ;;  %v3407_v43 = vld [vmem:[#allocation12 + $0x668] sm:$0xff]  ;;  %v1650_v26 = vunpack.c.h.bf16 %v1458_v20  ;;  %v1967_v50 = vld [vmem:[#allocation10 + $0x180] sm:$0xff]  }
 0x164   :  { %v6536_v27 = vsel %vm4045_vm6, %v4298_v10, %v6492_v63  ;;  %2820 = vadd.xlane.f32.xlu1 %v1664_v54  ;;  %v1936_v54 = vld [vmem:[#allocation10 + $0x88] sm:$0xff]   ;;  %5425 = vmatpush2.msra.mxu1 %v3422_v45  ;;  %v1665_v18 = vadd.f32 %v1601_v57, %v1473_v0 }
 0x165   :  { %v6540_v24 = vsel %vm4038_vm5, %v4214_v1, %v6496_v12  ;;  %2818 = vadd.xlane.f32.xlu0 %v1663_v15  ;;  %v2997_v37 = vpop.xlane.xlu1 %2996  ;;  %v3267_v12 = vld [vmem:[#allocation12 + $0x208] sm:$0xff]  ;;  %v1935_v15 = vld [vmem:[#allocation10 + $0x80] sm:$0xff]   ;;  %5426 = vmatprep.subr.mxu1 %v3419_v46  ;;  %v2000_v6 = vunpack.c.l.bf16 %v1936_v54  ;;  %v2128_v34 = vunpack.c.h.bf16 %v1936_v54 }
 0x166   :  { %v2963_v39 = vpop.xlane.xlu0 %2962  ;;  %v4782_v63 = vrot.slane %v2997_v37, %v6510_v36  ;;  %5367 = vmatprep.subr.mxu0 %v3267_v12  ;;  %5427 = vmatpush2.msra.mxu1 %v3418_v55  ;;  %v3411_v10 = vld [vmem:[#allocation12 + $0x688] sm:$0xff]  ;;  %v1999_v2 = vunpack.c.l.bf16 %v1935_v15  ;;  %v2127_v51 = vunpack.c.h.bf16 %v1935_v15  ;;  %v1427_v15 = vld [vmem:[#allocation9 + $0xa0] sm:$0xff]  }
 0x167   :  { %v4698_v41 = vrot.slane %v2963_v39, %v6466_v52  ;;  %5368 = vmatpush2.msra.mxu0 %v3266_v58  ;;  %5428 = vmatprep.subr.mxu1 %v3415_v3  ;;  %v2192_v28 = vadd.f32 %v2128_v34, %v2000_v6  ;;  %v1968_v37 = vld [vmem:[#allocation10 + $0x188] sm:$0xff]   ;;  %v3406_v39 = vld [vmem:[#allocation12 + $0x660] sm:$0xff] }
 0x168   :  { %v6547_v11 = vsel %vm4059_vm8, %v4782_v63, %v6503_v8  ;;  %3074 = vadd.xlane.f32.xlu1 %v1695_v19  ;;  %v1441_v19 = vld [vmem:[#allocation9 + $0x110] sm:$0xff]   ;;  %v2032_v57 = vunpack.c.l.bf16 %v1968_v37  ;;  %v2160_v54 = vunpack.c.h.bf16 %v1968_v37 }
 0x169   :  { %v6551_v4 = vsel %vm4052_vm7, %v4698_v41, %v6507_v9  ;;  %2854 = vadd.xlane.f32.xlu0 %v1681_v21  ;;  %v3057_v59 = vpop.xlane.xlu1 %3056  ;;  %v3414_v9 = vld [vmem:[#allocation12 + $0x6a0] sm:$0xff]  ;;  %v1505_v33 = vunpack.c.l.bf16 %v1441_v19  ;;  %v1633_v45 = vunpack.c.h.bf16 %v1441_v19  ;;  %v2191_v41 = vadd.f32 %v2127_v51, %v1999_v2  ;;  %v1920_v19 = vld [vmem:[#allocation10 + $0x8] sm:$0xff]  }
 0x16a   :  { %v3023_v60 = vpop.xlane.xlu0 %3022  ;;  %v4930_v17 = vrot.slane %v3057_v59, %v6422_v62  ;;  %v3410_v21 = vld [vmem:[#allocation12 + $0x680] sm:$0xff]  ;;  %5429 = vmatpush2.msra.mxu1 %v3414_v9  ;;  %v2031_v59 = vunpack.c.l.bf16 %v1967_v50  ;;  %v4068_v9 = vadd.s32 4294967208, %v6236_v30  ;;  %v1619_v2 = vunpack.c.h.bf16 %v1427_v15 }
 0x16b   :  { %v4846_v8 = vrot.slane %v3023_v60, %v6378_v49  ;;  %5430 = vmatprep.subr.mxu1 %v3411_v10  ;;  %v1697_v55 = vadd.f32 %v1633_v45, %v1505_v33  ;;  %v2159_v60 = vunpack.c.h.bf16 %v1967_v50  ;;  %v1491_v10 = vunpack.c.l.bf16 %v1427_v15  ;;  %v1937_v50 = vld [vmem:[#allocation10 + $0x90] sm:$0xff]   ;;  %v1951_v15 = vld [vmem:[#allocation10 + $0x100] sm:$0xff]  }
 0x16c   :  { %v6560_v1 = vsel %vm4045_vm6, %v4930_v17, %v6516_v38  ;;  %3110 = vadd.xlane.f32.xlu1 %v1713_v56  ;;  %5431 = vmatpush2.msra.mxu1 %v3410_v21  ;;  %v3403_v56 = vld [vmem:[#allocation12 + $0x648] sm:$0xff]  ;;  %v1410_v17 = vld [vmem:[#allocation9 + $0x18] sm:$0xff]   ;;  %v3394_v21 = vld [vmem:[#allocation12 + $0x600] sm:$0xff]  ;;  %v2112_v45 = vunpack.c.h.bf16 %v1920_v19 }
 0x16d   :  { %v6564_v25 = vsel %vm4038_vm5, %v4846_v8, %v6520_v53  ;;  %3076 = vadd.xlane.f32.xlu0 %v1696_v13  ;;  %v2743_v32 = vpop.xlane.xlu1 %2742  ;;  %v1522_v53 = vunpack.c.l.bf16 %v1458_v20  ;;  %5432 = vmatprep.subr.mxu1 %v3407_v43  ;;  %v3398_v8 = vld [vmem:[#allocation12 + $0x620] sm:$0xff]  ;;  %v1474_v51 = vunpack.c.l.bf16 %v1410_v17  ;;  %v1602_v20 = vunpack.c.h.bf16 %v1410_v17 }
 0x16e   :  { %v2709_v22 = vpop.xlane.xlu0 %2708  ;;  %v4155_v23 = vrot.slane %v2743_v32, %v6554_v5  ;;  %5433 = vmatpush2.msra.mxu1 %v3406_v39  ;;  %v6598_v43 = vsub.s32 %v4068_v9, %v6238_v35  ;;  %v1683_v37 = vadd.f32 %v1619_v2, %v1491_v10 }
 0x16f   :  { %v4058_v38 = vrot.slane %v2709_v22, %v6510_v36  ;;  %v1714_v58 = vadd.f32 %v1650_v26, %v1522_v53  ;;  %5434 = vmatprep.subr.mxu1 %v3403_v56  ;;  %v1919_v53 = vld [vmem:[#allocation10] sm:$0xff]  }
 0x170   :  { %v6570_v40 = vsel %vm4066_vm9, %v4155_v23, %v6526_v61  ;;  %2856 = vadd.xlane.f32.xlu1 %v1682_v7  ;;  %v3402_v61 = vld [vmem:[#allocation12 + $0x640] sm:$0xff]  ;;  %v2223_v23 = vadd.f32 %v2159_v60, %v2031_v59  ;;  %v1983_v56 = vunpack.c.l.bf16 %v1919_v53 }
 0x171   :  { %v6574_v63 = vsel %vm4059_vm8, %v4058_v38, %v6530_v29  ;;  %2822 = vadd.xlane.f32.xlu0 %v1665_v18  ;;  %v2803_v12 = vpop.xlane.xlu1 %2802  ;;  %v3399_v29 = vld [vmem:[#allocation12 + $0x628] sm:$0xff]  ;;  %5435 = vmatpush2.msra.mxu1 %v3402_v61  ;;  %v2224_v18 = vadd.f32 %v2160_v54, %v2032_v57 }
 0x172   :  { %v2769_v46 = vpop.xlane.xlu0 %2768  ;;  %v4303_v16 = vrot.slane %v2803_v12, %v6466_v52  ;;  %5436 = vmatprep.subr.mxu1 %v3399_v29  ;;  %v2111_v12 = vunpack.c.h.bf16 %v1919_v53  ;;  %v2129_v29 = vunpack.c.h.bf16 %v1937_v50 }
 0x173   :  { %v4219_v0 = vrot.slane %v2769_v46, %v6422_v62  ;;  %5437 = vmatpush2.msra.mxu1 %v3398_v8  ;;  %v1442_v46 = vld [vmem:[#allocation9 + $0x118] sm:$0xff]  }
 0x174   :  { %v6580_v13 = vsel %vm4052_vm7, %v4303_v16, %v6536_v27  ;;  %2916 = vadd.xlane.f32.xlu1 %v2192_v28  ;;  %v2175_v60 = vadd.f32 %v2111_v12, %v1983_v56 }
 0x175   :  { %v6584_v3 = vsel %vm4045_vm6, %v4219_v0, %v6540_v24  ;;  %2914 = vadd.xlane.f32.xlu0 %v2191_v41  ;;  %v2999_v6 = vpop.xlane.xlu1 %2998  ;;  %v3395_v24 = vld [vmem:[#allocation12 + $0x608] sm:$0xff] }
 0x176   :  { %v2965_v34 = vpop.xlane.xlu0 %2964  ;;  %v4787_v7 = vrot.slane %v2999_v6, %v6554_v5  ;;  %5438 = vmatprep.subr.mxu1 %v3395_v24  ;;  %v1459_v6 = vld [vmem:[#allocation9 + $0x1a0] sm:$0xff]   ;;  %v2143_v24 = vunpack.c.h.bf16 %v1951_v15 }
 0x177   :  { %v4703_v27 = vrot.slane %v2965_v34, %v6510_v36  ;;  %5439 = vmatpush2.msra.mxu1 %v3394_v21  ;;  %v1523_v10 = vunpack.c.l.bf16 %v1459_v6  ;;  %v1651_v2 = vunpack.c.h.bf16 %v1459_v6 }
 0x178   :  { %v6591_v32 = vsel %vm4066_vm9, %v4787_v7, %v6547_v11  ;;  %3112 = vadd.xlane.f32.xlu1 %v1714_v58  ;;  %v1984_v11 = vunpack.c.l.bf16 %v1920_v19  ;;  %v1634_v58 = vunpack.c.h.bf16 %v1442_v46 }
 0x179   :  { %v6595_v22 = vsel %vm4059_vm8, %v4703_v27, %v6551_v4  ;;  %3078 = vadd.xlane.f32.xlu0 %v1697_v55  ;;  %v3059_v38 = vpop.xlane.xlu1 %3058  ;;  %v1666_v4 = vadd.f32 %v1602_v20, %v1474_v51  ;;  %v2001_v55 = vunpack.c.l.bf16 %v1937_v50  ;;  %v1969_v51 = vld [vmem:[#allocation10 + $0x190] sm:$0xff]   ;;  %v1952_v20 = vld [vmem:[#allocation10 + $0x108] sm:$0xff]  }
 0x17a   :  { %v3025_v28 = vpop.xlane.xlu0 %3024  ;;  %v4935_v26 = vrot.slane %v3059_v38, %v6466_v52  ;;  %v2176_v61 = vadd.f32 %v2112_v45, %v1984_v11  ;;  %v2033_v38 = vunpack.c.l.bf16 %v1969_v51  ;;  %v2016_v53 = vunpack.c.l.bf16 %v1952_v20  ;;  %v1428_v11 = vld [vmem:[#allocation9 + $0xa8] sm:$0xff]  }
 0x17b   :  { %v4851_v33 = vrot.slane %v3025_v28, %v6422_v62  ;;  %v2193_v27 = vadd.f32 %v2129_v29, %v2001_v55  ;;  %v2161_v28 = vunpack.c.h.bf16 %v1969_v51  ;;  %v1921_v29 = vld [vmem:[#allocation10 + $0x10] sm:$0xff]   ;;  %v1463_v62 = vld [vmem:[#allocation9 + $0x1c0] sm:$0xff]  }
 0x17c   :  { %v6604_v39 = vsel %vm4052_vm7, %v4935_v26, %v6560_v1  ;;  %3172 = vadd.xlane.f32.xlu1 %v2224_v18  ;;  %v1506_v1 = vunpack.c.l.bf16 %v1442_v46  ;;  %v2015_v18 = vunpack.c.l.bf16 %v1951_v15  ;;  %v2144_v26 = vunpack.c.h.bf16 %v1952_v20 }
 0x17d   :  { %v6608_v41 = vsel %vm4045_vm6, %v4851_v33, %v6564_v25  ;;  %3170 = vadd.xlane.f32.xlu0 %v2223_v23  ;;  %v2745_v16 = vpop.xlane.xlu1 %2744  ;;  %v1715_v33 = vadd.f32 %v1651_v2, %v1523_v10  ;;  %v2225_v46 = vadd.f32 %v2161_v28, %v2033_v38  ;;  %v1655_v31 = vunpack.c.h.bf16 %v1463_v62 }
 0x17e   :  { %v2711_v0 = vpop.xlane.xlu0 %2710  ;;  %v4160_v57 = vrot.slane %v2745_v16, %v6598_v43  ;;  %v1698_v7 = vadd.f32 %v1634_v58, %v1506_v1  ;;  %v2208_v50 = vadd.f32 %v2144_v26, %v2016_v53  ;;  %v1492_v16 = vunpack.c.l.bf16 %v1428_v11 }
 0x17f   :  { %v4065_v54 = vrot.slane %v2711_v0, %v6554_v5  ;;  %v1620_v0 = vunpack.c.h.bf16 %v1428_v11 }
 0x180   :  { %v6614_v25 = vsel %vm4073_vm10, %v4160_v57, %v6570_v40  ;;  %2858 = vadd.xlane.f32.xlu1 %v1683_v37  ;;  %v1938_v57 = vld [vmem:[#allocation10 + $0x98] sm:$0xff]  }
 0x181   :  { %v4067_v59 = vsel %vm4066_vm9, %v4065_v54, %v6574_v63  ;;  %2824 = vadd.xlane.f32.xlu0 %v1666_v4  ;;  %v2805_v17 = vpop.xlane.xlu1 %2804  ;;  %v1411_v4 = vld [vmem:[#allocation9 + $0x20] sm:$0xff]   ;;  %v2002_v15 = vunpack.c.l.bf16 %v1938_v57 }
 0x182   :  { %v2771_v8 = vpop.xlane.xlu0 %2770  ;;  %v4308_v34 = vrot.slane %v2805_v17, %v6510_v36  ;;  %v1603_v1 = vunpack.c.h.bf16 %v1411_v4  ;;  %v2130_v17 = vunpack.c.h.bf16 %v1938_v57 }
 0x183   :  { %v4224_v9 = vrot.slane %v2771_v8, %v6466_v52  ;;  %v1684_v8 = vadd.f32 %v1620_v0, %v1492_v16 }
 0x184   :  { %v4309_v40 = vsel %vm4059_vm8, %v4308_v34, %v6580_v13  ;;  %2884 = vadd.xlane.f32.xlu1 %v2176_v61  ;;  %v1475_v61 = vunpack.c.l.bf16 %v1411_v4  ;;  %v2113_v34 = vunpack.c.h.bf16 %v1921_v29  ;;  %v2194_v2 = vadd.f32 %v2130_v17, %v2002_v15 }
 0x185   :  { %v4225_v63 = vsel %vm4052_vm7, %v4224_v9, %v6584_v3  ;;  %2882 = vadd.xlane.f32.xlu0 %v2175_v60  ;;  %v6624_v19 = vpop.xlane.xlu1 %3000  ;;  %v2207_v3 = vadd.f32 %v2143_v24, %v2015_v18  ;;  %v1460_v9 = vld [vmem:[#allocation9 + $0x1a8] sm:$0xff]  }
 0x186   :  { %v2967_v21 = vpop.xlane.xlu0 %2966  ;;  %v1524_v51 = vunpack.c.l.bf16 %v1460_v9  ;;  %v1652_v20 = vunpack.c.h.bf16 %v1460_v9 }
 0x187   :  { %v4708_v23 = vrot.slane %v2967_v21, %v6554_v5 }
 0x188   :  { %3080 = vadd.xlane.f32.xlu1 %v1698_v7  ;;  %v1443_v7 = vld [vmem:[#allocation9 + $0x120] sm:$0xff]   ;;  %v1716_v11 = vadd.f32 %v1652_v20, %v1524_v51 }
 0x189   :  { %v6629_v13 = vsel %vm4066_vm9, %v4708_v23, %v6595_v22  ;;  %2918 = vadd.xlane.f32.xlu0 %v2193_v27  ;;  %v3061_v45 = vpop.xlane.xlu1 %3060  ;;  %v1507_v21 = vunpack.c.l.bf16 %v1443_v7  ;;  %v1635_v23 = vunpack.c.h.bf16 %v1443_v7 }
 0x18a   :  { %v3027_v37 = vpop.xlane.xlu0 %3026  ;;  %v4940_v56 = vrot.slane %v3061_v45, %v6510_v36 }
 0x18b   :  { %v4856_v12 = vrot.slane %v3027_v37, %v6466_v52  ;;  %v1699_v45 = vadd.f32 %v1635_v23, %v1507_v21 }
 0x18c   :  { %v6635_v22 = vsel %vm4059_vm8, %v4940_v56, %v6604_v39  ;;  %3138 = vadd.xlane.f32.xlu1 %v2207_v3  ;;  %v1667_v39 = vadd.f32 %v1603_v1, %v1475_v61  ;;  %v1970_v3 = vld [vmem:[#allocation10 + $0x198] sm:$0xff]  }
 0x18d   :  { %v4857_v54 = vsel %vm4052_vm7, %v4856_v12, %v6608_v41  ;;  %3114 = vadd.xlane.f32.xlu0 %v1715_v33  ;;  %v6639_v58 = vpop.xlane.xlu1 %2746  ;;  %v1985_v41 = vunpack.c.l.bf16 %v1921_v29  ;;  %v1953_v33 = vld [vmem:[#allocation10 + $0x110] sm:$0xff]   ;;  %v2034_v37 = vunpack.c.l.bf16 %v1970_v3  ;;  %v2162_v4 = vunpack.c.h.bf16 %v1970_v3 }
 0x18e   :  { %v2713_v55 = vpop.xlane.xlu0 %2712  ;;  %v2145_v56 = vunpack.c.h.bf16 %v1953_v33  ;;  %v1429_v12 = vld [vmem:[#allocation9 + $0xb0] sm:$0xff]  }
 0x18f   :  { %v4072_v60 = vrot.slane %v2713_v55, %v6598_v43  ;;  %v2177_v28 = vadd.f32 %v2113_v34, %v1985_v41  ;;  %v1493_v0 = vunpack.c.l.bf16 %v1429_v12  ;;  %v1621_v57 = vunpack.c.h.bf16 %v1429_v12 }
 0x190   :  { %3174 = vadd.xlane.f32.xlu1 %v2225_v46  ;;  %v2226_v29 = vadd.f32 %v2162_v4, %v2034_v37  ;;  %v1954_v37 = vld [vmem:[#allocation10 + $0x118] sm:$0xff]  }
 0x191   :  { %v6643_v6 = vsel %vm4073_vm10, %v4072_v60, %v4067_v59  ;;  %3140 = vadd.xlane.f32.xlu0 %v2208_v50  ;;  %v2807_v27 = vpop.xlane.xlu1 %2806  ;;  %v1685_v41 = vadd.f32 %v1621_v57, %v1493_v0  ;;  %v1413_v0 = vld [vmem:[#allocation9 + $0x30] sm:$0xff]  }
 0x192   :  { %v2773_v18 = vpop.xlane.xlu0 %2772  ;;  %v4313_v24 = vrot.slane %v2807_v27, %v6554_v5 }
 0x193   :  { %v4229_v10 = vrot.slane %v2773_v18, %v6510_v36 }
 0x194   :  { %v6648_v59 = vsel %vm4066_vm9, %v4313_v24, %v4309_v40  ;;  %2860 = vadd.xlane.f32.xlu1 %v1684_v8  ;;  %v2017_v40 = vunpack.c.l.bf16 %v1953_v33  ;;  %v1939_v8 = vld [vmem:[#allocation10 + $0xa0] sm:$0xff]   ;;  %v1444_v24 = vld [vmem:[#allocation9 + $0x128] sm:$0xff]  }
 0x195   :  { %v6651_v38 = vsel %vm4059_vm8, %v4229_v10, %v4225_v63  ;;  %2826 = vadd.xlane.f32.xlu0 %v1667_v39  ;;  %v6653_v53 = vpop.xlane.xlu1 %3002  ;;  %v1412_v63 = vld [vmem:[#allocation9 + $0x28] sm:$0xff]   ;;  %v1922_v39 = vld [vmem:[#allocation10 + $0x18] sm:$0xff]   ;;  %v2003_v9 = vunpack.c.l.bf16 %v1939_v8  ;;  %v2131_v7 = vunpack.c.h.bf16 %v1939_v8  ;;  %v1508_v21 = vunpack.c.l.bf16 %v1444_v24 }
 0x196   :  { %v6655_v26 = vpop.xlane.xlu0 %2968  ;;  %v1476_v61 = vunpack.c.l.bf16 %v1412_v63  ;;  %v1604_v1 = vunpack.c.h.bf16 %v1412_v63  ;;  %v2209_v60 = vadd.f32 %v2145_v56, %v2017_v40  ;;  %v1986_v27 = vunpack.c.l.bf16 %v1922_v39 }
 0x197   :  { %v2114_v18 = vunpack.c.h.bf16 %v1922_v39  ;;  %v1636_v23 = vunpack.c.h.bf16 %v1444_v24  ;;  %v2018_v63 = vunpack.c.l.bf16 %v1954_v37  ;;  %v1605_v8 = vunpack.c.h.bf16 %v1413_v0 }
 0x198   :  { %2920 = vadd.xlane.f32.xlu1 %v2194_v2  ;;  %v1668_v34 = vadd.f32 %v1604_v1, %v1476_v61 }
 0x199   :  { %2886 = vadd.xlane.f32.xlu0 %v2177_v28  ;;  %v6657_v46 = vpop.xlane.xlu1 %3062  ;;  %v2195_v28 = vadd.f32 %v2131_v7, %v2003_v9  ;;  %v2178_v3 = vadd.f32 %v2114_v18, %v1986_v27  ;;  %v1700_v40 = vadd.f32 %v1636_v23, %v1508_v21  ;;  %v1940_v7 = vld [vmem:[#allocation10 + $0xa8] sm:$0xff]   ;;  %v1923_v27 = vld [vmem:[#allocation10 + $0x20] sm:$0xff]   ;;  %v1462_v23 = vld [vmem:[#allocation9 + $0x1b8] sm:$0xff]  }
 0x19a   :  { %v3029_v50 = vpop.xlane.xlu0 %3028  ;;  %v2004_v24 = vunpack.c.l.bf16 %v1940_v7  ;;  %v2115_v21 = vunpack.c.h.bf16 %v1923_v27 }
 0x19b   :  { %v4861_v16 = vrot.slane %v3029_v50, %v6510_v36  ;;  %v2146_v50 = vunpack.c.h.bf16 %v1954_v37  ;;  %v1526_v37 = vunpack.c.l.bf16 %v1462_v23 }
 0x19c   :  { %3116 = vadd.xlane.f32.xlu1 %v1716_v11 }
 0x19d   :  { %v6661_v55 = vsel %vm4059_vm8, %v4861_v16, %v4857_v54  ;;  %3082 = vadd.xlane.f32.xlu0 %v1699_v45  ;;  %v6663_v15 = vpop.xlane.xlu1 %2748  ;;  %v1461_v54 = vld [vmem:[#allocation9 + $0x1b0] sm:$0xff]   ;;  %v1971_v45 = vld [vmem:[#allocation10 + $0x1a0] sm:$0xff]   ;;  %v1430_v16 = vld [vmem:[#allocation9 + $0xb8] sm:$0xff]  }
 0x19e   :  { %v6665_v17 = vpop.xlane.xlu0 %2714  ;;  %v1525_v51 = vunpack.c.l.bf16 %v1461_v54  ;;  %v1653_v20 = vunpack.c.h.bf16 %v1461_v54  ;;  %v2035_v56 = vunpack.c.l.bf16 %v1971_v45  ;;  %v2163_v12 = vunpack.c.h.bf16 %v1971_v45 }
 0x19f   :  { %v1494_v1 = vunpack.c.l.bf16 %v1430_v16 }
 0x1a0   :  { %3176 = vadd.xlane.f32.xlu1 %v2226_v29  ;;  %v1717_v4 = vadd.f32 %v1653_v20, %v1525_v51  ;;  %v1622_v29 = vunpack.c.h.bf16 %v1430_v16  ;;  %v2227_v39 = vadd.f32 %v2163_v12, %v2035_v56  ;;  %v2132_v51 = vunpack.c.h.bf16 %v1940_v7 }
 0x1a1   :  { %3142 = vadd.xlane.f32.xlu0 %v2209_v60  ;;  %v6667_v10 = vpop.xlane.xlu1 %2808  ;;  %v1477_v60 = vunpack.c.l.bf16 %v1413_v0  ;;  %v1987_v20 = vunpack.c.l.bf16 %v1923_v27  ;;  %v1972_v0 = vld [vmem:[#allocation10 + $0x1a8] sm:$0xff]  }
 0x1a2   :  { %v6669_v2 = vpop.xlane.xlu0 %2774  ;;  %v1686_v18 = vadd.f32 %v1622_v29, %v1494_v1  ;;  %v2196_v12 = vadd.f32 %v2132_v51, %v2004_v24  ;;  %v1955_v1 = vld [vmem:[#allocation10 + $0x120] sm:$0xff]  }
 0x1a3   :  { %v1669_v54 = vadd.f32 %v1605_v8, %v1477_v60  ;;  %v1431_v8 = vld [vmem:[#allocation9 + $0xc0] sm:$0xff]   ;;  %v2019_v7 = vunpack.c.l.bf16 %v1955_v1  ;;  %v2147_v27 = vunpack.c.h.bf16 %v1955_v1 }
 0x1a4   :  { %2862 = vadd.xlane.f32.xlu1 %v1685_v41  ;;  %v2210_v41 = vadd.f32 %v2146_v50, %v2018_v63  ;;  %v2179_v63 = vadd.f32 %v2115_v21, %v1987_v20  ;;  %v4089_v20 = vadd.s32 4294967184, %v6236_v30  ;;  %v4096_v21 = vadd.s32 4294967176, %v6236_v30 }
 0x1a5   :  { %2828 = vadd.xlane.f32.xlu0 %v1668_v34  ;;  %v6671_v33 = vpop.xlane.xlu1 %3004 }
 0x1a6   :  { %v6673_v11 = vpop.xlane.xlu0 %2970 }
 0x1a8   :  { %2922 = vadd.xlane.f32.xlu1 %v2195_v28  ;;  %v1445_v28 = vld [vmem:[#allocation9 + $0x130] sm:$0xff]  }
 0x1a9   :  { %2888 = vadd.xlane.f32.xlu0 %v2178_v3  ;;  %v6675_v57 = vpop.xlane.xlu1 %3064  ;;  %v1637_v56 = vunpack.c.h.bf16 %v1445_v28 }
 0x1aa   :  { %v6677_v61 = vpop.xlane.xlu0 %3030 }
 0x1ac   :  { %3118 = vadd.xlane.f32.xlu1 %v1717_v4  ;;  %v1654_v4 = vunpack.c.h.bf16 %v1462_v23  ;;  %v1414_v23 = vld [vmem:[#allocation9 + $0x38] sm:$0xff]  }
 0x1ad   :  { %3084 = vadd.xlane.f32.xlu0 %v1700_v40  ;;  %v6679_v34 = vpop.xlane.xlu1 %2750  ;;  %v1509_v40 = vunpack.c.l.bf16 %v1445_v28  ;;  %v1495_v28 = vunpack.c.l.bf16 %v1431_v8 }
 0x1ae   :  { %v6681_v9 = vpop.xlane.xlu0 %2716  ;;  %v1718_v29 = vadd.f32 %v1654_v4, %v1526_v37  ;;  %v1623_v37 = vunpack.c.h.bf16 %v1431_v8  ;;  %v1478_v4 = vunpack.c.l.bf16 %v1414_v23  ;;  %v6708_v8 = vsub.s32 %v4089_v20, %v6238_v35 }
 0x1af   :  { %v1701_v60 = vadd.f32 %v1637_v56, %v1509_v40  ;;  %v1606_v40 = vunpack.c.h.bf16 %v1414_v23 }
 0x1b0   :  { %3178 = vadd.xlane.f32.xlu1 %v2227_v39  ;;  %v2036_v39 = vunpack.c.l.bf16 %v1972_v0 }
 0x1b1   :  { %3144 = vadd.xlane.f32.xlu0 %v2210_v41  ;;  %v6683_v3 = vpop.xlane.xlu1 %2810  ;;  %v2164_v41 = vunpack.c.h.bf16 %v1972_v0  ;;  %v1924_v0 = vld [vmem:[#allocation10 + $0x28] sm:$0xff]  }
 0x1b2   :  { %v6685_v45 = vpop.xlane.xlu0 %2776  ;;  %v1988_v23 = vunpack.c.l.bf16 %v1924_v0  ;;  %v2116_v49 = vunpack.c.h.bf16 %v1924_v0 }
 0x1b3   :  { %v2228_v56 = vadd.f32 %v2164_v41, %v2036_v39  ;;  %v1446_v39 = vld [vmem:[#allocation9 + $0x138] sm:$0xff]   ;;  %v1670_v41 = vadd.f32 %v1606_v40, %v1478_v4 }
 0x1b4   :  { %2864 = vadd.xlane.f32.xlu1 %v1686_v18  ;;  %v4075_v18 = vadd.s32 4294967200, %v6236_v30  ;;  %v1510_v4 = vunpack.c.l.bf16 %v1446_v39  ;;  %v1638_v40 = vunpack.c.h.bf16 %v1446_v39 }
 0x1b5   :  { %2830 = vadd.xlane.f32.xlu0 %v1669_v54  ;;  %v6687_v50 = vpop.xlane.xlu1 %3006  ;;  %v4082_v54 = vadd.s32 4294967192, %v6236_v30 }
 0x1b6   :  { %v6689_v16 = vpop.xlane.xlu0 %2972  ;;  %v6700_v1 = vsub.s32 %v4075_v18, %v6238_v35  ;;  %v4792_v18 = vrot.slane %v6624_v19, %v6598_v43 }
 0x1b7   :  { %v6705_v30 = vsub.s32 %v4082_v54, %v6238_v35  ;;  %v1527_v54 = vunpack.c.l.bf16 %v1463_v62  ;;  %v4175_v62 = vrot.slane %v6679_v34, %v6708_v8 }
 0x1b8   :  { %2924 = vadd.xlane.f32.xlu1 %v2196_v12  ;;  %v2211_v12 = vadd.f32 %v2147_v27, %v2019_v7  ;;  %v4165_v20 = vrot.slane %v6639_v58, %v6700_v1  ;;  %v4807_v58 = vrot.slane %v6687_v50, %v6708_v8 }
 0x1b9   :  { %2890 = vadd.xlane.f32.xlu0 %v2179_v63  ;;  %v6693_v24 = vpop.xlane.xlu1 %3066  ;;  %v1941_v63 = vld [vmem:[#allocation10 + $0xb0] sm:$0xff]   ;;  %v4170_v19 = vrot.slane %v6663_v15, %v6705_v30  ;;  %v2180_v15 = vadd.f32 %v2116_v49, %v1988_v23 }
 0x1ba   :  { %v6695_v51 = vpop.xlane.xlu0 %3032  ;;  %v2005_v7 = vunpack.c.l.bf16 %v1941_v63  ;;  %v2133_v27 = vunpack.c.h.bf16 %v1941_v63  ;;  %v4793_v63 = vsel %vm4073_vm10, %v4792_v18, %v6591_v32  ;;  %v4166_v39 = vsel %vm4080_vm11, %v4165_v20, %v6614_v25 }
 0x1bb   :  { %v4171_v32 = vsel %vm4087_vm12, %v4170_v19, %v4166_v39  ;;  %v1464_v39 = vld [vmem:[#allocation9 + $0x1c8] sm:$0xff]  }
 0x1bc   :  { %3120 = vadd.xlane.f32.xlu1 %v1718_v29  ;;  %v6711_v29 = vsub.s32 %v4096_v21, %v6238_v35  ;;  %v4797_v21 = vrot.slane %v6653_v53, %v6700_v1  ;;  %v2197_v53 = vadd.f32 %v2133_v27, %v2005_v7  ;;  %v1719_v7 = vadd.f32 %v1655_v31, %v1527_v54 }
 0x1bd   :  { %3086 = vadd.xlane.f32.xlu0 %v1701_v60  ;;  %v2753_v36 = vpop.xlane.xlu1 %2752  ;;  %v1687_v60 = vadd.f32 %v1623_v37, %v1495_v28  ;;  %v1702_v27 = vadd.f32 %v1638_v40, %v1510_v4  ;;  %v4176_v23 = vsel %vm4094_vm13, %v4175_v62, %v4171_v32  ;;  %v1496_v40 = vunpack.c.l.bf16 %v1432_v42 }
 0x1be   :  { %v6702_v52 = vpop.xlane.xlu0 %2718  ;;  %v4180_v0 = vrot.slane %v2753_v36, %v6711_v29  ;;  %v4798_v34 = vsel %vm4080_vm11, %v4797_v21, %v4793_v63  ;;  %v1942_v21 = vld [vmem:[#allocation10 + $0xb8] sm:$0xff]   ;;  %v1925_v63 = vld [vmem:[#allocation10 + $0x30] sm:$0xff]   ;;  %v1624_v62 = vunpack.c.h.bf16 %v1432_v42  ;;  %v4079_v42 = vrot.slane %v6665_v17, %v6700_v1 }
 0x1bf   :  { %v4093_v17 = vrot.slane %v6702_v52, %v6708_v8 }
 0x1c0   :  { %3180 = vadd.xlane.f32.xlu1 %v2228_v56  ;;  %v4802_v56 = vrot.slane %v6671_v33, %v6705_v30  ;;  %v1956_v33 = vld [vmem:[#allocation10 + $0x128] sm:$0xff]   ;;  %v4181_v31 = vsel %vm4101_vm14, %v4180_v0, %v4176_v23  ;;  %v1989_v0 = vunpack.c.l.bf16 %v1925_v63  ;;  %v1656_v23 = vunpack.c.h.bf16 %v1464_v39 }
 0x1c1   :  { %3146 = vadd.xlane.f32.xlu0 %v2211_v12  ;;  %v6719_v28 = vpop.xlane.xlu1 %2812  ;;  %v1973_v12 = vld [vmem:[#allocation10 + $0x1b0] sm:$0xff]   ;;  %v2020_v20 = vunpack.c.l.bf16 %v1956_v33  ;;  %v2148_v4 = vunpack.c.h.bf16 %v1956_v33  ;;  %v4713_v33 = vrot.slane %v6655_v26, %v6598_v43  ;;  %v4086_v26 = vrot.slane %v6681_v9, %v6705_v30 }
 0x1c2   :  { %v6721_v37 = vpop.xlane.xlu0 %2778  ;;  %v4803_v36 = vsel %vm4087_vm12, %v4802_v56, %v4798_v34  ;;  %v2037_v49 = vunpack.c.l.bf16 %v1973_v12  ;;  %v2165_v18 = vunpack.c.h.bf16 %v1973_v12  ;;  %v2117_v34 = vunpack.c.h.bf16 %v1925_v63 }
 0x1c3   :  { %v4808_v25 = vsel %vm4094_vm13, %v4807_v58, %v4803_v36  ;;  %v2212_v36 = vadd.f32 %v2148_v4, %v2020_v20  ;;  %v1688_v63 = vadd.f32 %v1624_v62, %v1496_v40  ;;  %v4714_v40 = vsel %vm4073_vm10, %v4713_v33, %v6629_v13 }
 0x1c4   :  { %2866 = vadd.xlane.f32.xlu1 %v1687_v60  ;;  %v2229_v32 = vadd.f32 %v2165_v18, %v2037_v49  ;;  %v1974_v18 = vld [vmem:[#allocation10 + $0x1b8] sm:$0xff]   ;;  %v2181_v20 = vadd.f32 %v2117_v34, %v1989_v0  ;;  %v1416_v34 = vld [vmem:[#allocation9 + $0x48] sm:$0xff]  }
 0x1c5   :  { %2832 = vadd.xlane.f32.xlu0 %v1670_v41  ;;  %v3009_v35 = vpop.xlane.xlu1 %3008  ;;  %v1415_v41 = vld [vmem:[#allocation9 + $0x40] sm:$0xff]  }
 0x1c6   :  { %v6737_v50 = vpop.xlane.xlu0 %2974  ;;  %v4812_v60 = vrot.slane %v3009_v35, %v6711_v29  ;;  %v1479_v58 = vunpack.c.l.bf16 %v1415_v41  ;;  %v1607_v12 = vunpack.c.h.bf16 %v1415_v41  ;;  %v4718_v41 = vrot.slane %v6673_v11, %v6700_v1 }
 0x1c7   :  { %v4728_v11 = vrot.slane %v6737_v50, %v6708_v8 }
 0x1c8   :  { %2926 = vadd.xlane.f32.xlu1 %v2197_v53  ;;  %v4813_v54 = vsel %vm4101_vm14, %v4812_v60, %v4808_v25  ;;  %v2006_v53 = vunpack.c.l.bf16 %v1942_v21  ;;  %v1528_v60 = vunpack.c.l.bf16 %v1464_v39  ;;  %v1447_v25 = vld [vmem:[#allocation9 + $0x140] sm:$0xff]   ;;  %v1671_v49 = vadd.f32 %v1607_v12, %v1479_v58  ;;  %v1433_v58 = vld [vmem:[#allocation9 + $0xd0] sm:$0xff]  }
 0x1c9   :  { %2892 = vadd.xlane.f32.xlu0 %v2180_v15  ;;  %v6746_v19 = vpop.xlane.xlu1 %3068  ;;  %v6751_v56 = vsel %vm5288_vm15, %v4813_v54, %v4181_v31  ;;  %v2134_v15 = vunpack.c.h.bf16 %v1942_v21  ;;  %v1957_v54 = vld [vmem:[#allocation10 + $0x130] sm:$0xff]   ;;  %v1511_v4 = vunpack.c.l.bf16 %v1447_v25  ;;  %v1639_v39 = vunpack.c.h.bf16 %v1447_v25 }
 0x1ca   :  { %v6748_v35 = vpop.xlane.xlu0 %3034  ;;  %5369 = vmatprep.mubr.f32.mxu0 %v6751_v56  ;;  %v6773_v9 = vadd.f32 %v1656_v23, %v1528_v60  ;;  %v4081_v12 = vsel %vm4080_vm11, %v4079_v42, %v6643_v6  ;;  %v4719_v52 = vsel %vm4080_vm11, %v4718_v41, %v4714_v40  ;;  %v2021_v0 = vunpack.c.l.bf16 %v1957_v54  ;;  %v1943_v60 = vld [vmem:[#allocation10 + $0xc0] sm:$0xff]  }
 0x1cb   :  { %v4088_v13 = vsel %vm4087_vm12, %v4086_v26, %v4081_v12  ;;  %v1497_v25 = vunpack.c.l.bf16 %v1433_v58  ;;  %v1625_v42 = vunpack.c.h.bf16 %v1433_v58  ;;  %v1608_v26 = vunpack.c.h.bf16 %v1416_v34  ;;  %v1926_v58 = vld [vmem:[#allocation10 + $0x38] sm:$0xff]  }
 0x1cc   :  { %3122 = vadd.xlane.f32.xlu1 %v1719_v7  ;;  %v4723_v7 = vrot.slane %v6689_v16, %v6705_v30  ;;  %v2038_v16 = vunpack.c.l.bf16 %v1974_v18  ;;  %v4095_v23 = vsel %vm4094_vm13, %v4093_v17, %v4088_v13  ;;  %v2135_v12 = vunpack.c.h.bf16 %v1943_v60 }
 0x1cd   :  { %3088 = vadd.xlane.f32.xlu0 %v1702_v27  ;;  %v6760_v31 = vpop.xlane.xlu1 %2780  ;;  %v2198_v27 = vadd.f32 %v2134_v15, %v2006_v53  ;;  %v2166_v15 = vunpack.c.h.bf16 %v1974_v18  ;;  %v1480_v18 = vunpack.c.l.bf16 %v1416_v34 }
 0x1ce   :  { %v2721_v21 = vpop.xlane.xlu0 %2720 }
 0x1cf   :  { %v4100_v62 = vrot.slane %v2721_v21, %v6711_v29  ;;  %v2230_v34 = vadd.f32 %v2166_v15, %v2038_v16 }
 0x1d0   :  { %3182 = vadd.xlane.f32.xlu1 %v2229_v32  ;;  %v4724_v32 = vsel %vm4087_vm12, %v4723_v7, %v4719_v52  ;;  %v4945_v7 = vrot.slane %v6657_v46, %v6554_v5  ;;  %v1703_v46 = vadd.f32 %v1639_v39, %v1511_v4  ;;  %v4866_v52 = vrot.slane %v6677_v61, %v6554_v5 }
 0x1d1   :  { %3148 = vadd.xlane.f32.xlu0 %v2212_v36  ;;  %v2977_v53 = vpop.xlane.xlu1 %2976  ;;  %v2149_v36 = vunpack.c.h.bf16 %v1957_v54  ;;  %v4729_v6 = vsel %vm4094_vm13, %v4728_v11, %v4724_v32  ;;  %v4102_v41 = vsel %vm4101_vm14, %v4100_v62, %v4095_v23  ;;  %v2007_v11 = vunpack.c.l.bf16 %v1943_v60 }
 0x1d2   :  { %v6778_v50 = vpop.xlane.xlu0 %2814  ;;  %v4733_v33 = vrot.slane %v2977_v53, %v6711_v29  ;;  %v4950_v62 = vrot.slane %v6675_v57, %v6598_v43  ;;  %v4323_v53 = vrot.slane %v6683_v3, %v6700_v1  ;;  %v1672_v32 = vadd.f32 %v1608_v26, %v1480_v18 }
 0x1d3   :  { %v2213_v13 = vadd.f32 %v2149_v36, %v2021_v0  ;;  %v4946_v57 = vsel %vm4066_vm9, %v4945_v7, %v6635_v22  ;;  %v4955_v4 = vrot.slane %v6693_v24, %v6700_v1  ;;  %v4328_v61 = vrot.slane %v6719_v28, %v6705_v30 }
 0x1d4   :  { %2868 = vadd.xlane.f32.xlu1 %v1688_v63  ;;  %v4734_v21 = vsel %vm4101_vm14, %v4733_v33, %v4729_v6  ;;  %v4318_v63 = vrot.slane %v6667_v10, %v6598_v43  ;;  %v4239_v10 = vrot.slane %v6685_v45, %v6598_v43  ;;  %v1990_v33 = vunpack.c.l.bf16 %v1926_v58 }
 0x1d5   :  { %2834 = vadd.xlane.f32.xlu0 %v1671_v49  ;;  %v3071_v40 = vpop.xlane.xlu1 %3070  ;;  %v6792_v17 = vsel %vm5288_vm15, %v4734_v21, %v4102_v41  ;;  %v4234_v49 = vrot.slane %v6669_v2, %v6554_v5  ;;  %v1689_v2 = vadd.f32 %v1625_v42, %v1497_v25  ;;  %v6813_v16 = vadd.f32 %v2135_v12, %v2007_v11 }
 0x1d6   :  { %v6789_v54 = vpop.xlane.xlu0 %3036  ;;  %5370 = vmatmul.mubr.f32.vlgmr.msra.gmra.mxu0 %v6792_v17  ;;  %v4319_v45 = vsel %vm4073_vm10, %v4318_v63, %v6648_v59  ;;  %v4960_v22 = vrot.slane %v6746_v19, %v6705_v30  ;;  %v4867_v24 = vsel %vm4066_vm9, %v4866_v52, %v6661_v55  ;;  %v4333_v15 = vrot.slane %v6778_v50, %v6708_v8 }
 0x1d7   :  { %v4324_v28 = vsel %vm4080_vm11, %v4323_v53, %v4319_v45  ;;  %v4965_v0 = vrot.slane %v3071_v40, %v6708_v8  ;;  %v2118_v19 = vunpack.c.h.bf16 %v1926_v58  ;;  %v4244_v50 = vrot.slane %v6721_v37, %v6700_v1  ;;  %v1465_v40 = vld [vmem:[#allocation9 + $0x1d0] sm:$0xff]   ;;  %v1975_v45 = vld [vmem:[#allocation10 + $0x1c0] sm:$0xff]  }
 0x1d8   :  { %2928 = vadd.xlane.f32.xlu1 %v2198_v27  ;;  %v4235_v27 = vsel %vm4066_vm9, %v4234_v49, %v6651_v38  ;;  %v4871_v38 = vrot.slane %v6695_v51, %v6598_v43  ;;  %v4329_v60 = vsel %vm4087_vm12, %v4328_v61, %v4324_v28  ;;  %v4876_v23 = vrot.slane %v6748_v35, %v6700_v1 }
 0x1d9   :  { %2894 = vadd.xlane.f32.xlu0 %v2181_v20  ;;  %v2817_v3 = vpop.xlane.xlu1 %2816  ;;  %v4951_v20 = vsel %vm4073_vm10, %v4950_v62, %v4946_v57  ;;  %v4240_v59 = vsel %vm4073_vm10, %v4239_v10, %v4235_v27  ;;  %v4249_v42 = vrot.slane %v6760_v31, %v6705_v30  ;;  %v4334_v37 = vsel %vm4094_vm13, %v4333_v15, %v4329_v60  ;;  %v1448_v62 = vld [vmem:[#allocation9 + $0x148] sm:$0xff]  }
 0x1da   :  { %v2783_v39 = vpop.xlane.xlu0 %2782  ;;  %v4338_v36 = vrot.slane %v2817_v3, %v6711_v29  ;;  %v4956_v55 = vsel %vm4080_vm11, %v4955_v4, %v4951_v20  ;;  %v4872_v26 = vsel %vm4073_vm10, %v4871_v38, %v4867_v24  ;;  %v2182_v49 = vadd.f32 %v2118_v19, %v1990_v33  ;;  %v1958_v24 = vld [vmem:[#allocation10 + $0x138] sm:$0xff]  }
 0x1db   :  { %v4961_v51 = vsel %vm4087_vm12, %v4960_v22, %v4956_v55  ;;  %v4254_v21 = vrot.slane %v2783_v39, %v6708_v8  ;;  %v4877_v11 = vsel %vm4080_vm11, %v4876_v23, %v4872_v26  ;;  %v1529_v57 = vunpack.c.l.bf16 %v1465_v40  ;;  %v1434_v55 = vld [vmem:[#allocation9 + $0xd8] sm:$0xff]   ;;  %v1417_v23 = vld [vmem:[#allocation9 + $0x50] sm:$0xff]  }
 0x1dc   :  { %3124 = vadd.xlane.f32.xlu1 %v6773_v9  ;;  %v4881_v9 = vrot.slane %v6789_v54, %v6705_v30  ;;  %v4966_v35 = vsel %vm4094_vm13, %v4965_v0, %v4961_v51  ;;  %v4339_v7 = vsel %vm4101_vm14, %v4338_v36, %v4334_v37  ;;  %v4245_v54 = vsel %vm4080_vm11, %v4244_v50, %v4240_v59  ;;  %v1944_v37 = vld [vmem:[#allocation10 + $0xc8] sm:$0xff]  }
 0x1dd   :  { %3090 = vadd.xlane.f32.xlu0 %v1703_v46  ;;  %v3073_v6 = vpop.xlane.xlu1 %3072  ;;  %v4250_v46 = vsel %vm4087_vm12, %v4249_v42, %v4245_v54  ;;  %v1657_v4 = vunpack.c.h.bf16 %v1465_v40  ;;  %v1512_v3 = vunpack.c.l.bf16 %v1448_v62  ;;  %v1640_v39 = vunpack.c.h.bf16 %v1448_v62 }
 0x1de   :  { %v3039_v25 = vpop.xlane.xlu0 %3038  ;;  %v4970_v41 = vrot.slane %v3073_v6, %v6711_v29  ;;  %v4882_v52 = vsel %vm4087_vm12, %v4881_v9, %v4877_v11  ;;  %v2167_v0 = vunpack.c.h.bf16 %v1975_v45  ;;  %v2022_v36 = vunpack.c.l.bf16 %v1958_v24 }
 0x1df   :  { %v4886_v18 = vrot.slane %v3039_v25, %v6708_v8  ;;  %v1704_v38 = vadd.f32 %v1640_v39, %v1512_v3  ;;  %v2150_v19 = vunpack.c.h.bf16 %v1958_v24  ;;  %v1498_v42 = vunpack.c.l.bf16 %v1434_v55 }
 0x1e0   :  { %3184 = vadd.xlane.f32.xlu1 %v2230_v34  ;;  %v4971_v31 = vsel %vm4101_vm14, %v4970_v41, %v4966_v35  ;;  %v1626_v9 = vunpack.c.h.bf16 %v1434_v55  ;;  %v2008_v11 = vunpack.c.l.bf16 %v1944_v37 }
 0x1e1   :  { %3150 = vadd.xlane.f32.xlu0 %v2213_v13  ;;  %v3041_v12 = vpop.xlane.xlu1 %3040  ;;  %v6855_v63 = vsel %vm5288_vm15, %v4971_v31, %v4339_v7  ;;  %v4255_v13 = vsel %vm4094_vm13, %v4254_v21, %v4250_v46  ;;  %v4887_v10 = vsel %vm4094_vm13, %v4886_v18, %v4882_v52  ;;  %v1481_v21 = vunpack.c.l.bf16 %v1417_v23  ;;  %v1927_v7 = vld [vmem:[#allocation10 + $0x40] sm:$0xff]  }
 0x1e2   :  { %v2785_v58 = vpop.xlane.xlu0 %2784  ;;  %v4891_v53 = vrot.slane %v3041_v12, %v6711_v29  ;;  %5440 = vmatprep.mubr.f32.mxu1 %v6855_v63  ;;  %v1609_v18 = vunpack.c.h.bf16 %v1417_v23  ;;  %v1690_v54 = vadd.f32 %v1626_v9, %v1498_v42  ;;  %v2136_v12 = vunpack.c.h.bf16 %v1944_v37  ;;  %v1435_v23 = vld [vmem:[#allocation9 + $0xe0] sm:$0xff]  }
 0x1e3   :  { %v4259_v34 = vrot.slane %v2785_v58, %v6711_v29  ;;  %v1466_v58 = vld [vmem:[#allocation9 + $0x1d8] sm:$0xff]   ;;  %v1991_v46 = vunpack.c.l.bf16 %v1927_v7  ;;  %v2119_v52 = vunpack.c.h.bf16 %v1927_v7  ;;  %v1627_v37 = vunpack.c.h.bf16 %v1435_v23 }
 0x1e4   :  { %2870 = vadd.xlane.f32.xlu1 %v1689_v2  ;;  %v4892_v61 = vsel %vm4101_vm14, %v4891_v53, %v4887_v10  ;;  %v1721_v2 = vadd.f32 %v1657_v4, %v1529_v57  ;;  %v1673_v62 = vadd.f32 %v1609_v18, %v1481_v21  ;;  %v1530_v57 = vunpack.c.l.bf16 %v1466_v58 }
 0x1e5   :  { %2836 = vadd.xlane.f32.xlu0 %v1672_v32  ;;  %v4260_v33 = vsel %vm4101_vm14, %v4259_v34, %v4255_v13  ;;  %v2853_v27 = vpop.xlane.xlu1 %2852  ;;  %v2039_v32 = vunpack.c.l.bf16 %v1975_v45  ;;  %v1449_v13 = vld [vmem:[#allocation9 + $0x150] sm:$0xff]   ;;  %v1658_v4 = vunpack.c.h.bf16 %v1466_v58  ;;  %v2183_v3 = vadd.f32 %v2119_v52, %v1991_v46 }
 0x1e6   :  { %v2851_v20 = vpop.xlane.xlu0 %2850  ;;  %v6867_v22 = vsel %vm5288_vm15, %v4892_v61, %v4260_v33  ;;  %v4426_v28 = vrot.slane %v2853_v27, %v6246_v48  ;;  %v2200_v33 = vadd.f32 %v2136_v12, %v2008_v11  ;;  %v1513_v39 = vunpack.c.l.bf16 %v1449_v13  ;;  %v1976_v27 = vld [vmem:[#allocation10 + $0x1c8] sm:$0xff]  }
 0x1e7   :  { %v4422_v15 = vrot.slane %v2851_v20, %v6243_v47  ;;  %5441 = vmatmul.mubr.f32.vlgmr.msra.gmra.mxu1 %v6867_v22  ;;  %v2231_v51 = vadd.f32 %v2167_v0, %v2039_v32  ;;  %v1641_v45 = vunpack.c.h.bf16 %v1449_v13  ;;  %v1959_v20 = vld [vmem:[#allocation10 + $0x140] sm:$0xff]   ;;  %v1722_v0 = vadd.f32 %v1658_v4, %v1530_v57 }
 0x1e8   :  { %2930 = vadd.xlane.f32.xlu1 %v6813_v16  ;;  %v2214_v16 = vadd.f32 %v2150_v19, %v2022_v36  ;;  %v2168_v36 = vunpack.c.h.bf16 %v1976_v27  ;;  %v2023_v19 = vunpack.c.l.bf16 %v1959_v20  ;;  %v1499_v18 = vunpack.c.l.bf16 %v1435_v23 }
 0x1e9   :  { %v4427_v59 = vsel %vm4003_vm0, %v4426_v28, %v4422_v15  ;;  %2896 = vadd.xlane.f32.xlu0 %v2182_v49  ;;  %v3109_v60 = vpop.xlane.xlu1 %3108 }
 0x1ea   :  { %v3107_v50 = vpop.xlane.xlu0 %3106  ;;  %v5058_v6 = vrot.slane %v3109_v60, %v6246_v48 }
 0x1eb   :  { %v5054_v25 = vrot.slane %v3107_v50, %v6243_v47  ;;  %v1705_v50 = vadd.f32 %v1641_v45, %v1513_v39 }
 0x1ec   :  { %3126 = vadd.xlane.f32.xlu1 %v1721_v2 }
 0x1ed   :  { %v5059_v41 = vsel %vm4003_vm0, %v5058_v6, %v5054_v25  ;;  %3092 = vadd.xlane.f32.xlu0 %v1704_v38  ;;  %v2821_v35 = vpop.xlane.xlu1 %2820  ;;  %v2040_v38 = vunpack.c.l.bf16 %v1976_v27 }
 0x1ee   :  { %v2819_v26 = vpop.xlane.xlu0 %2818  ;;  %v4347_v31 = vrot.slane %v2821_v35, %v6246_v48 }
 0x1ef   :  { %v4343_v40 = vrot.slane %v2819_v26, %v6243_v47 }
 0x1f0   :  { %3186 = vadd.xlane.f32.xlu1 %v2231_v51  ;;  %v1418_v51 = vld [vmem:[#allocation9 + $0x58] sm:$0xff]  }
 0x1f1   :  { %v4348_v49 = vsel %vm4003_vm0, %v4347_v31, %v4343_v40  ;;  %3152 = vadd.xlane.f32.xlu0 %v2214_v16  ;;  %v3075_v53 = vpop.xlane.xlu1 %3074  ;;  %v2232_v16 = vadd.f32 %v2168_v36, %v2040_v38  ;;  %v1482_v26 = vunpack.c.l.bf16 %v1418_v51  ;;  %v1610_v7 = vunpack.c.h.bf16 %v1418_v51  ;;  %v1945_v31 = vld [vmem:[#allocation10 + $0xd0] sm:$0xff]   ;;  %v1928_v40 = vld [vmem:[#allocation10 + $0x48] sm:$0xff]  }
 0x1f2   :  { %v2855_v34 = vpop.xlane.xlu0 %2854  ;;  %v4975_v15 = vrot.slane %v3075_v53, %v6243_v47  ;;  %v2137_v46 = vunpack.c.h.bf16 %v1945_v31  ;;  %v1992_v52 = vunpack.c.l.bf16 %v1928_v40  ;;  %v2120_v53 = vunpack.c.h.bf16 %v1928_v40 }
 0x1f3   :  { %v4431_v10 = vrot.slane %v2855_v34, %v6258_v14  ;;  %v1674_v13 = vadd.f32 %v1610_v7, %v1482_v26 }
 0x1f4   :  { %2872 = vadd.xlane.f32.xlu1 %v1690_v54  ;;  %v2184_v45 = vadd.f32 %v2120_v53, %v1992_v52  ;;  %v1929_v52 = vld [vmem:[#allocation10 + $0x50] sm:$0xff]  }
 0x1f5   :  { %v4432_v61 = vsel %vm4010_vm1, %v4431_v10, %v4427_v59  ;;  %2838 = vadd.xlane.f32.xlu0 %v1673_v62  ;;  %v3111_v24 = vpop.xlane.xlu1 %3110  ;;  %v2151_v59 = vunpack.c.h.bf16 %v1959_v20  ;;  %v2009_v62 = vunpack.c.l.bf16 %v1945_v31  ;;  %v1467_v10 = vld [vmem:[#allocation9 + $0x1e0] sm:$0xff]  }
 0x1f6   :  { %v3077_v28 = vpop.xlane.xlu0 %3076  ;;  %v5063_v2 = vrot.slane %v3111_v24, %v6258_v14  ;;  %v1531_v27 = vunpack.c.l.bf16 %v1467_v10  ;;  %v1659_v20 = vunpack.c.h.bf16 %v1467_v10 }
 0x1f7   :  { %v4979_v32 = vrot.slane %v3077_v28, %v6246_v48  ;;  %v2215_v21 = vadd.f32 %v2151_v59, %v2023_v19  ;;  %v2201_v39 = vadd.f32 %v2137_v46, %v2009_v62  ;;  %v1946_v46 = vld [vmem:[#allocation10 + $0xd8] sm:$0xff]  }
 0x1f8   :  { %v5064_v55 = vsel %vm4010_vm1, %v5063_v2, %v5059_v41  ;;  %2932 = vadd.xlane.f32.xlu1 %v2200_v33  ;;  %v1450_v33 = vld [vmem:[#allocation9 + $0x158] sm:$0xff]  }
 0x1f9   :  { %v4980_v60 = vsel %vm4003_vm0, %v4979_v32, %v4975_v15  ;;  %2898 = vadd.xlane.f32.xlu0 %v2183_v3  ;;  %v2857_v6 = vpop.xlane.xlu1 %2856  ;;  %v1514_v15 = vunpack.c.l.bf16 %v1450_v33  ;;  %v1642_v2 = vunpack.c.h.bf16 %v1450_v33  ;;  %v1977_v32 = vld [vmem:[#allocation10 + $0x1d0] sm:$0xff]   ;;  %v2121_v33 = vunpack.c.h.bf16 %v1929_v52 }
 0x1fa   :  { %v2823_v25 = vpop.xlane.xlu0 %2822  ;;  %v4436_v42 = vrot.slane %v2857_v6, %v6268_v44  ;;  %v2169_v23 = vunpack.c.h.bf16 %v1977_v32 }
 0x1fb   :  { %v4352_v9 = vrot.slane %v2823_v25, %v6258_v14  ;;  %v1706_v51 = vadd.f32 %v1642_v2, %v1514_v15 }
 0x1fc   :  { %v6890_v35 = vsel %vm4017_vm2, %v4436_v42, %v4432_v61  ;;  %3128 = vadd.xlane.f32.xlu1 %v1722_v0  ;;  %v1960_v0 = vld [vmem:[#allocation10 + $0x148] sm:$0xff]  }
 0x1fd   :  { %v6893_v41 = vsel %vm4010_vm1, %v4352_v9, %v4348_v49  ;;  %3094 = vadd.xlane.f32.xlu0 %v1705_v50  ;;  %v2917_v54 = vpop.xlane.xlu1 %2916  ;;  %v1691_v49 = vadd.f32 %v1627_v37, %v1499_v18  ;;  %v2041_v50 = vunpack.c.l.bf16 %v1977_v32  ;;  %v2024_v6 = vunpack.c.l.bf16 %v1960_v0  ;;  %v1436_v42 = vld [vmem:[#allocation9 + $0xe8] sm:$0xff]   ;;  %v7396_v18 = vld [vmem:[#allocation23_spill] sm:$0xff] }
 0x1fe   :  { %v2915_v11 = vpop.xlane.xlu0 %2914  ;;  %v4584_v12 = vrot.slane %v2917_v54, %v6246_v48  ;;  %v1500_v40 = vunpack.c.l.bf16 %v1436_v42  ;;  %v1628_v54 = vunpack.c.h.bf16 %v1436_v42  ;;  %v1961_v42 = vld [vmem:[#allocation10 + $0x150] sm:$0xff]  }
 0x1ff   :  { %v4580_v58 = vrot.slane %v2915_v11, %v6243_v47  ;;  %v2233_v7 = vadd.f32 %v2169_v23, %v2041_v50 }
 0x200   :  { %3188 = vadd.xlane.f32.xlu1 %v2232_v16 }
 0x201   :  { %v6898_v34 = vsel %vm4003_vm0, %v4584_v12, %v4580_v58  ;;  %3154 = vadd.xlane.f32.xlu0 %v2215_v21  ;;  %v3113_v57 = vpop.xlane.xlu1 %3112  ;;  %v1419_v21 = vld [vmem:[#allocation9 + $0x60] sm:$0xff]  }
 0x202   :  { %v3079_v4 = vpop.xlane.xlu0 %3078  ;;  %v5068_v61 = vrot.slane %v3113_v57, %v6268_v44  ;;  %v1483_v58 = vunpack.c.l.bf16 %v1419_v21  ;;  %v1611_v62 = vunpack.c.h.bf16 %v1419_v21  ;;  %v2010_v57 = vunpack.c.l.bf16 %v1946_v46 }
 0x203   :  { %v4984_v3 = vrot.slane %v3079_v4, %v6258_v14  ;;  %v2138_v4 = vunpack.c.h.bf16 %v1946_v46  ;;  %v3511_v46 = vld [vmem:[#allocation12 + $0x9a8] sm:$0xff] }
 0x204   :  { %v6903_v24 = vsel %vm4017_vm2, %v5068_v61, %v5064_v55  ;;  %2874 = vadd.xlane.f32.xlu1 %v1691_v49  ;;  %v2152_v55 = vunpack.c.h.bf16 %v1960_v0 }
 0x205   :  { %v6906_v28 = vsel %vm4010_vm1, %v4984_v3, %v4980_v60  ;;  %2840 = vadd.xlane.f32.xlu0 %v1674_v13  ;;  %v3173_v38 = vpop.xlane.xlu1 %3172  ;;  %v1723_v60 = vadd.f32 %v1659_v20, %v1531_v27  ;;  %v1675_v3 = vadd.f32 %v1611_v62, %v1483_v58  ;;  %v1451_v20 = vld [vmem:[#allocation9 + $0x160] sm:$0xff]   ;;  %v2202_v32 = vadd.f32 %v2138_v4, %v2010_v57  ;;  %v1437_v58 = vld [vmem:[#allocation9 + $0xf0] sm:$0xff]   ;;  %v1420_v62 = vld [vmem:[#allocation9 + $0x68] sm:$0xff]  }
 0x206   :  { %v3171_v36 = vpop.xlane.xlu0 %3170  ;;  %v5216_v19 = vrot.slane %v3173_v38, %v6246_v48  ;;  %v2216_v31 = vadd.f32 %v2152_v55, %v2024_v6  ;;  %v1515_v23 = vunpack.c.l.bf16 %v1451_v20  ;;  %v1643_v6 = vunpack.c.h.bf16 %v1451_v20  ;;  %v3519_v55 = vld [vmem:[#allocation12 + $0x9e8] sm:$0xff] }
 0x207   :  { %v5212_v59 = vrot.slane %v3171_v36, %v6243_v47  ;;  %5447 = vmatprep.subr.mxu0 %v3519_v55  ;;  %v3507_v4 = vld [vmem:[#allocation12 + $0x988] sm:$0xff] }
 0x208   :  { %2934 = vadd.xlane.f32.xlu1 %v2201_v39  ;;  %v1468_v39 = vld [vmem:[#allocation9 + $0x1e8] sm:$0xff]  }
 0x209   :  { %v6911_v25 = vsel %vm4003_vm0, %v5216_v19, %v5212_v59  ;;  %2900 = vadd.xlane.f32.xlu0 %v2184_v45  ;;  %v2859_v9 = vpop.xlane.xlu1 %2858  ;;  %v1532_v38 = vunpack.c.l.bf16 %v1468_v39  ;;  %v1660_v36 = vunpack.c.h.bf16 %v1468_v39  ;;  %v1978_v19 = vld [vmem:[#allocation10 + $0x1d8] sm:$0xff]   ;;  %v3506_v39 = vld [vmem:[#allocation12 + $0x980] sm:$0xff]  ;;  %v3503_v20 = vld [vmem:[#allocation12 + $0x968] sm:$0xff] }
 0x20a   :  { %v2825_v16 = vpop.xlane.xlu0 %2824  ;;  %v4441_v37 = vrot.slane %v2859_v9, %v7396_v18  ;;  %v3518_v9 = vld [vmem:[#allocation12 + $0x9e0] sm:$0xff]  ;;  %v2042_v21 = vunpack.c.l.bf16 %v1978_v19 }
 0x20b   :  { %v4357_v26 = vrot.slane %v2825_v16, %v6268_v44  ;;  %5448 = vmatpush1.msra.mxu0 %v3518_v9 }
 0x20c   :  { %v6917_v11 = vsel %vm4024_vm3, %v4441_v37, %v6890_v35  ;;  %3130 = vadd.xlane.f32.xlu1 %v1723_v60  ;;  %v1993_v35 = vunpack.c.l.bf16 %v1929_v52  ;;  %v2170_v37 = vunpack.c.h.bf16 %v1978_v19  ;;  %v3502_v19 = vld [vmem:[#allocation12 + $0x960] sm:$0xff] }
 0x20d   :  { %v6921_v12 = vsel %vm4017_vm2, %v4357_v26, %v6893_v41  ;;  %3096 = vadd.xlane.f32.xlu0 %v1706_v51  ;;  %v2885_v53 = vpop.xlane.xlu1 %2884  ;;  %v1692_v41 = vadd.f32 %v1628_v54, %v1500_v40  ;;  %v1724_v26 = vadd.f32 %v1660_v36, %v1532_v38  ;;  %v2025_v40 = vunpack.c.l.bf16 %v1961_v42 }
 0x20e   :  { %v2883_v49 = vpop.xlane.xlu0 %2882  ;;  %v4505_v13 = vrot.slane %v2885_v53, %v6246_v48  ;;  %v2185_v0 = vadd.f32 %v2121_v33, %v1993_v35  ;;  %v2153_v54 = vunpack.c.h.bf16 %v1961_v42  ;;  %v1501_v35 = vunpack.c.l.bf16 %v1437_v58 }
 0x20f   :  { %v4501_v10 = vrot.slane %v2883_v49, %v6243_v47  ;;  %v3510_v49 = vld [vmem:[#allocation12 + $0x9a0] sm:$0xff]  ;;  %v1629_v33 = vunpack.c.h.bf16 %v1437_v58 }
 0x210   :  { %3190 = vadd.xlane.f32.xlu1 %v2233_v7 }
 0x211   :  { %v6926_v61 = vsel %vm4003_vm0, %v4505_v13, %v4501_v10  ;;  %3156 = vadd.xlane.f32.xlu0 %v2216_v31  ;;  %v3081_v45 = vpop.xlane.xlu1 %3080  ;;  %v1707_v31 = vadd.f32 %v1643_v6, %v1515_v23 }
 0x212   :  { %v2919_v27 = vpop.xlane.xlu0 %2918  ;;  %v4989_v15 = vrot.slane %v3081_v45, %v6268_v44 }
 0x213   :  { %v4589_v2 = vrot.slane %v2919_v27, %v6258_v14 }
 0x214   :  { %v6932_v59 = vsel %vm4017_vm2, %v4989_v15, %v6906_v28  ;;  %2876 = vadd.xlane.f32.xlu1 %v1692_v41  ;;  %v3515_v28 = vld [vmem:[#allocation12 + $0x9c8] sm:$0xff]  ;;  %v1484_v41 = vunpack.c.l.bf16 %v1420_v62 }
 0x215   :  { %v6936_v50 = vsel %vm4010_vm1, %v4589_v2, %v6898_v34  ;;  %2842 = vadd.xlane.f32.xlu0 %v1675_v3  ;;  %v3139_v60 = vpop.xlane.xlu1 %3138  ;;  %5449 = vmatprep.subr.mxu0 %v3515_v28  ;;  %v3514_v34 = vld [vmem:[#allocation12 + $0x9c0] sm:$0xff]  ;;  %v1612_v3 = vunpack.c.h.bf16 %v1420_v62 }
 0x216   :  { %v3115_v51 = vpop.xlane.xlu0 %3114  ;;  %5450 = vmatpush1.msra.mxu0 %v3514_v34  ;;  %v5133_v13 = vrot.slane %v3139_v60, %v6243_v47  ;;  %v2217_v47 = vadd.f32 %v2153_v54, %v2025_v40  ;;  %v3499_v60 = vld [vmem:[#allocation12 + $0x948] sm:$0xff]  ;;  %v3498_v28 = vld [vmem:[#allocation12 + $0x940] sm:$0xff] }
 0x217   :  { %v5073_v16 = vrot.slane %v3115_v51, %v7396_v18  ;;  %5451 = vmatprep.subr.mxu0 %v3511_v46  ;;  %v1676_v23 = vadd.f32 %v1612_v3, %v1484_v41  ;;  %v3643_v41 = vld [vmem:[#allocation12 + $0xdc8] sm:$0xff] }
 0x218   :  { %2936 = vadd.xlane.f32.xlu1 %v2202_v32  ;;  %5452 = vmatpush1.msra.mxu0 %v3510_v49  ;;  %v1930_v32 = vld [vmem:[#allocation10 + $0x58] sm:$0xff]   ;;  %v3647_v49 = vld [vmem:[#allocation12 + $0xde8] sm:$0xff] }
 0x219   :  { %v6941_v7 = vsel %vm4024_vm3, %v5073_v16, %v6903_v24  ;;  %2902 = vadd.xlane.f32.xlu0 %v2185_v0  ;;  %v3175_v52 = vpop.xlane.xlu1 %3174  ;;  %v2234_v24 = vadd.f32 %v2170_v37, %v2042_v21  ;;  %5453 = vmatprep.subr.mxu0 %v3507_v4  ;;  %v7397_v0 = vld [vmem:[#allocation24_spill] sm:$0xff]  ;;  %v1994_v9 = vunpack.c.l.bf16 %v1930_v32  ;;  %v2122_v16 = vunpack.c.h.bf16 %v1930_v32  ;;  %v1469_v21 = vld [vmem:[#allocation9 + $0x1f0] sm:$0xff]   ;;  %v1452_v37 = vld [vmem:[#allocation9 + $0x168] sm:$0xff]  }
 0x21a   :  { %v3141_v53 = vpop.xlane.xlu0 %3140  ;;  %v5221_v10 = vrot.slane %v3175_v52, %v6258_v14  ;;  %5454 = vmatpush1.msra.mxu0 %v3506_v39  ;;  %v1661_v40 = vunpack.c.h.bf16 %v1469_v21  ;;  %v1516_v54 = vunpack.c.l.bf16 %v1452_v37  ;;  %v1644_v58 = vunpack.c.h.bf16 %v1452_v37  ;;  %v1979_v52 = vld [vmem:[#allocation10 + $0x1e0] sm:$0xff]   ;;  %5518 = vmatprep.subr.mxu1 %v3647_v49  ;;  %v3631_v49 = vld [vmem:[#allocation12 + $0xd68] sm:$0xff] }
 0x21b   :  { %v5137_v57 = vrot.slane %v3141_v53, %v6246_v48  ;;  %v1947_v48 = vld [vmem:[#allocation10 + $0xe0] sm:$0xff]   ;;  %5455 = vmatprep.subr.mxu0 %v3503_v20  ;;  %v2186_v46 = vadd.f32 %v2122_v16, %v1994_v9  ;;  %v3491_v53 = vld [vmem:[#allocation12 + $0x908] sm:$0xff]  ;;  %v1438_v20 = vld [vmem:[#allocation9 + $0xf8] sm:$0xff]  }
 0x21c   :  { %v6948_v45 = vsel %vm4010_vm1, %v5221_v10, %v6911_v25  ;;  %3132 = vadd.xlane.f32.xlu1 %v1724_v26  ;;  %v1693_v25 = vadd.f32 %v1629_v33, %v1501_v35  ;;  %v2011_v6 = vunpack.c.l.bf16 %v1947_v48  ;;  %v2139_v55 = vunpack.c.h.bf16 %v1947_v48  ;;  %5456 = vmatpush1.msra.mxu0 %v3502_v19  ;;  %v3490_v33 = vld [vmem:[#allocation12 + $0x900] sm:$0xff] }
 0x21d   :  { %v6951_v27 = vsel %vm4003_vm0, %v5137_v57, %v5133_v13  ;;  %3098 = vadd.xlane.f32.xlu0 %v1707_v31  ;;  %v2861_v15 = vpop.xlane.xlu1 %2860  ;;  %5457 = vmatprep.subr.mxu0 %v3499_v60  ;;  %v3495_v31 = vld [vmem:[#allocation12 + $0x928] sm:$0xff]  ;;  %v1962_v57 = vld [vmem:[#allocation10 + $0x158] sm:$0xff]   ;;  %v1708_v39 = vadd.f32 %v1644_v58, %v1516_v54  ;;  %v2171_v48 = vunpack.c.h.bf16 %v1979_v52  ;;  %v3638_v9 = vld [vmem:[#allocation12 + $0xda0] sm:$0xff]  ;;  %v1630_v37 = vunpack.c.h.bf16 %v1438_v20 }
 0x21e   :  { %v2827_v2 = vpop.xlane.xlu0 %2826  ;;  %v4446_v38 = vrot.slane %v2861_v15, %v7397_v0  ;;  %5458 = vmatpush1.msra.mxu0 %v3498_v28  ;;  %v2203_v62 = vadd.f32 %v2139_v55, %v2011_v6  ;;  %v3487_v15 = vld [vmem:[#allocation12 + $0x8e8] sm:$0xff]  ;;  %v2154_v19 = vunpack.c.h.bf16 %v1962_v57  ;;  %v3482_v58 = vld [vmem:[#allocation12 + $0x8c0] sm:$0xff]  ;;  %vm5903_vm0 = vcmask 1041408  }
 0x21f   :  { %v4362_v36 = vrot.slane %v2827_v2, %v7396_v18  ;;  %5459 = vmatprep.subr.mxu0 %v3495_v31  ;;  %v3642_v2 = vld [vmem:[#allocation12 + $0xdc0] sm:$0xff]  ;;  %v3639_v6 = vld [vmem:[#allocation12 + $0xda8] sm:$0xff] }
 0x220   :  { %v6957_v51 = vsel %vm4031_vm4, %v4446_v38, %v6917_v11  ;;  %3192 = vadd.xlane.f32.xlu1 %v2234_v24  ;;  %v1533_v11 = vunpack.c.l.bf16 %v1469_v21  ;;  %v3646_v24 = vld [vmem:[#allocation12 + $0xde0] sm:$0xff]  ;;  %v1502_v21 = vunpack.c.l.bf16 %v1438_v20  ;;  %v3483_v28 = vld [vmem:[#allocation12 + $0x8c8] sm:$0xff]  ;;  %v1470_v20 = vld [vmem:[#allocation9 + $0x1f8] sm:$0xff]  }
 0x221   :  { %v6961_v42 = vsel %vm4024_vm3, %v4362_v36, %v6921_v12  ;;  %3158 = vadd.xlane.f32.xlu0 %v2217_v47  ;;  %v6963_v26 = vpop.xlane.xlu1 %2920  ;;  %v3494_v12 = vld [vmem:[#allocation12 + $0x920] sm:$0xff]  ;;  %5519 = vmatpush1.msra.mxu1 %v3646_v24  ;;  %v2043_v47 = vunpack.c.l.bf16 %v1979_v52  ;;  %v2026_v36 = vunpack.c.l.bf16 %v1962_v57  ;;  %v3635_v31 = vld [vmem:[#allocation12 + $0xd88] sm:$0xff] }
 0x222   :  { %v6965_v34 = vpop.xlane.xlu0 %2886  ;;  %5460 = vmatpush1.msra.mxu0 %v3494_v12  ;;  %v1725_v3 = vadd.f32 %v1661_v40, %v1533_v11  ;;  %5520 = vmatprep.subr.mxu1 %v3643_v41  ;;  %v3634_v12 = vld [vmem:[#allocation12 + $0xd80] sm:$0xff]  ;;  %v1694_v41 = vadd.f32 %v1630_v37, %v1502_v21  ;;  %v3623_v21 = vld [vmem:[#allocation12 + $0xd28] sm:$0xff] }
 0x223   :  { %5461 = vmatprep.subr.mxu0 %v3491_v53  ;;  %5521 = vmatpush1.msra.mxu1 %v3642_v2  ;;  %v2235_v11 = vadd.f32 %v2171_v48, %v2043_v47  ;;  %v2218_v52 = vadd.f32 %v2154_v19, %v2026_v36  ;;  %v3479_v53 = vld [vmem:[#allocation12 + $0x8a8] sm:$0xff]  ;;  %v4510_v47 = vrot.slane %v6965_v34, %v6258_v14  ;;  %v3626_v34 = vld [vmem:[#allocation12 + $0xd40] sm:$0xff] }
 0x224   :  { %2878 = vadd.xlane.f32.xlu1 %v1693_v25  ;;  %v1421_v25 = vld [vmem:[#allocation9 + $0x70] sm:$0xff]   ;;  %5462 = vmatpush1.msra.mxu0 %v3490_v33  ;;  %v3627_v2 = vld [vmem:[#allocation12 + $0xd48] sm:$0xff] }
 0x225   :  { %2844 = vadd.xlane.f32.xlu0 %v1676_v23  ;;  %v3117_v13 = vpop.xlane.xlu1 %3116  ;;  %v3486_v23 = vld [vmem:[#allocation12 + $0x8e0] sm:$0xff]  ;;  %5463 = vmatprep.subr.mxu0 %v3487_v15  ;;  %v1485_v40 = vunpack.c.l.bf16 %v1421_v25  ;;  %v1613_v54 = vunpack.c.h.bf16 %v1421_v25  ;;  %v3475_v15 = vld [vmem:[#allocation12 + $0x888] sm:$0xff] }
 0x226   :  { %v3083_v10 = vpop.xlane.xlu0 %3082  ;;  %v5078_v4 = vrot.slane %v3117_v13, %v7397_v0  ;;  %5522 = vmatprep.subr.mxu1 %v3639_v6  ;;  %5464 = vmatpush1.msra.mxu0 %v3486_v23  ;;  %v1453_v23 = vld [vmem:[#allocation9 + $0x170] sm:$0xff]  }
 0x227   :  { %v4994_v35 = vrot.slane %v3083_v10, %v7396_v18  ;;  %5523 = vmatpush1.msra.mxu1 %v3638_v9  ;;  %5465 = vmatprep.subr.mxu0 %v3483_v28  ;;  %v1677_v48 = vadd.f32 %v1613_v54, %v1485_v40  ;;  %v1517_v28 = vunpack.c.l.bf16 %v1453_v23  ;;  %v3470_v40 = vld [vmem:[#allocation12 + $0x860] sm:$0xff] }
 0x228   :  { %v6971_v32 = vsel %vm4031_vm4, %v5078_v4, %v6941_v7  ;;  %2938 = vadd.xlane.f32.xlu1 %v2203_v62  ;;  %v1931_v4 = vld [vmem:[#allocation10 + $0x60] sm:$0xff]   ;;  %5524 = vmatprep.subr.mxu1 %v3635_v31  ;;  %v1645_v31 = vunpack.c.h.bf16 %v1453_v23 }
 0x229   :  { %v6975_v38 = vsel %vm4024_vm3, %v4994_v35, %v6932_v59  ;;  %2904 = vadd.xlane.f32.xlu0 %v2186_v46  ;;  %v3177_v55 = vpop.xlane.xlu1 %3176  ;;  %v1948_v59 = vld [vmem:[#allocation10 + $0xe8] sm:$0xff]   ;;  %5466 = vmatpush1.msra.mxu0 %v3482_v58  ;;  %v2123_v25 = vunpack.c.h.bf16 %v1931_v4  ;;  %v3622_v54 = vld [vmem:[#allocation12 + $0xd20] sm:$0xff] }
 0x22a   :  { %v3143_v60 = vpop.xlane.xlu0 %3142  ;;  %v5226_v16 = vrot.slane %v3177_v55, %v6268_v44  ;;  %v2012_v57 = vunpack.c.l.bf16 %v1948_v59  ;;  %v2140_v24 = vunpack.c.h.bf16 %v1948_v59  ;;  %v7398_v35 = vld [vmem:[#allocation25_spill] sm:$0xff]  ;;  %5525 = vmatpush1.msra.mxu1 %v3634_v12  ;;  %5467 = vmatprep.subr.mxu0 %v3479_v53  ;;  %v4511_v59 = vsel %vm4010_vm1, %v4510_v47, %v6926_v61 }
 0x22b   :  { %v5142_v7 = vrot.slane %v3143_v60, %v6258_v14  ;;  %5526 = vmatprep.subr.mxu1 %v3631_v49  ;;  %v3474_v14 = vld [vmem:[#allocation12 + $0x880] sm:$0xff]  ;;  %v3619_v53 = vld [vmem:[#allocation12 + $0xd08] sm:$0xff] }
 0x22c   :  { %v6981_v62 = vsel %vm4017_vm2, %v5226_v16, %v6948_v45  ;;  %3134 = vadd.xlane.f32.xlu1 %v1725_v3  ;;  %v3630_v3 = vld [vmem:[#allocation12 + $0xd60] sm:$0xff]  ;;  %v2204_v60 = vadd.f32 %v2140_v24, %v2012_v57  ;;  %v1534_v16 = vunpack.c.l.bf16 %v1470_v20  ;;  %v3615_v47 = vld [vmem:[#allocation12 + $0xce8] sm:$0xff] }
 0x22d   :  { %v6985_v46 = vsel %vm4010_vm1, %v5142_v7, %v6951_v27  ;;  %3100 = vadd.xlane.f32.xlu0 %v1708_v39  ;;  %v2863_v13 = vpop.xlane.xlu1 %2862  ;;  %v3478_v27 = vld [vmem:[#allocation12 + $0x8a0] sm:$0xff]  ;;  %v4594_v39 = vrot.slane %v6963_v26, %v6268_v44  ;;  %v1995_v26 = vunpack.c.l.bf16 %v1931_v4  ;;  %5527 = vmatpush1.msra.mxu1 %v3630_v3  ;;  %v1662_v7 = vunpack.c.h.bf16 %v1470_v20  ;;  %v1932_v3 = vld [vmem:[#allocation10 + $0x68] sm:$0xff]  }
 0x22e   :  { %v2829_v10 = vpop.xlane.xlu0 %2828  ;;  %v4451_v33 = vrot.slane %v2863_v13, %v7398_v35  ;;  %5468 = vmatpush1.msra.mxu0 %v3478_v27  ;;  %5528 = vmatprep.subr.mxu1 %v3627_v2  ;;  %v1963_v13 = vld [vmem:[#allocation10 + $0x160] sm:$0xff]   ;;  %v1709_v27 = vadd.f32 %v1645_v31, %v1517_v28  ;;  %v3583_v31 = vld [vmem:[#allocation12 + $0xbe8] sm:$0xff] }
 0x22f   :  { %v4367_v45 = vrot.slane %v2829_v10, %v7397_v0  ;;  %5469 = vmatprep.subr.mxu0 %v3475_v15  ;;  %v4595_v37 = vsel %vm4017_vm2, %v4594_v39, %v6936_v50  ;;  %5529 = vmatpush1.msra.mxu1 %v3626_v34  ;;  %v3467_v50 = vld [vmem:[#allocation12 + $0x848] sm:$0xff]  ;;  %v2027_v15 = vunpack.c.l.bf16 %v1963_v13  ;;  %v2155_v2 = vunpack.c.h.bf16 %v1963_v13  ;;  %v3614_v23 = vld [vmem:[#allocation12 + $0xce0] sm:$0xff] }
 0x230   :  { %v6995_v36 = vsel %vm4038_vm5, %v4451_v33, %v6957_v51  ;;  %3194 = vadd.xlane.f32.xlu1 %v2235_v11  ;;  %v1980_v11 = vld [vmem:[#allocation10 + $0x1e8] sm:$0xff]   ;;  %5470 = vmatpush1.msra.mxu0 %v3474_v14  ;;  %v3466_v33 = vld [vmem:[#allocation12 + $0x840] sm:$0xff] }
 0x231   :  { %v6999_v19 = vsel %vm4031_vm4, %v4367_v45, %v6961_v42  ;;  %3160 = vadd.xlane.f32.xlu0 %v2218_v52  ;;  %v2923_v6 = vpop.xlane.xlu1 %2922  ;;  %v3471_v42 = vld [vmem:[#allocation12 + $0x868] sm:$0xff]  ;;  %v2187_v52 = vadd.f32 %v2123_v25, %v1995_v26  ;;  %5530 = vmatprep.subr.mxu1 %v3623_v21  ;;  %v2044_v24 = vunpack.c.l.bf16 %v1980_v11  ;;  %v2172_v4 = vunpack.c.h.bf16 %v1980_v11  ;;  %v3618_v45 = vld [vmem:[#allocation12 + $0xd00] sm:$0xff]  ;;  %v1422_v26 = vld [vmem:[#allocation9 + $0x78] sm:$0xff]  }
 0x232   :  { %v2889_v55 = vpop.xlane.xlu0 %2888  ;;  %v4599_v9 = vrot.slane %v2923_v6, %v7396_v18  ;;  %5471 = vmatprep.subr.mxu0 %v3471_v42  ;;  %5531 = vmatpush1.msra.mxu1 %v3622_v54  ;;  %v3463_v39 = vld [vmem:[#allocation12 + $0x828] sm:$0xff]  ;;  %v3462_v25 = vld [vmem:[#allocation12 + $0x820] sm:$0xff]  ;;  %v1454_v42 = vld [vmem:[#allocation9 + $0x178] sm:$0xff]   ;;  %v2219_v28 = vadd.f32 %v2155_v2, %v2027_v15 }
 0x233   :  { %v4515_v51 = vrot.slane %v2889_v55, %v6268_v44  ;;  %5472 = vmatpush1.msra.mxu0 %v3470_v40  ;;  %5532 = vmatprep.subr.mxu1 %v3619_v53  ;;  %v2236_v55 = vadd.f32 %v2172_v4, %v2044_v24  ;;  %v3458_v21 = vld [vmem:[#allocation12 + $0x800] sm:$0xff]  ;;  %v3607_v11 = vld [vmem:[#allocation12 + $0xca8] sm:$0xff]  ;;  %v1981_v24 = vld [vmem:[#allocation10 + $0x1f0] sm:$0xff]  }
 0x234   :  { %v7008_v58 = vsel %vm4024_vm3, %v4599_v9, %v4595_v37  ;;  %2880 = vadd.xlane.f32.xlu1 %v1694_v41  ;;  %v1726_v41 = vadd.f32 %v1662_v7, %v1534_v16  ;;  %5473 = vmatprep.subr.mxu0 %v3467_v50  ;;  %v3459_v9 = vld [vmem:[#allocation12 + $0x808] sm:$0xff]  ;;  %v1486_v16 = vunpack.c.l.bf16 %v1422_v26  ;;  %v1614_v7 = vunpack.c.h.bf16 %v1422_v26  ;;  %v3610_v37 = vld [vmem:[#allocation12 + $0xcc0] sm:$0xff] }
 0x235   :  { %v7011_v12 = vsel %vm4017_vm2, %v4515_v51, %v4511_v59  ;;  %2846 = vadd.xlane.f32.xlu0 %v1677_v48  ;;  %v3119_v49 = vpop.xlane.xlu1 %3118  ;;  %5474 = vmatpush1.msra.mxu0 %v3466_v33  ;;  %v2124_v51 = vunpack.c.h.bf16 %v1932_v3  ;;  %v7399_v50 = vld [vmem:[#allocation26_spill] sm:$0xff]  ;;  %v3582_v13 = vld [vmem:[#allocation12 + $0xbe0] sm:$0xff] }
 0x236   :  { %v3085_v61 = vpop.xlane.xlu0 %3084  ;;  %v5083_v10 = vrot.slane %v3119_v49, %v7398_v35  ;;  %5533 = vmatpush1.msra.mxu1 %v3618_v45  ;;  %5475 = vmatprep.subr.mxu0 %v3463_v39  ;;  %v3579_v4 = vld [vmem:[#allocation12 + $0xbc8] sm:$0xff]  ;;  %v3602_v15 = vld [vmem:[#allocation12 + $0xc80] sm:$0xff] }
 0x237   :  { %v4999_v57 = vrot.slane %v3085_v61, %v7397_v0  ;;  %5534 = vmatprep.subr.mxu1 %v3615_v47  ;;  %5476 = vmatpush1.msra.mxu0 %v3462_v25  ;;  %v1646_v61 = vunpack.c.h.bf16 %v1454_v42  ;;  %v3603_v33 = vld [vmem:[#allocation12 + $0xc88] sm:$0xff]  ;;  %v3578_v47 = vld [vmem:[#allocation12 + $0xbc0] sm:$0xff] }
 0x238   :  { %v7017_v48 = vsel %vm4038_vm5, %v5083_v10, %v6971_v32  ;;  %2940 = vadd.xlane.f32.xlu1 %v2204_v60  ;;  %v1996_v60 = vunpack.c.l.bf16 %v1932_v3  ;;  %5535 = vmatpush1.msra.mxu1 %v3614_v23  ;;  %v1964_v39 = vld [vmem:[#allocation10 + $0x168] sm:$0xff]  }
 0x239   :  { %v7021_v20 = vsel %vm4031_vm4, %v4999_v57, %v6975_v38  ;;  %2906 = vadd.xlane.f32.xlu0 %v2187_v52  ;;  %v3179_v14 = vpop.xlane.xlu1 %3178  ;;  %v3611_v38 = vld [vmem:[#allocation12 + $0xcc8] sm:$0xff]  ;;  %v1949_v52 = vld [vmem:[#allocation10 + $0xf0] sm:$0xff]   ;;  %5477 = vmatprep.subr.mxu0 %v3459_v9  ;;  %v1678_v57 = vadd.f32 %v1614_v7, %v1486_v16  ;;  %v1950_v9 = vld [vmem:[#allocation10 + $0xf8] sm:$0xff]  }
 0x23a   :  { %v3145_v34 = vpop.xlane.xlu0 %3144  ;;  %v5231_v6 = vrot.slane %v3179_v14, %v7396_v18  ;;  %5536 = vmatprep.subr.mxu1 %v3611_v38  ;;  %5478 = vmatpush1.msra.mxu0 %v3458_v21  ;;  %v2188_v10 = vadd.f32 %v2124_v51, %v1996_v60  ;;  %v2141_v3 = vunpack.c.h.bf16 %v1949_v52  ;;  %v3575_v14 = vld [vmem:[#allocation12 + $0xba8] sm:$0xff]  ;;  %v3574_v38 = vld [vmem:[#allocation12 + $0xba0] sm:$0xff] }
 0x23b   :  { %v5147_v32 = vrot.slane %v3145_v34, %v6268_v44  ;;  %5537 = vmatpush1.msra.mxu1 %v3610_v37  ;;  %5479 = vmatprep.subr.mxu0 %v3583_v31  ;;  %v2045_v34 = vunpack.c.l.bf16 %v1981_v24  ;;  %v3598_v60 = vld [vmem:[#allocation12 + $0xc60] sm:$0xff]  ;;  %v3595_v21 = vld [vmem:[#allocation12 + $0xc48] sm:$0xff]  ;;  %v1933_v31 = vld [vmem:[#allocation10 + $0x70] sm:$0xff]  }
 0x23c   :  { %v7027_v59 = vsel %vm4024_vm3, %v5231_v6, %v6981_v62  ;;  %3136 = vadd.xlane.f32.xlu1 %v1726_v41  ;;  %v1518_v62 = vunpack.c.l.bf16 %v1454_v42  ;;  %5538 = vmatprep.subr.mxu1 %v3607_v11  ;;  %v2173_v6 = vunpack.c.h.bf16 %v1981_v24  ;;  %v3571_v42 = vld [vmem:[#allocation12 + $0xb88] sm:$0xff]  ;;  %v2125_v24 = vunpack.c.h.bf16 %v1933_v31 }
 0x23d   :  { %v7031_v44 = vsel %vm4017_vm2, %v5147_v32, %v6985_v46  ;;  %3102 = vadd.xlane.f32.xlu0 %v1709_v27  ;;  %v2865_v40 = vpop.xlane.xlu1 %2864  ;;  %v3606_v46 = vld [vmem:[#allocation12 + $0xca0] sm:$0xff]  ;;  %v2013_v27 = vunpack.c.l.bf16 %v1949_v52  ;;  %5480 = vmatpush2.msra.mxu0 %v3582_v13  ;;  %v2028_v32 = vunpack.c.l.bf16 %v1964_v39  ;;  %v3591_v13 = vld [vmem:[#allocation12 + $0xc28] sm:$0xff] }
 0x23e   :  { %v2831_v54 = vpop.xlane.xlu0 %2830  ;;  %v4456_v53 = vrot.slane %v2865_v40, %v7399_v50  ;;  %5539 = vmatpush1.msra.mxu1 %v3606_v46  ;;  %v1710_v23 = vadd.f32 %v1646_v61, %v1518_v62  ;;  %5481 = vmatprep.subr.mxu0 %v3579_v4  ;;  %v3570_v52 = vld [vmem:[#allocation12 + $0xb80] sm:$0xff]  ;;  %v1982_v62 = vld [vmem:[#allocation10 + $0x1f8] sm:$0xff]   ;;  %v3567_v61 = vld [vmem:[#allocation12 + $0xb68] sm:$0xff] }
 0x23f   :  { %v4372_v49 = vrot.slane %v2831_v54, %v7398_v35  ;;  %5540 = vmatprep.subr.mxu1 %v3603_v33  ;;  %5482 = vmatpush2.msra.mxu0 %v3578_v47  ;;  %v2205_v7 = vadd.f32 %v2141_v3, %v2013_v27  ;;  %v2142_v54 = vunpack.c.h.bf16 %v1950_v9  ;;  %v1965_v4 = vld [vmem:[#allocation10 + $0x170] sm:$0xff]   ;;  %v3566_v33 = vld [vmem:[#allocation12 + $0xb60] sm:$0xff] }
 0x240   :  { %v7037_v45 = vsel %vm4045_vm6, %v4456_v53, %v6995_v36  ;;  %3196 = vadd.xlane.f32.xlu1 %v2236_v55  ;;  %v2156_v55 = vunpack.c.h.bf16 %v1964_v39  ;;  %5541 = vmatpush1.msra.mxu1 %v3602_v15  ;;  %v2237_v53 = vadd.f32 %v2173_v6, %v2045_v34  ;;  %v3590_v27 = vld [vmem:[#allocation12 + $0xc20] sm:$0xff] }
 0x241   :  { %v7041_v41 = vsel %vm4038_vm5, %v4372_v49, %v6999_v19  ;;  %3162 = vadd.xlane.f32.xlu0 %v2219_v28  ;;  %v2925_v2 = vpop.xlane.xlu1 %2924  ;;  %v3599_v19 = vld [vmem:[#allocation12 + $0xc68] sm:$0xff]  ;;  %5483 = vmatprep.subr.mxu0 %v3575_v14  ;;  %v3562_v14 = vld [vmem:[#allocation12 + $0xb40] sm:$0xff] }
 0x242   :  { %v2891_v26 = vpop.xlane.xlu0 %2890  ;;  %v4604_v25 = vrot.slane %v2925_v2, %v7397_v0  ;;  %5542 = vmatprep.subr.mxu1 %v3599_v19  ;;  %5484 = vmatpush2.msra.mxu0 %v3574_v38  ;;  %v2220_v49 = vadd.f32 %v2156_v55, %v2028_v32  ;;  %v3563_v2 = vld [vmem:[#allocation12 + $0xb48] sm:$0xff]  ;;  %v3586_v19 = vld [vmem:[#allocation12 + $0xc00] sm:$0xff]  ;;  %v1966_v32 = vld [vmem:[#allocation10 + $0x178] sm:$0xff]  }
 0x243   :  { %v4520_v36 = vrot.slane %v2891_v26, %v7396_v18  ;;  %5543 = vmatpush1.msra.mxu1 %v3598_v60  ;;  %5485 = vmatprep.subr.mxu0 %v3571_v42  ;;  %v2046_v26 = vunpack.c.l.bf16 %v1982_v62  ;;  %v3559_v55 = vld [vmem:[#allocation12 + $0xb28] sm:$0xff]  ;;  %v7400_v42 = vld [vmem:[#allocation27_spill] sm:$0xff] }
 0x244   :  { %v7047_v51 = vsel %vm4031_vm4, %v4604_v25, %v7008_v58  ;;  %2908 = vadd.xlane.f32.xlu1 %v2188_v10  ;;  %v2014_v58 = vunpack.c.l.bf16 %v1950_v9  ;;  %5544 = vmatprep.subr.mxu1 %v3595_v21  ;;  %v2174_v25 = vunpack.c.h.bf16 %v1982_v62  ;;  %v3711_v9 = vld [vmem:[#allocation12 + $0xfe8] sm:$0xff]  ;;  %v3554_v62 = vld [vmem:[#allocation12 + $0xb00] sm:$0xff] }
 0x245   :  { %v7051_v16 = vsel %vm4024_vm3, %v4520_v36, %v7011_v12  ;;  %2848 = vadd.xlane.f32.xlu0 %v1678_v57  ;;  %v3121_v37 = vpop.xlane.xlu1 %3120  ;;  %v3594_v12 = vld [vmem:[#allocation12 + $0xc40] sm:$0xff]  ;;  %v1997_v57 = vunpack.c.l.bf16 %v1933_v31  ;;  %5486 = vmatpush2.msra.mxu0 %v3570_v52  ;;  %v2029_v36 = vunpack.c.l.bf16 %v1965_v4 }
 0x246   :  { %v3087_v28 = vpop.xlane.xlu0 %3086  ;;  %v5088_v11 = vrot.slane %v3121_v37, %v7399_v50  ;;  %5545 = vmatpush1.msra.mxu1 %v3594_v12  ;;  %v2206_v15 = vadd.f32 %v2142_v54, %v2014_v58  ;;  %5487 = vmatprep.subr.mxu0 %v3567_v61  ;;  %v3558_v37 = vld [vmem:[#allocation12 + $0xb20] sm:$0xff]  ;;  %v3555_v58 = vld [vmem:[#allocation12 + $0xb08] sm:$0xff] }
 0x247   :  { %v5004_v40 = vrot.slane %v3087_v28, %v7398_v35  ;;  %5546 = vmatprep.subr.mxu1 %v3591_v13  ;;  %5488 = vmatpush2.msra.mxu0 %v3566_v33  ;;  %v2189_v6 = vadd.f32 %v2125_v24, %v1997_v57  ;;  %v2238_v28 = vadd.f32 %v2174_v25, %v2046_v26  ;;  %v3707_v54 = vld [vmem:[#allocation12 + $0xfc8] sm:$0xff]  ;;  %v3706_v61 = vld [vmem:[#allocation12 + $0xfc0] sm:$0xff] }
 0x248   :  { %v7057_v46 = vsel %vm4045_vm6, %v5088_v11, %v7017_v48  ;;  %3104 = vadd.xlane.f32.xlu1 %v1710_v23  ;;  %v2157_v23 = vunpack.c.h.bf16 %v1965_v4  ;;  %5547 = vmatpush1.msra.mxu1 %v3590_v27  ;;  %v2030_v11 = vunpack.c.l.bf16 %v1966_v32  ;;  %v3703_v33 = vld [vmem:[#allocation12 + $0xfa8] sm:$0xff]  ;;  %v3550_v27 = vld [vmem:[#allocation12 + $0xae0] sm:$0xff] }
 0x249   :  { %v7061_v10 = vsel %vm4038_vm5, %v5004_v40, %v7021_v20  ;;  %2942 = vadd.xlane.f32.xlu0 %v2205_v7  ;;  %v3181_v3 = vpop.xlane.xlu1 %3180  ;;  %v3587_v20 = vld [vmem:[#allocation12 + $0xc08] sm:$0xff]  ;;  %v1934_v7 = vld [vmem:[#allocation10 + $0x78] sm:$0xff]   ;;  %5489 = vmatprep.subr.mxu0 %v3563_v2  ;;  %v2158_v40 = vunpack.c.h.bf16 %v1966_v32  ;;  %v3542_v32 = vld [vmem:[#allocation12 + $0xaa0] sm:$0xff] }
 0x24a   :  { %v3147_v39 = vpop.xlane.xlu0 %3146  ;;  %v5236_v47 = vrot.slane %v3181_v3, %v7397_v0  ;;  %5548 = vmatprep.subr.mxu1 %v3587_v20  ;;  %5490 = vmatpush2.msra.mxu0 %v3562_v14  ;;  %v2221_v31 = vadd.f32 %v2157_v23, %v2029_v36  ;;  %v3702_v3 = vld [vmem:[#allocation12 + $0xfa0] sm:$0xff]  ;;  %v3699_v2 = vld [vmem:[#allocation12 + $0xf88] sm:$0xff] }
 0x24b   :  { %v5152_v48 = vrot.slane %v3147_v39, %v7396_v18  ;;  %5549 = vmatpush1.msra.mxu1 %v3586_v19  ;;  %5491 = vmatprep.subr.mxu0 %v3559_v55  ;;  %v3698_v23 = vld [vmem:[#allocation12 + $0xf80] sm:$0xff]  ;;  %v3695_v14 = vld [vmem:[#allocation12 + $0xf68] sm:$0xff] }
 0x24c   :  { %v7067_v34 = vsel %vm4031_vm4, %v5236_v47, %v7027_v59  ;;  %3198 = vadd.xlane.f32.xlu1 %v2237_v53  ;;  %5550 = vmatprep.subr.mxu1 %v3711_v9  ;;  %v1998_v53 = vunpack.c.l.bf16 %v1934_v7  ;;  %v3694_v55 = vld [vmem:[#allocation12 + $0xf60] sm:$0xff] }
 0x24d   :  { %v7071_v18 = vsel %vm4024_vm3, %v5152_v48, %v7031_v44  ;;  %3164 = vadd.xlane.f32.xlu0 %v2220_v49  ;;  %v2867_v38 = vpop.xlane.xlu1 %2866  ;;  %v3710_v44 = vld [vmem:[#allocation12 + $0xfe0] sm:$0xff]  ;;  %v2126_v49 = vunpack.c.h.bf16 %v1934_v7  ;;  %5492 = vmatpush2.msra.mxu0 %v3558_v37  ;;  %v3691_v7 = vld [vmem:[#allocation12 + $0xf48] sm:$0xff] }
 0x24e   :  { %v2833_v60 = vpop.xlane.xlu0 %2832  ;;  %v4461_v21 = vrot.slane %v2867_v38, %v7400_v42  ;;  %5551 = vmatpush2.msra.mxu1 %v3710_v44  ;;  %5493 = vmatprep.subr.mxu0 %v3555_v58  ;;  %v3690_v37 = vld [vmem:[#allocation12 + $0xf40] sm:$0xff]  ;;  %v3687_v44 = vld [vmem:[#allocation12 + $0xf28] sm:$0xff] }
 0x24f   :  { %v4377_v59 = vrot.slane %v2833_v60, %v7399_v50  ;;  %5552 = vmatprep.subr.mxu1 %v3707_v54  ;;  %5494 = vmatpush2.msra.mxu0 %v3554_v62  ;;  %v2190_v48 = vadd.f32 %v2126_v49, %v1998_v53  ;;  %v3539_v60 = vld [vmem:[#allocation12 + $0xa88] sm:$0xff]  ;;  %v7401_v49 = vld [vmem:[#allocation28_spill] sm:$0xff] }
 0x250   :  { %v7077_v52 = vsel %vm4052_vm7, %v4461_v21, %v7037_v45  ;;  %2944 = vadd.xlane.f32.xlu1 %v2206_v15  ;;  %v3551_v45 = vld [vmem:[#allocation12 + $0xae8] sm:$0xff]  ;;  %5553 = vmatpush2.msra.mxu1 %v3706_v61 }
 0x251   :  { %v7081_v12 = vsel %vm4045_vm6, %v4377_v59, %v7041_v41  ;;  %2910 = vadd.xlane.f32.xlu0 %v2189_v6  ;;  %v2927_v13 = vpop.xlane.xlu1 %2926  ;;  %v2222_v41 = vadd.f32 %v2158_v40, %v2030_v11  ;;  %v3547_v15 = vld [vmem:[#allocation12 + $0xac8] sm:$0xff]  ;;  %5495 = vmatprep.subr.mxu0 %v3551_v45  ;;  %v3534_v11 = vld [vmem:[#allocation12 + $0xa60] sm:$0xff] }
 0x252   :  { %v2893_v57 = vpop.xlane.xlu0 %2892  ;;  %v4609_v24 = vrot.slane %v2927_v13, %v7398_v35  ;;  %5554 = vmatprep.subr.mxu1 %v3703_v33  ;;  %5496 = vmatpush2.msra.mxu0 %v3550_v27  ;;  %v3531_v54 = vld [vmem:[#allocation12 + $0xa48] sm:$0xff]  ;;  %v3682_v13 = vld [vmem:[#allocation12 + $0xf00] sm:$0xff] }
 0x253   :  { %v4525_v4 = vrot.slane %v2893_v57, %v7397_v0  ;;  %5555 = vmatpush2.msra.mxu1 %v3702_v3  ;;  %5497 = vmatprep.subr.mxu0 %v3547_v15  ;;  %v3683_v53 = vld [vmem:[#allocation12 + $0xf08] sm:$0xff]  ;;  %v3526_v45 = vld [vmem:[#allocation12 + $0xa20] sm:$0xff] }
 0x254   :  { %v7087_v39 = vsel %vm4038_vm5, %v4609_v24, %v7047_v51  ;;  %3200 = vadd.xlane.f32.xlu1 %v2238_v28  ;;  %v3546_v51 = vld [vmem:[#allocation12 + $0xac0] sm:$0xff]  ;;  %5556 = vmatprep.subr.mxu1 %v3699_v2  ;;  %v3679_v57 = vld [vmem:[#allocation12 + $0xee8] sm:$0xff] }
 0x255   :  { %v7091_v47 = vsel %vm4031_vm4, %v4525_v4, %v7051_v16  ;;  %3166 = vadd.xlane.f32.xlu0 %v2221_v31  ;;  %v3123_v20 = vpop.xlane.xlu1 %3122  ;;  %v3543_v16 = vld [vmem:[#allocation12 + $0xaa8] sm:$0xff]  ;;  %5498 = vmatpush2.msra.mxu0 %v3546_v51  ;;  %v3678_v33 = vld [vmem:[#allocation12 + $0xee0] sm:$0xff] }
 0x256   :  { %v3089_v26 = vpop.xlane.xlu0 %3088  ;;  %v5093_v25 = vrot.slane %v3123_v20, %v7400_v42  ;;  %5557 = vmatpush2.msra.mxu1 %v3698_v23  ;;  %5499 = vmatprep.subr.mxu0 %v3543_v16  ;;  %v3523_v3 = vld [vmem:[#allocation12 + $0xa08] sm:$0xff]  ;;  %v3674_v20 = vld [vmem:[#allocation12 + $0xec0] sm:$0xff] }
 0x257   :  { %v5009_v36 = vrot.slane %v3089_v26, %v7399_v50  ;;  %5558 = vmatprep.subr.mxu1 %v3695_v14  ;;  %5500 = vmatpush2.msra.mxu0 %v3542_v32  ;;  %v3671_v26 = vld [vmem:[#allocation12 + $0xea8] sm:$0xff]  ;;  %v3670_v51 = vld [vmem:[#allocation12 + $0xea0] sm:$0xff] }
 0x258   :  { %v7097_v19 = vsel %vm4052_vm7, %v5093_v25, %v7057_v46  ;;  %3168 = vadd.xlane.f32.xlu1 %v2222_v41  ;;  %v3538_v46 = vld [vmem:[#allocation12 + $0xa80] sm:$0xff]  ;;  %5559 = vmatpush2.msra.mxu1 %v3694_v55  ;;  %v3667_v14 = vld [vmem:[#allocation12 + $0xe88] sm:$0xff] }
 0x259   :  { %v7101_v6 = vsel %vm4045_vm6, %v5009_v36, %v7061_v10  ;;  %2912 = vadd.xlane.f32.xlu0 %v2190_v48  ;;  %v3183_v9 = vpop.xlane.xlu1 %3182  ;;  %v3535_v10 = vld [vmem:[#allocation12 + $0xa68] sm:$0xff]  ;;  %5501 = vmatprep.subr.mxu0 %v3539_v60  ;;  %v3662_v60 = vld [vmem:[#allocation12 + $0xe60] sm:$0xff] }
 0x25a   :  { %v3149_v38 = vpop.xlane.xlu0 %3148  ;;  %v5241_v21 = vrot.slane %v3183_v9, %v7398_v35  ;;  %5560 = vmatprep.subr.mxu1 %v3691_v7  ;;  %5502 = vmatpush2.msra.mxu0 %v3538_v46  ;;  %v3675_v48 = vld [vmem:[#allocation12 + $0xec8] sm:$0xff]  ;;  %v3666_v9 = vld [vmem:[#allocation12 + $0xe80] sm:$0xff] }
 0x25b   :  { %v5157_v59 = vrot.slane %v3149_v38, %v7397_v0  ;;  %v3686_v0 = vld [vmem:[#allocation12 + $0xf20] sm:$0xff]  ;;  %5561 = vmatpush2.msra.mxu1 %v3690_v37  ;;  %5503 = vmatprep.subr.mxu0 %v3535_v10 }
 0x25c   :  { %v7107_v28 = vsel %vm4038_vm5, %v5241_v21, %v7067_v34  ;;  %v3530_v34 = vld [vmem:[#allocation12 + $0xa40] sm:$0xff]  ;;  %5562 = vmatprep.subr.mxu1 %v3687_v44  ;;  %5504 = vmatpush2.msra.mxu0 %v3534_v11  ;;  %v3655_v44 = vld [vmem:[#allocation12 + $0xe28] sm:$0xff] }
 0x25d   :  { %v7111_v31 = vsel %vm4031_vm4, %v5157_v59, %v7071_v18  ;;  %v2869_v40 = vpop.xlane.xlu1 %2868  ;;  %v3527_v18 = vld [vmem:[#allocation12 + $0xa28] sm:$0xff]  ;;  %5563 = vmatpush2.msra.mxu1 %v3686_v0  ;;  %5505 = vmatprep.subr.mxu0 %v3531_v54  ;;  %v3658_v10 = vld [vmem:[#allocation12 + $0xe40] sm:$0xff] }
 0x25e   :  { %v2835_v58 = vpop.xlane.xlu0 %2834  ;;  %v4466_v62 = vrot.slane %v2869_v40, %v7401_v49  ;;  %5564 = vmatprep.subr.mxu1 %v3683_v53  ;;  %5506 = vmatpush2.msra.mxu0 %v3530_v34  ;;  %v3659_v59 = vld [vmem:[#allocation12 + $0xe48] sm:$0xff]  ;;  %v3654_v11 = vld [vmem:[#allocation12 + $0xe20] sm:$0xff] }
 0x25f   :  { %v4382_v61 = vrot.slane %v2835_v58, %v7400_v42  ;;  %5565 = vmatpush2.msra.mxu1 %v3682_v13  ;;  %5507 = vmatprep.subr.mxu0 %v3527_v18  ;;  %v3651_v58 = vld [vmem:[#allocation12 + $0xe08] sm:$0xff]  ;;  %v3650_v53 = vld [vmem:[#allocation12 + $0xe00] sm:$0xff] }
 0x260   :  { %v7117_v24 = vsel %vm4059_vm8, %v4466_v62, %v7077_v52  ;;  %v3522_v52 = vld [vmem:[#allocation12 + $0xa00] sm:$0xff]  ;;  %5566 = vmatprep.subr.mxu1 %v3679_v57  ;;  %5508 = vmatpush2.msra.mxu0 %v3526_v45  ;;  %v3393_v62 = vld [vmem:[#allocation12 + $0x5f8] sm:$0xff] }
 0x261   :  { %v7121_v4 = vsel %vm4052_vm7, %v4382_v61, %v7081_v12  ;;  %v2929_v41 = vpop.xlane.xlu1 %2928  ;;  %v3265_v12 = vld [vmem:[#allocation12 + $0x1f8] sm:$0xff]  ;;  %5567 = vmatpush2.msra.mxu1 %v3678_v33  ;;  %5509 = vmatprep.subr.mxu0 %v3523_v3 }
 0x262   :  { %v2895_v27 = vpop.xlane.xlu0 %2894  ;;  %v4614_v15 = vrot.slane %v2929_v41, %v7399_v50  ;;  %5568 = vmatprep.subr.mxu1 %v3675_v48  ;;  %5510 = vmatpush2.msra.mxu0 %v3522_v52 }
 0x263   :  { %v4530_v2 = vrot.slane %v2895_v27, %v7398_v35  ;;  %5569 = vmatpush2.msra.mxu1 %v3674_v20  ;;  %5589 = vmatprep.subr.mxu0 %v3265_v12 }
 0x264   :  { %v4615_v25 = vsel %vm4045_vm6, %v4614_v15, %v7087_v39  ;;  %5570 = vmatprep.subr.mxu1 %v3671_v26  ;;  %v3663_v39 = vld [vmem:[#allocation12 + $0xe68] sm:$0xff] }
 0x265   :  { %v4531_v36 = vsel %vm4038_vm5, %v4530_v2, %v7091_v47  ;;  %v3125_v23 = vpop.xlane.xlu1 %3124  ;;  %5571 = vmatpush2.msra.mxu1 %v3670_v51 }
 0x266   :  { %v3091_v16 = vpop.xlane.xlu0 %3090  ;;  %v5098_v32 = vrot.slane %v3125_v23, %v7401_v49  ;;  %5572 = vmatprep.subr.mxu1 %v3667_v14 }
 0x267   :  { %v5014_v55 = vrot.slane %v3091_v16, %v7400_v42  ;;  %5573 = vmatpush2.msra.mxu1 %v3666_v9 }
 0x268   :  { %v5099_v47 = vsel %vm4059_vm8, %v5098_v32, %v7097_v19  ;;  %5574 = vmatprep.subr.mxu1 %v3663_v39 }
 0x269   :  { %v5015_v38 = vsel %vm4052_vm7, %v5014_v55, %v7101_v6  ;;  %v3185_v7 = vpop.xlane.xlu1 %3184  ;;  %5575 = vmatpush2.msra.mxu1 %v3662_v60 }
 0x26a   :  { %v3151_v21 = vpop.xlane.xlu0 %3150  ;;  %v5246_v46 = vrot.slane %v3185_v7, %v7399_v50  ;;  %5576 = vmatprep.subr.mxu1 %v3659_v59 }
 0x26b   :  { %v5162_v37 = vrot.slane %v3151_v21, %v7398_v35  ;;  %5577 = vmatpush2.msra.mxu1 %v3658_v10 }
 0x26c   :  { %v5247_v19 = vsel %vm4045_vm6, %v5246_v46, %v7107_v28  ;;  %5578 = vmatprep.subr.mxu1 %v3655_v44 }
 0x26d   :  { %v5163_v6 = vsel %vm4038_vm5, %v5162_v37, %v7111_v31  ;;  %v2871_v0 = vpop.xlane.xlu1 %2870  ;;  %5579 = vmatpush2.msra.mxu1 %v3654_v11 }
 0x26e   :  { %v2837_v40 = vpop.xlane.xlu0 %2836  ;;  %v4471_v54 = vrot.slane %v2871_v0, %v6554_v5  ;;  %5580 = vmatprep.subr.mxu1 %v3651_v58 }
 0x26f   :  { %v4387_v35 = vrot.slane %v2837_v40, %v7401_v49  ;;  %5581 = vmatpush2.msra.mxu1 %v3650_v53 }
 0x270   :  { %v4472_v28 = vsel %vm4066_vm9, %v4471_v54, %v7117_v24  ;;  %5660 = vmatprep.subr.mxu1 %v3393_v62 }
 0x271   :  { %v4388_v31 = vsel %vm4059_vm8, %v4387_v35, %v7121_v4  ;;  %v2931_v61 = vpop.xlane.xlu1 %2930 }
 0x272   :  { %v2897_v34 = vpop.xlane.xlu0 %2896  ;;  %v4619_v13 = vrot.slane %v2931_v61, %v7400_v42 }
 0x273   :  { %v4535_v18 = vrot.slane %v2897_v34, %v7399_v50 }
 0x274   :  { %v4620_v57 = vsel %vm4052_vm7, %v4619_v13, %v4615_v25 }
 0x275   :  { %v4536_v45 = vsel %vm4045_vm6, %v4535_v18, %v4531_v36  ;;  %v3127_v33 = vpop.xlane.xlu1 %3126 }
 0x276   :  { %v3093_v41 = vpop.xlane.xlu0 %3092  ;;  %v5103_v24 = vrot.slane %v3127_v33, %v6554_v5 }
 0x277   :  { %v5019_v27 = vrot.slane %v3093_v41, %v7401_v49 }
 0x278   :  { %v7154_v4 = vsel %vm4066_vm9, %v5103_v24, %v5099_v47 }
 0x279   :  { %v5020_v3 = vsel %vm4059_vm8, %v5019_v27, %v5015_v38  ;;  %v3187_v48 = vpop.xlane.xlu1 %3186 }
 0x27a   :  { %v3153_v15 = vpop.xlane.xlu0 %3152  ;;  %v5251_v2 = vrot.slane %v3187_v48, %v7400_v42 }
 0x27b   :  { %v5167_v52 = vrot.slane %v3153_v15, %v7399_v50 }
 0x27c   :  { %v5252_v20 = vsel %vm4052_vm7, %v5251_v2, %v5247_v19 }
 0x27d   :  { %v5168_v12 = vsel %vm4045_vm6, %v5167_v52, %v5163_v6  ;;  %v2873_v26 = vpop.xlane.xlu1 %2872 }
 0x27e   :  { %v2839_v25 = vpop.xlane.xlu0 %2838  ;;  %v4476_v36 = vrot.slane %v2873_v26, %v6598_v43 }
 0x27f   :  { %v4392_v51 = vrot.slane %v2839_v25, %v6554_v5 }
 0x280   :  { %v7164_v23 = vsel %vm4073_vm10, %v4476_v36, %v4472_v28 }
 0x281   :  { %v4393_v16 = vsel %vm4066_vm9, %v4392_v51, %v4388_v31  ;;  %v2933_v14 = vpop.xlane.xlu1 %2932 }
 0x282   :  { %v2899_v32 = vpop.xlane.xlu0 %2898  ;;  %v4624_v55 = vrot.slane %v2933_v14, %v7401_v49 }
 0x283   :  { %v4540_v50 = vrot.slane %v2899_v32, %v7400_v42 }
 0x284   :  { %v4625_v9 = vsel %vm4059_vm8, %v4624_v55, %v4620_v57 }
 0x285   :  { %v4541_v39 = vsel %vm4052_vm7, %v4540_v50, %v4536_v45  ;;  %v3129_v47 = vpop.xlane.xlu1 %3128 }
 0x286   :  { %v3095_v38 = vpop.xlane.xlu0 %3094  ;;  %v5108_v51 = vrot.slane %v3129_v47, %v6598_v43 }
 0x287   :  { %v5024_v60 = vrot.slane %v3095_v38, %v6554_v5 }
 0x289   :  { %v7173_v7 = vsel %vm4066_vm9, %v5024_v60, %v5020_v3  ;;  %v3189_v21 = vpop.xlane.xlu1 %3188  ;;  %v5109_v60 = vsel %vm4073_vm10, %v5108_v51, %v7154_v4 }
 0x28a   :  { %v3155_v59 = vpop.xlane.xlu0 %3154  ;;  %v5256_v46 = vrot.slane %v3189_v21, %v7401_v49 }
 0x28b   :  { %v5172_v37 = vrot.slane %v3155_v59, %v7400_v42 }
 0x28c   :  { %v7178_v10 = vsel %vm4059_vm8, %v5256_v46, %v5252_v20 }
 0x28d   :  { %v5173_v44 = vsel %vm4052_vm7, %v5172_v37, %v5168_v12  ;;  %v2875_v19 = vpop.xlane.xlu1 %2874 }
 0x28e   :  { %v2841_v6 = vpop.xlane.xlu0 %2840 }
 0x28f   :  { %v4397_v11 = vrot.slane %v2841_v6, %v6598_v43 }
 0x291   :  { %v7183_v0 = vsel %vm4073_vm10, %v4397_v11, %v4393_v16  ;;  %v2935_v40 = vpop.xlane.xlu1 %2934  ;;  %v4481_v16 = vrot.slane %v2875_v19, %v6700_v1 }
 0x292   :  { %v2901_v58 = vpop.xlane.xlu0 %2900  ;;  %v4629_v54 = vrot.slane %v2935_v40, %v6554_v5 }
 0x293   :  { %v4545_v35 = vrot.slane %v2901_v58, %v7401_v49  ;;  %v4482_v21 = vsel %vm4080_vm11, %v4481_v16, %v7164_v23 }
 0x294   :  { %v7188_v42 = vsel %vm4066_vm9, %v4629_v54, %v4625_v9 }
 0x295   :  { %v7191_v53 = vsel %vm4059_vm8, %v4545_v35, %v4541_v39  ;;  %v3131_v62 = vpop.xlane.xlu1 %3130 }
 0x296   :  { %v3097_v28 = vpop.xlane.xlu0 %3096  ;;  %v5113_v14 = vrot.slane %v3131_v62, %v6700_v1 }
 0x297   :  { %v5029_v62 = vrot.slane %v3097_v28, %v6598_v43 }
 0x298   :  { %v5114_v59 = vsel %vm4080_vm11, %v5113_v14, %v5109_v60 }
 0x299   :  { %v7193_v31 = vpop.xlane.xlu1 %3190  ;;  %v5030_v16 = vsel %vm4073_vm10, %v5029_v62, %v7173_v7 }
 0x29a   :  { %v3157_v61 = vpop.xlane.xlu0 %3156  ;;  %v5261_v60 = vrot.slane %v7193_v31, %v6554_v5 }
 0x29b   :  { %v5177_v34 = vrot.slane %v3157_v61, %v7401_v49 }
 0x29d   :  { %v7197_v13 = vsel %vm4059_vm8, %v5177_v34, %v5173_v44  ;;  %v2877_v18 = vpop.xlane.xlu1 %2876 }
 0x29e   :  { %v2843_v57 = vpop.xlane.xlu0 %2842  ;;  %v4486_v50 = vrot.slane %v2877_v18, %v6705_v30 }
 0x29f   :  { %v4402_v61 = vrot.slane %v2843_v57, %v6700_v1 }
 0x2a0   :  { %v4487_v44 = vsel %vm4087_vm12, %v4486_v50, %v4482_v21 }
 0x2a1   :  { %v7199_v45 = vpop.xlane.xlu1 %2936  ;;  %v4403_v57 = vsel %vm4080_vm11, %v4402_v61, %v7183_v0  ;;  %v3264_v0 = vld [vmem:[#allocation12 + $0x1f0] sm:$0xff] }
 0x2a2   :  { %v7201_v33 = vpop.xlane.xlu0 %2902 }
 0x2a5   :  { %v3133_v41 = vpop.xlane.xlu1 %3132 }
 0x2a6   :  { %v3099_v24 = vpop.xlane.xlu0 %3098  ;;  %v5118_v9 = vrot.slane %v3133_v41, %v6705_v30 }
 0x2a7   :  { %v5034_v34 = vrot.slane %v3099_v24, %v6700_v1 }
 0x2a8   :  { %v5119_v19 = vsel %vm4087_vm12, %v5118_v9, %v5114_v59 }
 0x2a9   :  { %v7203_v27 = vpop.xlane.xlu1 %3192  ;;  %v5035_v24 = vsel %vm4080_vm11, %v5034_v34, %v5030_v16 }
 0x2aa   :  { %v7205_v3 = vpop.xlane.xlu0 %3158 }
 0x2ab   :  { %v5182_v31 = vrot.slane %v7205_v3, %v6554_v5 }
 0x2ad   :  { %v2879_v48 = vpop.xlane.xlu1 %2878  ;;  %v5183_v61 = vsel %vm4066_vm9, %v5182_v31, %v7197_v13 }
 0x2ae   :  { %v2845_v15 = vpop.xlane.xlu0 %2844  ;;  %v4491_v39 = vrot.slane %v2879_v48, %v6708_v8 }
 0x2af   :  { %v4407_v48 = vrot.slane %v2845_v15, %v6705_v30 }
 0x2b0   :  { %v4492_v11 = vsel %vm4094_vm13, %v4491_v39, %v4487_v44  ;;  %v4550_v44 = vrot.slane %v7201_v33, %v6554_v5  ;;  %v5262_v33 = vsel %vm4066_vm9, %v5261_v60, %v7178_v10 }
 0x2b1   :  { %v7207_v2 = vpop.xlane.xlu1 %2938  ;;  %v4408_v15 = vsel %vm4087_vm12, %v4407_v48, %v4403_v57 }
 0x2b2   :  { %v7209_v49 = vpop.xlane.xlu0 %2904 }
 0x2b5   :  { %v3135_v52 = vpop.xlane.xlu1 %3134 }
 0x2b6   :  { %v3101_v20 = vpop.xlane.xlu0 %3100  ;;  %v5123_v38 = vrot.slane %v3135_v52, %v6708_v8 }
 0x2b7   :  { %v5039_v52 = vrot.slane %v3101_v20, %v6705_v30 }
 0x2b8   :  { %v5124_v40 = vsel %vm4094_vm13, %v5123_v38, %v5119_v19  ;;  %v3260_v19 = vld [vmem:[#allocation12 + $0x1d0] sm:$0xff] }
 0x2b9   :  { %v7211_v12 = vpop.xlane.xlu1 %3194  ;;  %v5040_v20 = vsel %vm4087_vm12, %v5039_v52, %v5035_v24  ;;  %v3248_v52 = vld [vmem:[#allocation12 + $0x170] sm:$0xff] }
 0x2ba   :  { %v7213_v26 = vpop.xlane.xlu0 %3160 }
 0x2bd   :  { %v2881_v25 = vpop.xlane.xlu1 %2880 }
 0x2be   :  { %v2847_v36 = vpop.xlane.xlu0 %2846  ;;  %v4496_v47 = vrot.slane %v2881_v25, %v6711_v29 }
 0x2bf   :  { %v4412_v25 = vrot.slane %v2847_v36, %v6708_v8 }
 0x2c0   :  { %v4497_v4 = vsel %vm4101_vm14, %v4496_v47, %v4492_v11  ;;  %v3257_v11 = vld [vmem:[#allocation12 + $0x1b8] sm:$0xff] }
 0x2c1   :  { %v7218_v32 = vpop.xlane.xlu1 %2940  ;;  %v4413_v9 = vsel %vm4094_vm13, %v4412_v25, %v4408_v15 }
 0x2c2   :  { %v7220_v55 = vpop.xlane.xlu0 %2906  ;;  %v4644_v62 = vrot.slane %v7218_v32, %v6705_v30  ;;  %v5187_v32 = vrot.slane %v7213_v26, %v6598_v43  ;;  %v3245_v26 = vld [vmem:[#allocation12 + $0x158] sm:$0xff] }
 0x2c5   :  { %v3137_v46 = vpop.xlane.xlu1 %3136 }
 0x2c6   :  { %v3103_v37 = vpop.xlane.xlu0 %3102  ;;  %v5128_v6 = vrot.slane %v3137_v46, %v6711_v29  ;;  %v3261_v46 = vld [vmem:[#allocation12 + $0x1d8] sm:$0xff] }
 0x2c7   :  { %v5044_v51 = vrot.slane %v3103_v37, %v6708_v8  ;;  %v4634_v37 = vrot.slane %v7199_v45, %v6598_v43  ;;  %v3256_v45 = vld [vmem:[#allocation12 + $0x1b0] sm:$0xff] }
 0x2c8   :  { %v5129_v58 = vsel %vm4101_vm14, %v5128_v6, %v5124_v40  ;;  %v5266_v6 = vrot.slane %v7203_v27, %v6598_v43  ;;  %v4639_v40 = vrot.slane %v7207_v2, %v6700_v1  ;;  %v5271_v27 = vrot.slane %v7211_v12, %v6700_v1 }
 0x2c9   :  { %v7239_v54 = vpop.xlane.xlu1 %3196  ;;  %v7244_v35 = vsel %vm5288_vm15, %v5129_v58, %v4497_v4  ;;  %v5045_v7 = vsel %vm4094_vm13, %v5044_v51, %v5040_v20  ;;  %v4555_v4 = vrot.slane %v7209_v49, %v6598_v43  ;;  %v3253_v58 = vld [vmem:[#allocation12 + $0x198] sm:$0xff]  ;;  %v4551_v2 = vsel %vm4066_vm9, %v4550_v44, %v7191_v53  ;;  %v3252_v49 = vld [vmem:[#allocation12 + $0x190] sm:$0xff] }
 0x2ca   :  { %v7241_v23 = vpop.xlane.xlu0 %3162  ;;  %5511 = vmatprep.mubr.f32.mxu0 %v7244_v35  ;;  %v5276_v10 = vrot.slane %v7239_v54, %v6705_v30  ;;  %v5267_v12 = vsel %vm4073_vm10, %v5266_v6, %v5262_v33  ;;  %v3249_v53 = vld [vmem:[#allocation12 + $0x178] sm:$0xff]  ;;  %v4560_v54 = vrot.slane %v7220_v55, %v6700_v1  ;;  %v3232_v33 = vld [vmem:[#allocation12 + $0xf0] sm:$0xff] }
 0x2cb   :  { %v4556_v13 = vsel %vm4073_vm10, %v4555_v4, %v4551_v2  ;;  %v5272_v25 = vsel %vm4080_vm11, %v5271_v27, %v5267_v12  ;;  %v5192_v51 = vrot.slane %v7241_v23, %v6700_v1  ;;  %v3241_v20 = vld [vmem:[#allocation12 + $0x138] sm:$0xff]  ;;  %v3392_v4 = vld [vmem:[#allocation12 + $0x5f0] sm:$0xff] }
 0x2cc   :  { %v5277_v57 = vsel %vm4087_vm12, %v5276_v10, %v5272_v25  ;;  %v3385_v2 = vld [vmem:[#allocation12 + $0x5b8] sm:$0xff]  ;;  %v3384_v10 = vld [vmem:[#allocation12 + $0x5b0] sm:$0xff] }
 0x2cd   :  { %v7250_v18 = vpop.xlane.xlu1 %2908  ;;  %v3381_v12 = vld [vmem:[#allocation12 + $0x598] sm:$0xff] }
 0x2ce   :  { %v2849_v41 = vpop.xlane.xlu0 %2848  ;;  %v4565_v16 = vrot.slane %v7250_v18, %v6705_v30  ;;  %v3369_v25 = vld [vmem:[#allocation12 + $0x538] sm:$0xff] }
 0x2cf   :  { %v4417_v28 = vrot.slane %v2849_v41, %v6711_v29 }
 0x2d1   :  { %v3105_v14 = vpop.xlane.xlu1 %3104  ;;  %v4418_v39 = vsel %vm4101_vm14, %v4417_v28, %v4413_v9  ;;  %v4561_v9 = vsel %vm4080_vm11, %v4560_v54, %v4556_v13  ;;  %v3213_v54 = vld [vmem:[#allocation12 + $0x58] sm:$0xff] }
 0x2d2   :  { %v7262_v50 = vpop.xlane.xlu0 %2942  ;;  %v5049_v36 = vrot.slane %v3105_v14, %v6711_v29  ;;  %v3209_v13 = vld [vmem:[#allocation12 + $0x38] sm:$0xff] }
 0x2d3   :  { %v4649_v34 = vrot.slane %v7262_v50, %v6708_v8  ;;  %v3244_v50 = vld [vmem:[#allocation12 + $0x150] sm:$0xff] }
 0x2d4   :  { %v5050_v38 = vsel %vm4101_vm14, %v5049_v36, %v5045_v7  ;;  %v5188_v36 = vsel %vm4073_vm10, %v5187_v32, %v5183_v61  ;;  %v3220_v61 = vld [vmem:[#allocation12 + $0x90] sm:$0xff] }
 0x2d5   :  { %v3199_v47 = vpop.xlane.xlu1 %3198  ;;  %v7276_v59 = vsel %vm5288_vm15, %v5050_v38, %v4418_v39  ;;  %v3240_v39 = vld [vmem:[#allocation12 + $0x130] sm:$0xff]  ;;  %v5193_v38 = vsel %vm4080_vm11, %v5192_v51, %v5188_v36  ;;  %v3353_v36 = vld [vmem:[#allocation12 + $0x4b8] sm:$0xff] }
 0x2d6   :  { %v7273_v21 = vpop.xlane.xlu0 %3164  ;;  %5512 = vmatmul.mubr.f32.vlgmr.msra.gmra.mxu0 %v7276_v59  ;;  %v3376_v32 = vld [vmem:[#allocation12 + $0x570] sm:$0xff] }
 0x2d7   :  { %5590 = vmatpush1.msra.mxu0 %v3264_v0  ;;  %5653 = vmatprep.mubr.f32.mxu0 %v6751_v56  ;;  %v4635_v56 = vsel %vm4073_vm10, %v4634_v37, %v7188_v42  ;;  %v5281_v42 = vrot.slane %v3199_v47, %v6708_v8  ;;  %v5197_v24 = vrot.slane %v7273_v21, %v6705_v30  ;;  %v3237_v21 = vld [vmem:[#allocation12 + $0x118] sm:$0xff]  ;;  %v3208_v51 = vld [vmem:[#allocation12 + $0x30] sm:$0xff] }
 0x2d8   :  { %5591 = vmatprep.subr.mxu0 %v3261_v46  ;;  %v4640_v41 = vsel %vm4080_vm11, %v4639_v40, %v4635_v56  ;;  %v4566_v0 = vsel %vm4087_vm12, %v4565_v16, %v4561_v9  ;;  %v3225_v56 = vld [vmem:[#allocation12 + $0xb8] sm:$0xff]  ;;  %v3368_v16 = vld [vmem:[#allocation12 + $0x530] sm:$0xff] }
 0x2d9   :  { %5592 = vmatpush1.msra.mxu0 %v3260_v19  ;;  %v2945_v5 = vpop.xlane.xlu1 %2944  ;;  %v4645_v55 = vsel %vm4087_vm12, %v4644_v62, %v4640_v41  ;;  %v5282_v23 = vsel %vm4094_vm13, %v5281_v42, %v5277_v57  ;;  %v5198_v46 = vsel %vm4087_vm12, %v5197_v24, %v5193_v38  ;;  %v3236_v19 = vld [vmem:[#allocation12 + $0x110] sm:$0xff]  ;;  %v3217_v42 = vld [vmem:[#allocation12 + $0x78] sm:$0xff] }
 0x2da   :  { %v2911_v3 = vpop.xlane.xlu0 %2910  ;;  %5593 = vmatprep.subr.mxu0 %v3257_v11  ;;  %v4654_v48 = vrot.slane %v2945_v5, %v6711_v29  ;;  %v4650_v1 = vsel %vm4094_vm13, %v4649_v34, %v4645_v55  ;;  %v3233_v11 = vld [vmem:[#allocation12 + $0xf8] sm:$0xff]  ;;  %v3224_v62 = vld [vmem:[#allocation12 + $0xb0] sm:$0xff] }
 0x2db   :  { %5594 = vmatpush1.msra.mxu0 %v3256_v45  ;;  %v4570_v18 = vrot.slane %v2911_v3, %v6708_v8  ;;  %v3389_v5 = vld [vmem:[#allocation12 + $0x5d8] sm:$0xff]  ;;  %v3228_v3 = vld [vmem:[#allocation12 + $0xd0] sm:$0xff] }
 0x2dc   :  { %5595 = vmatprep.subr.mxu0 %v3253_v58  ;;  %v4655_v30 = vsel %vm4101_vm14, %v4654_v48, %v4650_v1  ;;  %v3388_v58 = vld [vmem:[#allocation12 + $0x5d0] sm:$0xff]  ;;  %v3329_v57 = vld [vmem:[#allocation12 + $0x3f8] sm:$0xff] }
 0x2dd   :  { %5596 = vmatpush1.msra.mxu0 %v3252_v49  ;;  %v3201_v28 = vpop.xlane.xlu1 %3200  ;;  %v4571_v6 = vsel %vm4094_vm13, %v4570_v18, %v4566_v0  ;;  %v3221_v49 = vld [vmem:[#allocation12 + $0x98] sm:$0xff]  ;;  %v3380_v34 = vld [vmem:[#allocation12 + $0x590] sm:$0xff] }
 0x2de   :  { %v3167_v43 = vpop.xlane.xlu0 %3166  ;;  %v5286_v14 = vrot.slane %v3201_v28, %v6711_v29  ;;  %5597 = vmatprep.subr.mxu0 %v3249_v53  ;;  %v3377_v53 = vld [vmem:[#allocation12 + $0x578] sm:$0xff]  ;;  %v3216_v41 = vld [vmem:[#allocation12 + $0x70] sm:$0xff] }
 0x2df   :  { %v5202_v15 = vrot.slane %v3167_v43, %v6708_v8  ;;  %5598 = vmatpush1.msra.mxu0 %v3248_v52  ;;  %v3212_v48 = vld [vmem:[#allocation12 + $0x50] sm:$0xff]  ;;  %v3205_v28 = vld [vmem:[#allocation12 + $0x18] sm:$0xff] }
 0x2e0   :  { %5599 = vmatprep.subr.mxu0 %v3245_v26  ;;  %v5287_v7 = vsel %vm4101_vm14, %v5286_v14, %v5282_v23  ;;  %v3372_v52 = vld [vmem:[#allocation12 + $0x550] sm:$0xff]  ;;  %v3365_v43 = vld [vmem:[#allocation12 + $0x518] sm:$0xff] }
 0x2e1   :  { %5600 = vmatpush1.msra.mxu0 %v3244_v50  ;;  %v3169_v60 = vpop.xlane.xlu1 %3168  ;;  %v7338_v8 = vsel %vm5288_vm15, %v5287_v7, %v4655_v30  ;;  %v5203_v31 = vsel %vm4094_vm13, %v5202_v15, %v5198_v46  ;;  %v3204_v26 = vld [vmem:[#allocation12 + $0x10] sm:$0xff]  ;;  %v3361_v24 = vld [vmem:[#allocation12 + $0x4f8] sm:$0xff] }
 0x2e2   :  { %v2913_v47 = vpop.xlane.xlu0 %2912  ;;  %v5207_v37 = vrot.slane %v3169_v60, %v6711_v29  ;;  %5601 = vmatprep.subr.mxu0 %v3241_v20  ;;  %5582 = vmatprep.mubr.f32.mxu1 %v7338_v8  ;;  %v3364_v55 = vld [vmem:[#allocation12 + $0x510] sm:$0xff]  ;;  %v3325_v1 = vld [vmem:[#allocation12 + $0x3d8] sm:$0xff] }
 0x2e3   :  { %v4575_v44 = vrot.slane %v2913_v47, %v6711_v29  ;;  %5602 = vmatpush1.msra.mxu0 %v3240_v39  ;;  %v3229_v29 = vld [vmem:[#allocation12 + $0xd8] sm:$0xff]  ;;  %v3328_v14 = vld [vmem:[#allocation12 + $0x3f0] sm:$0xff] }
 0x2e4   :  { %v5208_v40 = vsel %vm4101_vm14, %v5207_v37, %v5203_v31  ;;  %5603 = vmatprep.subr.mxu0 %v3237_v21  ;;  %v3360_v50 = vld [vmem:[#allocation12 + $0x4f0] sm:$0xff]  ;;  %v3357_v23 = vld [vmem:[#allocation12 + $0x4d8] sm:$0xff] }
 0x2e5   :  { %v4576_v45 = vsel %vm4101_vm14, %v4575_v44, %v4571_v6  ;;  %5604 = vmatpush1.msra.mxu0 %v3236_v19  ;;  %v3324_v18 = vld [vmem:[#allocation12 + $0x3d0] sm:$0xff]  ;;  %v3321_v20 = vld [vmem:[#allocation12 + $0x3b8] sm:$0xff] }
 0x2e6   :  { %v7349_v27 = vsel %vm5288_vm15, %v5208_v40, %v4576_v45  ;;  %5605 = vmatprep.subr.mxu0 %v3233_v11  ;;  %v3356_v15 = vld [vmem:[#allocation12 + $0x4d0] sm:$0xff]  ;;  %v3317_v7 = vld [vmem:[#allocation12 + $0x398] sm:$0xff] }
 0x2e7   :  { %5583 = vmatmul.mubr.f32.vlgmr.msra.gmra.mxu1 %v7349_v27  ;;  %5606 = vmatpush1.msra.mxu0 %v3232_v33  ;;  %v3320_v9 = vld [vmem:[#allocation12 + $0x3b0] sm:$0xff]  ;;  %v3349_v39 = vld [vmem:[#allocation12 + $0x498] sm:$0xff] }
 0x2e8   :  { %5661 = vmatpush1.msra.mxu1 %v3392_v4  ;;  %5607 = vmatprep.subr.mxu0 %v3229_v29  ;;  %v3352_v30 = vld [vmem:[#allocation12 + $0x4b0] sm:$0xff]  ;;  %v3313_v60 = vld [vmem:[#allocation12 + $0x378] sm:$0xff] }
 0x2e9   :  { %5662 = vmatprep.subr.mxu1 %v3389_v5  ;;  %5724 = vmatprep.mubr.f32.mxu1 %v6855_v63  ;;  %v3373_v63 = vld [vmem:[#allocation12 + $0x558] sm:$0xff]  ;;  %v3316_v38 = vld [vmem:[#allocation12 + $0x390] sm:$0xff] }
 0x2ea   :  { %5608 = vmatpush1.msra.mxu0 %v3228_v3  ;;  %5663 = vmatpush1.msra.mxu1 %v3388_v58  ;;  %v3348_v0 = vld [vmem:[#allocation12 + $0x490] sm:$0xff]  ;;  %v3345_v47 = vld [vmem:[#allocation12 + $0x478] sm:$0xff] }
 0x2eb   :  { %5609 = vmatprep.subr.mxu0 %v3225_v56  ;;  %5664 = vmatprep.subr.mxu1 %v3385_v2  ;;  %v3312_v21 = vld [vmem:[#allocation12 + $0x370] sm:$0xff]  ;;  %v3309_v37 = vld [vmem:[#allocation12 + $0x358] sm:$0xff] }
 0x2ec   :  { %5610 = vmatpush1.msra.mxu0 %v3224_v62  ;;  %5665 = vmatpush1.msra.mxu1 %v3384_v10  ;;  %v3344_v46 = vld [vmem:[#allocation12 + $0x470] sm:$0xff]  ;;  %v3341_v44 = vld [vmem:[#allocation12 + $0x458] sm:$0xff] }
 0x2ed   :  { %5611 = vmatprep.subr.mxu0 %v3221_v49  ;;  %5666 = vmatprep.subr.mxu1 %v3381_v12  ;;  %v3308_v19 = vld [vmem:[#allocation12 + $0x350] sm:$0xff]  ;;  %v3305_v31 = vld [vmem:[#allocation12 + $0x338] sm:$0xff] }
 0x2ee   :  { %5612 = vmatpush1.msra.mxu0 %v3220_v61  ;;  %5667 = vmatpush1.msra.mxu1 %v3380_v34  ;;  %v3340_v6 = vld [vmem:[#allocation12 + $0x450] sm:$0xff]  ;;  %v3337_v11 = vld [vmem:[#allocation12 + $0x438] sm:$0xff] }
 0x2ef   :  { %5613 = vmatprep.subr.mxu0 %v3217_v42  ;;  %5668 = vmatprep.subr.mxu1 %v3377_v53  ;;  %v3304_v40 = vld [vmem:[#allocation12 + $0x330] sm:$0xff]  ;;  %v3301_v33 = vld [vmem:[#allocation12 + $0x318] sm:$0xff] }
 0x2f0   :  { %5614 = vmatpush1.msra.mxu0 %v3216_v41  ;;  %5669 = vmatpush1.msra.mxu1 %v3376_v32  ;;  %v3336_v45 = vld [vmem:[#allocation12 + $0x430] sm:$0xff]  ;;  %v3333_v4 = vld [vmem:[#allocation12 + $0x418] sm:$0xff] }
 0x2f1   :  { %5615 = vmatprep.subr.mxu0 %v3213_v54  ;;  %5670 = vmatprep.subr.mxu1 %v3373_v63  ;;  %v3300_v29 = vld [vmem:[#allocation12 + $0x310] sm:$0xff]  ;;  %v3297_v3 = vld [vmem:[#allocation12 + $0x2f8] sm:$0xff] }
 0x2f2   :  { %5616 = vmatpush1.msra.mxu0 %v3212_v48  ;;  %5671 = vmatpush1.msra.mxu1 %v3372_v52  ;;  %v3332_v5 = vld [vmem:[#allocation12 + $0x410] sm:$0xff]  ;;  %v3457_v58 = vld [vmem:[#allocation12 + $0x7f8] sm:$0xff] }
 0x2f3   :  { %5617 = vmatprep.subr.mxu0 %v3209_v13  ;;  %5672 = vmatprep.subr.mxu1 %v3369_v25  ;;  %v3296_v56 = vld [vmem:[#allocation12 + $0x2f0] sm:$0xff]  ;;  %v3293_v62 = vld [vmem:[#allocation12 + $0x2d8] sm:$0xff] }
 0x2f4   :  { %5618 = vmatpush1.msra.mxu0 %v3208_v51  ;;  %5673 = vmatpush1.msra.mxu1 %v3368_v16  ;;  %v3456_v2 = vld [vmem:[#allocation12 + $0x7f0] sm:$0xff]  ;;  %v3453_v10 = vld [vmem:[#allocation12 + $0x7d8] sm:$0xff] }
 0x2f5   :  { %5619 = vmatprep.subr.mxu0 %v3205_v28  ;;  %5674 = vmatprep.subr.mxu1 %v3365_v43  ;;  %v3292_v49 = vld [vmem:[#allocation12 + $0x2d0] sm:$0xff]  ;;  %v3289_v61 = vld [vmem:[#allocation12 + $0x2b8] sm:$0xff] }
 0x2f6   :  { %5620 = vmatpush1.msra.mxu0 %v3204_v26  ;;  %5675 = vmatpush1.msra.mxu1 %v3364_v55  ;;  %v3452_v12 = vld [vmem:[#allocation12 + $0x7d0] sm:$0xff]  ;;  %v3449_v34 = vld [vmem:[#allocation12 + $0x7b8] sm:$0xff] }
 0x2f7   :  { %5621 = vmatprep.subr.mxu0 %v3329_v57  ;;  %5676 = vmatprep.subr.mxu1 %v3361_v24  ;;  %v3288_v42 = vld [vmem:[#allocation12 + $0x2b0] sm:$0xff]  ;;  %v3285_v41 = vld [vmem:[#allocation12 + $0x298] sm:$0xff] }
 0x2f8   :  { %5622 = vmatpush2.msra.mxu0 %v3328_v14  ;;  %5677 = vmatpush1.msra.mxu1 %v3360_v50  ;;  %v3448_v53 = vld [vmem:[#allocation12 + $0x7b0] sm:$0xff]  ;;  %v3445_v32 = vld [vmem:[#allocation12 + $0x798] sm:$0xff] }
 0x2f9   :  { %5623 = vmatprep.subr.mxu0 %v3325_v1  ;;  %5678 = vmatprep.subr.mxu1 %v3357_v23  ;;  %v3284_v54 = vld [vmem:[#allocation12 + $0x290] sm:$0xff]  ;;  %v3281_v48 = vld [vmem:[#allocation12 + $0x278] sm:$0xff] }
 0x2fa   :  { %5624 = vmatpush2.msra.mxu0 %v3324_v18  ;;  %5679 = vmatpush1.msra.mxu1 %v3356_v15  ;;  %v3444_v63 = vld [vmem:[#allocation12 + $0x790] sm:$0xff]  ;;  %v3441_v52 = vld [vmem:[#allocation12 + $0x778] sm:$0xff] }
 0x2fb   :  { %5625 = vmatprep.subr.mxu0 %v3321_v20  ;;  %5680 = vmatprep.subr.mxu1 %v3353_v36  ;;  %v3280_v13 = vld [vmem:[#allocation12 + $0x270] sm:$0xff]  ;;  %v3277_v51 = vld [vmem:[#allocation12 + $0x258] sm:$0xff] }
 0x2fc   :  { %5626 = vmatpush2.msra.mxu0 %v3320_v9  ;;  %5681 = vmatpush1.msra.mxu1 %v3352_v30  ;;  %v3440_v25 = vld [vmem:[#allocation12 + $0x770] sm:$0xff]  ;;  %v3437_v16 = vld [vmem:[#allocation12 + $0x758] sm:$0xff] }
 0x2fd   :  { %5627 = vmatprep.subr.mxu0 %v3317_v7  ;;  %5682 = vmatprep.subr.mxu1 %v3349_v39  ;;  %v3276_v28 = vld [vmem:[#allocation12 + $0x250] sm:$0xff]  ;;  %v3273_v26 = vld [vmem:[#allocation12 + $0x238] sm:$0xff] }
 0x2fe   :  { %5628 = vmatpush2.msra.mxu0 %v3316_v38  ;;  %5683 = vmatpush1.msra.mxu1 %v3348_v0  ;;  %v3436_v43 = vld [vmem:[#allocation12 + $0x750] sm:$0xff]  ;;  %v3433_v55 = vld [vmem:[#allocation12 + $0x738] sm:$0xff] }
 0x2ff   :  { %5629 = vmatprep.subr.mxu0 %v3313_v60  ;;  %5684 = vmatprep.subr.mxu1 %v3345_v47  ;;  %v3272_v57 = vld [vmem:[#allocation12 + $0x230] sm:$0xff]  ;;  %v3269_v14 = vld [vmem:[#allocation12 + $0x218] sm:$0xff] }
 0x300   :  { %5630 = vmatpush2.msra.mxu0 %v3312_v21  ;;  %5685 = vmatpush1.msra.mxu1 %v3344_v46  ;;  %v3432_v24 = vld [vmem:[#allocation12 + $0x730] sm:$0xff]  ;;  %v3429_v50 = vld [vmem:[#allocation12 + $0x718] sm:$0xff] }
 0x301   :  { %5631 = vmatprep.subr.mxu0 %v3309_v37  ;;  %5686 = vmatprep.subr.mxu1 %v3341_v44  ;;  %v3268_v1 = vld [vmem:[#allocation12 + $0x210] sm:$0xff]  ;;  %v3425_v18 = vld [vmem:[#allocation12 + $0x6f8] sm:$0xff] }
 0x302   :  { %5632 = vmatpush2.msra.mxu0 %v3308_v19  ;;  %5687 = vmatpush1.msra.mxu1 %v3340_v6  ;;  %v3428_v23 = vld [vmem:[#allocation12 + $0x710] sm:$0xff]  ;;  %v3521_v15 = vld [vmem:[#allocation12 + $0x9f8] sm:$0xff] }
 0x303   :  { %5633 = vmatprep.subr.mxu0 %v3305_v31  ;;  %5688 = vmatprep.subr.mxu1 %v3337_v11  ;;  %v3424_v20 = vld [vmem:[#allocation12 + $0x6f0] sm:$0xff]  ;;  %v3421_v9 = vld [vmem:[#allocation12 + $0x6d8] sm:$0xff] }
 0x304   :  { %5634 = vmatpush2.msra.mxu0 %v3304_v40  ;;  %5689 = vmatpush1.msra.mxu1 %v3336_v45  ;;  %v3520_v36 = vld [vmem:[#allocation12 + $0x9f0] sm:$0xff]  ;;  %v3517_v30 = vld [vmem:[#allocation12 + $0x9d8] sm:$0xff] }
 0x305   :  { %5635 = vmatprep.subr.mxu0 %v3301_v33  ;;  %5690 = vmatprep.subr.mxu1 %v3333_v4  ;;  %v3420_v7 = vld [vmem:[#allocation12 + $0x6d0] sm:$0xff]  ;;  %v3417_v38 = vld [vmem:[#allocation12 + $0x6b8] sm:$0xff] }
 0x306   :  { %5636 = vmatpush2.msra.mxu0 %v3300_v29  ;;  %5691 = vmatpush1.msra.mxu1 %v3332_v5  ;;  %v3516_v39 = vld [vmem:[#allocation12 + $0x9d0] sm:$0xff]  ;;  %v3513_v0 = vld [vmem:[#allocation12 + $0x9b8] sm:$0xff] }
 0x307   :  { %5637 = vmatprep.subr.mxu0 %v3297_v3  ;;  %5692 = vmatprep.subr.mxu1 %v3457_v58  ;;  %v3416_v60 = vld [vmem:[#allocation12 + $0x6b0] sm:$0xff]  ;;  %v3413_v21 = vld [vmem:[#allocation12 + $0x698] sm:$0xff] }
 0x308   :  { %5638 = vmatpush2.msra.mxu0 %v3296_v56  ;;  %5693 = vmatpush2.msra.mxu1 %v3456_v2  ;;  %v3512_v47 = vld [vmem:[#allocation12 + $0x9b0] sm:$0xff]  ;;  %v3409_v44 = vld [vmem:[#allocation12 + $0x678] sm:$0xff] }
 0x309   :  { %5639 = vmatprep.subr.mxu0 %v3293_v62  ;;  %5694 = vmatprep.subr.mxu1 %v3453_v10  ;;  %v3412_v46 = vld [vmem:[#allocation12 + $0x690] sm:$0xff]  ;;  %v3505_v19 = vld [vmem:[#allocation12 + $0x978] sm:$0xff] }
 0x30a   :  { %5640 = vmatpush2.msra.mxu0 %v3292_v49  ;;  %5695 = vmatpush2.msra.mxu1 %v3452_v12  ;;  %v3508_v37 = vld [vmem:[#allocation12 + $0x990] sm:$0xff]  ;;  %v3405_v31 = vld [vmem:[#allocation12 + $0x658] sm:$0xff] }
 0x30b   :  { %5641 = vmatprep.subr.mxu0 %v3289_v61  ;;  %5696 = vmatprep.subr.mxu1 %v3449_v34  ;;  %v3408_v6 = vld [vmem:[#allocation12 + $0x670] sm:$0xff]  ;;  %v3501_v11 = vld [vmem:[#allocation12 + $0x958] sm:$0xff] }
 0x30c   :  { %5642 = vmatpush2.msra.mxu0 %v3288_v42  ;;  %5697 = vmatpush2.msra.mxu1 %v3448_v53  ;;  %v3404_v40 = vld [vmem:[#allocation12 + $0x650] sm:$0xff]  ;;  %v3401_v33 = vld [vmem:[#allocation12 + $0x638] sm:$0xff] }
 0x30d   :  { %5643 = vmatprep.subr.mxu0 %v3285_v41  ;;  %5698 = vmatprep.subr.mxu1 %v3445_v32  ;;  %v3500_v45 = vld [vmem:[#allocation12 + $0x950] sm:$0xff]  ;;  %v3497_v4 = vld [vmem:[#allocation12 + $0x938] sm:$0xff] }
 0x30e   :  { %5644 = vmatpush2.msra.mxu0 %v3284_v54  ;;  %5699 = vmatpush2.msra.mxu1 %v3444_v63  ;;  %v3400_v29 = vld [vmem:[#allocation12 + $0x630] sm:$0xff]  ;;  %v3397_v3 = vld [vmem:[#allocation12 + $0x618] sm:$0xff] }
 0x30f   :  { %5645 = vmatprep.subr.mxu0 %v3281_v48  ;;  %5700 = vmatprep.subr.mxu1 %v3441_v52  ;;  %v3496_v5 = vld [vmem:[#allocation12 + $0x930] sm:$0xff]  ;;  %v3493_v58 = vld [vmem:[#allocation12 + $0x918] sm:$0xff] }
 0x310   :  { %5646 = vmatpush2.msra.mxu0 %v3280_v13  ;;  %5701 = vmatpush2.msra.mxu1 %v3440_v25  ;;  %v3396_v56 = vld [vmem:[#allocation12 + $0x610] sm:$0xff]  ;;  %v3489_v62 = vld [vmem:[#allocation12 + $0x8f8] sm:$0xff] }
 0x311   :  { %5647 = vmatprep.subr.mxu0 %v3277_v51  ;;  %5702 = vmatprep.subr.mxu1 %v3437_v16  ;;  %v3492_v2 = vld [vmem:[#allocation12 + $0x910] sm:$0xff]  ;;  %v3649_v10 = vld [vmem:[#allocation12 + $0xdf8] sm:$0xff] }
 0x312   :  { %5648 = vmatpush2.msra.mxu0 %v3276_v28  ;;  %5703 = vmatpush2.msra.mxu1 %v3436_v43  ;;  %v3488_v49 = vld [vmem:[#allocation12 + $0x8f0] sm:$0xff]  ;;  %v3485_v61 = vld [vmem:[#allocation12 + $0x8d8] sm:$0xff] }
 0x313   :  { %5649 = vmatprep.subr.mxu0 %v3273_v26  ;;  %5704 = vmatprep.subr.mxu1 %v3433_v55  ;;  %v3648_v12 = vld [vmem:[#allocation12 + $0xdf0] sm:$0xff]  ;;  %v3645_v34 = vld [vmem:[#allocation12 + $0xdd8] sm:$0xff] }
 0x314   :  { %5650 = vmatpush2.msra.mxu0 %v3272_v57  ;;  %5705 = vmatpush2.msra.mxu1 %v3432_v24  ;;  %v3484_v42 = vld [vmem:[#allocation12 + $0x8d0] sm:$0xff]  ;;  %v3481_v41 = vld [vmem:[#allocation12 + $0x8b8] sm:$0xff] }
 0x315   :  { %5651 = vmatprep.subr.mxu0 %v3269_v14  ;;  %5706 = vmatprep.subr.mxu1 %v3429_v50  ;;  %v3644_v53 = vld [vmem:[#allocation12 + $0xdd0] sm:$0xff]  ;;  %v3641_v32 = vld [vmem:[#allocation12 + $0xdb8] sm:$0xff] }
 0x316   :  { %5652 = vmatpush2.msra.mxu0 %v3268_v1  ;;  %5707 = vmatpush2.msra.mxu1 %v3428_v23  ;;  %v3480_v54 = vld [vmem:[#allocation12 + $0x8b0] sm:$0xff]  ;;  %v3477_v48 = vld [vmem:[#allocation12 + $0x898] sm:$0xff] }
 0x317   :  { %5654 = vmatmul.mubr.f32.vlgmr.msra.gmra.mxu0 %v6792_v17  ;;  %5708 = vmatprep.subr.mxu1 %v3425_v18  ;;  %v3509_v17 = vld [vmem:[#allocation12 + $0x998] sm:$0xff]  ;;  %v3640_v63 = vld [vmem:[#allocation12 + $0xdb0] sm:$0xff] }
 0x318   :  { %5731 = vmatprep.subr.mxu0 %v3521_v15  ;;  %5709 = vmatpush2.msra.mxu1 %v3424_v20  ;;  %v3476_v52 = vld [vmem:[#allocation12 + $0x890] sm:$0xff]  ;;  %v3473_v25 = vld [vmem:[#allocation12 + $0x878] sm:$0xff] }
 0x319   :  { %5732 = vmatpush1.msra.mxu0 %v3520_v36  ;;  %5795 = vmatprep.mubr.f32.mxu0 %v7244_v35  ;;  %v3504_v35 = vld [vmem:[#allocation12 + $0x970] sm:$0xff]  ;;  %v3633_v51 = vld [vmem:[#allocation12 + $0xd78] sm:$0xff] }
 0x31a   :  { %5710 = vmatprep.subr.mxu1 %v3421_v9  ;;  %5733 = vmatprep.subr.mxu0 %v3517_v30  ;;  %v3636_v13 = vld [vmem:[#allocation12 + $0xd90] sm:$0xff]  ;;  %v3469_v28 = vld [vmem:[#allocation12 + $0x858] sm:$0xff] }
 0x31b   :  { %5711 = vmatpush2.msra.mxu1 %v3420_v7  ;;  %5734 = vmatpush1.msra.mxu0 %v3516_v39  ;;  %v3472_v16 = vld [vmem:[#allocation12 + $0x870] sm:$0xff]  ;;  %v3629_v43 = vld [vmem:[#allocation12 + $0xd58] sm:$0xff] }
 0x31c   :  { %5712 = vmatprep.subr.mxu1 %v3417_v38  ;;  %5735 = vmatprep.subr.mxu0 %v3513_v0  ;;  %v3468_v26 = vld [vmem:[#allocation12 + $0x850] sm:$0xff]  ;;  %v3465_v57 = vld [vmem:[#allocation12 + $0x838] sm:$0xff] }
 0x31d   :  { %5713 = vmatpush2.msra.mxu1 %v3416_v60  ;;  %5736 = vmatpush1.msra.mxu0 %v3512_v47  ;;  %v3628_v55 = vld [vmem:[#allocation12 + $0xd50] sm:$0xff]  ;;  %v3625_v24 = vld [vmem:[#allocation12 + $0xd38] sm:$0xff] }
 0x31e   :  { %5714 = vmatprep.subr.mxu1 %v3413_v21  ;;  %5737 = vmatprep.subr.mxu0 %v3509_v17  ;;  %v3464_v14 = vld [vmem:[#allocation12 + $0x830] sm:$0xff]  ;;  %v3461_v1 = vld [vmem:[#allocation12 + $0x818] sm:$0xff] }
 0x31f   :  { %5715 = vmatpush2.msra.mxu1 %v3412_v46  ;;  %5738 = vmatpush1.msra.mxu0 %v3508_v37  ;;  %v3624_v50 = vld [vmem:[#allocation12 + $0xd30] sm:$0xff]  ;;  %v3621_v23 = vld [vmem:[#allocation12 + $0xd18] sm:$0xff] }
 0x320   :  { %5716 = vmatprep.subr.mxu1 %v3409_v44  ;;  %5739 = vmatprep.subr.mxu0 %v3505_v19  ;;  %v3460_v18 = vld [vmem:[#allocation12 + $0x810] sm:$0xff]  ;;  %v3585_v20 = vld [vmem:[#allocation12 + $0xbf8] sm:$0xff] }
 0x321   :  { %5717 = vmatpush2.msra.mxu1 %v3408_v6  ;;  %5740 = vmatpush1.msra.mxu0 %v3504_v35  ;;  %v3620_v15 = vld [vmem:[#allocation12 + $0xd10] sm:$0xff]  ;;  %v3617_v36 = vld [vmem:[#allocation12 + $0xcf8] sm:$0xff] }
 0x322   :  { %5718 = vmatprep.subr.mxu1 %v3405_v31  ;;  %5741 = vmatprep.subr.mxu0 %v3501_v11  ;;  %v3584_v9 = vld [vmem:[#allocation12 + $0xbf0] sm:$0xff]  ;;  %v3581_v7 = vld [vmem:[#allocation12 + $0xbd8] sm:$0xff] }
 0x323   :  { %5719 = vmatpush2.msra.mxu1 %v3404_v40  ;;  %5742 = vmatpush1.msra.mxu0 %v3500_v45  ;;  %v3616_v30 = vld [vmem:[#allocation12 + $0xcf0] sm:$0xff]  ;;  %v3613_v39 = vld [vmem:[#allocation12 + $0xcd8] sm:$0xff] }
 0x324   :  { %5720 = vmatprep.subr.mxu1 %v3401_v33  ;;  %5743 = vmatprep.subr.mxu0 %v3497_v4  ;;  %v3580_v38 = vld [vmem:[#allocation12 + $0xbd0] sm:$0xff]  ;;  %v3577_v60 = vld [vmem:[#allocation12 + $0xbb8] sm:$0xff] }
 0x325   :  { %5721 = vmatpush2.msra.mxu1 %v3400_v29  ;;  %5744 = vmatpush1.msra.mxu0 %v3496_v5  ;;  %v3612_v0 = vld [vmem:[#allocation12 + $0xcd0] sm:$0xff]  ;;  %v3609_v47 = vld [vmem:[#allocation12 + $0xcb8] sm:$0xff] }
 0x326   :  { %5722 = vmatprep.subr.mxu1 %v3397_v3  ;;  %5745 = vmatprep.subr.mxu0 %v3493_v58  ;;  %v3576_v21 = vld [vmem:[#allocation12 + $0xbb0] sm:$0xff]  ;;  %v3573_v46 = vld [vmem:[#allocation12 + $0xb98] sm:$0xff] }
 0x327   :  { %5723 = vmatpush2.msra.mxu1 %v3396_v56  ;;  %5746 = vmatpush1.msra.mxu0 %v3492_v2  ;;  %v3608_v17 = vld [vmem:[#allocation12 + $0xcb0] sm:$0xff]  ;;  %v3605_v37 = vld [vmem:[#allocation12 + $0xc98] sm:$0xff] }
 0x328   :  { %5725 = vmatmul.mubr.f32.vlgmr.msra.gmra.mxu1 %v6867_v22  ;;  %5747 = vmatprep.subr.mxu0 %v3489_v62  ;;  %v3637_v22 = vld [vmem:[#allocation12 + $0xd98] sm:$0xff]  ;;  %v3572_v44 = vld [vmem:[#allocation12 + $0xb90] sm:$0xff] }
 0x329   :  { %5802 = vmatprep.subr.mxu1 %v3649_v10  ;;  %5748 = vmatpush1.msra.mxu0 %v3488_v49  ;;  %v3604_v19 = vld [vmem:[#allocation12 + $0xc90] sm:$0xff]  ;;  %v3569_v6 = vld [vmem:[#allocation12 + $0xb78] sm:$0xff] }
 0x32a   :  { %5803 = vmatpush1.msra.mxu1 %v3648_v12  ;;  %5866 = vmatprep.mubr.f32.mxu1 %v7338_v8  ;;  %v3632_v8 = vld [vmem:[#allocation12 + $0xd70] sm:$0xff]  ;;  %v3601_v35 = vld [vmem:[#allocation12 + $0xc78] sm:$0xff] }
 0x32b   :  { %5749 = vmatprep.subr.mxu0 %v3485_v61  ;;  %5804 = vmatprep.subr.mxu1 %v3645_v34  ;;  %v3568_v31 = vld [vmem:[#allocation12 + $0xb70] sm:$0xff]  ;;  %v3565_v40 = vld [vmem:[#allocation12 + $0xb58] sm:$0xff] }
 0x32c   :  { %5750 = vmatpush1.msra.mxu0 %v3484_v42  ;;  %5805 = vmatpush1.msra.mxu1 %v3644_v53  ;;  %v3600_v11 = vld [vmem:[#allocation12 + $0xc70] sm:$0xff]  ;;  %v3597_v45 = vld [vmem:[#allocation12 + $0xc58] sm:$0xff] }
 0x32d   :  { %5751 = vmatprep.subr.mxu0 %v3481_v41  ;;  %5806 = vmatprep.subr.mxu1 %v3641_v32  ;;  %v3564_v33 = vld [vmem:[#allocation12 + $0xb50] sm:$0xff]  ;;  %v3561_v29 = vld [vmem:[#allocation12 + $0xb38] sm:$0xff] }
 0x32e   :  { %5752 = vmatpush1.msra.mxu0 %v3480_v54  ;;  %5807 = vmatpush1.msra.mxu1 %v3640_v63  ;;  %v3596_v4 = vld [vmem:[#allocation12 + $0xc50] sm:$0xff]  ;;  %v3593_v5 = vld [vmem:[#allocation12 + $0xc38] sm:$0xff] }
 0x32f   :  { %5753 = vmatprep.subr.mxu0 %v3477_v48  ;;  %5808 = vmatprep.subr.mxu1 %v3637_v22  ;;  %v3560_v3 = vld [vmem:[#allocation12 + $0xb30] sm:$0xff]  ;;  %v3557_v56 = vld [vmem:[#allocation12 + $0xb18] sm:$0xff] }
 0x330   :  { %5754 = vmatpush1.msra.mxu0 %v3476_v52  ;;  %5809 = vmatpush1.msra.mxu1 %v3636_v13  ;;  %v3592_v58 = vld [vmem:[#allocation12 + $0xc30] sm:$0xff]  ;;  %v3589_v2 = vld [vmem:[#allocation12 + $0xc18] sm:$0xff] }
 0x331   :  { %5755 = vmatprep.subr.mxu0 %v3473_v25  ;;  %5810 = vmatprep.subr.mxu1 %v3633_v51  ;;  %v3556_v62 = vld [vmem:[#allocation12 + $0xb10] sm:$0xff]  ;;  %v3553_v49 = vld [vmem:[#allocation12 + $0xaf8] sm:$0xff] }
 0x332   :  { %5756 = vmatpush1.msra.mxu0 %v3472_v16  ;;  %5811 = vmatpush1.msra.mxu1 %v3632_v8  ;;  %v3588_v10 = vld [vmem:[#allocation12 + $0xc10] sm:$0xff]  ;;  %v3713_v12 = vld [vmem:[#allocation12 + $0xff8] sm:$0xff] }
 0x333   :  { %5757 = vmatprep.subr.mxu0 %v3469_v28  ;;  %5812 = vmatprep.subr.mxu1 %v3629_v43  ;;  %v3552_v61 = vld [vmem:[#allocation12 + $0xaf0] sm:$0xff]  ;;  %v3549_v42 = vld [vmem:[#allocation12 + $0xad8] sm:$0xff] }
 0x334   :  { %5758 = vmatpush1.msra.mxu0 %v3468_v26  ;;  %5813 = vmatpush1.msra.mxu1 %v3628_v55  ;;  %v3712_v34 = vld [vmem:[#allocation12 + $0xff0] sm:$0xff]  ;;  %v3709_v53 = vld [vmem:[#allocation12 + $0xfd8] sm:$0xff] }
 0x335   :  { %5759 = vmatprep.subr.mxu0 %v3465_v57  ;;  %5814 = vmatprep.subr.mxu1 %v3625_v24  ;;  %v3548_v41 = vld [vmem:[#allocation12 + $0xad0] sm:$0xff]  ;;  %v3545_v54 = vld [vmem:[#allocation12 + $0xab8] sm:$0xff] }
 0x336   :  { %5760 = vmatpush1.msra.mxu0 %v3464_v14  ;;  %5815 = vmatpush1.msra.mxu1 %v3624_v50  ;;  %v3708_v32 = vld [vmem:[#allocation12 + $0xfd0] sm:$0xff]  ;;  %v3705_v63 = vld [vmem:[#allocation12 + $0xfb8] sm:$0xff] }
 0x337   :  { %5761 = vmatprep.subr.mxu0 %v3461_v1  ;;  %5816 = vmatprep.subr.mxu1 %v3621_v23  ;;  %v3544_v48 = vld [vmem:[#allocation12 + $0xab0] sm:$0xff]  ;;  %v3541_v52 = vld [vmem:[#allocation12 + $0xa98] sm:$0xff] }
 0x338   :  { %5762 = vmatpush1.msra.mxu0 %v3460_v18  ;;  %5817 = vmatpush1.msra.mxu1 %v3620_v15  ;;  %v3704_v22 = vld [vmem:[#allocation12 + $0xfb0] sm:$0xff]  ;;  %v3701_v13 = vld [vmem:[#allocation12 + $0xf98] sm:$0xff] }
 0x339   :  { %5763 = vmatprep.subr.mxu0 %v3585_v20  ;;  %5818 = vmatprep.subr.mxu1 %v3617_v36  ;;  %v3540_v25 = vld [vmem:[#allocation12 + $0xa90] sm:$0xff]  ;;  %v3537_v16 = vld [vmem:[#allocation12 + $0xa78] sm:$0xff] }
 0x33a   :  { %5764 = vmatpush2.msra.mxu0 %v3584_v9  ;;  %5819 = vmatpush1.msra.mxu1 %v3616_v30  ;;  %v3700_v51 = vld [vmem:[#allocation12 + $0xf90] sm:$0xff]  ;;  %v3697_v8 = vld [vmem:[#allocation12 + $0xf78] sm:$0xff] }
 0x33b   :  { %5765 = vmatprep.subr.mxu0 %v3581_v7  ;;  %5820 = vmatprep.subr.mxu1 %v3613_v39  ;;  %v3536_v28 = vld [vmem:[#allocation12 + $0xa70] sm:$0xff]  ;;  %v3533_v26 = vld [vmem:[#allocation12 + $0xa58] sm:$0xff] }
 0x33c   :  { %5766 = vmatpush2.msra.mxu0 %v3580_v38  ;;  %5821 = vmatpush1.msra.mxu1 %v3612_v0  ;;  %v3696_v43 = vld [vmem:[#allocation12 + $0xf70] sm:$0xff]  ;;  %v3693_v55 = vld [vmem:[#allocation12 + $0xf58] sm:$0xff] }
 0x33d   :  { %5767 = vmatprep.subr.mxu0 %v3577_v60  ;;  %5822 = vmatprep.subr.mxu1 %v3609_v47  ;;  %v3532_v57 = vld [vmem:[#allocation12 + $0xa50] sm:$0xff]  ;;  %v3529_v14 = vld [vmem:[#allocation12 + $0xa38] sm:$0xff] }
 0x33e   :  { %5768 = vmatpush2.msra.mxu0 %v3576_v21  ;;  %5823 = vmatpush1.msra.mxu1 %v3608_v17  ;;  %v3692_v24 = vld [vmem:[#allocation12 + $0xf50] sm:$0xff]  ;;  %v3689_v50 = vld [vmem:[#allocation12 + $0xf38] sm:$0xff] }
 0x33f   :  { %5769 = vmatprep.subr.mxu0 %v3573_v46  ;;  %5824 = vmatprep.subr.mxu1 %v3605_v37  ;;  %v3528_v1 = vld [vmem:[#allocation12 + $0xa30] sm:$0xff]  ;;  %v3525_v18 = vld [vmem:[#allocation12 + $0xa18] sm:$0xff] }
 0x340   :  { %5770 = vmatpush2.msra.mxu0 %v3572_v44  ;;  %5825 = vmatpush1.msra.mxu1 %v3604_v19  ;;  %v3688_v23 = vld [vmem:[#allocation12 + $0xf30] sm:$0xff]  ;;  %v3685_v15 = vld [vmem:[#allocation12 + $0xf18] sm:$0xff] }
 0x341   :  { %5771 = vmatprep.subr.mxu0 %v3569_v6  ;;  %5826 = vmatprep.subr.mxu1 %v3601_v35  ;;  %v3524_v20 = vld [vmem:[#allocation12 + $0xa10] sm:$0xff]  ;;  %v3681_v9 = vld [vmem:[#allocation12 + $0xef8] sm:$0xff]  ;;  %v5371_v35 = vpop.f32.mrf.mxu0 }
 0x342   :  { %5772 = vmatpush2.msra.mxu0 %v3568_v31  ;;  %5827 = vmatpush1.msra.mxu1 %v3600_v11  ;;  %v3684_v36 = vld [vmem:[#allocation12 + $0xf10] sm:$0xff]  ;;  %v3677_v7 = vld [vmem:[#allocation12 + $0xed8] sm:$0xff] }
 0x343   :  { %5773 = vmatprep.subr.mxu0 %v3565_v40  ;;  %5828 = vmatprep.subr.mxu1 %v3597_v45  ;;  %v3680_v30 = vld [vmem:[#allocation12 + $0xef0] sm:$0xff]  ;;  %v3673_v38 = vld [vmem:[#allocation12 + $0xeb8] sm:$0xff]  ;;  %v5442_v40 = vpop.f32.mrf.mxu1 }
 0x344   :  { %5774 = vmatpush2.msra.mxu0 %v3564_v33  ;;  %5829 = vmatpush1.msra.mxu1 %v3596_v4  ;;  %v3676_v39 = vld [vmem:[#allocation12 + $0xed0] sm:$0xff]  ;;  %v3669_v60 = vld [vmem:[#allocation12 + $0xe98] sm:$0xff]  ;;  %v3714_v33 = vld [vmem:[#allocation13] sm:$0xf]  ;;  %v5373_v4 = vpop.f32.mrf.mxu0 }
 0x345   :  { %5775 = vmatprep.subr.mxu0 %v3561_v29  ;;  %5830 = vmatprep.subr.mxu1 %v3593_v5  ;;  %v3672_v0 = vld [vmem:[#allocation12 + $0xeb0] sm:$0xff]  ;;  %v3665_v21 = vld [vmem:[#allocation12 + $0xe78] sm:$0xff]  ;;  %v5444_v5 = vpop.f32.mrf.mxu1 }
 0x346   :  { %5776 = vmatpush2.msra.mxu0 %v3560_v3  ;;  %5831 = vmatpush1.msra.mxu1 %v3592_v58  ;;  %v3668_v47 = vld [vmem:[#allocation12 + $0xe90] sm:$0xff]  ;;  %v3661_v46 = vld [vmem:[#allocation12 + $0xe58] sm:$0xff] }
 0x347   :  { %5777 = vmatprep.subr.mxu0 %v3557_v56  ;;  %5832 = vmatprep.subr.mxu1 %v3589_v2  ;;  %v3664_v17 = vld [vmem:[#allocation12 + $0xe70] sm:$0xff]  ;;  %v3653_v19 = vld [vmem:[#allocation12 + $0xe18] sm:$0xff] }
 0x348   :  { %5778 = vmatpush2.msra.mxu0 %v3556_v62  ;;  %5833 = vmatpush1.msra.mxu1 %v3588_v10  ;;  %v3660_v37 = vld [vmem:[#allocation12 + $0xe50] sm:$0xff] }
 0x349   :  { %5779 = vmatprep.subr.mxu0 %v3553_v49  ;;  %5834 = vmatprep.subr.mxu1 %v3713_v12  ;;  %v3656_v44 = vld [vmem:[#allocation12 + $0xe30] sm:$0xff] }
 0x34a   :  { %5780 = vmatpush2.msra.mxu0 %v3552_v61  ;;  %5835 = vmatpush2.msra.mxu1 %v3712_v34  ;;  %v3652_v6 = vld [vmem:[#allocation12 + $0xe10] sm:$0xff] }
 0x34b   :  { %5781 = vmatprep.subr.mxu0 %v3549_v42  ;;  %5836 = vmatprep.subr.mxu1 %v3709_v53  ;;  %v7402_v31 = vld [vmem:[#allocation22_spill] sm:$0xff] }
 0x34c   :  { %5782 = vmatpush2.msra.mxu0 %v3548_v41  ;;  %5837 = vmatpush2.msra.mxu1 %v3708_v32  ;;  %v3722_v11 = vsub.s32 1, %v7402_v31  ;;  %v3718_v45 = vsub.s32 0, %v7402_v31  ;;  %v3726_v12 = vsub.s32 2, %v7402_v31  ;;  %v3730_v53 = vsub.s32 3, %v7402_v31 }
 0x34d   :  { %5783 = vmatprep.subr.mxu0 %v3545_v54  ;;  %5838 = vmatprep.subr.mxu1 %v3705_v63 }
 0x34e   :  { %5784 = vmatpush2.msra.mxu0 %v3544_v48  ;;  %5839 = vmatpush2.msra.mxu1 %v3704_v22  ;;  %v3723_v29 = vrot.slane %v3714_v33, %v3722_v11  ;;  %v3719_v58 = vrot.slane %v3714_v33, %v3718_v45  ;;  %v3727_v54 = vrot.slane %v3714_v33, %v3726_v12 }
 0x34f   :  { %5785 = vmatprep.subr.mxu0 %v3541_v52  ;;  %5840 = vmatprep.subr.mxu1 %v3701_v13  ;;  %v3731_v52 = vrot.slane %v3714_v33, %v3730_v53  ;;  %v5877_v13 = vld [vmem:[#allocation15] sm:$0xf] }
 0x350   :  { %5786 = vmatpush2.msra.mxu0 %v3540_v25  ;;  %5841 = vmatpush2.msra.mxu1 %v3700_v51  ;;  %v5374_v2 = vadd.f32 %v5373_v4, %v3723_v29  ;;  %v5372_v10 = vadd.f32 %v5371_v35, %v3719_v58 }
 0x351   :  { %5787 = vmatprep.subr.mxu0 %v3537_v16  ;;  %5842 = vmatprep.subr.mxu1 %v3697_v8  ;;  %v5886_v16 = vrot.slane %v5877_v13, %v3722_v11 }
 0x352   :  { %5788 = vmatpush2.msra.mxu0 %v3536_v28  ;;  %5843 = vmatpush2.msra.mxu1 %v3696_v43  ;;  %v5445_v49 = vadd.f32 %v5444_v5, %v5374_v2  ;;  %v5443_v34 = vadd.f32 %v5442_v40, %v5372_v10 }
 0x353   :  { %5789 = vmatprep.subr.mxu0 %v3533_v26  ;;  %5844 = vmatprep.subr.mxu1 %v3693_v55  ;;  %v5882_v26 = vrot.slane %v5877_v13, %v3718_v45 }
 0x354   :  { %5790 = vmatpush2.msra.mxu0 %v3532_v57  ;;  %5845 = vmatpush2.msra.mxu1 %v3692_v24 }
 0x355   :  { %5791 = vmatprep.subr.mxu0 %v3529_v14  ;;  %5846 = vmatprep.subr.mxu1 %v3689_v50 }
 0x356   :  { %5792 = vmatpush2.msra.mxu0 %v3528_v1  ;;  %5847 = vmatpush2.msra.mxu1 %v3688_v23 }
 0x357   :  { %5793 = vmatprep.subr.mxu0 %v3525_v18  ;;  %5848 = vmatprep.subr.mxu1 %v3685_v15 }
 0x358   :  { %5794 = vmatpush2.msra.mxu0 %v3524_v20  ;;  %5849 = vmatpush2.msra.mxu1 %v3684_v36  ;;  %v5890_v36 = vrot.slane %v5877_v13, %v3726_v12 }
 0x359   :  { %5796 = vmatmul.mubr.f32.vlgmr.msra.gmra.mxu0 %v7276_v59  ;;  %5850 = vmatprep.subr.mxu1 %v3681_v9  ;;  %v3657_v59 = vld [vmem:[#allocation12 + $0xe38] sm:$0xff] }
 0x35a   :  { %5851 = vmatpush2.msra.mxu1 %v3680_v30 }
 0x35b   :  { %5852 = vmatprep.subr.mxu1 %v3677_v7 }
 0x35c   :  { %5853 = vmatpush2.msra.mxu1 %v3676_v39 }
 0x35d   :  { %5854 = vmatprep.subr.mxu1 %v3673_v38  ;;  %v5894_v38 = vrot.slane %v5877_v13, %v3730_v53 }
 0x35e   :  { %5855 = vmatpush2.msra.mxu1 %v3672_v0 }
 0x35f   :  { %5856 = vmatprep.subr.mxu1 %v3669_v60 }
 0x360   :  { %5857 = vmatpush2.msra.mxu1 %v3668_v47 }
 0x361   :  { %5858 = vmatprep.subr.mxu1 %v3665_v21 }
 0x362   :  { %5859 = vmatpush2.msra.mxu1 %v3664_v17 }
 0x363   :  { %5860 = vmatprep.subr.mxu1 %v3661_v46 }
 0x364   :  { %5861 = vmatpush2.msra.mxu1 %v3660_v37 }
 0x365   :  { %5862 = vmatprep.subr.mxu1 %v3657_v59 }
 0x366   :  { %5863 = vmatpush2.msra.mxu1 %v3656_v44 }
 0x367   :  { %5864 = vmatprep.subr.mxu1 %v3653_v19  ;;  %v6153_v19 = vmov 0  }
 0x368   :  { %5865 = vmatpush2.msra.mxu1 %v3652_v6  ;;  %5966 = vset.pattern.permute.xlu1 %v6153_v19  ;;  %v5951_v6 = vld [vmem:[#allocation3] ss:$0 sm:$0xff] }
 0x369   :  { %5867 = vmatmul.mubr.f32.vlgmr.msra.gmra.mxu1 %v7349_v27  ;;  %5967 = vset.pattern.permute.xlu0 %v6153_v19 }
 0x396   :  { %v5513_v3 = vpop.f32.mrf.mxu0 }
 0x397   :  { %v5514_v41 = vadd.f32 %v5513_v3, %v5443_v34 }
 0x398   :  { %v5515_v62 = vpop.f32.mrf.mxu0 }
 0x399   :  { %v5516_v42 = vadd.f32 %v5515_v62, %v5445_v49 }
 0x3a7   :  { %v5584_v56 = vpop.f32.mrf.mxu1 }
 0x3a8   :  { %v5585_v22 = vadd.f32 %v5584_v56, %v5514_v41 }
 0x3a9   :  { %v5586_v27 = vpop.f32.mrf.mxu1 }
 0x3aa   :  { %v5587_v32 = vadd.f32 %v5586_v27, %v5516_v42  ;;  %v5873_v43 = vmax.f32 %v5585_v22, 0.0 }
 0x3ac   :  { %v5874_v51 = vmax.f32 %v5587_v32, 0.0  ;;  %v5899_v18 = vmul.f32 %v5882_v26, %v5873_v43 }
 0x3ae   :  { %v5900_v14 = vmul.f32 %v5886_v16, %v5874_v51  ;;  %v5904_v0 = vsel %vm5903_vm0, %v5899_v18, 0.0 }
 0x3b0   :  { %v5905_v30 = vsel %vm5903_vm0, %v5900_v14, 0.0 }
 0x3b1   :  { %v5906_v21 = vadd.f32 %v5905_v30, %v5904_v0 }
 0x3d7   :  { %v5655_v61 = vpop.f32.mrf.mxu0 }
 0x3d8   :  { %v5656_v8 = vadd.f32 %v5655_v61, %v3727_v54 }
 0x3d9   :  { %v5657_v63 = vpop.f32.mrf.mxu0 }
 0x3da   :  { %v5658_v55 = vadd.f32 %v5657_v63, %v3731_v52 }
 0x3e8   :  { %v5726_v48 = vpop.f32.mrf.mxu1 }
 0x3e9   :  { %v5727_v57 = vadd.f32 %v5726_v48, %v5656_v8 }
 0x3ea   :  { %v5728_v28 = vpop.f32.mrf.mxu1 }
 0x3eb   :  { %v5729_v50 = vadd.f32 %v5728_v28, %v5658_v55 }
 0x419   :  { %v5797_v25 = vpop.f32.mrf.mxu0 }
 0x41a   :  { %v5798_v1 = vadd.f32 %v5797_v25, %v5727_v57 }
 0x41b   :  { %v5799_v24 = vpop.f32.mrf.mxu0 }
 0x41c   :  { %v5800_v15 = vadd.f32 %v5799_v24, %v5729_v50 }
 0x429   :  { %v5868_v23 = vpop.f32.mrf.mxu1 }
 0x42a   :  { %v5869_v20 = vadd.f32 %v5868_v23, %v5798_v1 }
 0x42b   :  { %v5870_v9 = vpop.f32.mrf.mxu1 }
 0x42c   :  { %v5875_v7 = vmax.f32 %v5869_v20, 0.0  ;;  %v5871_v39 = vadd.f32 %v5870_v9, %v5800_v15 }
 0x42e   :  { %v5901_v60 = vmul.f32 %v5890_v36, %v5875_v7  ;;  %v5876_v47 = vmax.f32 %v5871_v39, 0.0 }
 0x430   :  { %v5907_v17 = vsel %vm5903_vm0, %v5901_v60, 0.0  ;;  %v5902_v46 = vmul.f32 %v5894_v38, %v5876_v47 }
 0x431   :  { %v5908_v37 = vadd.f32 %v5907_v17, %v5906_v21 }
 0x432   :  { %v5909_v59 = vsel %vm5903_vm0, %v5902_v46, 0.0 }
 0x433   :  { %v5910_v44 = vadd.f32 %v5909_v59, %v5908_v37 }
 0x435   :  { %5911 = vadd.xlane.f32.xlu0 %v5910_v44 }
 0x4be   :  { %v5912_v35 = vpop.xlane.xlu0 %5911 }
 0x4bf   :  { %v5920_v31 = vadd.f32 %v5951_v6, %v5912_v35 }
 0x4c1   :  { %v5952_v11 = vmul.f32 -1.442695, %v5920_v31 }
 0x4c3   :  { %5968 = vpow2.f32 %v5952_v11 }
 0x4d0   :  { %v5969_v40 = vpop.eup %5968 }
 0x4d1   :  { %v5924_v45 = vadd.f32 1.0, %v5969_v40 }
 0x4d3   :  { %5970 = vrcp.f32 %v5924_v45 }
 0x4e0   :  { %v5971_v33 = vpop.eup %5970 }
 0x4e1   :  { %5929 = vperm.xlu1 %5966, %v5971_v33  }
 0x55c   :  { %v5930_v4 = vpop.permute.xlu1 %5929 }
 0x55d   :  { %5932 = vst [vmem:[#allocation16] sm:$0x3] %v5930_v4 }
 0x55e   :  { %6123 = shalt.err (!%p6120_p11)
}
 0x55f   :  { %5942 = dma.vmem_to_hbm [thread:$0]  %s5940_s6, 32, %s7374_s8, [#allocation6]  }
 0x560   :  { %6140 = dma.done.wait [#allocation6], 32  }
 0x561   :  { %6141 = vsyncadd [#allocation6], 4294967264 }
 0x562   :  { %5946 = vsyncpa [#allocation5], 1 }
 0x563   :  { %5947 = vsyncpa [#allocation8], 1 }
 0x564   :  { %5948 = vsyncpa [#allocation11], 1 }
 0x565   :  { %5949 = vsyncpa [#allocation14], 1 }
 0x566   :  { %5950 = vsyncpa [#allocation6], 1 }

</bundles_post_ra>
